<compile_context>
chip_gen: v6e
topology: v6e:2x2x1
jax: 0.10.0
libtpu: 0.0.40
codegen_flags: <defaults>
</compile_context>

<pallas_src>
import functools

import jax
import jax.numpy as jnp
from jax.experimental import pallas as pl
from jax.experimental.pallas import tpu as pltpu

EPS = 1e-5     # nn.BatchNorm2d default
LANE = 128     # TPU lane width: channel axes are padded to a multiple of this


def _round_up(x, m):
    return (x + m - 1) // m * m


def _pick_strip_rows(h, w):
    """Rows per conv strip: S divides H, with M = S*W in roughly [256, 2048]."""
    best = 1
    for s in range(1, h + 1):
        if h % s:
            continue
        if s * w > 2048 and best * w >= 256:
            break
        best = s
        if s * w >= 256 and s >= 8:
            break
    return best


def _pick_bn_rows(rows, cap=8192):
    """Row-block size for the BN+ReLU pass: a multiple of 8 dividing `rows`."""
    if rows <= cap:
        return rows
    for t in range(cap - cap % 8, 7, -8):
        if rows % t == 0:
            return t
    return rows   # fall back to one big block (equals the full dim -> legal)


@functools.lru_cache()
def _vmem_limit_bytes():
    # Generation-aware scoped-VMEM limit: ~3/4 of physical per-core VMEM
    # (v5e/v6e: 128 MiB -> 96 MiB; v7x: 64 MiB -> 48 MiB), with a safe fallback.
    try:
        cap = getattr(pltpu.get_tpu_info(), "vmem_capacity_bytes", None)
    except Exception:
        cap = None
    if not cap:
        return 32 * 1024 * 1024
    return int(min(cap * 3 // 4, 100 * 1024 * 1024))


# ----------------------------- conv (+stats) kernel ---------------------------
def _conv3x3_kernel(top_ref, mid_ref, bot_ref, w_ref, scale_ref, shift_ref,
                    y_ref, sum_ref, sq_ref, *, strip_rows, fuse_input_bnrelu):
    # top_ref  : (1, 1, W, Cin_p)   image row r*S-1 (clamped; zeroed when r==0)
    # mid_ref  : (1, S, W, Cin_p)   image rows [r*S, r*S+S)
    # bot_ref  : (1, 1, W, Cin_p)   image row r*S+S (clamped; zeroed when r==R-1)
    # w_ref    : (9*Cin_p, Cout_p)  im2col weight slab, taps in (dy, dx) order
    # scale_ref: (1, Cin_p)         BN scale of the *previous* layer (fused prologue)
    # shift_ref: (1, Cin_p)         BN shift of the *previous* layer
    # y_ref    : (1, S, W, Cout_p)  raw conv output rows [r*S, r*S+S)
    # sum_ref  : (1, 1, 1, Cout_p)  per-strip channel sum        (batch stats)
    # sq_ref   : (1, 1, 1, Cout_p)  per-strip channel sum of sq  (batch stats)
    S = strip_rows
    _, _, W, C = mid_ref.shape
    Cout = y_ref.shape[-1]
    M = S * W
    M2 = (S + 2) * W

    r = pl.program_id(1)
    first = r == 0
    last = r == pl.num_programs(1) - 1

    def act(v):  # fused BN+ReLU of the previous layer (identity for conv1)
        v = v.astype(jnp.float32)
        if fuse_input_bnrelu:
            v = jnp.maximum(v * scale_ref[0, :] + shift_ref[0, :], 0.0)
        return v

    # Halo rows must be zero *after* the fused activation ("same" zero padding).
    top = jnp.where(first, 0.0, act(top_ref[0]))     # (1, W, C)
    mid = act(mid_ref[0])                            # (S, W, C)
    bot = jnp.where(last, 0.0, act(bot_ref[0]))      # (1, W, C)

    # Lane-dense flattened window: row q <-> image pixel (r*S-1 + q//W, q%W).
    win = jnp.concatenate([top, mid, bot], axis=0).reshape(M2, C)

    # Column masks implementing the zero padding in W; they also zero the single
    # wrapped row produced by each roll (its column index is 0 / W-1).
    w_id = jax.lax.broadcasted_iota(jnp.int32, (M2, 1), 0) % W
    not_left = (w_id != 0).astype(jnp.float32)       # taps dx=0 read column w-1
    not_right = (w_id != W - 1).astype(jnp.float32)  # taps dx=2 read column w+1

    # +-1 pixel shifts along the flattened row axis on the XLU (pltpu.roll),
    # masked once per shifted window instead of once per tap.
    win_p1 = pltpu.roll(win, shift=1, axis=0) * not_left        # win_p1[q] = win[q-1]
    win_m1 = pltpu.roll(win, shift=M2 - 1, axis=0) * not_right  # win_m1[q] = win[q+1]

    # Nine accumulating MXU dots on sublane-aligned static slices: no im2col
    # patch is materialized. Conv bias is dropped (it cancels exactly under
    # training-mode BatchNorm).
    # TODO(synk): cast operands + weight slab to bfloat16 on v6e/v7x once the
    # looser tolerance vs the f32 reference is validated.
    srcs = (win_p1, win, win_m1)                     # dx = 0, 1, 2
    acc = None
    for dy in range(3):
        base = dy * W                                # sublane-aligned static slice
        for dx in range(3):
            a = srcs[dx][base:base + M, :]
            wt = w_ref[(dy * 3 + dx) * C:(dy * 3 + dx + 1) * C, :]
            d = jnp.dot(a, wt, preferred_element_type=jnp.float32)
            acc = d if acc is None else acc + d      # (M, Cout) f32

    y_ref[...] = acc.reshape(1, S, W, Cout).astype(y_ref.dtype)
    sum_ref[...] = jnp.sum(acc, axis=0).reshape(1, 1, 1, Cout)
    sq_ref[...] = jnp.sum(acc * acc, axis=0).reshape(1, 1, 1, Cout)


def conv3x3_bn_stats(x, w_slab, scale, shift, *, strip_rows, fuse_input_bnrelu):
    # x: (N, H, W, Cin_p) channel-padded NHWC. Returns the raw conv output plus
    # per-strip channel sums / sums-of-squares for the BatchNorm batch stats.
    N, H, W, Cp = x.shape
    KC, Cout_p = w_slab.shape
    S = strip_rows
    R = H // S
    kernel = functools.partial(_conv3x3_kernel, strip_rows=S,
                               fuse_input_bnrelu=fuse_input_bnrelu)
    return pl.pallas_call(
        kernel,
        out_shape=(jax.ShapeDtypeStruct((N, H, W, Cout_p), jnp.float32),
                   jax.ShapeDtypeStruct((N, R, 1, Cout_p), jnp.float32),
                   jax.ShapeDtypeStruct((N, R, 1, Cout_p), jnp.float32)),
        grid_spec=pltpu.PrefetchScalarGridSpec(
            num_scalar_prefetch=0,
            grid=(N, R),
            in_specs=[
                # Halo'd strip as three Blocked views of the same HBM array:
                # top halo row (clamped at the top edge; zeroed in-kernel at r==0),
                pl.BlockSpec((1, 1, W, Cp),
                             lambda n, r: (n, jnp.maximum(r * S - 1, 0), 0, 0)),
                # the S middle rows of the strip,
                pl.BlockSpec((1, S, W, Cp), lambda n, r: (n, r, 0, 0)),
                # bottom halo row (clamped at the bottom edge; zeroed at r==R-1).
                pl.BlockSpec((1, 1, W, Cp),
                             lambda n, r: (n, jnp.minimum(r * S + S, H - 1), 0, 0)),
                pl.BlockSpec((KC, Cout_p), lambda n, r: (0, 0)),
                pl.BlockSpec((1, Cp), lambda n, r: (0, 0)),
                pl.BlockSpec((1, Cp), lambda n, r: (0, 0)),
            ],
            out_specs=[
                pl.BlockSpec((1, S, W, Cout_p), lambda n, r: (n, r, 0, 0)),
                pl.BlockSpec((1, 1, 1, Cout_p), lambda n, r: (n, r, 0, 0)),
                pl.BlockSpec((1, 1, 1, Cout_p), lambda n, r: (n, r, 0, 0)),
            ]),
        compiler_params=pltpu.CompilerParams(
            # Per-strip blocks are disjoint, so both axes are safe to shard
            # across TensorCores (no duplicated full-image residency anymore).
            dimension_semantics=("parallel", "parallel"),
            vmem_limit_bytes=_vmem_limit_bytes()),
    )(x, x, x, w_slab, scale, shift)


# --------------------------- BN + ReLU (final) kernel --------------------------
def _bn_relu_kernel(y_ref, scale_ref, shift_ref, o_ref):
    y = y_ref[...].astype(jnp.float32)
    o = y * scale_ref[0, :] + shift_ref[0, :]
    o_ref[...] = jnp.maximum(o, 0.0).astype(o_ref.dtype)


def bn_relu(y, scale, shift):
    # Pure mem-bound elementwise pass: use large lane-dense 2-D row blocks
    # instead of small (S, W, C) tiles to stay near the HBM roofline.
    N, H, W, C = y.shape
    rows = N * H * W
    tr = _pick_bn_rows(rows)
    out = pl.pallas_call(
        _bn_relu_kernel,
        out_shape=jax.ShapeDtypeStruct((rows, C), jnp.float32),
        grid_spec=pltpu.PrefetchScalarGridSpec(
            num_scalar_prefetch=0,
            grid=(rows // tr,),
            in_specs=[
                pl.BlockSpec((tr, C), lambda i: (i, 0)),
                pl.BlockSpec((1, C), lambda i: (0, 0)),
                pl.BlockSpec((1, C), lambda i: (0, 0)),
            ],
            out_specs=pl.BlockSpec((tr, C), lambda i: (i, 0))),
        compiler_params=pltpu.CompilerParams(
            dimension_semantics=("parallel",),
            vmem_limit_bytes=_vmem_limit_bytes()),
    )(y.reshape(rows, C), scale, shift)
    return out.reshape(N, H, W, C)


# ------------------------------ module forward ---------------------------------
def _bn_affine_from_stats(sums, sumsqs, gamma_p, beta_p, count):
    # BatchNorm2d training mode: batch mean and *biased* variance over N,H,W.
    # NOTE: E[x^2]-E[x]^2 can lose precision for large channel means; the
    # max(.,0) guard covers tiny negative drift (fine for normalized-scale data).
    s = jnp.sum(sums, axis=(0, 1, 2))
    ss = jnp.sum(sumsqs, axis=(0, 1, 2))
    mean = s / count
    var = jnp.maximum(ss / count - mean * mean, 0.0)
    scale = gamma_p / jnp.sqrt(var + EPS)
    shift = beta_p - mean * scale
    return scale.reshape(1, -1), shift.reshape(1, -1)


def _pad_channels(x, target):
    pad = target - x.shape[-1]
    if pad == 0:
        return x
    return jnp.pad(x, [(0, 0)] * (x.ndim - 1) + [(0, pad)])


def _prep_weight_slab(w, cin_p, cout_p):
    # TODO(synk): for thin first-layer inputs (Cin << 128), pack K = 9*Cin up to
    # 128 after flattening the taps instead of padding Cin to 128 per tap.
    kh, kw, cin, cout = w.shape
    w = jnp.pad(w, ((0, 0), (0, 0), (0, cin_p - cin), (0, cout_p - cout)))
    return w.reshape(kh * kw * cin_p, cout_p).astype(jnp.float32)


def double_conv2d_forward(x_nchw, params):
    # PyTorch: x = ReLU(BN1(Conv1(x))); x = ReLU(BN2(Conv2(x)))   (training-mode BN)
    x = jnp.transpose(x_nchw, (0, 2, 3, 1)).astype(jnp.float32)   # NCHW -> NHWC
    N, H, W, Cin = x.shape
    Cout = params["w1"].shape[-1]
    Cin_p = _round_up(Cin, LANE)
    Cout_p = _round_up(Cout, LANE)
    S = _pick_strip_rows(H, W)
    count = float(N * H * W)

    xp = _pad_channels(x, Cin_p)
    w1 = _prep_weight_slab(params["w1"], Cin_p, Cout_p)
    w2 = _prep_weight_slab(params["w2"], Cout_p, Cout_p)
    g1 = _pad_channels(params["gamma1"], Cout_p)
    be1 = _pad_channels(params["beta1"], Cout_p)
    g2 = _pad_channels(params["gamma2"], Cout_p)
    be2 = _pad_channels(params["beta2"], Cout_p)
    # Conv biases b1/b2 are intentionally not added inside the kernels: any
    # per-channel constant cancels exactly in training-mode BatchNorm.

    one = jnp.ones((1, Cin_p), jnp.float32)
    zero = jnp.zeros((1, Cin_p), jnp.float32)

    # conv1 (no input activation) -> raw y1 + batch stats
    y1, s1, q1 = conv3x3_bn_stats(xp, w1, one, zero,
                                  strip_rows=S, fuse_input_bnrelu=False)
    sc1, sh1 = _bn_affine_from_stats(s1, q1, g1, be1, count)

    # conv2 with BN1+ReLU fused into its prologue (the activated intermediate
    # never round-trips through HBM).
    y2, s2, q2 = conv3x3_bn_stats(y1, w2, sc1, sh1,
                                  strip_rows=S, fuse_input_bnrelu=True)
    sc2, sh2 = _bn_affine_from_stats(s2, q2, g2, be2, count)

    z2 = bn_relu(y2, sc2, sh2)

    return jnp.transpose(z2[..., :Cout], (0, 3, 1, 2))            # NHWC -> NCHW


# ------------------------------ pure-JAX reference ------------------------------
def _ref_forward(x_nchw, params):
    def conv(x, w, b):
        wk = jnp.transpose(w, (3, 2, 0, 1))  # (KH,KW,Cin,Cout) -> OIHW
        y = jax.lax.conv_general_dilated(
            x, wk, window_strides=(1, 1), padding=((1, 1), (1, 1)),
            dimension_numbers=("NCHW", "OIHW", "NCHW"))
        return y + b.reshape(1, -1, 1, 1)

    def bnrelu(y, g, be):
        mean = jnp.mean(y, axis=(0, 2, 3), keepdims=True)
        var = jnp.var(y, axis=(0, 2, 3), keepdims=True)  # biased, as in BN train
        yn = (y - mean) / jnp.sqrt(var + EPS)
        return jnp.maximum(yn * g.reshape(1, -1, 1, 1) + be.reshape(1, -1, 1, 1), 0.0)

    y = bnrelu(conv(x_nchw, params["w1"], params["b1"]),
               params["gamma1"], params["beta1"])
    return bnrelu(conv(y, params["w2"], params["b2"]),
                  params["gamma2"], params["beta2"])


# ----------------------------------- main ---------------------------------------
def _init_params(key, cin, cout, k=3):
    ks = jax.random.split(key, 4)
    fan1 = cin * k * k
    fan2 = cout * k * k
    bound1 = (1.0 / fan1) ** 0.5
    bound2 = (1.0 / fan2) ** 0.5
    return {
        "w1": jax.random.uniform(ks[0], (k, k, cin, cout), jnp.float32,
                                 -bound1, bound1),
        "b1": jax.random.uniform(ks[1], (cout,), jnp.float32, -bound1, bound1),
        "w2": jax.random.uniform(ks[2], (k, k, cout, cout), jnp.float32,
                                 -bound2, bound2),
        "b2": jax.random.uniform(ks[3], (cout,), jnp.float32, -bound2, bound2),
        # nn.BatchNorm2d defaults: weight=1, bias=0
        "gamma1": jnp.ones((cout,), jnp.float32),
        "beta1": jnp.zeros((cout,), jnp.float32),
        "gamma2": jnp.ones((cout,), jnp.float32),
        "beta2": jnp.zeros((cout,), jnp.float32),
    }


if __name__ == "__main__":
    key = jax.random.PRNGKey(0)
    kx, kp = jax.random.split(key)

    N, Cin, Cout, H, W = 2, 4, 8, 16, 16
    x = jax.random.normal(kx, (N, Cin, H, W), jnp.float32)   # NCHW, PyTorch layout
    params = _init_params(kp, Cin, Cout)

    out = jax.block_until_ready(jax.jit(double_conv2d_forward)(x, params))
    ref = jax.block_until_ready(_ref_forward(x, params))

    assert out.shape == (N, Cout, H, W), out.shape
    if not jnp.allclose(out, ref, rtol=1e-3, atol=1e-3):
        err = float(jnp.max(jnp.abs(out - ref)))
        raise AssertionError(f"Pallas output mismatch vs JAX reference (max err {err})")

    print("KERNEL_OK")
</pallas_src>

<mosaic_0001>
module attributes {stable_mosaic.version = 11 : i64} {
  func.func @_conv3x3_kernel(%arg0: i32, %arg1: i32, %arg2: memref<1x1x16x128xf32, #tpu.memory_space<vmem>>, %arg3: memref<1x16x16x128xf32, #tpu.memory_space<vmem>>, %arg4: memref<1x1x16x128xf32, #tpu.memory_space<vmem>>, %arg5: memref<1152x128xf32, #tpu.memory_space<vmem>>, %arg6: memref<1x128xf32, #tpu.memory_space<vmem>>, %arg7: memref<1x128xf32, #tpu.memory_space<vmem>>, %arg8: memref<1x16x16x128xf32, #tpu.memory_space<vmem>>, %arg9: memref<1x1x1x128xf32, #tpu.memory_space<vmem>>, %arg10: memref<1x1x1x128xf32, #tpu.memory_space<vmem>>) attributes {dimension_semantics = [#tpu.dimension_semantics<parallel>, #tpu.dimension_semantics<parallel>], iteration_bounds = array<i64: 2, 1>, scalar_prefetch = 0 : i64, scratch_operands = 0 : i64, tpu.core_type = #tpu.core_type<tc>, window_params = [{transform_indices = @transform_0, window_bounds = array<i64: 1, 1, 16, 128>}, {transform_indices = @transform_1, window_bounds = array<i64: 1, 16, 16, 128>}, {transform_indices = @transform_2, window_bounds = array<i64: 1, 1, 16, 128>}, {pipeline_mode = #tpu.pipeline_mode<synchronous>, transform_indices = @transform_3, window_bounds = array<i64: 1152, 128>}, {pipeline_mode = #tpu.pipeline_mode<synchronous>, transform_indices = @transform_4, window_bounds = array<i64: 1, 128>}, {pipeline_mode = #tpu.pipeline_mode<synchronous>, transform_indices = @transform_5, window_bounds = array<i64: 1, 128>}, {transform_indices = @transform_6, window_bounds = array<i64: 1, 16, 16, 128>}, {transform_indices = @transform_7, window_bounds = array<i64: 1, 1, 1, 128>}, {transform_indices = @transform_8, window_bounds = array<i64: 1, 1, 1, 128>}]} {
    %c0_i32 = arith.constant 0 : i32
    %0 = arith.cmpi eq, %arg1, %c0_i32 : i32
    %c0_i32_0 = arith.constant 0 : i32
    %1 = arith.cmpi eq, %arg1, %c0_i32_0 : i32
    %c0 = arith.constant 0 : index
    %c0_1 = arith.constant 0 : index
    %c0_2 = arith.constant 0 : index
    %c0_3 = arith.constant 0 : index
    %2 = vector.load %arg2[%c0, %c0_1, %c0_2, %c0_3] : memref<1x1x16x128xf32, #tpu.memory_space<vmem>>, vector<1x1x16x128xf32>
    %3 = vector.shape_cast %2 : vector<1x1x16x128xf32> to vector<1x16x128xf32>
    %cst = arith.constant 0.000000e+00 : f32
    %4 = vector.broadcast %cst : f32 to vector<1x16x128xf32>
    %5 = arith.select %0, %4, %3 : vector<1x16x128xf32>
    %c0_4 = arith.constant 0 : index
    %c0_5 = arith.constant 0 : index
    %c0_6 = arith.constant 0 : index
    %c0_7 = arith.constant 0 : index
    %6 = vector.load %arg3[%c0_4, %c0_5, %c0_6, %c0_7] : memref<1x16x16x128xf32, #tpu.memory_space<vmem>>, vector<1x16x16x128xf32>
    %7 = vector.shape_cast %6 : vector<1x16x16x128xf32> to vector<16x16x128xf32>
    %c0_8 = arith.constant 0 : index
    %c0_9 = arith.constant 0 : index
    %c0_10 = arith.constant 0 : index
    %c0_11 = arith.constant 0 : index
    %8 = vector.load %arg4[%c0_8, %c0_9, %c0_10, %c0_11] : memref<1x1x16x128xf32, #tpu.memory_space<vmem>>, vector<1x1x16x128xf32>
    %9 = vector.shape_cast %8 : vector<1x1x16x128xf32> to vector<1x16x128xf32>
    %cst_12 = arith.constant 0.000000e+00 : f32
    %10 = vector.broadcast %cst_12 : f32 to vector<1x16x128xf32>
    %11 = arith.select %1, %10, %9 : vector<1x16x128xf32>
    %12 = tpu.concatenate %5, %7, %11 in 0 : vector<1x16x128xf32>, vector<16x16x128xf32>, vector<1x16x128xf32> -> vector<18x16x128xf32>
    %13 = vector.shape_cast %12 : vector<18x16x128xf32> to vector<288x128xf32>
    %14 = tpu.iota {dimensions = array<i32: 0>} : vector<288x1xi32>
    %c16_i32 = arith.constant 16 : i32
    %c0_i32_13 = arith.constant 0 : i32
    %15 = arith.cmpi eq, %c16_i32, %c0_i32_13 : i32
    %c1_i32 = arith.constant 1 : i32
    %16 = arith.select %15, %c1_i32, %c16_i32 : i32
    %17 = vector.broadcast %16 : i32 to vector<288x1xi32>
    %18 = arith.remsi %14, %17 : vector<288x1xi32>
    %c0_i32_14 = arith.constant 0 : i32
    %19 = vector.broadcast %c0_i32_14 : i32 to vector<288x1xi32>
    %20 = arith.cmpi ne, %18, %19 : vector<288x1xi32>
    %c0_i32_15 = arith.constant 0 : i32
    %21 = vector.broadcast %c0_i32_15 : i32 to vector<288x1xi32>
    %22 = arith.cmpi slt, %18, %21 : vector<288x1xi32>
    %c0_i32_16 = arith.constant 0 : i32
    %23 = arith.cmpi slt, %16, %c0_i32_16 : i32
    %24 = vector.broadcast %23 : i1 to vector<288x1xi1>
    %25 = vector.broadcast %24 : vector<288x1xi1> to vector<288x1xi1>
    %26 = arith.xori %22, %25 : vector<288x1xi1>
    %27 = arith.andi %26, %20 : vector<288x1xi1>
    %28 = vector.broadcast %16 : i32 to vector<288x1xi32>
    %29 = arith.addi %18, %28 : vector<288x1xi32>
    %30 = arith.select %27, %29, %18 : vector<288x1xi1>, vector<288x1xi32>
    %c0_i32_17 = arith.constant 0 : i32
    %31 = vector.broadcast %c0_i32_17 : i32 to vector<288x1xi32>
    %32 = arith.cmpi ne, %30, %31 : vector<288x1xi32>
    %33 = arith.extui %32 : vector<288x1xi1> to vector<288x1xi32>
    %34 = arith.sitofp %33 : vector<288x1xi32> to vector<288x1xf32>
    %c15_i32 = arith.constant 15 : i32
    %35 = vector.broadcast %c15_i32 : i32 to vector<288x1xi32>
    %36 = arith.cmpi ne, %30, %35 : vector<288x1xi32>
    %37 = arith.extui %36 : vector<288x1xi1> to vector<288x1xi32>
    %38 = arith.sitofp %37 : vector<288x1xi32> to vector<288x1xf32>
    %c1_i32_18 = arith.constant 1 : i32
    %39 = tpu.dynamic_rotate %13 by %c1_i32_18 dim 0 : vector<288x128xf32>, i32 -> vector<288x128xf32>
    %40 = vector.broadcast %34 : vector<288x1xf32> to vector<288x128xf32>
    %41 = arith.mulf %39, %40 : vector<288x128xf32>
    %c287_i32 = arith.constant 287 : i32
    %42 = tpu.dynamic_rotate %13 by %c287_i32 dim 0 : vector<288x128xf32>, i32 -> vector<288x128xf32>
    %43 = vector.broadcast %38 : vector<288x1xf32> to vector<288x128xf32>
    %44 = arith.mulf %42, %43 : vector<288x128xf32>
    %45 = vector.extract_strided_slice %41 {offsets = [0, 0], sizes = [256, 128], strides = [1, 1]} : vector<288x128xf32> to vector<256x128xf32>
    %c0_19 = arith.constant 0 : index
    %c0_20 = arith.constant 0 : index
    %46 = vector.load %arg5[%c0_19, %c0_20] : memref<1152x128xf32, #tpu.memory_space<vmem>>, vector<128x128xf32>
    %cst_21 = arith.constant dense<0.000000e+00> : vector<256x128xf32>
    %47 = tpu.matmul %45, %46, %cst_21 {dimension_numbers = #tpu.dot_dimension_numbers<[1], [0], [0], [1], [0, 0, 1, 1], [], []>} : vector<256x128xf32>, vector<128x128xf32>, vector<256x128xf32> -> vector<256x128xf32>
    %48 = vector.extract_strided_slice %13 {offsets = [0, 0], sizes = [256, 128], strides = [1, 1]} : vector<288x128xf32> to vector<256x128xf32>
    %c128 = arith.constant 128 : index
    %c0_22 = arith.constant 0 : index
    %49 = vector.load %arg5[%c128, %c0_22] : memref<1152x128xf32, #tpu.memory_space<vmem>>, vector<128x128xf32>
    %cst_23 = arith.constant dense<0.000000e+00> : vector<256x128xf32>
    %50 = tpu.matmul %48, %49, %cst_23 {dimension_numbers = #tpu.dot_dimension_numbers<[1], [0], [0], [1], [0, 0, 1, 1], [], []>} : vector<256x128xf32>, vector<128x128xf32>, vector<256x128xf32> -> vector<256x128xf32>
    %51 = arith.addf %47, %50 : vector<256x128xf32>
    %52 = vector.extract_strided_slice %44 {offsets = [0, 0], sizes = [256, 128], strides = [1, 1]} : vector<288x128xf32> to vector<256x128xf32>
    %c256 = arith.constant 256 : index
    %c0_24 = arith.constant 0 : index
    %53 = vector.load %arg5[%c256, %c0_24] : memref<1152x128xf32, #tpu.memory_space<vmem>>, vector<128x128xf32>
    %cst_25 = arith.constant dense<0.000000e+00> : vector<256x128xf32>
    %54 = tpu.matmul %52, %53, %cst_25 {dimension_numbers = #tpu.dot_dimension_numbers<[1], [0], [0], [1], [0, 0, 1, 1], [], []>} : vector<256x128xf32>, vector<128x128xf32>, vector<256x128xf32> -> vector<256x128xf32>
    %55 = arith.addf %51, %54 : vector<256x128xf32>
    %56 = vector.extract_strided_slice %41 {offsets = [16, 0], sizes = [256, 128], strides = [1, 1]} : vector<288x128xf32> to vector<256x128xf32>
    %c384 = arith.constant 384 : index
    %c0_26 = arith.constant 0 : index
    %57 = vector.load %arg5[%c384, %c0_26] : memref<1152x128xf32, #tpu.memory_space<vmem>>, vector<128x128xf32>
    %cst_27 = arith.constant dense<0.000000e+00> : vector<256x128xf32>
    %58 = tpu.matmul %56, %57, %cst_27 {dimension_numbers = #tpu.dot_dimension_numbers<[1], [0], [0], [1], [0, 0, 1, 1], [], []>} : vector<256x128xf32>, vector<128x128xf32>, vector<256x128xf32> -> vector<256x128xf32>
    %59 = arith.addf %55, %58 : vector<256x128xf32>
    %60 = vector.extract_strided_slice %13 {offsets = [16, 0], sizes = [256, 128], strides = [1, 1]} : vector<288x128xf32> to vector<256x128xf32>
    %c512 = arith.constant 512 : index
    %c0_28 = arith.constant 0 : index
    %61 = vector.load %arg5[%c512, %c0_28] : memref<1152x128xf32, #tpu.memory_space<vmem>>, vector<128x128xf32>
    %cst_29 = arith.constant dense<0.000000e+00> : vector<256x128xf32>
    %62 = tpu.matmul %60, %61, %cst_29 {dimension_numbers = #tpu.dot_dimension_numbers<[1], [0], [0], [1], [0, 0, 1, 1], [], []>} : vector<256x128xf32>, vector<128x128xf32>, vector<256x128xf32> -> vector<256x128xf32>
    %63 = arith.addf %59, %62 : vector<256x128xf32>
    %64 = vector.extract_strided_slice %44 {offsets = [16, 0], sizes = [256, 128], strides = [1, 1]} : vector<288x128xf32> to vector<256x128xf32>
    %c640 = arith.constant 640 : index
    %c0_30 = arith.constant 0 : index
    %65 = vector.load %arg5[%c640, %c0_30] : memref<1152x128xf32, #tpu.memory_space<vmem>>, vector<128x128xf32>
    %cst_31 = arith.constant dense<0.000000e+00> : vector<256x128xf32>
    %66 = tpu.matmul %64, %65, %cst_31 {dimension_numbers = #tpu.dot_dimension_numbers<[1], [0], [0], [1], [0, 0, 1, 1], [], []>} : vector<256x128xf32>, vector<128x128xf32>, vector<256x128xf32> -> vector<256x128xf32>
    %67 = arith.addf %63, %66 : vector<256x128xf32>
    %68 = vector.extract_strided_slice %41 {offsets = [32, 0], sizes = [256, 128], strides = [1, 1]} : vector<288x128xf32> to vector<256x128xf32>
    %c768 = arith.constant 768 : index
    %c0_32 = arith.constant 0 : index
    %69 = vector.load %arg5[%c768, %c0_32] : memref<1152x128xf32, #tpu.memory_space<vmem>>, vector<128x128xf32>
    %cst_33 = arith.constant dense<0.000000e+00> : vector<256x128xf32>
    %70 = tpu.matmul %68, %69, %cst_33 {dimension_numbers = #tpu.dot_dimension_numbers<[1], [0], [0], [1], [0, 0, 1, 1], [], []>} : vector<256x128xf32>, vector<128x128xf32>, vector<256x128xf32> -> vector<256x128xf32>
    %71 = arith.addf %67, %70 : vector<256x128xf32>
    %72 = vector.extract_strided_slice %13 {offsets = [32, 0], sizes = [256, 128], strides = [1, 1]} : vector<288x128xf32> to vector<256x128xf32>
    %c896 = arith.constant 896 : index
    %c0_34 = arith.constant 0 : index
    %73 = vector.load %arg5[%c896, %c0_34] : memref<1152x128xf32, #tpu.memory_space<vmem>>, vector<128x128xf32>
    %cst_35 = arith.constant dense<0.000000e+00> : vector<256x128xf32>
    %74 = tpu.matmul %72, %73, %cst_35 {dimension_numbers = #tpu.dot_dimension_numbers<[1], [0], [0], [1], [0, 0, 1, 1], [], []>} : vector<256x128xf32>, vector<128x128xf32>, vector<256x128xf32> -> vector<256x128xf32>
    %75 = arith.addf %71, %74 : vector<256x128xf32>
    %76 = vector.extract_strided_slice %44 {offsets = [32, 0], sizes = [256, 128], strides = [1, 1]} : vector<288x128xf32> to vector<256x128xf32>
    %c1024 = arith.constant 1024 : index
    %c0_36 = arith.constant 0 : index
    %77 = vector.load %arg5[%c1024, %c0_36] : memref<1152x128xf32, #tpu.memory_space<vmem>>, vector<128x128xf32>
    %cst_37 = arith.constant dense<0.000000e+00> : vector<256x128xf32>
    %78 = tpu.matmul %76, %77, %cst_37 {dimension_numbers = #tpu.dot_dimension_numbers<[1], [0], [0], [1], [0, 0, 1, 1], [], []>} : vector<256x128xf32>, vector<128x128xf32>, vector<256x128xf32> -> vector<256x128xf32>
    %79 = arith.addf %75, %78 : vector<256x128xf32>
    %80 = vector.shape_cast %79 : vector<256x128xf32> to vector<1x16x16x128xf32>
    %c0_38 = arith.constant 0 : index
    %c0_39 = arith.constant 0 : index
    %c0_40 = arith.constant 0 : index
    %c0_41 = arith.constant 0 : index
    %81 = vector.load %arg8[%c0_38, %c0_39, %c0_40, %c0_41] : memref<1x16x16x128xf32, #tpu.memory_space<vmem>>, vector<1x16x16x128xf32>
    tpu.vector_store %arg8[%c0_38, %c0_39, %c0_40, %c0_41], %80 {strides = array<i32>} : memref<1x16x16x128xf32, #tpu.memory_space<vmem>>, vector<1x16x16x128xf32>,
    %cst_42 = arith.constant dense<0.000000e+00> : vector<128xf32>
    %82 = vector.multi_reduction <add>, %79, %cst_42 [0] : vector<256x128xf32> to vector<128xf32>
    %83 = vector.shape_cast %82 : vector<128xf32> to vector<1x1x1x128xf32>
    %c0_43 = arith.constant 0 : index
    %c0_44 = arith.constant 0 : index
    %c0_45 = arith.constant 0 : index
    %c0_46 = arith.constant 0 : index
    %84 = vector.load %arg9[%c0_43, %c0_44, %c0_45, %c0_46] : memref<1x1x1x128xf32, #tpu.memory_space<vmem>>, vector<1x1x1x128xf32>
    tpu.vector_store %arg9[%c0_43, %c0_44, %c0_45, %c0_46], %83 {strides = array<i32>} : memref<1x1x1x128xf32, #tpu.memory_space<vmem>>, vector<1x1x1x128xf32>,
    %85 = arith.mulf %79, %79 : vector<256x128xf32>
    %cst_47 = arith.constant dense<0.000000e+00> : vector<128xf32>
    %86 = vector.multi_reduction <add>, %85, %cst_47 [0] : vector<256x128xf32> to vector<128xf32>
    %87 = vector.shape_cast %86 : vector<128xf32> to vector<1x1x1x128xf32>
    %c0_48 = arith.constant 0 : index
    %c0_49 = arith.constant 0 : index
    %c0_50 = arith.constant 0 : index
    %c0_51 = arith.constant 0 : index
    %88 = vector.load %arg10[%c0_48, %c0_49, %c0_50, %c0_51] : memref<1x1x1x128xf32, #tpu.memory_space<vmem>>, vector<1x1x1x128xf32>
    tpu.vector_store %arg10[%c0_48, %c0_49, %c0_50, %c0_51], %87 {strides = array<i32>} : memref<1x1x1x128xf32, #tpu.memory_space<vmem>>, vector<1x1x1x128xf32>,
    return
  }
  func.func @transform_0(%arg0: i32, %arg1: i32) -> (i32, i32, i32, i32) {
    %c16_i32 = arith.constant 16 : i32
    %0 = arith.muli %arg1, %c16_i32 : i32
    %c1_i32 = arith.constant 1 : i32
    %1 = arith.subi %0, %c1_i32 : i32
    %c0_i32 = arith.constant 0 : i32
    %2 = arith.maxsi %1, %c0_i32 : i32
    %c0_i32_0 = arith.constant 0 : i32
    %c0_i32_1 = arith.constant 0 : i32
    %c0_i32_2 = arith.constant 0 : i32
    return %arg0, %2, %c0_i32_0, %c0_i32_1 : i32, i32, i32, i32
  }
  func.func @transform_1(%arg0: i32, %arg1: i32) -> (i32, i32, i32, i32) {
    %c0_i32 = arith.constant 0 : i32
    %c0_i32_0 = arith.constant 0 : i32
    %c0_i32_1 = arith.constant 0 : i32
    return %arg0, %arg1, %c0_i32, %c0_i32_0 : i32, i32, i32, i32
  }
  func.func @transform_2(%arg0: i32, %arg1: i32) -> (i32, i32, i32, i32) {
    %c16_i32 = arith.constant 16 : i32
    %0 = arith.muli %arg1, %c16_i32 : i32
    %c16_i32_0 = arith.constant 16 : i32
    %1 = arith.addi %0, %c16_i32_0 : i32
    %c15_i32 = arith.constant 15 : i32
    %2 = arith.minsi %1, %c15_i32 : i32
    %c0_i32 = arith.constant 0 : i32
    %c0_i32_1 = arith.constant 0 : i32
    %c0_i32_2 = arith.constant 0 : i32
    return %arg0, %2, %c0_i32, %c0_i32_1 : i32, i32, i32, i32
  }
  func.func @transform_3(%arg0: i32, %arg1: i32) -> (i32, i32) {
    %c0_i32 = arith.constant 0 : i32
    %c0_i32_0 = arith.constant 0 : i32
    %c0_i32_1 = arith.constant 0 : i32
    return %c0_i32, %c0_i32_0 : i32, i32
  }
  func.func @transform_4(%arg0: i32, %arg1: i32) -> (i32, i32) {
    %c0_i32 = arith.constant 0 : i32
    %c0_i32_0 = arith.constant 0 : i32
    %c0_i32_1 = arith.constant 0 : i32
    return %c0_i32, %c0_i32_0 : i32, i32
  }
  func.func @transform_5(%arg0: i32, %arg1: i32) -> (i32, i32) {
    %c0_i32 = arith.constant 0 : i32
    %c0_i32_0 = arith.constant 0 : i32
    %c0_i32_1 = arith.constant 0 : i32
    return %c0_i32, %c0_i32_0 : i32, i32
  }
  func.func @transform_6(%arg0: i32, %arg1: i32) -> (i32, i32, i32, i32) {
    %c0_i32 = arith.constant 0 : i32
    %c0_i32_0 = arith.constant 0 : i32
    %c0_i32_1 = arith.constant 0 : i32
    return %arg0, %arg1, %c0_i32, %c0_i32_0 : i32, i32, i32, i32
  }
  func.func @transform_7(%arg0: i32, %arg1: i32) -> (i32, i32, i32, i32) {
    %c0_i32 = arith.constant 0 : i32
    %c0_i32_0 = arith.constant 0 : i32
    %c0_i32_1 = arith.constant 0 : i32
    return %arg0, %arg1, %c0_i32, %c0_i32_0 : i32, i32, i32, i32
  }
  func.func @transform_8(%arg0: i32, %arg1: i32) -> (i32, i32, i32, i32) {
    %c0_i32 = arith.constant 0 : i32
    %c0_i32_0 = arith.constant 0 : i32
    %c0_i32_1 = arith.constant 0 : i32
    return %arg0, %arg1, %c0_i32, %c0_i32_0 : i32, i32, i32, i32
  }
}

module attributes {stable_mosaic.version = 11 : i64} {
  func.func @_conv3x3_kernel(%arg0: i32, %arg1: i32, %arg2: memref<1x1x16x128xf32, #tpu.memory_space<vmem>>, %arg3: memref<1x16x16x128xf32, #tpu.memory_space<vmem>>, %arg4: memref<1x1x16x128xf32, #tpu.memory_space<vmem>>, %arg5: memref<1152x128xf32, #tpu.memory_space<vmem>>, %arg6: memref<1x128xf32, #tpu.memory_space<vmem>>, %arg7: memref<1x128xf32, #tpu.memory_space<vmem>>, %arg8: memref<1x16x16x128xf32, #tpu.memory_space<vmem>>, %arg9: memref<1x1x1x128xf32, #tpu.memory_space<vmem>>, %arg10: memref<1x1x1x128xf32, #tpu.memory_space<vmem>>) attributes {dimension_semantics = [#tpu.dimension_semantics<parallel>, #tpu.dimension_semantics<parallel>], iteration_bounds = array<i64: 2, 1>, scalar_prefetch = 0 : i64, scratch_operands = 0 : i64, tpu.core_type = #tpu.core_type<tc>, window_params = [{transform_indices = @transform_0, window_bounds = array<i64: 1, 1, 16, 128>}, {transform_indices = @transform_1, window_bounds = array<i64: 1, 16, 16, 128>}, {transform_indices = @transform_2, window_bounds = array<i64: 1, 1, 16, 128>}, {pipeline_mode = #tpu.pipeline_mode<synchronous>, transform_indices = @transform_3, window_bounds = array<i64: 1152, 128>}, {pipeline_mode = #tpu.pipeline_mode<synchronous>, transform_indices = @transform_4, window_bounds = array<i64: 1, 128>}, {pipeline_mode = #tpu.pipeline_mode<synchronous>, transform_indices = @transform_5, window_bounds = array<i64: 1, 128>}, {transform_indices = @transform_6, window_bounds = array<i64: 1, 16, 16, 128>}, {transform_indices = @transform_7, window_bounds = array<i64: 1, 1, 1, 128>}, {transform_indices = @transform_8, window_bounds = array<i64: 1, 1, 1, 128>}]} {
    %c0_i32 = arith.constant 0 : i32
    %0 = arith.cmpi eq, %arg1, %c0_i32 : i32
    %c0_i32_0 = arith.constant 0 : i32
    %1 = arith.cmpi eq, %arg1, %c0_i32_0 : i32
    %c0 = arith.constant 0 : index
    %c0_1 = arith.constant 0 : index
    %c0_2 = arith.constant 0 : index
    %c0_3 = arith.constant 0 : index
    %2 = vector.load %arg2[%c0, %c0_1, %c0_2, %c0_3] : memref<1x1x16x128xf32, #tpu.memory_space<vmem>>, vector<1x1x16x128xf32>
    %3 = vector.shape_cast %2 : vector<1x1x16x128xf32> to vector<1x16x128xf32>
    %c0_4 = arith.constant 0 : index
    %c0_5 = arith.constant 0 : index
    %4 = vector.load %arg6[%c0_4, %c0_5] : memref<1x128xf32, #tpu.memory_space<vmem>>, vector<1x128xf32>
    %5 = vector.shape_cast %4 : vector<1x128xf32> to vector<128xf32>
    %6 = vector.shape_cast %5 : vector<128xf32> to vector<1x1x128xf32>
    %7 = vector.broadcast %6 : vector<1x1x128xf32> to vector<1x16x128xf32>
    %8 = arith.mulf %3, %7 : vector<1x16x128xf32>
    %c0_6 = arith.constant 0 : index
    %c0_7 = arith.constant 0 : index
    %9 = vector.load %arg7[%c0_6, %c0_7] : memref<1x128xf32, #tpu.memory_space<vmem>>, vector<1x128xf32>
    %10 = vector.shape_cast %9 : vector<1x128xf32> to vector<128xf32>
    %11 = vector.shape_cast %10 : vector<128xf32> to vector<1x1x128xf32>
    %12 = vector.broadcast %11 : vector<1x1x128xf32> to vector<1x16x128xf32>
    %13 = arith.addf %8, %12 : vector<1x16x128xf32>
    %cst = arith.constant 0.000000e+00 : f32
    %14 = vector.broadcast %cst : f32 to vector<1x16x128xf32>
    %15 = arith.maximumf %13, %14 : vector<1x16x128xf32>
    %cst_8 = arith.constant 0.000000e+00 : f32
    %16 = vector.broadcast %cst_8 : f32 to vector<1x16x128xf32>
    %17 = arith.select %0, %16, %15 : vector<1x16x128xf32>
    %c0_9 = arith.constant 0 : index
    %c0_10 = arith.constant 0 : index
    %c0_11 = arith.constant 0 : index
    %c0_12 = arith.constant 0 : index
    %18 = vector.load %arg3[%c0_9, %c0_10, %c0_11, %c0_12] : memref<1x16x16x128xf32, #tpu.memory_space<vmem>>, vector<1x16x16x128xf32>
    %19 = vector.shape_cast %18 : vector<1x16x16x128xf32> to vector<16x16x128xf32>
    %c0_13 = arith.constant 0 : index
    %c0_14 = arith.constant 0 : index
    %20 = vector.load %arg6[%c0_13, %c0_14] : memref<1x128xf32, #tpu.memory_space<vmem>>, vector<1x128xf32>
    %21 = vector.shape_cast %20 : vector<1x128xf32> to vector<128xf32>
    %22 = vector.shape_cast %21 : vector<128xf32> to vector<1x1x128xf32>
    %23 = vector.broadcast %22 : vector<1x1x128xf32> to vector<16x16x128xf32>
    %24 = arith.mulf %19, %23 : vector<16x16x128xf32>
    %c0_15 = arith.constant 0 : index
    %c0_16 = arith.constant 0 : index
    %25 = vector.load %arg7[%c0_15, %c0_16] : memref<1x128xf32, #tpu.memory_space<vmem>>, vector<1x128xf32>
    %26 = vector.shape_cast %25 : vector<1x128xf32> to vector<128xf32>
    %27 = vector.shape_cast %26 : vector<128xf32> to vector<1x1x128xf32>
    %28 = vector.broadcast %27 : vector<1x1x128xf32> to vector<16x16x128xf32>
    %29 = arith.addf %24, %28 : vector<16x16x128xf32>
    %cst_17 = arith.constant 0.000000e+00 : f32
    %30 = vector.broadcast %cst_17 : f32 to vector<16x16x128xf32>
    %31 = arith.maximumf %29, %30 : vector<16x16x128xf32>
    %c0_18 = arith.constant 0 : index
    %c0_19 = arith.constant 0 : index
    %c0_20 = arith.constant 0 : index
    %c0_21 = arith.constant 0 : index
    %32 = vector.load %arg4[%c0_18, %c0_19, %c0_20, %c0_21] : memref<1x1x16x128xf32, #tpu.memory_space<vmem>>, vector<1x1x16x128xf32>
    %33 = vector.shape_cast %32 : vector<1x1x16x128xf32> to vector<1x16x128xf32>
    %c0_22 = arith.constant 0 : index
    %c0_23 = arith.constant 0 : index
    %34 = vector.load %arg6[%c0_22, %c0_23] : memref<1x128xf32, #tpu.memory_space<vmem>>, vector<1x128xf32>
    %35 = vector.shape_cast %34 : vector<1x128xf32> to vector<128xf32>
    %36 = vector.shape_cast %35 : vector<128xf32> to vector<1x1x128xf32>
    %37 = vector.broadcast %36 : vector<1x1x128xf32> to vector<1x16x128xf32>
    %38 = arith.mulf %33, %37 : vector<1x16x128xf32>
    %c0_24 = arith.constant 0 : index
    %c0_25 = arith.constant 0 : index
    %39 = vector.load %arg7[%c0_24, %c0_25] : memref<1x128xf32, #tpu.memory_space<vmem>>, vector<1x128xf32>
    %40 = vector.shape_cast %39 : vector<1x128xf32> to vector<128xf32>
    %41 = vector.shape_cast %40 : vector<128xf32> to vector<1x1x128xf32>
    %42 = vector.broadcast %41 : vector<1x1x128xf32> to vector<1x16x128xf32>
    %43 = arith.addf %38, %42 : vector<1x16x128xf32>
    %cst_26 = arith.constant 0.000000e+00 : f32
    %44 = vector.broadcast %cst_26 : f32 to vector<1x16x128xf32>
    %45 = arith.maximumf %43, %44 : vector<1x16x128xf32>
    %cst_27 = arith.constant 0.000000e+00 : f32
    %46 = vector.broadcast %cst_27 : f32 to vector<1x16x128xf32>
    %47 = arith.select %1, %46, %45 : vector<1x16x128xf32>
    %48 = tpu.concatenate %17, %31, %47 in 0 : vector<1x16x128xf32>, vector<16x16x128xf32>, vector<1x16x128xf32> -> vector<18x16x128xf32>
    %49 = vector.shape_cast %48 : vector<18x16x128xf32> to vector<288x128xf32>
    %50 = tpu.iota {dimensions = array<i32: 0>} : vector<288x1xi32>
    %c16_i32 = arith.constant 16 : i32
    %c0_i32_28 = arith.constant 0 : i32
    %51 = arith.cmpi eq, %c16_i32, %c0_i32_28 : i32
    %c1_i32 = arith.constant 1 : i32
    %52 = arith.select %51, %c1_i32, %c16_i32 : i32
    %53 = vector.broadcast %52 : i32 to vector<288x1xi32>
    %54 = arith.remsi %50, %53 : vector<288x1xi32>
    %c0_i32_29 = arith.constant 0 : i32
    %55 = vector.broadcast %c0_i32_29 : i32 to vector<288x1xi32>
    %56 = arith.cmpi ne, %54, %55 : vector<288x1xi32>
    %c0_i32_30 = arith.constant 0 : i32
    %57 = vector.broadcast %c0_i32_30 : i32 to vector<288x1xi32>
    %58 = arith.cmpi slt, %54, %57 : vector<288x1xi32>
    %c0_i32_31 = arith.constant 0 : i32
    %59 = arith.cmpi slt, %52, %c0_i32_31 : i32
    %60 = vector.broadcast %59 : i1 to vector<288x1xi1>
    %61 = vector.broadcast %60 : vector<288x1xi1> to vector<288x1xi1>
    %62 = arith.xori %58, %61 : vector<288x1xi1>
    %63 = arith.andi %62, %56 : vector<288x1xi1>
    %64 = vector.broadcast %52 : i32 to vector<288x1xi32>
    %65 = arith.addi %54, %64 : vector<288x1xi32>
    %66 = arith.select %63, %65, %54 : vector<288x1xi1>, vector<288x1xi32>
    %c0_i32_32 = arith.constant 0 : i32
    %67 = vector.broadcast %c0_i32_32 : i32 to vector<288x1xi32>
    %68 = arith.cmpi ne, %66, %67 : vector<288x1xi32>
    %69 = arith.extui %68 : vector<288x1xi1> to vector<288x1xi32>
    %70 = arith.sitofp %69 : vector<288x1xi32> to vector<288x1xf32>
    %c15_i32 = arith.constant 15 : i32
    %71 = vector.broadcast %c15_i32 : i32 to vector<288x1xi32>
    %72 = arith.cmpi ne, %66, %71 : vector<288x1xi32>
    %73 = arith.extui %72 : vector<288x1xi1> to vector<288x1xi32>
    %74 = arith.sitofp %73 : vector<288x1xi32> to vector<288x1xf32>
    %c1_i32_33 = arith.constant 1 : i32
    %75 = tpu.dynamic_rotate %49 by %c1_i32_33 dim 0 : vector<288x128xf32>, i32 -> vector<288x128xf32>
    %76 = vector.broadcast %70 : vector<288x1xf32> to vector<288x128xf32>
    %77 = arith.mulf %75, %76 : vector<288x128xf32>
    %c287_i32 = arith.constant 287 : i32
    %78 = tpu.dynamic_rotate %49 by %c287_i32 dim 0 : vector<288x128xf32>, i32 -> vector<288x128xf32>
    %79 = vector.broadcast %74 : vector<288x1xf32> to vector<288x128xf32>
    %80 = arith.mulf %78, %79 : vector<288x128xf32>
    %81 = vector.extract_strided_slice %77 {offsets = [0, 0], sizes = [256, 128], strides = [1, 1]} : vector<288x128xf32> to vector<256x128xf32>
    %c0_34 = arith.constant 0 : index
    %c0_35 = arith.constant 0 : index
    %82 = vector.load %arg5[%c0_34, %c0_35] : memref<1152x128xf32, #tpu.memory_space<vmem>>, vector<128x128xf32>
    %cst_36 = arith.constant dense<0.000000e+00> : vector<256x128xf32>
    %83 = tpu.matmul %81, %82, %cst_36 {dimension_numbers = #tpu.dot_dimension_numbers<[1], [0], [0], [1], [0, 0, 1, 1], [], []>} : vector<256x128xf32>, vector<128x128xf32>, vector<256x128xf32> -> vector<256x128xf32>
    %84 = vector.extract_strided_slice %49 {offsets = [0, 0], sizes = [256, 128], strides = [1, 1]} : vector<288x128xf32> to vector<256x128xf32>
    %c128 = arith.constant 128 : index
    %c0_37 = arith.constant 0 : index
    %85 = vector.load %arg5[%c128, %c0_37] : memref<1152x128xf32, #tpu.memory_space<vmem>>, vector<128x128xf32>
    %cst_38 = arith.constant dense<0.000000e+00> : vector<256x128xf32>
    %86 = tpu.matmul %84, %85, %cst_38 {dimension_numbers = #tpu.dot_dimension_numbers<[1], [0], [0], [1], [0, 0, 1, 1], [], []>} : vector<256x128xf32>, vector<128x128xf32>, vector<256x128xf32> -> vector<256x128xf32>
    %87 = arith.addf %83, %86 : vector<256x128xf32>
    %88 = vector.extract_strided_slice %80 {offsets = [0, 0], sizes = [256, 128], strides = [1, 1]} : vector<288x128xf32> to vector<256x128xf32>
    %c256 = arith.constant 256 : index
    %c0_39 = arith.constant 0 : index
    %89 = vector.load %arg5[%c256, %c0_39] : memref<1152x128xf32, #tpu.memory_space<vmem>>, vector<128x128xf32>
    %cst_40 = arith.constant dense<0.000000e+00> : vector<256x128xf32>
    %90 = tpu.matmul %88, %89, %cst_40 {dimension_numbers = #tpu.dot_dimension_numbers<[1], [0], [0], [1], [0, 0, 1, 1], [], []>} : vector<256x128xf32>, vector<128x128xf32>, vector<256x128xf32> -> vector<256x128xf32>
    %91 = arith.addf %87, %90 : vector<256x128xf32>
    %92 = vector.extract_strided_slice %77 {offsets = [16, 0], sizes = [256, 128], strides = [1, 1]} : vector<288x128xf32> to vector<256x128xf32>
    %c384 = arith.constant 384 : index
    %c0_41 = arith.constant 0 : index
    %93 = vector.load %arg5[%c384, %c0_41] : memref<1152x128xf32, #tpu.memory_space<vmem>>, vector<128x128xf32>
    %cst_42 = arith.constant dense<0.000000e+00> : vector<256x128xf32>
    %94 = tpu.matmul %92, %93, %cst_42 {dimension_numbers = #tpu.dot_dimension_numbers<[1], [0], [0], [1], [0, 0, 1, 1], [], []>} : vector<256x128xf32>, vector<128x128xf32>, vector<256x128xf32> -> vector<256x128xf32>
    %95 = arith.addf %91, %94 : vector<256x128xf32>
    %96 = vector.extract_strided_slice %49 {offsets = [16, 0], sizes = [256, 128], strides = [1, 1]} : vector<288x128xf32> to vector<256x128xf32>
    %c512 = arith.constant 512 : index
    %c0_43 = arith.constant 0 : index
    %97 = vector.load %arg5[%c512, %c0_43] : memref<1152x128xf32, #tpu.memory_space<vmem>>, vector<128x128xf32>
    %cst_44 = arith.constant dense<0.000000e+00> : vector<256x128xf32>
    %98 = tpu.matmul %96, %97, %cst_44 {dimension_numbers = #tpu.dot_dimension_numbers<[1], [0], [0], [1], [0, 0, 1, 1], [], []>} : vector<256x128xf32>, vector<128x128xf32>, vector<256x128xf32> -> vector<256x128xf32>
    %99 = arith.addf %95, %98 : vector<256x128xf32>
    %100 = vector.extract_strided_slice %80 {offsets = [16, 0], sizes = [256, 128], strides = [1, 1]} : vector<288x128xf32> to vector<256x128xf32>
    %c640 = arith.constant 640 : index
    %c0_45 = arith.constant 0 : index
    %101 = vector.load %arg5[%c640, %c0_45] : memref<1152x128xf32, #tpu.memory_space<vmem>>, vector<128x128xf32>
    %cst_46 = arith.constant dense<0.000000e+00> : vector<256x128xf32>
    %102 = tpu.matmul %100, %101, %cst_46 {dimension_numbers = #tpu.dot_dimension_numbers<[1], [0], [0], [1], [0, 0, 1, 1], [], []>} : vector<256x128xf32>, vector<128x128xf32>, vector<256x128xf32> -> vector<256x128xf32>
    %103 = arith.addf %99, %102 : vector<256x128xf32>
    %104 = vector.extract_strided_slice %77 {offsets = [32, 0], sizes = [256, 128], strides = [1, 1]} : vector<288x128xf32> to vector<256x128xf32>
    %c768 = arith.constant 768 : index
    %c0_47 = arith.constant 0 : index
    %105 = vector.load %arg5[%c768, %c0_47] : memref<1152x128xf32, #tpu.memory_space<vmem>>, vector<128x128xf32>
    %cst_48 = arith.constant dense<0.000000e+00> : vector<256x128xf32>
    %106 = tpu.matmul %104, %105, %cst_48 {dimension_numbers = #tpu.dot_dimension_numbers<[1], [0], [0], [1], [0, 0, 1, 1], [], []>} : vector<256x128xf32>, vector<128x128xf32>, vector<256x128xf32> -> vector<256x128xf32>
    %107 = arith.addf %103, %106 : vector<256x128xf32>
    %108 = vector.extract_strided_slice %49 {offsets = [32, 0], sizes = [256, 128], strides = [1, 1]} : vector<288x128xf32> to vector<256x128xf32>
    %c896 = arith.constant 896 : index
    %c0_49 = arith.constant 0 : index
    %109 = vector.load %arg5[%c896, %c0_49] : memref<1152x128xf32, #tpu.memory_space<vmem>>, vector<128x128xf32>
    %cst_50 = arith.constant dense<0.000000e+00> : vector<256x128xf32>
    %110 = tpu.matmul %108, %109, %cst_50 {dimension_numbers = #tpu.dot_dimension_numbers<[1], [0], [0], [1], [0, 0, 1, 1], [], []>} : vector<256x128xf32>, vector<128x128xf32>, vector<256x128xf32> -> vector<256x128xf32>
    %111 = arith.addf %107, %110 : vector<256x128xf32>
    %112 = vector.extract_strided_slice %80 {offsets = [32, 0], sizes = [256, 128], strides = [1, 1]} : vector<288x128xf32> to vector<256x128xf32>
    %c1024 = arith.constant 1024 : index
    %c0_51 = arith.constant 0 : index
    %113 = vector.load %arg5[%c1024, %c0_51] : memref<1152x128xf32, #tpu.memory_space<vmem>>, vector<128x128xf32>
    %cst_52 = arith.constant dense<0.000000e+00> : vector<256x128xf32>
    %114 = tpu.matmul %112, %113, %cst_52 {dimension_numbers = #tpu.dot_dimension_numbers<[1], [0], [0], [1], [0, 0, 1, 1], [], []>} : vector<256x128xf32>, vector<128x128xf32>, vector<256x128xf32> -> vector<256x128xf32>
    %115 = arith.addf %111, %114 : vector<256x128xf32>
    %116 = vector.shape_cast %115 : vector<256x128xf32> to vector<1x16x16x128xf32>
    %c0_53 = arith.constant 0 : index
    %c0_54 = arith.constant 0 : index
    %c0_55 = arith.constant 0 : index
    %c0_56 = arith.constant 0 : index
    %117 = vector.load %arg8[%c0_53, %c0_54, %c0_55, %c0_56] : memref<1x16x16x128xf32, #tpu.memory_space<vmem>>, vector<1x16x16x128xf32>
    tpu.vector_store %arg8[%c0_53, %c0_54, %c0_55, %c0_56], %116 {strides = array<i32>} : memref<1x16x16x128xf32, #tpu.memory_space<vmem>>, vector<1x16x16x128xf32>,
    %cst_57 = arith.constant dense<0.000000e+00> : vector<128xf32>
    %118 = vector.multi_reduction <add>, %115, %cst_57 [0] : vector<256x128xf32> to vector<128xf32>
    %119 = vector.shape_cast %118 : vector<128xf32> to vector<1x1x1x128xf32>
    %c0_58 = arith.constant 0 : index
    %c0_59 = arith.constant 0 : index
    %c0_60 = arith.constant 0 : index
    %c0_61 = arith.constant 0 : index
    %120 = vector.load %arg9[%c0_58, %c0_59, %c0_60, %c0_61] : memref<1x1x1x128xf32, #tpu.memory_space<vmem>>, vector<1x1x1x128xf32>
    tpu.vector_store %arg9[%c0_58, %c0_59, %c0_60, %c0_61], %119 {strides = array<i32>} : memref<1x1x1x128xf32, #tpu.memory_space<vmem>>, vector<1x1x1x128xf32>,
    %121 = arith.mulf %115, %115 : vector<256x128xf32>
    %cst_62 = arith.constant dense<0.000000e+00> : vector<128xf32>
    %122 = vector.multi_reduction <add>, %121, %cst_62 [0] : vector<256x128xf32> to vector<128xf32>
    %123 = vector.shape_cast %122 : vector<128xf32> to vector<1x1x1x128xf32>
    %c0_63 = arith.constant 0 : index
    %c0_64 = arith.constant 0 : index
    %c0_65 = arith.constant 0 : index
    %c0_66 = arith.constant 0 : index
    %124 = vector.load %arg10[%c0_63, %c0_64, %c0_65, %c0_66] : memref<1x1x1x128xf32, #tpu.memory_space<vmem>>, vector<1x1x1x128xf32>
    tpu.vector_store %arg10[%c0_63, %c0_64, %c0_65, %c0_66], %123 {strides = array<i32>} : memref<1x1x1x128xf32, #tpu.memory_space<vmem>>, vector<1x1x1x128xf32>,
    return
  }
  func.func @transform_0(%arg0: i32, %arg1: i32) -> (i32, i32, i32, i32) {
    %c16_i32 = arith.constant 16 : i32
    %0 = arith.muli %arg1, %c16_i32 : i32
    %c1_i32 = arith.constant 1 : i32
    %1 = arith.subi %0, %c1_i32 : i32
    %c0_i32 = arith.constant 0 : i32
    %2 = arith.maxsi %1, %c0_i32 : i32
    %c0_i32_0 = arith.constant 0 : i32
    %c0_i32_1 = arith.constant 0 : i32
    %c0_i32_2 = arith.constant 0 : i32
    return %arg0, %2, %c0_i32_0, %c0_i32_1 : i32, i32, i32, i32
  }
  func.func @transform_1(%arg0: i32, %arg1: i32) -> (i32, i32, i32, i32) {
    %c0_i32 = arith.constant 0 : i32
    %c0_i32_0 = arith.constant 0 : i32
    %c0_i32_1 = arith.constant 0 : i32
    return %arg0, %arg1, %c0_i32, %c0_i32_0 : i32, i32, i32, i32
  }
  func.func @transform_2(%arg0: i32, %arg1: i32) -> (i32, i32, i32, i32) {
    %c16_i32 = arith.constant 16 : i32
    %0 = arith.muli %arg1, %c16_i32 : i32
    %c16_i32_0 = arith.constant 16 : i32
    %1 = arith.addi %0, %c16_i32_0 : i32
    %c15_i32 = arith.constant 15 : i32
    %2 = arith.minsi %1, %c15_i32 : i32
    %c0_i32 = arith.constant 0 : i32
    %c0_i32_1 = arith.constant 0 : i32
    %c0_i32_2 = arith.constant 0 : i32
    return %arg0, %2, %c0_i32, %c0_i32_1 : i32, i32, i32, i32
  }
  func.func @transform_3(%arg0: i32, %arg1: i32) -> (i32, i32) {
    %c0_i32 = arith.constant 0 : i32
    %c0_i32_0 = arith.constant 0 : i32
    %c0_i32_1 = arith.constant 0 : i32
    return %c0_i32, %c0_i32_0 : i32, i32
  }
  func.func @transform_4(%arg0: i32, %arg1: i32) -> (i32, i32) {
    %c0_i32 = arith.constant 0 : i32
    %c0_i32_0 = arith.constant 0 : i32
    %c0_i32_1 = arith.constant 0 : i32
    return %c0_i32, %c0_i32_0 : i32, i32
  }
  func.func @transform_5(%arg0: i32, %arg1: i32) -> (i32, i32) {
    %c0_i32 = arith.constant 0 : i32
    %c0_i32_0 = arith.constant 0 : i32
    %c0_i32_1 = arith.constant 0 : i32
    return %c0_i32, %c0_i32_0 : i32, i32
  }
  func.func @transform_6(%arg0: i32, %arg1: i32) -> (i32, i32, i32, i32) {
    %c0_i32 = arith.constant 0 : i32
    %c0_i32_0 = arith.constant 0 : i32
    %c0_i32_1 = arith.constant 0 : i32
    return %arg0, %arg1, %c0_i32, %c0_i32_0 : i32, i32, i32, i32
  }
  func.func @transform_7(%arg0: i32, %arg1: i32) -> (i32, i32, i32, i32) {
    %c0_i32 = arith.constant 0 : i32
    %c0_i32_0 = arith.constant 0 : i32
    %c0_i32_1 = arith.constant 0 : i32
    return %arg0, %arg1, %c0_i32, %c0_i32_0 : i32, i32, i32, i32
  }
  func.func @transform_8(%arg0: i32, %arg1: i32) -> (i32, i32, i32, i32) {
    %c0_i32 = arith.constant 0 : i32
    %c0_i32_0 = arith.constant 0 : i32
    %c0_i32_1 = arith.constant 0 : i32
    return %arg0, %arg1, %c0_i32, %c0_i32_0 : i32, i32, i32, i32
  }
}

module attributes {stable_mosaic.version = 11 : i64} {
  func.func @_bn_relu_kernel(%arg0: i32, %arg1: memref<512x128xf32, #tpu.memory_space<vmem>>, %arg2: memref<1x128xf32, #tpu.memory_space<vmem>>, %arg3: memref<1x128xf32, #tpu.memory_space<vmem>>, %arg4: memref<512x128xf32, #tpu.memory_space<vmem>>) attributes {dimension_semantics = [#tpu.dimension_semantics<parallel>], iteration_bounds = array<i64: 1>, scalar_prefetch = 0 : i64, scratch_operands = 0 : i64, tpu.core_type = #tpu.core_type<tc>, window_params = [{transform_indices = @transform_0, window_bounds = array<i64: 512, 128>}, {pipeline_mode = #tpu.pipeline_mode<synchronous>, transform_indices = @transform_1, window_bounds = array<i64: 1, 128>}, {pipeline_mode = #tpu.pipeline_mode<synchronous>, transform_indices = @transform_2, window_bounds = array<i64: 1, 128>}, {transform_indices = @transform_3, window_bounds = array<i64: 512, 128>}]} {
    %c0 = arith.constant 0 : index
    %c0_0 = arith.constant 0 : index
    %0 = vector.load %arg1[%c0, %c0_0] : memref<512x128xf32, #tpu.memory_space<vmem>>, vector<512x128xf32>
    %c0_1 = arith.constant 0 : index
    %c0_2 = arith.constant 0 : index
    %1 = vector.load %arg2[%c0_1, %c0_2] : memref<1x128xf32, #tpu.memory_space<vmem>>, vector<1x128xf32>
    %2 = vector.shape_cast %1 : vector<1x128xf32> to vector<128xf32>
    %3 = vector.shape_cast %2 : vector<128xf32> to vector<1x128xf32>
    %4 = vector.broadcast %3 : vector<1x128xf32> to vector<512x128xf32>
    %5 = arith.mulf %0, %4 : vector<512x128xf32>
    %c0_3 = arith.constant 0 : index
    %c0_4 = arith.constant 0 : index
    %6 = vector.load %arg3[%c0_3, %c0_4] : memref<1x128xf32, #tpu.memory_space<vmem>>, vector<1x128xf32>
    %7 = vector.shape_cast %6 : vector<1x128xf32> to vector<128xf32>
    %8 = vector.shape_cast %7 : vector<128xf32> to vector<1x128xf32>
    %9 = vector.broadcast %8 : vector<1x128xf32> to vector<512x128xf32>
    %10 = arith.addf %5, %9 : vector<512x128xf32>
    %cst = arith.constant 0.000000e+00 : f32
    %11 = vector.broadcast %cst : f32 to vector<512x128xf32>
    %12 = arith.maximumf %10, %11 : vector<512x128xf32>
    %c0_5 = arith.constant 0 : index
    %c0_6 = arith.constant 0 : index
    %13 = vector.load %arg4[%c0_5, %c0_6] : memref<512x128xf32, #tpu.memory_space<vmem>>, vector<512x128xf32>
    tpu.vector_store %arg4[%c0_5, %c0_6], %12 {strides = array<i32>} : memref<512x128xf32, #tpu.memory_space<vmem>>, vector<512x128xf32>,
    return
  }
  func.func @transform_0(%arg0: i32) -> (i32, i32) {
    %c0_i32 = arith.constant 0 : i32
    %c0_i32_0 = arith.constant 0 : i32
    return %arg0, %c0_i32 : i32, i32
  }
  func.func @transform_1(%arg0: i32) -> (i32, i32) {
    %c0_i32 = arith.constant 0 : i32
    %c0_i32_0 = arith.constant 0 : i32
    %c0_i32_1 = arith.constant 0 : i32
    return %c0_i32, %c0_i32_0 : i32, i32
  }
  func.func @transform_2(%arg0: i32) -> (i32, i32) {
    %c0_i32 = arith.constant 0 : i32
    %c0_i32_0 = arith.constant 0 : i32
    %c0_i32_1 = arith.constant 0 : i32
    return %c0_i32, %c0_i32_0 : i32, i32
  }
  func.func @transform_3(%arg0: i32) -> (i32, i32) {
    %c0_i32 = arith.constant 0 : i32
    %c0_i32_0 = arith.constant 0 : i32
    return %arg0, %c0_i32 : i32, i32
  }
}

</mosaic_0001>

<bundles_post_ra>
// kernel: double_conv2d_forward.5
= control target key start
LH: loop header
LB: loop body
LE: loop exit
PB: predicated region body
PF: predicated region fallthrough
CT: control target
= control target key end

     0   :  { %s896_s0 = inlined_call_operand.vmem [shape: f32[512,128], index: 0, kind: input, shape index: {}]   ;;  %s897_s1 = inlined_call_operand.vmem [shape: f32[1,128], index: 1, kind: input, shape index: {}]   ;;  %s898_s2 = inlined_call_operand.vmem [shape: f32[1,128], index: 2, kind: input, shape index: {}]   ;;  %s899_s3 = inlined_call_operand.vmem [shape: f32[512,128], index: 3, kind: output, shape index: {}]  }
   0x1   :  { %v14_v0 = vld [vmem:[%s896_s0] sm:$0xff]  ;;  %v15_v4 = vld [vmem:[%s896_s0 + $0x8] sm:$0xff]  ;;  %v16_v5 = vld [vmem:[%s896_s0 + $0x10] sm:$0xff] }
   0x2   :  { %v380_v1 = vld [vmem:[%s897_s1] ss:$0 sm:$0xff]  ;;  %v17_v6 = vld [vmem:[%s896_s0 + $0x18] sm:$0xff]  ;;  %v19_v11 = vld [vmem:[%s896_s0 + $0x28] sm:$0xff] }
   0x3   :  { %v385_v2 = vld [vmem:[%s898_s2] ss:$0 sm:$0xff]  ;;  %v85_v3 = vmul.f32 %v380_v1, %v14_v0  ;;  %v86_v7 = vmul.f32 %v380_v1, %v15_v4  ;;  %v87_v8 = vmul.f32 %v380_v1, %v16_v5  ;;  %v88_v9 = vmul.f32 %v380_v1, %v17_v6  ;;  %v20_v12 = vld [vmem:[%s896_s0 + $0x30] sm:$0xff]  ;;  %v21_v17 = vld [vmem:[%s896_s0 + $0x38] sm:$0xff] }
   0x4   :  { %v18_v10 = vld [vmem:[%s896_s0 + $0x20] sm:$0xff]  ;;  %v90_v15 = vmul.f32 %v380_v1, %v19_v11  ;;  %v91_v16 = vmul.f32 %v380_v1, %v20_v12  ;;  %v92_v21 = vmul.f32 %v380_v1, %v21_v17  ;;  %v23_v27 = vld [vmem:[%s896_s0 + $0x48] sm:$0xff]  ;;  %v24_v28 = vld [vmem:[%s896_s0 + $0x50] sm:$0xff] }
   0x5   :  { %v156_v13 = vadd.f32 %v385_v2, %v85_v3  ;;  %v89_v14 = vmul.f32 %v380_v1, %v18_v10  ;;  %v157_v18 = vadd.f32 %v385_v2, %v86_v7  ;;  %v158_v19 = vadd.f32 %v385_v2, %v87_v8  ;;  %v22_v22 = vld [vmem:[%s896_s0 + $0x40] sm:$0xff]  ;;  %v25_v29 = vld [vmem:[%s896_s0 + $0x58] sm:$0xff]  ;;  %v27_v35 = vld [vmem:[%s896_s0 + $0x68] sm:$0xff] }
   0x6   :  { %v159_v20 = vadd.f32 %v385_v2, %v88_v9  ;;  %v161_v25 = vadd.f32 %v385_v2, %v90_v15  ;;  %v162_v26 = vadd.f32 %v385_v2, %v91_v16  ;;  %v163_v33 = vadd.f32 %v385_v2, %v92_v21  ;;  %v26_v34 = vld [vmem:[%s896_s0 + $0x60] sm:$0xff]  ;;  %v28_v36 = vld [vmem:[%s896_s0 + $0x70] sm:$0xff]  ;;  %v29_v41 = vld [vmem:[%s896_s0 + $0x78] sm:$0xff] }
   0x7   :  { %v220_v23 = vmax.f32 %v156_v13, 0.0  ;;  %v160_v24 = vadd.f32 %v385_v2, %v89_v14  ;;  %v221_v30 = vmax.f32 %v157_v18, 0.0  ;;  %v222_v31 = vmax.f32 %v158_v19, 0.0  ;;  %v30_v54 = vld [vmem:[%s896_s0 + $0x80] sm:$0xff]  ;;  %v31_v59 = vld [vmem:[%s896_s0 + $0x88] sm:$0xff]  ;;  %v32_v60 = vld [vmem:[%s896_s0 + $0x90] sm:$0xff] }
   0x8   :  { %v223_v32 = vmax.f32 %v159_v20, 0.0  ;;  %v225_v38 = vmax.f32 %v161_v25, 0.0  ;;  %v226_v39 = vmax.f32 %v162_v26, 0.0  ;;  %v93_v40 = vmul.f32 %v380_v1, %v22_v22  ;;  %v33_v61 = vld [vmem:[%s896_s0 + $0x98] sm:$0xff]  ;;  %v34_v4 = vld [vmem:[%s896_s0 + $0xa0] sm:$0xff]  ;;  %v35_v5 = vld [vmem:[%s896_s0 + $0xa8] sm:$0xff] }
   0x9   :  { %284 = vst [vmem:[%s899_s3] sm:$0xff] %v220_v23  ;;  %v224_v37 = vmax.f32 %v160_v24, 0.0  ;;  %285 = vst [vmem:[%s899_s3 + $0x8] sm:$0xff] %v221_v30  ;;  %v227_v42 = vmax.f32 %v163_v33, 0.0  ;;  %v94_v43 = vmul.f32 %v380_v1, %v23_v27  ;;  %v95_v44 = vmul.f32 %v380_v1, %v24_v28  ;;  %v36_v6 = vld [vmem:[%s896_s0 + $0xb0] sm:$0xff]  ;;  %v37_v11 = vld [vmem:[%s896_s0 + $0xb8] sm:$0xff] }
   0xa   :  { %286 = vst [vmem:[%s899_s3 + $0x10] sm:$0xff] %v222_v31  ;;  %287 = vst [vmem:[%s899_s3 + $0x18] sm:$0xff] %v223_v32  ;;  %v96_v45 = vmul.f32 %v380_v1, %v25_v29  ;;  %v164_v46 = vadd.f32 %v385_v2, %v93_v40  ;;  %v97_v47 = vmul.f32 %v380_v1, %v26_v34  ;;  %v38_v24 = vld [vmem:[%s896_s0 + $0xc0] sm:$0xff]  ;;  %v39_v29 = vld [vmem:[%s896_s0 + $0xc8] sm:$0xff] }
   0xb   :  { %288 = vst [vmem:[%s899_s3 + $0x20] sm:$0xff] %v224_v37  ;;  %289 = vst [vmem:[%s899_s3 + $0x28] sm:$0xff] %v225_v38  ;;  %v98_v48 = vmul.f32 %v380_v1, %v27_v35  ;;  %v99_v49 = vmul.f32 %v380_v1, %v28_v36  ;;  %v165_v50 = vadd.f32 %v385_v2, %v94_v43  ;;  %v40_v30 = vld [vmem:[%s896_s0 + $0xd0] sm:$0xff]  ;;  %v41_v31 = vld [vmem:[%s896_s0 + $0xd8] sm:$0xff] }
   0xc   :  { %290 = vst [vmem:[%s899_s3 + $0x30] sm:$0xff] %v226_v39  ;;  %291 = vst [vmem:[%s899_s3 + $0x38] sm:$0xff] %v227_v42  ;;  %v166_v51 = vadd.f32 %v385_v2, %v95_v44  ;;  %v167_v52 = vadd.f32 %v385_v2, %v96_v45  ;;  %v100_v53 = vmul.f32 %v380_v1, %v29_v41  ;;  %v228_v55 = vmax.f32 %v164_v46, 0.0  ;;  %v42_v36 = vld [vmem:[%s896_s0 + $0xe0] sm:$0xff]  ;;  %v43_v37 = vld [vmem:[%s896_s0 + $0xe8] sm:$0xff] }
   0xd   :  { %v168_v56 = vadd.f32 %v385_v2, %v97_v47  ;;  %v169_v57 = vadd.f32 %v385_v2, %v98_v48  ;;  %v170_v58 = vadd.f32 %v385_v2, %v99_v49  ;;  %v229_v62 = vmax.f32 %v165_v50, 0.0  ;;  %v44_v38 = vld [vmem:[%s896_s0 + $0xf0] sm:$0xff]  ;;  %v45_v43 = vld [vmem:[%s896_s0 + $0xf8] sm:$0xff] }
   0xe   :  { %v230_v63 = vmax.f32 %v166_v51, 0.0  ;;  %v231_v0 = vmax.f32 %v167_v52, 0.0  ;;  %v171_v3 = vadd.f32 %v385_v2, %v100_v53  ;;  %292 = vst [vmem:[%s899_s3 + $0x40] sm:$0xff] %v228_v55  ;;  %v101_v10 = vmul.f32 %v380_v1, %v30_v54 }
   0xf   :  { %v232_v7 = vmax.f32 %v168_v56, 0.0  ;;  %v233_v8 = vmax.f32 %v169_v57, 0.0  ;;  %v234_v9 = vmax.f32 %v170_v58, 0.0  ;;  %293 = vst [vmem:[%s899_s3 + $0x48] sm:$0xff] %v229_v62  ;;  %v102_v13 = vmul.f32 %v380_v1, %v31_v59  ;;  %v46_v56 = vld [vmem:[%s896_s0 + $0x100] sm:$0xff]  ;;  %v48_v62 = vld [vmem:[%s896_s0 + $0x110] sm:$0xff] }
  0x10   :  { %294 = vst [vmem:[%s899_s3 + $0x50] sm:$0xff] %v230_v63  ;;  %295 = vst [vmem:[%s899_s3 + $0x58] sm:$0xff] %v231_v0  ;;  %v235_v12 = vmax.f32 %v171_v3, 0.0  ;;  %v103_v14 = vmul.f32 %v380_v1, %v32_v60  ;;  %v104_v15 = vmul.f32 %v380_v1, %v33_v61  ;;  %v172_v16 = vadd.f32 %v385_v2, %v101_v10  ;;  %v47_v61 = vld [vmem:[%s896_s0 + $0x108] sm:$0xff]  ;;  %v49_v63 = vld [vmem:[%s896_s0 + $0x118] sm:$0xff] }
  0x11   :  { %296 = vst [vmem:[%s899_s3 + $0x60] sm:$0xff] %v232_v7  ;;  %297 = vst [vmem:[%s899_s3 + $0x68] sm:$0xff] %v233_v8  ;;  %v105_v17 = vmul.f32 %v380_v1, %v34_v4  ;;  %v106_v18 = vmul.f32 %v380_v1, %v35_v5  ;;  %v107_v19 = vmul.f32 %v380_v1, %v36_v6  ;;  %v50_v6 = vld [vmem:[%s896_s0 + $0x120] sm:$0xff]  ;;  %v51_v7 = vld [vmem:[%s896_s0 + $0x128] sm:$0xff] }
  0x12   :  { %298 = vst [vmem:[%s899_s3 + $0x70] sm:$0xff] %v234_v9  ;;  %299 = vst [vmem:[%s899_s3 + $0x78] sm:$0xff] %v235_v12  ;;  %v173_v20 = vadd.f32 %v385_v2, %v102_v13  ;;  %v174_v21 = vadd.f32 %v385_v2, %v103_v14  ;;  %v175_v22 = vadd.f32 %v385_v2, %v104_v15  ;;  %v236_v25 = vmax.f32 %v172_v16, 0.0  ;;  %v52_v8 = vld [vmem:[%s896_s0 + $0x130] sm:$0xff]  ;;  %v53_v13 = vld [vmem:[%s896_s0 + $0x138] sm:$0xff] }
  0x13   :  { %v108_v23 = vmul.f32 %v380_v1, %v37_v11  ;;  %v176_v26 = vadd.f32 %v385_v2, %v105_v17  ;;  %v177_v27 = vadd.f32 %v385_v2, %v106_v18  ;;  %v178_v28 = vadd.f32 %v385_v2, %v107_v19 }
  0x14   :  { %v237_v32 = vmax.f32 %v173_v20, 0.0  ;;  %v238_v33 = vmax.f32 %v174_v21, 0.0  ;;  %v239_v34 = vmax.f32 %v175_v22, 0.0  ;;  %300 = vst [vmem:[%s899_s3 + $0x80] sm:$0xff] %v236_v25  ;;  %v109_v42 = vmul.f32 %v380_v1, %v38_v24 }
  0x15   :  { %v179_v35 = vadd.f32 %v385_v2, %v108_v23  ;;  %v240_v39 = vmax.f32 %v176_v26, 0.0  ;;  %v241_v40 = vmax.f32 %v177_v27, 0.0  ;;  %v242_v41 = vmax.f32 %v178_v28, 0.0  ;;  %v54_v26 = vld [vmem:[%s896_s0 + $0x140] sm:$0xff] }
  0x16   :  { %301 = vst [vmem:[%s899_s3 + $0x88] sm:$0xff] %v237_v32  ;;  %302 = vst [vmem:[%s899_s3 + $0x90] sm:$0xff] %v238_v33  ;;  %v110_v45 = vmul.f32 %v380_v1, %v39_v29  ;;  %v111_v46 = vmul.f32 %v380_v1, %v40_v30  ;;  %v112_v47 = vmul.f32 %v380_v1, %v41_v31  ;;  %v55_v31 = vld [vmem:[%s896_s0 + $0x148] sm:$0xff]  ;;  %v56_v32 = vld [vmem:[%s896_s0 + $0x150] sm:$0xff] }
  0x17   :  { %303 = vst [vmem:[%s899_s3 + $0x98] sm:$0xff] %v239_v34  ;;  %v243_v44 = vmax.f32 %v179_v35, 0.0  ;;  %304 = vst [vmem:[%s899_s3 + $0xa0] sm:$0xff] %v240_v39  ;;  %v180_v48 = vadd.f32 %v385_v2, %v109_v42  ;;  %v113_v49 = vmul.f32 %v380_v1, %v42_v36  ;;  %v114_v50 = vmul.f32 %v380_v1, %v43_v37  ;;  %v57_v33 = vld [vmem:[%s896_s0 + $0x158] sm:$0xff]  ;;  %v59_v39 = vld [vmem:[%s896_s0 + $0x168] sm:$0xff] }
  0x18   :  { %305 = vst [vmem:[%s899_s3 + $0xa8] sm:$0xff] %v241_v40  ;;  %306 = vst [vmem:[%s899_s3 + $0xb0] sm:$0xff] %v242_v41  ;;  %v115_v51 = vmul.f32 %v380_v1, %v44_v38  ;;  %v181_v52 = vadd.f32 %v385_v2, %v110_v45  ;;  %v182_v53 = vadd.f32 %v385_v2, %v111_v46  ;;  %v58_v38 = vld [vmem:[%s896_s0 + $0x160] sm:$0xff]  ;;  %v60_v40 = vld [vmem:[%s896_s0 + $0x170] sm:$0xff] }
  0x19   :  { %307 = vst [vmem:[%s899_s3 + $0xb8] sm:$0xff] %v243_v44  ;;  %v183_v54 = vadd.f32 %v385_v2, %v112_v47  ;;  %v116_v55 = vmul.f32 %v380_v1, %v45_v43  ;;  %v244_v57 = vmax.f32 %v180_v48, 0.0  ;;  %v184_v58 = vadd.f32 %v385_v2, %v113_v49  ;;  %v61_v45 = vld [vmem:[%s896_s0 + $0x178] sm:$0xff] }
  0x1a   :  { %v185_v59 = vadd.f32 %v385_v2, %v114_v50  ;;  %v186_v60 = vadd.f32 %v385_v2, %v115_v51  ;;  %v245_v0 = vmax.f32 %v181_v52, 0.0  ;;  %v246_v3 = vmax.f32 %v182_v53, 0.0 }
  0x1b   :  { %v247_v4 = vmax.f32 %v183_v54, 0.0  ;;  %v187_v5 = vadd.f32 %v385_v2, %v116_v55  ;;  %308 = vst [vmem:[%s899_s3 + $0xc0] sm:$0xff] %v244_v57  ;;  %v248_v9 = vmax.f32 %v184_v58, 0.0  ;;  %v117_v12 = vmul.f32 %v380_v1, %v46_v56  ;;  %v62_v58 = vld [vmem:[%s896_s0 + $0x180] sm:$0xff] }
  0x1c   :  { %v249_v10 = vmax.f32 %v185_v59, 0.0  ;;  %v250_v11 = vmax.f32 %v186_v60, 0.0  ;;  %309 = vst [vmem:[%s899_s3 + $0xc8] sm:$0xff] %v245_v0  ;;  %310 = vst [vmem:[%s899_s3 + $0xd0] sm:$0xff] %v246_v3  ;;  %v118_v15 = vmul.f32 %v380_v1, %v47_v61  ;;  %v119_v16 = vmul.f32 %v380_v1, %v48_v62  ;;  %v64_v0 = vld [vmem:[%s896_s0 + $0x190] sm:$0xff]  ;;  %v65_v3 = vld [vmem:[%s896_s0 + $0x198] sm:$0xff] }
  0x1d   :  { %311 = vst [vmem:[%s899_s3 + $0xd8] sm:$0xff] %v247_v4  ;;  %v251_v14 = vmax.f32 %v187_v5, 0.0  ;;  %v120_v17 = vmul.f32 %v380_v1, %v49_v63  ;;  %312 = vst [vmem:[%s899_s3 + $0xe0] sm:$0xff] %v248_v9  ;;  %v188_v18 = vadd.f32 %v385_v2, %v117_v12  ;;  %v121_v19 = vmul.f32 %v380_v1, %v50_v6  ;;  %v63_v63 = vld [vmem:[%s896_s0 + $0x188] sm:$0xff] }
  0x1e   :  { %313 = vst [vmem:[%s899_s3 + $0xe8] sm:$0xff] %v249_v10  ;;  %314 = vst [vmem:[%s899_s3 + $0xf0] sm:$0xff] %v250_v11  ;;  %v122_v20 = vmul.f32 %v380_v1, %v51_v7  ;;  %v123_v21 = vmul.f32 %v380_v1, %v52_v8  ;;  %v189_v22 = vadd.f32 %v385_v2, %v118_v15  ;;  %v66_v8 = vld [vmem:[%s896_s0 + $0x1a0] sm:$0xff]  ;;  %v67_v9 = vld [vmem:[%s896_s0 + $0x1a8] sm:$0xff] }
  0x1f   :  { %315 = vst [vmem:[%s899_s3 + $0xf8] sm:$0xff] %v251_v14  ;;  %v190_v23 = vadd.f32 %v385_v2, %v119_v16  ;;  %v191_v24 = vadd.f32 %v385_v2, %v120_v17  ;;  %v124_v25 = vmul.f32 %v380_v1, %v53_v13  ;;  %v252_v27 = vmax.f32 %v188_v18, 0.0  ;;  %v68_v10 = vld [vmem:[%s896_s0 + $0x1b0] sm:$0xff]  ;;  %v69_v15 = vld [vmem:[%s896_s0 + $0x1b8] sm:$0xff] }
  0x20   :  { %v192_v28 = vadd.f32 %v385_v2, %v121_v19  ;;  %v193_v29 = vadd.f32 %v385_v2, %v122_v20  ;;  %v194_v30 = vadd.f32 %v385_v2, %v123_v21  ;;  %v253_v34 = vmax.f32 %v189_v22, 0.0 }
  0x21   :  { %v254_v35 = vmax.f32 %v190_v23, 0.0  ;;  %v255_v36 = vmax.f32 %v191_v24, 0.0  ;;  %v195_v37 = vadd.f32 %v385_v2, %v124_v25  ;;  %316 = vst [vmem:[%s899_s3 + $0x100] sm:$0xff] %v252_v27  ;;  %v125_v44 = vmul.f32 %v380_v1, %v54_v26 }
  0x22   :  { %v256_v41 = vmax.f32 %v192_v28, 0.0  ;;  %v257_v42 = vmax.f32 %v193_v29, 0.0  ;;  %v258_v43 = vmax.f32 %v194_v30, 0.0  ;;  %317 = vst [vmem:[%s899_s3 + $0x108] sm:$0xff] %v253_v34  ;;  %v126_v47 = vmul.f32 %v380_v1, %v55_v31  ;;  %v70_v28 = vld [vmem:[%s896_s0 + $0x1c0] sm:$0xff]  ;;  %v72_v34 = vld [vmem:[%s896_s0 + $0x1d0] sm:$0xff] }
  0x23   :  { %318 = vst [vmem:[%s899_s3 + $0x110] sm:$0xff] %v254_v35  ;;  %319 = vst [vmem:[%s899_s3 + $0x118] sm:$0xff] %v255_v36  ;;  %v259_v46 = vmax.f32 %v195_v37, 0.0  ;;  %v127_v48 = vmul.f32 %v380_v1, %v56_v32  ;;  %v128_v49 = vmul.f32 %v380_v1, %v57_v33  ;;  %v196_v50 = vadd.f32 %v385_v2, %v125_v44  ;;  %v71_v33 = vld [vmem:[%s896_s0 + $0x1c8] sm:$0xff]  ;;  %v73_v35 = vld [vmem:[%s896_s0 + $0x1d8] sm:$0xff] }
  0x24   :  { %320 = vst [vmem:[%s899_s3 + $0x120] sm:$0xff] %v256_v41  ;;  %321 = vst [vmem:[%s899_s3 + $0x128] sm:$0xff] %v257_v42  ;;  %v129_v51 = vmul.f32 %v380_v1, %v58_v38  ;;  %v130_v52 = vmul.f32 %v380_v1, %v59_v39  ;;  %v131_v53 = vmul.f32 %v380_v1, %v60_v40  ;;  %v74_v40 = vld [vmem:[%s896_s0 + $0x1e0] sm:$0xff]  ;;  %v75_v41 = vld [vmem:[%s896_s0 + $0x1e8] sm:$0xff] }
  0x25   :  { %322 = vst [vmem:[%s899_s3 + $0x130] sm:$0xff] %v258_v43  ;;  %323 = vst [vmem:[%s899_s3 + $0x138] sm:$0xff] %v259_v46  ;;  %v197_v54 = vadd.f32 %v385_v2, %v126_v47  ;;  %v198_v55 = vadd.f32 %v385_v2, %v127_v48  ;;  %v199_v56 = vadd.f32 %v385_v2, %v128_v49  ;;  %v260_v59 = vmax.f32 %v196_v50, 0.0  ;;  %v76_v42 = vld [vmem:[%s896_s0 + $0x1f0] sm:$0xff]  ;;  %v77_v47 = vld [vmem:[%s896_s0 + $0x1f8] sm:$0xff] }
  0x26   :  { %v132_v57 = vmul.f32 %v380_v1, %v61_v45  ;;  %v200_v60 = vadd.f32 %v385_v2, %v129_v51  ;;  %v201_v61 = vadd.f32 %v385_v2, %v130_v52  ;;  %v202_v62 = vadd.f32 %v385_v2, %v131_v53 }
  0x27   :  { %v261_v4 = vmax.f32 %v197_v54, 0.0  ;;  %v262_v5 = vmax.f32 %v198_v55, 0.0  ;;  %v263_v6 = vmax.f32 %v199_v56, 0.0  ;;  %324 = vst [vmem:[%s899_s3 + $0x140] sm:$0xff] %v260_v59  ;;  %v133_v14 = vmul.f32 %v380_v1, %v62_v58 }
  0x28   :  { %v203_v7 = vadd.f32 %v385_v2, %v132_v57  ;;  %v264_v11 = vmax.f32 %v200_v60, 0.0  ;;  %v265_v12 = vmax.f32 %v201_v61, 0.0  ;;  %v266_v13 = vmax.f32 %v202_v62, 0.0 }
  0x29   :  { %325 = vst [vmem:[%s899_s3 + $0x148] sm:$0xff] %v261_v4  ;;  %326 = vst [vmem:[%s899_s3 + $0x150] sm:$0xff] %v262_v5  ;;  %v134_v17 = vmul.f32 %v380_v1, %v63_v63  ;;  %v135_v18 = vmul.f32 %v380_v1, %v64_v0  ;;  %v136_v19 = vmul.f32 %v380_v1, %v65_v3 }
  0x2a   :  { %327 = vst [vmem:[%s899_s3 + $0x158] sm:$0xff] %v263_v6  ;;  %v267_v16 = vmax.f32 %v203_v7, 0.0  ;;  %328 = vst [vmem:[%s899_s3 + $0x160] sm:$0xff] %v264_v11  ;;  %v204_v20 = vadd.f32 %v385_v2, %v133_v14  ;;  %v137_v21 = vmul.f32 %v380_v1, %v66_v8  ;;  %v138_v22 = vmul.f32 %v380_v1, %v67_v9 }
  0x2b   :  { %329 = vst [vmem:[%s899_s3 + $0x168] sm:$0xff] %v265_v12  ;;  %330 = vst [vmem:[%s899_s3 + $0x170] sm:$0xff] %v266_v13  ;;  %v139_v23 = vmul.f32 %v380_v1, %v68_v10  ;;  %v205_v24 = vadd.f32 %v385_v2, %v134_v17  ;;  %v206_v25 = vadd.f32 %v385_v2, %v135_v18 }
  0x2c   :  { %331 = vst [vmem:[%s899_s3 + $0x178] sm:$0xff] %v267_v16  ;;  %v207_v26 = vadd.f32 %v385_v2, %v136_v19  ;;  %v140_v27 = vmul.f32 %v380_v1, %v69_v15  ;;  %v268_v29 = vmax.f32 %v204_v20, 0.0  ;;  %v208_v30 = vadd.f32 %v385_v2, %v137_v21 }
  0x2d   :  { %v209_v31 = vadd.f32 %v385_v2, %v138_v22  ;;  %v210_v32 = vadd.f32 %v385_v2, %v139_v23  ;;  %v269_v36 = vmax.f32 %v205_v24, 0.0  ;;  %v270_v37 = vmax.f32 %v206_v25, 0.0 }
  0x2e   :  { %v271_v38 = vmax.f32 %v207_v26, 0.0  ;;  %v211_v39 = vadd.f32 %v385_v2, %v140_v27  ;;  %332 = vst [vmem:[%s899_s3 + $0x180] sm:$0xff] %v268_v29  ;;  %v272_v43 = vmax.f32 %v208_v30, 0.0  ;;  %v141_v46 = vmul.f32 %v380_v1, %v70_v28 }
  0x2f   :  { %v273_v44 = vmax.f32 %v209_v31, 0.0  ;;  %v274_v45 = vmax.f32 %v210_v32, 0.0  ;;  %333 = vst [vmem:[%s899_s3 + $0x188] sm:$0xff] %v269_v36  ;;  %334 = vst [vmem:[%s899_s3 + $0x190] sm:$0xff] %v270_v37  ;;  %v142_v49 = vmul.f32 %v380_v1, %v71_v33  ;;  %v143_v50 = vmul.f32 %v380_v1, %v72_v34 }
  0x30   :  { %335 = vst [vmem:[%s899_s3 + $0x198] sm:$0xff] %v271_v38  ;;  %v275_v48 = vmax.f32 %v211_v39, 0.0  ;;  %v144_v51 = vmul.f32 %v380_v1, %v73_v35  ;;  %336 = vst [vmem:[%s899_s3 + $0x1a0] sm:$0xff] %v272_v43  ;;  %v212_v52 = vadd.f32 %v385_v2, %v141_v46  ;;  %v145_v53 = vmul.f32 %v380_v1, %v74_v40 }
  0x31   :  { %337 = vst [vmem:[%s899_s3 + $0x1a8] sm:$0xff] %v273_v44  ;;  %338 = vst [vmem:[%s899_s3 + $0x1b0] sm:$0xff] %v274_v45  ;;  %v146_v54 = vmul.f32 %v380_v1, %v75_v41  ;;  %v147_v55 = vmul.f32 %v380_v1, %v76_v42  ;;  %v213_v56 = vadd.f32 %v385_v2, %v142_v49 }
  0x32   :  { %339 = vst [vmem:[%s899_s3 + $0x1b8] sm:$0xff] %v275_v48  ;;  %v214_v57 = vadd.f32 %v385_v2, %v143_v50  ;;  %v215_v58 = vadd.f32 %v385_v2, %v144_v51  ;;  %v148_v59 = vmul.f32 %v380_v1, %v77_v47  ;;  %v276_v60 = vmax.f32 %v212_v52, 0.0 }
  0x33   :  { %v216_v61 = vadd.f32 %v385_v2, %v145_v53  ;;  %v217_v62 = vadd.f32 %v385_v2, %v146_v54  ;;  %v218_v63 = vadd.f32 %v385_v2, %v147_v55  ;;  %v277_v0 = vmax.f32 %v213_v56, 0.0 }
  0x34   :  { %v278_v3 = vmax.f32 %v214_v57, 0.0  ;;  %v279_v4 = vmax.f32 %v215_v58, 0.0  ;;  %v219_v5 = vadd.f32 %v385_v2, %v148_v59  ;;  %340 = vst [vmem:[%s899_s3 + $0x1c0] sm:$0xff] %v276_v60 }
  0x35   :  { %v280_v6 = vmax.f32 %v216_v61, 0.0  ;;  %v281_v7 = vmax.f32 %v217_v62, 0.0  ;;  %v282_v8 = vmax.f32 %v218_v63, 0.0  ;;  %341 = vst [vmem:[%s899_s3 + $0x1c8] sm:$0xff] %v277_v0 }
  0x36   :  { %342 = vst [vmem:[%s899_s3 + $0x1d0] sm:$0xff] %v278_v3  ;;  %343 = vst [vmem:[%s899_s3 + $0x1d8] sm:$0xff] %v279_v4  ;;  %v283_v1 = vmax.f32 %v219_v5, 0.0 }
  0x37   :  { %344 = vst [vmem:[%s899_s3 + $0x1e0] sm:$0xff] %v280_v6  ;;  %345 = vst [vmem:[%s899_s3 + $0x1e8] sm:$0xff] %v281_v7 }
  0x38   :  { %346 = vst [vmem:[%s899_s3 + $0x1f0] sm:$0xff] %v282_v8  ;;  %347 = vst [vmem:[%s899_s3 + $0x1f8] sm:$0xff] %v283_v1 }

// kernel: double_conv2d_forward.4
= control target key start
LH: loop header
LB: loop body
LE: loop exit
PB: predicated region body
PF: predicated region fallthrough
CT: control target
= control target key end

     0   :  { %s5656_s26 = smov 0   ;;  %s5658_s2 = smov 0   ;;  %s7757_s0 = inlined_call_operand.vmem [shape: f32[2,16,16,128], index: 0, kind: input, shape index: {}, may-alias: {0,1,2}]   ;;  %s7758_s1 = inlined_call_operand.vmem [shape: f32[2,16,16,128], index: 1, kind: input, shape index: {}, may-alias: {0,1,2}]   ;;  %s7759_s2 = inlined_call_operand.vmem [shape: f32[2,16,16,128], index: 2, kind: input, shape index: {}, may-alias: {0,1,2}]   ;;  %s7760_s3 = inlined_call_operand.vmem [shape: f32[1152,128], index: 3, kind: input, shape index: {}]   ;;  %s7761_s4 = inlined_call_operand.vmem [shape: f32[1,128], index: 4, kind: input, shape index: {}]   ;;  %s7762_s5 = inlined_call_operand.vmem [shape: f32[1,128], index: 5, kind: input, shape index: {}]   ;;  %s7763_s6 = inlined_call_operand.vmem [shape: f32[2,16,16,128], index: 6, kind: output, shape index: {0}]   ;;  %s7764_s7 = inlined_call_operand.vmem [shape: f32[2,1,1,128], index: 7, kind: output, shape index: {1}]   ;;  %s7765_s8 = inlined_call_operand.vmem [shape: f32[2,1,1,128], index: 8, kind: output, shape index: {2}]  }
   0x1   :  { %s5660_s27 = smov 0  }
   0x2 LB: > { %s31_s28 = sadd.s32 1, %s5604_s2  ;;  %p4321_p0 = scmp.ge.s32.totalorder %s5608_s27, 1  ;;  %s5608_s27 = sphi %s5660_s27, %s19_s27   ;;  %s5604_s2 = sphi %s5658_s2, %s8185_s2   ;;  %s5600_s26 = sphi %s5656_s26, %s8184_s26  }
   0x3   : > { %p33_p1 = scmp.ge.s32.totalorder %s31_s28, 2  ;;  %p357_p2 = scmp.lt.s32.totalorder %s5608_s27, 3 }
   0x5   : > { %s8187_s28 = smov (%p33_p1, %s31_s28), 0  ;;  %p358_p3 = pnand %p4321_p0, %p357_p2 }
   0x7   : > { %361 = sbr.rel (%p358_p3) target bundleno = 564 (0x234), region = 44 }
   0xc   : > { %v1607_v0 = vld [vmem:[%s7760_s3 + $0xf8] sm:$0xff]  ;;  %v1606_v1 = vld [vmem:[%s7760_s3 + $0xf0] sm:$0xff]  ;;  %v1605_v2 = vld [vmem:[%s7760_s3 + $0xe8] sm:$0xff]  ;;  %p457_p4 = scmp.lt.s32.totalorder %s5600_s26, 1  ;;  %v7777_v43 = vmov 0.0  }
   0xd   : > { %5527 = vmatprep.subr.mxu1 %v1607_v0  ;;  %4807 = vmatprep.subr.mxu0 %v1607_v0  ;;  %v1604_v3 = vld [vmem:[%s7760_s3 + $0xe0] sm:$0xff]  ;;  %v1603_v4 = vld [vmem:[%s7760_s3 + $0xd8] sm:$0xff]  ;;  %v1602_v5 = vld [vmem:[%s7760_s3 + $0xd0] sm:$0xff] }
   0xe   : > { %5543 = vmatpush3.msra.mxu1 %v1607_v0  ;;  %4808 = vmatpush3.msra.mxu0 %v1607_v0  ;;  %s8189_s26 = smov (!%p457_p4, %s5600_s26), 1  ;;  %v1601_v6 = vld [vmem:[%s7760_s3 + $0xc8] sm:$0xff]  ;;  %v1600_v7 = vld [vmem:[%s7760_s3 + $0xc0] sm:$0xff]  ;;  %v1599_v8 = vld [vmem:[%s7760_s3 + $0xb8] sm:$0xff] }
   0xf   : > { %5528 = vmatprep.subr.mxu1 %v1606_v1  ;;  %4809 = vmatprep.subr.mxu0 %v1606_v1  ;;  %s4371_s21 = sshll.u32 %s8189_s26, 8  ;;  %v1598_v9 = vld [vmem:[%s7760_s3 + $0xb0] sm:$0xff]  ;;  %v5721_v10 = vld [vmem:[%s7761_s4] ss:$0 sm:$0xff]  ;;  %v1597_v12 = vld [vmem:[%s7760_s3 + $0xa8] sm:$0xff]  ;;  %s500_s16 = scalar_lea.vmem %s7764_s7, %s8189_s26 }
  0x10   : > { %5544 = vmatpush3.msra.mxu1 %v1606_v1  ;;  %4810 = vmatpush3.msra.mxu0 %v1606_v1  ;;  %s5713_s30 = scalar_lea.vmem %s7758_s1, %s4371_s21  ;;  %v1596_v14 = vld [vmem:[%s7760_s3 + $0xa0] sm:$0xff]  ;;  %v1595_v17 = vld [vmem:[%s7760_s3 + $0x98] sm:$0xff]  ;;  %v1594_v20 = vld [vmem:[%s7760_s3 + $0x90] sm:$0xff]  ;;  %s7622_s14 = scalar_lea.vmem %s7763_s6, %s4371_s21 }
  0x11   : > { %5529 = vmatprep.subr.mxu1 %v1605_v2  ;;  %4811 = vmatprep.subr.mxu0 %v1605_v2  ;;  %v549_v11 = vld [vmem:[%s5713_s30 + $0x70] sm:$0xff]  ;;  %v550_v13 = vld [vmem:[%s5713_s30 + $0x78] sm:$0xff]  ;;  %v5735_v16 = vld [vmem:[%s7762_s5] ss:$0 sm:$0xff]  ;;  %s506_s19 = scalar_lea.vmem %s7765_s8, %s8189_s26 }
  0x12   : > { %5545 = vmatpush3.msra.mxu1 %v1605_v2  ;;  %4812 = vmatpush3.msra.mxu0 %v1605_v2  ;;  %v581_v15 = vmul.f32 %v5721_v10, %v549_v11  ;;  %v582_v18 = vmul.f32 %v5721_v10, %v550_v13  ;;  %v551_v19 = vld [vmem:[%s5713_s30 + $0x80] sm:$0xff]  ;;  %v552_v23 = vld [vmem:[%s5713_s30 + $0x88] sm:$0xff]  ;;  %v553_v32 = vld [vmem:[%s5713_s30 + $0x90] sm:$0xff] }
  0x13   : > { %5530 = vmatprep.subr.mxu1 %v1604_v3  ;;  %4813 = vmatprep.subr.mxu0 %v1604_v3  ;;  %v535_v22 = vld [vmem:[%s5713_s30] sm:$0xff]  ;;  %v583_v24 = vmul.f32 %v5721_v10, %v551_v19  ;;  %v1593_v25 = vld [vmem:[%s7760_s3 + $0x88] sm:$0xff]  ;;  %v584_v29 = vmul.f32 %v5721_v10, %v552_v23  ;;  %v537_v36 = vld [vmem:[%s5713_s30 + $0x10] sm:$0xff]  ;;  %v585_v41 = vmul.f32 %v5721_v10, %v553_v32 }
  0x14   : > { %5546 = vmatpush3.msra.mxu1 %v1604_v3  ;;  %4814 = vmatpush3.msra.mxu0 %v1604_v3  ;;  %v613_v21 = vadd.f32 %v5735_v16, %v581_v15  ;;  %v614_v26 = vadd.f32 %v5735_v16, %v582_v18  ;;  %v536_v27 = vld [vmem:[%s5713_s30 + $0x8] sm:$0xff]  ;;  %v567_v28 = vmul.f32 %v5721_v10, %v535_v22  ;;  %v1592_v30 = vld [vmem:[%s7760_s3 + $0x80] sm:$0xff]  ;;  %v554_v37 = vld [vmem:[%s5713_s30 + $0x98] sm:$0xff]  ;;  %v673_v15 = vlaneseq }
  0x15   : > { %5531 = vmatprep.subr.mxu1 %v1603_v4  ;;  %4815 = vmatprep.subr.mxu0 %v1603_v4  ;;  %v615_v33 = vadd.f32 %v5735_v16, %v583_v24  ;;  %v568_v34 = vmul.f32 %v5721_v10, %v536_v27  ;;  %v1591_v38 = vld [vmem:[%s7760_s3 + $0x78] sm:$0xff]  ;;  %v616_v40 = vadd.f32 %v5735_v16, %v584_v29  ;;  %v1590_v45 = vld [vmem:[%s7760_s3 + $0x70] sm:$0xff]  ;;  %v555_v50 = vld [vmem:[%s5713_s30 + $0xa0] sm:$0xff] }
  0x16   : > { %5547 = vmatpush3.msra.mxu1 %v1603_v4  ;;  %4816 = vmatpush3.msra.mxu0 %v1603_v4  ;;  %v5759_v31 = vmax.f32 %v613_v21, 0.0  ;;  %v5764_v35 = vmax.f32 %v614_v26, 0.0  ;;  %v599_v39 = vadd.f32 %v5735_v16, %v567_v28  ;;  %v538_v42 = vld [vmem:[%s5713_s30 + $0x18] sm:$0xff]  ;;  %v569_v48 = vmul.f32 %v5721_v10, %v537_v36  ;;  %v2072_v51 = vld [vmem:[%s7760_s3 + $0x170] sm:$0xff]  ;;  %v539_v56 = vld [vmem:[%s5713_s30 + $0x20] sm:$0xff] }
  0x17   : > { %5532 = vmatprep.subr.mxu1 %v1602_v5  ;;  %4817 = vmatprep.subr.mxu0 %v1602_v5  ;;  %v2073_v44 = vld [vmem:[%s7760_s3 + $0x178] sm:$0xff]  ;;  %v5783_v46 = vmax.f32 %v615_v33, 0.0  ;;  %v600_v47 = vadd.f32 %v5735_v16, %v568_v34  ;;  %v586_v49 = vmul.f32 %v5721_v10, %v554_v37  ;;  %v5796_v53 = vmax.f32 %v616_v40, 0.0  ;;  %v556_v57 = vld [vmem:[%s5713_s30 + $0xa8] sm:$0xff]  ;;  %v1588_v1 = vld [vmem:[%s7760_s3 + $0x60] sm:$0xff] }
  0x18   : > { %5548 = vmatpush3.msra.mxu1 %v1602_v5  ;;  %4818 = vmatpush3.msra.mxu0 %v1602_v5  ;;  %7869 = vst [vmem:[#allocation2_spill] sm:$0xff] %v5759_v31  ;;  %7870 = vst [vmem:[#allocation3_spill] sm:$0xff] %v5764_v35  ;;  %v5794_v52 = vmax.f32 %v599_v39, 0.0  ;;  %v617_v54 = vadd.f32 %v5735_v16, %v585_v41  ;;  %v570_v55 = vmul.f32 %v5721_v10, %v538_v42  ;;  %v1589_v58 = vld [vmem:[%s7760_s3 + $0x68] sm:$0xff]  ;;  %v541_v13 = vld [vmem:[%s5713_s30 + $0x30] sm:$0xff] }
  0x19   : > { %5533 = vmatprep.subr.mxu1 %v1601_v6  ;;  %4819 = vmatprep.subr.mxu0 %v1601_v6  ;;  %7871 = vst [vmem:[#allocation4_spill] sm:$0xff] %v5783_v46  ;;  %7872 = vst [vmem:[#allocation5_spill] sm:$0xff] %v5796_v53  ;;  %v5806_v59 = vmax.f32 %v600_v47, 0.0  ;;  %v601_v60 = vadd.f32 %v5735_v16, %v569_v48  ;;  %v618_v61 = vadd.f32 %v5735_v16, %v586_v49  ;;  %v540_v63 = vld [vmem:[%s5713_s30 + $0x28] sm:$0xff]  ;;  %v542_v22 = vld [vmem:[%s5713_s30 + $0x38] sm:$0xff] }
  0x1a   : > { %5549 = vmatpush3.msra.mxu1 %v1601_v6  ;;  %4820 = vmatpush3.msra.mxu0 %v1601_v6  ;;  %v587_v62 = vmul.f32 %v5721_v10, %v555_v50  ;;  %v2071_v0 = vld [vmem:[%s7760_s3 + $0x168] sm:$0xff]  ;;  %v5820_v2 = vmax.f32 %v617_v54, 0.0  ;;  %v602_v3 = vadd.f32 %v5735_v16, %v570_v55  ;;  %v571_v4 = vmul.f32 %v5721_v10, %v539_v56  ;;  %v557_v6 = vld [vmem:[%s5713_s30 + $0xb0] sm:$0xff]  ;;  %v2069_v23 = vld [vmem:[%s7760_s3 + $0x158] sm:$0xff] }
  0x1b   : > { %5534 = vmatprep.subr.mxu1 %v1600_v7  ;;  %4821 = vmatprep.subr.mxu0 %v1600_v7  ;;  %v588_v5 = vmul.f32 %v5721_v10, %v556_v57  ;;  %v589_v21 = vmul.f32 %v5721_v10, %v557_v6  ;;  %v1586_v24 = vld [vmem:[%s7760_s3 + $0x50] sm:$0xff]  ;;  %v573_v27 = vmul.f32 %v5721_v10, %v541_v13  ;;  %v559_v29 = vld [vmem:[%s5713_s30 + $0xc0] sm:$0xff]  ;;  %v560_v39 = vld [vmem:[%s5713_s30 + $0xc8] sm:$0xff] }
  0x1c   : > { %5550 = vmatpush3.msra.mxu1 %v1600_v7  ;;  %4822 = vmatpush3.msra.mxu0 %v1600_v7  ;;  %7873 = vst [vmem:[#allocation6_spill] sm:$0xff] %v5820_v2  ;;  %v2070_v7 = vld [vmem:[%s7760_s3 + $0x160] sm:$0xff]  ;;  %v619_v11 = vadd.f32 %v5735_v16, %v587_v62  ;;  %v5842_v18 = vmax.f32 %v602_v3, 0.0  ;;  %v603_v19 = vadd.f32 %v5735_v16, %v571_v4  ;;  %v2068_v32 = vld [vmem:[%s7760_s3 + $0x150] sm:$0xff]  ;;  %v1585_v40 = vld [vmem:[%s7760_s3 + $0x48] sm:$0xff] }
  0x1d   : > { %5535 = vmatprep.subr.mxu1 %v1599_v8  ;;  %4823 = vmatprep.subr.mxu0 %v1599_v8  ;;  %v621_v36 = vadd.f32 %v5735_v16, %v589_v21  ;;  %v574_v37 = vmul.f32 %v5721_v10, %v542_v22  ;;  %v605_v42 = vadd.f32 %v5735_v16, %v573_v27  ;;  %v544_v47 = vld [vmem:[%s5713_s30 + $0x48] sm:$0xff]  ;;  %v1584_v50 = vld [vmem:[%s7760_s3 + $0x40] sm:$0xff]  ;;  %v561_v57 = vld [vmem:[%s5713_s30 + $0xd0] sm:$0xff] }
  0x1e   : > { %5551 = vmatpush3.msra.mxu1 %v1599_v8  ;;  %4824 = vmatpush3.msra.mxu0 %v1599_v8  ;;  %v5830_v8 = vmax.f32 %v601_v60, 0.0  ;;  %v5868_v33 = vmax.f32 %v603_v19, 0.0  ;;  %v2067_v49 = vld [vmem:[%s7760_s3 + $0x148] sm:$0xff]  ;;  %v592_v56 = vmul.f32 %v5721_v10, %v560_v39  ;;  %v2065_v13 = vld [vmem:[%s7760_s3 + $0x138] sm:$0xff]  ;;  %v1582_v19 = vld [vmem:[%s7760_s3 + $0x30] sm:$0xff] }
  0x1f   : > { %5536 = vmatprep.subr.mxu1 %v1598_v9  ;;  %4825 = vmatprep.subr.mxu0 %v1598_v9  ;;  %v606_v54 = vadd.f32 %v5735_v16, %v574_v37  ;;  %v5905_v60 = vmax.f32 %v605_v42, 0.0 }
  0x20   : > { %5552 = vmatpush3.msra.mxu1 %v1598_v9  ;;  %4826 = vmatpush3.msra.mxu0 %v1598_v9  ;;  %v5832_v9 = vmax.f32 %v618_v61, 0.0 }
  0x21   : > { %5537 = vmatprep.subr.mxu1 %v1597_v12  ;;  %4827 = vmatprep.subr.mxu0 %v1597_v12  ;;  %7879 = vst [vmem:[#allocation12_spill] sm:$0xff] %v5905_v60  ;;  %v5918_v6 = vmax.f32 %v606_v54, 0.0 }
  0x22   : > { %5553 = vmatpush3.msra.mxu1 %v1597_v12  ;;  %4828 = vmatpush3.msra.mxu0 %v1597_v12  ;;  %7874 = vst [vmem:[#allocation7_spill] sm:$0xff] %v5832_v9  ;;  %v572_v12 = vmul.f32 %v5721_v10, %v540_v63  ;;  %v576_v63 = vmul.f32 %v5721_v10, %v544_v47  ;;  %v548_v47 = vld [vmem:[%s5713_s30 + $0x68] sm:$0xff] }
  0x23   : > { %5538 = vmatprep.subr.mxu1 %v1596_v14  ;;  %4829 = vmatprep.subr.mxu0 %v1596_v14  ;;  %7881 = vst [vmem:[#allocation14_spill] sm:$0xff] %v5918_v6 }
  0x24   : > { %5554 = vmatpush3.msra.mxu1 %v1596_v14  ;;  %4830 = vmatpush3.msra.mxu0 %v1596_v14  ;;  %v558_v14 = vld [vmem:[%s5713_s30 + $0xb8] sm:$0xff]  ;;  %v604_v26 = vadd.f32 %v5735_v16, %v572_v12  ;;  %v593_v12 = vmul.f32 %v5721_v10, %v561_v57  ;;  %v608_v21 = vadd.f32 %v5735_v16, %v576_v63  ;;  %v2063_v63 = vld [vmem:[%s7760_s3 + $0x128] sm:$0xff] }
  0x25   : > { %5539 = vmatprep.subr.mxu1 %v1595_v17  ;;  %4831 = vmatprep.subr.mxu0 %v1595_v17  ;;  %v590_v28 = vmul.f32 %v5721_v10, %v558_v14 }
  0x26   : > { %5555 = vmatpush3.msra.mxu1 %v1595_v17  ;;  %4832 = vmatpush3.msra.mxu0 %v1595_v17  ;;  %v1587_v17 = vld [vmem:[%s7760_s3 + $0x58] sm:$0xff]  ;;  %v5880_v41 = vmax.f32 %v604_v26, 0.0  ;;  %v564_v26 = vld [vmem:[%s5713_s30 + $0xe8] sm:$0xff]  ;;  %v625_v39 = vadd.f32 %v5735_v16, %v593_v12  ;;  %v5974_v54 = vmax.f32 %v608_v21, 0.0 }
  0x27   : > { %5540 = vmatprep.subr.mxu1 %v1594_v20  ;;  %4833 = vmatprep.subr.mxu0 %v1594_v20 }
  0x28   : > { %5556 = vmatpush3.msra.mxu1 %v1594_v20  ;;  %4834 = vmatpush3.msra.mxu0 %v1594_v20  ;;  %v620_v20 = vadd.f32 %v5735_v16, %v588_v5  ;;  %7877 = vst [vmem:[#allocation10_spill] sm:$0xff] %v5880_v41  ;;  %v1583_v5 = vld [vmem:[%s7760_s3 + $0x38] sm:$0xff]  ;;  %7891 = vst [vmem:[#allocation20_spill] sm:$0xff] %v5974_v54 }
  0x29   : > { %5541 = vmatprep.subr.mxu1 %v1593_v25  ;;  %4835 = vmatprep.subr.mxu0 %v1593_v25 }
  0x2a   : > { %5557 = vmatpush3.msra.mxu1 %v1593_v25  ;;  %4836 = vmatpush3.msra.mxu0 %v1593_v25  ;;  %v5856_v25 = vmax.f32 %v619_v11, 0.0  ;;  %v5870_v34 = vmax.f32 %v620_v20, 0.0  ;;  %v624_v11 = vadd.f32 %v5735_v16, %v592_v56  ;;  %v596_v56 = vmul.f32 %v5721_v10, %v564_v26 }
  0x2b   : > { %5542 = vmatprep.subr.mxu1 %v1592_v30  ;;  %4837 = vmatprep.subr.mxu0 %v1592_v30 }
  0x2c   : > { %5558 = vmatpush3.msra.mxu1 %v1592_v30  ;;  %4863 = vmatprep.mubr.f32.mxu1 %v5759_v31  ;;  %7875 = vst [vmem:[#allocation8_spill] sm:$0xff] %v5856_v25  ;;  %7876 = vst [vmem:[#allocation9_spill] sm:$0xff] %v5870_v34 }
  0x2d   : > { %4838 = vmatpush3.msra.mxu0 %v1592_v30  ;;  %4839 = vmatprep.mubr.f32.mxu0 %v7777_v43  ;;  %v5862_v30 = vshrl.u32 %v673_v15, 7  ;;  %v546_v15 = vld [vmem:[%s5713_s30 + $0x58] sm:$0xff] }
  0x2e   : > { %4864 = vmatmul.mubr.f32.vlgmr.msra.gmra.mxu1 %v5764_v35  ;;  %4887 = vmatprep.subr.mxu1 %v1591_v38 }
  0x2f   : > { %4840 = vmatmul.mubr.f32.vlgmr.msra.gmra.mxu0 %v7777_v43  ;;  %4888 = vmatpush3.msra.mxu1 %v1591_v38  ;;  %v543_v38 = vld [vmem:[%s5713_s30 + $0x40] sm:$0xff]  ;;  %v675_v48 = vadd.s32 8, %v5862_v30  ;;  %v714_v3 = vand.u32 15, %v5862_v30  ;;  %vm1503_vm2 = vcmp.lt.s32.totalorder %v5862_v30, 7  ;;  %vm1394_vm4 = vcmp.lt.s32.totalorder %v5862_v30, 1 }
  0x30   : > { %4967 = vmatprep.subr.mxu0 %v2073_v44  ;;  %4889 = vmatprep.subr.mxu1 %v1590_v45  ;;  %v575_v55 = vmul.f32 %v5721_v10, %v543_v38  ;;  %v5961_v38 = vmax.f32 %v624_v11, 0.0 }
  0x31   : > { %4968 = vmatpush3.msra.mxu0 %v2073_v44  ;;  %4866 = vmatprep.mubr.f32.mxu1 %v5783_v46  ;;  %v622_v44 = vadd.f32 %v5735_v16, %v590_v28  ;;  %v721_v4 = vand.u32 15, %v675_v48  ;;  %vm5941_vm0 = vcmp.ne.s32.totalorder %v714_v3, 0  ;;  %v5946_v28 = vrot.slane %v7777_v43, 7 }
  0x32   : > { %4890 = vmatpush3.msra.mxu1 %v1590_v45  ;;  %4969 = vmatprep.subr.mxu0 %v2072_v51  ;;  %v591_v45 = vmul.f32 %v5721_v10, %v559_v29  ;;  %v5949_v29 = vrot.slane %v7777_v43, 1  ;;  %7890 = vst [vmem:[#allocation19_spill] sm:$0xff] %v5961_v38  ;;  %v4332_v57 = vsel %vm5941_vm0, 1.0, %v7777_v43 }
  0x33   : > { %4842 = vmatprep.mubr.f32.mxu0 %v5794_v52  ;;  %4867 = vmatmul.mubr.f32.gmra.mxu1 %v5796_v53  ;;  %v5907_v61 = vmax.f32 %v622_v44, 0.0  ;;  %7885 = vst [vmem:[#allocation16_spill] sm:$0xff] %v5946_v28  ;;  %vm5951_vm1 = vcmp.ne.s32.totalorder %v721_v4, 15  ;;  %v580_v4 = vmul.f32 %v5721_v10, %v548_v47  ;;  %v6021_v21 = vmul.f32 %v4332_v57, %v5946_v28 }
  0x34   : > { %4891 = vmatprep.subr.mxu1 %v1589_v58  ;;  %4970 = vmatpush3.msra.mxu0 %v2072_v51  ;;  %v5895_v51 = vmax.f32 %v621_v36, 0.0  ;;  %v623_v62 = vadd.f32 %v5735_v16, %v591_v45  ;;  %7886 = vst [vmem:[#allocation17_spill] sm:$0xff] %v5949_v29  ;;  %v2064_v36 = vld [vmem:[%s7760_s3 + $0x130] sm:$0xff] }
  0x35   : > { %4843 = vmatmul.mubr.f32.gmra.mxu0 %v5806_v59  ;;  %4892 = vmatpush3.msra.mxu1 %v1589_v58  ;;  %v2066_v58 = vld [vmem:[%s7760_s3 + $0x140] sm:$0xff]  ;;  %7880 = vst [vmem:[#allocation13_spill] sm:$0xff] %v5907_v61  ;;  %v612_v27 = vadd.f32 %v5735_v16, %v580_v4  ;;  %v1363_v4 = vrot.slane %v5842_v18, 7 }
  0x36   : > { %4971 = vmatprep.subr.mxu0 %v2071_v0  ;;  %4893 = vmatprep.subr.mxu1 %v1588_v1  ;;  %7878 = vst [vmem:[#allocation11_spill] sm:$0xff] %v5895_v51  ;;  %v5934_v20 = vmax.f32 %v623_v62, 0.0  ;;  %v677_v62 = vadd.s32 24, %v5862_v30 }
  0x37   : > { %4972 = vmatpush3.msra.mxu0 %v2071_v0  ;;  %4869 = vmatprep.mubr.f32.mxu1 %v5820_v2  ;;  %v545_v0 = vld [vmem:[%s5713_s30 + $0x50] sm:$0xff] }
  0x38   : > { %4894 = vmatpush3.msra.mxu1 %v1588_v1  ;;  %4973 = vmatprep.subr.mxu0 %v2070_v7  ;;  %v562_v1 = vld [vmem:[%s5713_s30 + $0xd8] sm:$0xff]  ;;  %v577_v14 = vmul.f32 %v5721_v10, %v545_v0  ;;  %7882 = vst [vmem:[#allocation15_spill] sm:$0xff] %v5934_v20  ;;  %v1580_v0 = vld [vmem:[%s7760_s3 + $0x20] sm:$0xff] }
  0x39   : > { %4845 = vmatprep.mubr.f32.mxu0 %v5830_v8  ;;  %4870 = vmatmul.mubr.f32.gmra.mxu1 %v5832_v9  ;;  %v594_v22 = vmul.f32 %v5721_v10, %v562_v1  ;;  %v5994_v1 = vmax.f32 %v625_v39, 0.0 }
  0x3a   : > { %4895 = vmatprep.subr.mxu1 %v1587_v17  ;;  %4974 = vmatpush3.msra.mxu0 %v2070_v7  ;;  %v607_v7 = vadd.f32 %v5735_v16, %v575_v55  ;;  %v609_v42 = vadd.f32 %v5735_v16, %v577_v14 }
  0x3b   : > { %4846 = vmatmul.mubr.f32.gmra.mxu0 %v5842_v18  ;;  %4896 = vmatpush3.msra.mxu1 %v1587_v17  ;;  %v676_v17 = vadd.s32 16, %v5862_v30  ;;  %v626_v55 = vadd.f32 %v5735_v16, %v594_v22  ;;  %7892 = vst [vmem:[#allocation21_spill] sm:$0xff] %v5994_v1  ;;  %v1360_v22 = vrot.slane %v5794_v52, 7 }
  0x3c   : > { %4975 = vmatprep.subr.mxu0 %v2069_v23  ;;  %4897 = vmatprep.subr.mxu1 %v1586_v24  ;;  %v5959_v37 = vmax.f32 %v607_v7, 0.0  ;;  %v5999_v7 = vmax.f32 %v609_v42, 0.0 }
  0x3d   : > { %4976 = vmatpush3.msra.mxu0 %v2069_v23  ;;  %4872 = vmatprep.mubr.f32.mxu1 %v5856_v25  ;;  %v563_v23 = vld [vmem:[%s5713_s30 + $0xe0] sm:$0xff]  ;;  %v728_v48 = vand.u32 15, %v676_v17  ;;  %v6011_v14 = vmax.f32 %v626_v55, 0.0 }
  0x3e   : > { %4898 = vmatpush3.msra.mxu1 %v1586_v24  ;;  %4977 = vmatprep.subr.mxu0 %v2068_v32  ;;  %v547_v24 = vld [vmem:[%s5713_s30 + $0x60] sm:$0xff]  ;;  %7889 = vst [vmem:[#allocation18_spill] sm:$0xff] %v5959_v37  ;;  %v595_v44 = vmul.f32 %v5721_v10, %v563_v23  ;;  %7893 = vst [vmem:[#allocation22_spill] sm:$0xff] %v5999_v7  ;;  %v735_v23 = vand.u32 15, %v677_v62  ;;  %v680_v62 = vadd.s32 48, %v5862_v30 }
  0x3f   : > { %4848 = vmatprep.mubr.f32.mxu0 %v5868_v33  ;;  %4873 = vmatmul.mubr.f32.gmra.mxu1 %v5870_v34  ;;  %v579_v45 = vmul.f32 %v5721_v10, %v547_v24  ;;  %vm6003_vm3 = vcmp.ne.s32.totalorder %v728_v48, 0  ;;  %7896 = vst [vmem:[#allocation23_spill] sm:$0xff] %v6011_v14  ;;  %v1579_v24 = vld [vmem:[%s7760_s3 + $0x18] sm:$0xff]  ;;  %v1470_v48 = vrot.slane %v5806_v59, 1 }
  0x40   : > { %4899 = vmatprep.subr.mxu1 %v1585_v40  ;;  %4978 = vmatpush3.msra.mxu0 %v2068_v32  ;;  %v627_v11 = vadd.f32 %v5735_v16, %v595_v44  ;;  %v4333_v32 = vsel %vm6003_vm3, 1.0, %v7777_v43  ;;  %v1361_v44 = vrot.slane %v5806_v59, 7  ;;  %vm6057_vm5 = vcmp.ne.s32.totalorder %v735_v23, 15 }
  0x41   : > { %4849 = vmatmul.mubr.f32.gmra.mxu0 %v5880_v41  ;;  %4900 = vmatpush3.msra.mxu1 %v1585_v40  ;;  %v578_v40 = vmul.f32 %v5721_v10, %v546_v15  ;;  %v611_v12 = vadd.f32 %v5735_v16, %v579_v45  ;;  %v2062_v10 = vld [vmem:[%s7760_s3 + $0x120] sm:$0xff]  ;;  %v628_v15 = vadd.f32 %v5735_v16, %v596_v56  ;;  %v1578_v45 = vld [vmem:[%s7760_s3 + $0x10] sm:$0xff] }
  0x42   : > { %4979 = vmatprep.subr.mxu0 %v2067_v49  ;;  %4901 = vmatprep.subr.mxu1 %v1584_v50  ;;  %v6035_v39 = vmax.f32 %v627_v11, 0.0  ;;  %v1428_v56 = vsel %vm1394_vm4, %v5946_v28, %v1360_v22  ;;  %v6077_v11 = vsel %vm1394_vm4, %v1360_v22, %v1361_v44 }
  0x43   : > { %4980 = vmatpush3.msra.mxu0 %v2067_v49  ;;  %4875 = vmatprep.mubr.f32.mxu1 %v5895_v51  ;;  %v1469_v49 = vrot.slane %v5794_v52, 1  ;;  %v610_v3 = vadd.f32 %v5735_v16, %v578_v40  ;;  %v6037_v40 = vmax.f32 %v611_v12, 0.0  ;;  %v2061_v16 = vld [vmem:[%s7760_s3 + $0x118] sm:$0xff]  ;;  %v6050_v47 = vmax.f32 %v628_v15, 0.0  ;;  %v1577_v15 = vld [vmem:[%s7760_s3 + $0x8] sm:$0xff] }
  0x44   : > { %4902 = vmatpush3.msra.mxu1 %v1584_v50  ;;  %4981 = vmatprep.subr.mxu0 %v2066_v58  ;;  %v1581_v50 = vld [vmem:[%s7760_s3 + $0x28] sm:$0xff]  ;;  %7898 = vst [vmem:[#allocation25_spill] sm:$0xff] %v6035_v39  ;;  %v1472_v12 = vrot.slane %v5842_v18, 1 }
  0x45   : > { %4851 = vmatprep.mubr.f32.mxu0 %v5905_v60  ;;  %4876 = vmatmul.mubr.f32.gmra.mxu1 %v5907_v61  ;;  %v1537_v17 = vsel %vm1503_vm2, %v5949_v29, %v1469_v49  ;;  %v6029_v26 = vmax.f32 %v610_v3, 0.0  ;;  %7899 = vst [vmem:[#allocation26_spill] sm:$0xff] %v6037_v40  ;;  %7900 = vst [vmem:[#allocation27_spill] sm:$0xff] %v6050_v47 }
  0x46   : > { %4903 = vmatprep.subr.mxu1 %v1583_v5  ;;  %4982 = vmatpush3.msra.mxu0 %v2066_v58  ;;  %v4350_v58 = vsel %vm5951_vm1, 1.0, %v7777_v43 }
  0x47   : > { %4852 = vmatmul.mubr.f32.gmra.mxu0 %v5918_v6  ;;  %4904 = vmatpush3.msra.mxu1 %v1583_v5  ;;  %v678_v5 = vadd.s32 32, %v5862_v30  ;;  %7897 = vst [vmem:[#allocation24_spill] sm:$0xff] %v6029_v26  ;;  %v6039_v42 = vmul.f32 %v4350_v58, %v1537_v17  ;;  %v1362_v58 = vrot.slane %v5830_v8, 7  ;;  %v6086_v17 = vmul.f32 %v4333_v32, %v1428_v56 }
  0x48   : > { %4983 = vmatprep.subr.mxu0 %v2065_v13  ;;  %4905 = vmatprep.subr.mxu1 %v1582_v19  ;;  %v756_v32 = vand.u32 15, %v680_v62  ;;  %v1365_v56 = vrot.slane %v5880_v41, 7 }
  0x49   : > { %4984 = vmatpush3.msra.mxu0 %v2065_v13  ;;  %4878 = vmatprep.mubr.f32.mxu1 %v5934_v20  ;;  %v7766_v13 = vrot.slane %v5868_v33, 1 }
  0x4a   : > { %4906 = vmatpush3.msra.mxu1 %v1582_v19  ;;  %4985 = vmatprep.subr.mxu0 %v2064_v36  ;;  %v679_v19 = vadd.s32 40, %v5862_v30  ;;  %vm6142_vm8 = vcmp.ne.s32.totalorder %v756_v32, 0 }
  0x4b   : > { %4854 = vmatprep.mubr.f32.mxu0 %v5959_v37  ;;  %4879 = vmatmul.mubr.f32.gmra.mxu1 %v5961_v38  ;;  %v1533_v3 = vsel %vm1503_vm2, %v1472_v12, %v7766_v13  ;;  %v1474_v13 = vrot.slane %v5880_v41, 1 }
  0x4c   : > { %4907 = vmatprep.subr.mxu1 %v1581_v50  ;;  %4986 = vmatpush3.msra.mxu0 %v2064_v36  ;;  %v742_v36 = vand.u32 15, %v678_v5  ;;  %v749_v55 = vand.u32 15, %v679_v19  ;;  %v681_v5 = vadd.s32 56, %v5862_v30  ;;  %v4351_v19 = vsel %vm6057_vm5, 1.0, %v7777_v43 }
  0x4d   : > { %4855 = vmatmul.mubr.f32.gmra.mxu0 %v5974_v54  ;;  %4908 = vmatpush3.msra.mxu1 %v1581_v50  ;;  %v1471_v50 = vrot.slane %v5830_v8, 1 }
  0x4e   : > { %4987 = vmatprep.subr.mxu0 %v2063_v63  ;;  %4909 = vmatprep.subr.mxu1 %v1580_v0  ;;  %vm6069_vm6 = vcmp.ne.s32.totalorder %v742_v36, 0  ;;  %vm6093_vm7 = vcmp.ne.s32.totalorder %v749_v55, 15  ;;  %v1364_v36 = vrot.slane %v5868_v33, 7  ;;  %v6119_v55 = vsel %vm1394_vm4, %v1362_v58, %v1363_v4 }
  0x4f   : > { %4988 = vmatpush3.msra.mxu0 %v2063_v63  ;;  %4881 = vmatprep.mubr.f32.mxu1 %v5994_v1  ;;  %v2060_v63 = vld [vmem:[%s7760_s3 + $0x110] sm:$0xff]  ;;  %v1535_v22 = vsel %vm1503_vm2, %v1470_v48, %v1471_v50  ;;  %v763_v57 = vand.u32 15, %v681_v5  ;;  %v4352_v62 = vsel %vm6093_vm7, 1.0, %v7777_v43  ;;  %v6140_v23 = vsel %vm1503_vm2, %v1471_v50, %v1472_v12  ;;  %v2346_v50 = vld [vmem:[%s7760_s3 + $0x1f8] sm:$0xff] }
  0x50   : > { %4910 = vmatpush3.msra.mxu1 %v1580_v0  ;;  %4989 = vmatprep.subr.mxu0 %v2062_v10  ;;  %v6067_v0 = vmax.f32 %v612_v27, 0.0  ;;  %v1426_v27 = vsel %vm1394_vm4, %v1361_v44, %v1362_v58  ;;  %v6115_v44 = vsel %vm1503_vm2, %v1469_v49, %v1470_v48  ;;  %v683_v48 = vadd.s32 72, %v5862_v30  ;;  %v2058_v58 = vld [vmem:[%s7760_s3 + $0x100] sm:$0xff]  ;;  %7910 = vst [vmem:[#allocation31_spill] sm:$0xff] %v6140_v23 }
  0x51   : > { %4857 = vmatprep.mubr.f32.mxu0 %v5999_v7  ;;  %4882 = vmatmul.mubr.f32.gmra.mxu1 %v6011_v14  ;;  %7908 = vst [vmem:[#allocation29_spill] sm:$0xff] %v6115_v44  ;;  %v6153_v12 = vmul.f32 %v4352_v62, %v1533_v3  ;;  %vm6159_vm9 = vcmp.ne.s32.totalorder %v763_v57, 15  ;;  %v1367_v57 = vrot.slane %v5918_v6, 7  ;;  %v1476_v62 = vrot.slane %v5918_v6, 1 }
  0x52   : > { %4911 = vmatprep.subr.mxu1 %v1579_v24  ;;  %4990 = vmatpush3.msra.mxu0 %v2062_v10  ;;  %7903 = vst [vmem:[#allocation28_spill] sm:$0xff] %v6067_v0  ;;  %v682_v10 = vadd.s32 64, %v5862_v30  ;;  %v777_v32 = vand.u32 15, %v683_v48  ;;  %v686_v3 = vadd.s32 96, %v5862_v30  ;;  %v1368_v6 = vrot.slane %v5959_v37, 7 }
  0x53   : > { %4858 = vmatmul.mubr.f32.gmra.mxu0 %v6029_v26  ;;  %4912 = vmatpush3.msra.mxu1 %v1579_v24  ;;  %v4334_v24 = vsel %vm6069_vm6, 1.0, %v7777_v43  ;;  %7913 = vst [vmem:[#allocation32_spill] sm:$0xff] %v6153_v12 }
  0x54   : > { %4991 = vmatprep.subr.mxu0 %v2061_v16  ;;  %4913 = vmatprep.subr.mxu1 %v1578_v45  ;;  %v770_v49 = vand.u32 15, %v682_v10  ;;  %v6136_v5 = vmul.f32 %v4334_v24, %v1426_v27  ;;  %vm6208_vm11 = vcmp.ne.s32.totalorder %v777_v32, 15  ;;  %v798_v32 = vand.u32 15, %v686_v3 }
  0x55   : > { %4992 = vmatpush3.msra.mxu0 %v2061_v16  ;;  %4884 = vmatprep.mubr.f32.mxu1 %v6035_v39  ;;  %v2059_v16 = vld [vmem:[%s7760_s3 + $0x108] sm:$0xff] }
  0x56   : > { %4914 = vmatpush3.msra.mxu1 %v1578_v45  ;;  %4993 = vmatprep.subr.mxu0 %v2060_v63  ;;  %v1576_v45 = vld [vmem:[%s7760_s3] sm:$0xff]  ;;  %vm6165_vm10 = vcmp.ne.s32.totalorder %v770_v49, 0  ;;  %v7918_v49 = vrot.slane %v5868_v33, 1  ;;  %vm6258_vm14 = vcmp.ne.s32.totalorder %v798_v32, 0 }
  0x57   : > { %4860 = vmatprep.mubr.f32.mxu0 %v6037_v40  ;;  %4885 = vmatmul.mubr.f32.gmra.mxu1 %v6050_v47 }
  0x58   : > { %4915 = vmatprep.subr.mxu1 %v1577_v15  ;;  %4994 = vmatpush3.msra.mxu0 %v2060_v63  ;;  %v6134_v63 = vmul.f32 %v4351_v19, %v1535_v22  ;;  %v1475_v19 = vrot.slane %v5905_v60, 1  ;;  %v6157_v22 = vsel %vm1394_vm4, %v1364_v36, %v1365_v56  ;;  %v6186_v48 = vsel %vm1503_vm2, %v7918_v49, %v1474_v13 }
  0x59   : > { %4861 = vmatmul.mubr.f32.gmra.mxu0 %v6067_v0  ;;  %4916 = vmatpush3.msra.mxu1 %v1577_v15  ;;  %v1424_v15 = vsel %vm1394_vm4, %v1363_v4, %v1364_v36  ;;  %v1366_v4 = vrot.slane %v5905_v60, 7  ;;  %v2619_v36 = vld [vmem:[%s7760_s3 + $0x278] sm:$0xff]  ;;  %7919 = vst [vmem:[#allocation33_spill] sm:$0xff] %v6186_v48  ;;  %v4336_v49 = vsel %vm6165_vm10, 1.0, %v7777_v43 }
  0x5a   : > { %7909 = vst [vmem:[#allocation30_spill] sm:$0xff] %v6134_v63  ;;  %4995 = vmatprep.subr.mxu0 %v2059_v16  ;;  %4917 = vmatprep.subr.mxu1 %v1576_v45  ;;  %v1531_v10 = vsel %vm1503_vm2, %v1474_v13, %v1475_v19  ;;  %v687_v13 = vadd.s32 104, %v5862_v30 }
  0x5b   : > { %4996 = vmatpush3.msra.mxu0 %v2059_v16  ;;  %4918 = vmatpush3.msra.mxu1 %v1576_v45  ;;  %v684_v16 = vadd.s32 80, %v5862_v30  ;;  %v685_v45 = vadd.s32 88, %v5862_v30  ;;  %v1422_v24 = vsel %vm1394_vm4, %v1365_v56, %v1366_v4  ;;  %v2618_v56 = vld [vmem:[%s7760_s3 + $0x270] sm:$0xff] }
  0x5c   : > { %4919 = vmatprep.mubr.f32.mxu1 %v6021_v21  ;;  %4997 = vmatprep.subr.mxu0 %v2058_v58  ;;  %v4335_v21 = vsel %vm6142_vm8, 1.0, %v7777_v43 }
  0x5d   : > { %4920 = vmatmul.mubr.f32.vlgmr.msra.gmra.mxu1 %v5946_v28  ;;  %4998 = vmatpush3.msra.mxu0 %v2058_v58  ;;  %v4353_v58 = vsel %vm6159_vm9, 1.0, %v7777_v43  ;;  %v1477_v28 = vrot.slane %v5959_v37, 1  ;;  %v784_v60 = vand.u32 15, %v684_v16  ;;  %v791_v41 = vand.u32 15, %v685_v45 }
  0x5e   : > { %4999 = vmatprep.mubr.f32.mxu0 %v5949_v29  ;;  %5047 = vmatprep.subr.mxu1 %v2346_v50  ;;  %v2345_v29 = vld [vmem:[%s7760_s3 + $0x1f0] sm:$0xff]  ;;  %v6216_v27 = vmul.f32 %v4353_v58, %v1531_v10  ;;  %v6220_v43 = vsel %vm1394_vm4, %v1366_v4, %v1367_v57  ;;  %v6227_v16 = vmul.f32 %v4336_v49, %v1422_v24  ;;  %v7924_v4 = vmov 0.0  }
  0x5f   : > { %5000 = vmatmul.mubr.f32.vlgmr.msra.gmra.mxu0 %v6039_v42  ;;  %5048 = vmatpush3.msra.mxu1 %v2346_v50  ;;  %v6206_v42 = vmul.f32 %v4335_v21, %v1424_v15  ;;  %v6224_v15 = vsel %vm1503_vm2, %v1475_v19, %v1476_v62  ;;  %v1529_v45 = vsel %vm1503_vm2, %v1476_v62, %v1477_v28  ;;  %v1478_v21 = vrot.slane %v5974_v54, 1  ;;  %v2344_v19 = vld [vmem:[%s7760_s3 + $0x1e8] sm:$0xff] }
  0x60   : > { %5127 = vmatprep.subr.mxu0 %v2619_v36  ;;  %4922 = vmatprep.mubr.f32.mxu1 %v6086_v17  ;;  %7922 = vst [vmem:[#allocation34_spill] sm:$0xff] %v6216_v27  ;;  %7923 = vst [vmem:[#allocation35_spill] sm:$0xff] %v6224_v15  ;;  %v4354_v3 = vsel %vm6208_vm11, 1.0, %v7924_v4  ;;  %v1420_v58 = vsel %vm1394_vm4, %v1367_v57, %v1368_v6  ;;  %v1479_v62 = vrot.slane %v5999_v7, 1  ;;  %v805_v10 = vand.u32 15, %v687_v13  ;;  %v2617_v57 = vld [vmem:[%s7760_s3 + $0x268] sm:$0xff] }
  0x61   : > { %5128 = vmatpush3.msra.mxu0 %v2619_v36  ;;  %4923 = vmatmul.mubr.f32.gmra.mxu1 %v6077_v11  ;;  %v1369_v36 = vrot.slane %v5974_v54, 7  ;;  %vm6244_vm12 = vcmp.ne.s32.totalorder %v784_v60, 0  ;;  %vm6248_vm13 = vcmp.ne.s32.totalorder %v791_v41, 15  ;;  %v1370_v24 = vrot.slane %v5999_v7, 7 }
  0x62   : > { %5002 = vmatprep.mubr.f32.mxu0 %v6115_v44  ;;  %5049 = vmatprep.subr.mxu1 %v2345_v29  ;;  %v688_v50 = vadd.s32 112, %v5862_v30  ;;  %v1480_v41 = vrot.slane %v6029_v26, 1  ;;  %v1481_v13 = vrot.slane %v6037_v40, 1  ;;  %v6274_v32 = vsel %vm1503_vm2, %v1477_v28, %v1478_v21 }
  0x63   : > { %5003 = vmatmul.mubr.f32.gmra.mxu0 %v6134_v63  ;;  %5050 = vmatpush3.msra.mxu1 %v2345_v29  ;;  %v689_v63 = vadd.s32 120, %v5862_v30  ;;  %v6270_v44 = vsel %vm1394_vm4, %v1368_v6, %v1369_v36  ;;  %7932 = vst [vmem:[#allocation37_spill] sm:$0xff] %v6274_v32  ;;  %v690_v7 = vadd.s32 128, %v5862_v30  ;;  %v1527_v6 = vsel %vm1503_vm2, %v1478_v21, %v1479_v62 }
  0x64   : > { %5129 = vmatprep.subr.mxu0 %v2618_v56  ;;  %4925 = vmatprep.mubr.f32.mxu1 %v6136_v5  ;;  %vm6287_vm15 = vcmp.ne.s32.totalorder %v805_v10, 15  ;;  %v4338_v49 = vsel %vm6258_vm14, 1.0, %v7924_v4  ;;  %v1418_v21 = vsel %vm1394_vm4, %v1369_v36, %v1370_v24  ;;  %v2616_v10 = vld [vmem:[%s7760_s3 + $0x260] sm:$0xff]  ;;  %v1372_v29 = vrot.slane %v6037_v40, 7  ;;  %v2342_v40 = vld [vmem:[%s7760_s3 + $0x1d8] sm:$0xff] }
  0x65   : > { %5130 = vmatpush3.msra.mxu0 %v2618_v56  ;;  %4926 = vmatmul.mubr.f32.gmra.mxu1 %v6119_v55  ;;  %v6266_v56 = vmul.f32 %v4354_v3, %v1529_v45  ;;  %v4337_v45 = vsel %vm6244_vm12, 1.0, %v7924_v4  ;;  %v1371_v3 = vrot.slane %v6029_v26, 7  ;;  %v1525_v26 = vsel %vm1503_vm2, %v1480_v41, %v1481_v13 }
  0x66   : > { %5005 = vmatprep.mubr.f32.mxu0 %v6140_v23  ;;  %5051 = vmatprep.subr.mxu1 %v2344_v19  ;;  %v2343_v23 = vld [vmem:[%s7760_s3 + $0x1e0] sm:$0xff]  ;;  %v1373_v54 = vrot.slane %v6067_v0, 7  ;;  %v819_v60 = vand.u32 15, %v689_v63  ;;  %v4356_v36 = vsel %vm6287_vm15, 1.0, %v7924_v4  ;;  %v691_v37 = vadd.s32 136, %v5862_v30 }
  0x67   : > { %7931 = vst [vmem:[#allocation36_spill] sm:$0xff] %v6266_v56  ;;  %5006 = vmatmul.mubr.f32.gmra.mxu0 %v6153_v12  ;;  %5052 = vmatpush3.msra.mxu1 %v2344_v19  ;;  %v4355_v19 = vsel %vm6248_vm13, 1.0, %v7924_v4  ;;  %v812_v12 = vand.u32 15, %v688_v50  ;;  %v1482_v50 = vrot.slane %v6067_v0, 1  ;;  %v6318_v63 = vmul.f32 %v4337_v45, %v1420_v58 }
  0x68   : > { %5131 = vmatprep.subr.mxu0 %v2617_v57  ;;  %4928 = vmatprep.mubr.f32.mxu1 %v6206_v42  ;;  %v6324_v28 = vsel %vm1394_vm4, %v1370_v24, %v1371_v3  ;;  %v1483_v0 = vrot.slane %v5759_v31, 1  ;;  %v692_v45 = vadd.s32 144, %v5862_v30  ;;  %v2615_v24 = vld [vmem:[%s7760_s3 + $0x258] sm:$0xff]  ;;  %vm6347_vm1 = vcmp.ne.s32.totalorder %v819_v60, 15 }
  0x69   : > { %5132 = vmatpush3.msra.mxu0 %v2617_v57  ;;  %4929 = vmatmul.mubr.f32.gmra.mxu1 %v6157_v22  ;;  %v826_v57 = vand.u32 15, %v690_v7  ;;  %v6328_v7 = vmul.f32 %v4338_v49, %v1418_v21  ;;  %vm6334_vm0 = vcmp.ne.s32.totalorder %v812_v12, 0  ;;  %v1374_v12 = vrot.slane %v5759_v31, 7  ;;  %v2341_v21 = vld [vmem:[%s7760_s3 + $0x1d0] sm:$0xff] }
  0x6a   : > { %5008 = vmatprep.mubr.f32.mxu0 %v6186_v48  ;;  %5053 = vmatprep.subr.mxu1 %v2343_v23  ;;  %v6320_v48 = vmul.f32 %v4355_v19, %v1527_v6  ;;  %v6343_v6 = vmul.f32 %v4356_v36, %v1525_v26  ;;  %v1416_v19 = vsel %vm1394_vm4, %v1371_v3, %v1372_v29  ;;  %v833_v3 = vand.u32 15, %v691_v37 }
  0x6b   : > { %5009 = vmatmul.mubr.f32.gmra.mxu0 %v6216_v27  ;;  %5054 = vmatpush3.msra.mxu1 %v2343_v23  ;;  %v6332_v23 = vsel %vm1503_vm2, %v1479_v62, %v1480_v41  ;;  %v6355_v41 = vsel %vm1394_vm4, %v1372_v29, %v1373_v54  ;;  %v6359_v26 = vsel %vm1503_vm2, %v1481_v13, %v1482_v50  ;;  %vm6361_vm3 = vcmp.ne.s32.totalorder %v826_v57, 0 }
  0x6c   : > { %7935 = vst [vmem:[#allocation38_spill] sm:$0xff] %v6320_v48  ;;  %5133 = vmatprep.subr.mxu0 %v2616_v10  ;;  %4931 = vmatprep.mubr.f32.mxu1 %v6227_v16  ;;  %7936 = vst [vmem:[#allocation39_spill] sm:$0xff] %v6332_v23  ;;  %v1523_v13 = vsel %vm1503_vm2, %v1482_v50, %v1483_v0  ;;  %v1375_v29 = vrot.slane %v5764_v35, 7  ;;  %v1484_v60 = vrot.slane %v5764_v35, 1  ;;  %v4357_v37 = vsel %vm6347_vm1, 1.0, %v7924_v4  ;;  %v2614_v50 = vld [vmem:[%s7760_s3 + $0x250] sm:$0xff] }
  0x6d   : > { %5134 = vmatpush3.msra.mxu0 %v2616_v10  ;;  %4932 = vmatmul.mubr.f32.gmra.mxu1 %v6220_v43  ;;  %7939 = vst [vmem:[#allocation40_spill] sm:$0xff] %v6343_v6  ;;  %7942 = vst [vmem:[#allocation41_spill] sm:$0xff] %v6359_v26  ;;  %v4339_v10 = vsel %vm6334_vm0, 1.0, %v7924_v4  ;;  %v693_v36 = vadd.s32 152, %v5862_v30  ;;  %v694_v57 = vadd.s32 160, %v5862_v30  ;;  %v4340_v58 = vsel %vm6361_vm3, 1.0, %v7924_v4 }
  0x6e   : > { %5011 = vmatprep.mubr.f32.mxu0 %v6224_v15  ;;  %5055 = vmatprep.subr.mxu1 %v2342_v40  ;;  %v1414_v62 = vsel %vm1394_vm4, %v1373_v54, %v1374_v12  ;;  %vm6396_vm5 = vcmp.ne.s32.totalorder %v833_v3, 15  ;;  %v1376_v27 = vrot.slane %v5783_v46, 7  ;;  %v1377_v49 = vrot.slane %v5796_v53, 7  ;;  %v2340_v54 = vld [vmem:[%s7760_s3 + $0x1c8] sm:$0xff] }
  0x6f   : > { %5012 = vmatmul.mubr.f32.gmra.mxu0 %v6266_v56  ;;  %5056 = vmatpush3.msra.mxu1 %v2342_v40  ;;  %v840_v40 = vand.u32 15, %v692_v45  ;;  %v1485_v45 = vrot.slane %v5783_v46, 1  ;;  %v695_v56 = vadd.s32 168, %v5862_v30  ;;  %v6406_v35 = vmul.f32 %v4357_v37, %v1523_v13 }
  0x70   : > { %5135 = vmatprep.subr.mxu0 %v2615_v24  ;;  %4934 = vmatprep.mubr.f32.mxu1 %v6318_v63  ;;  %v6414_v3 = vsel %vm1503_vm2, %v1483_v0, %v1484_v60  ;;  %v847_v13 = vand.u32 15, %v693_v36  ;;  %v854_v37 = vand.u32 15, %v694_v57  ;;  %v2613_v0 = vld [vmem:[%s7760_s3 + $0x248] sm:$0xff]  ;;  %v1412_v36 = vsel %vm1394_vm4, %v1375_v29, %v1376_v27 }
  0x71   : > { %5136 = vmatpush3.msra.mxu0 %v2615_v24  ;;  %4935 = vmatmul.mubr.f32.gmra.mxu1 %v6270_v44  ;;  %v6394_v24 = vmul.f32 %v4339_v10, %v1416_v19  ;;  %7947 = vst [vmem:[#allocation42_spill] sm:$0xff] %v6406_v35  ;;  %v6410_v19 = vsel %vm1394_vm4, %v1374_v12, %v1375_v29  ;;  %7948 = vst [vmem:[#allocation43_spill] sm:$0xff] %v6414_v3  ;;  %v1486_v10 = vrot.slane %v5796_v53, 1 }
  0x72   : > { %5014 = vmatprep.mubr.f32.mxu0 %v6274_v32  ;;  %5057 = vmatprep.subr.mxu1 %v2341_v21  ;;  %vm6420_vm6 = vcmp.ne.s32.totalorder %v840_v40, 0  ;;  %v4358_v12 = vsel %vm6396_vm5, 1.0, %v7924_v4  ;;  %v861_v40 = vand.u32 15, %v695_v56  ;;  %v6439_v57 = vsel %vm1394_vm4, %v1376_v27, %v1377_v49  ;;  %v2339_v56 = vld [vmem:[%s7760_s3 + $0x1c0] sm:$0xff] }
  0x73   : > { %5015 = vmatmul.mubr.f32.gmra.mxu0 %v6320_v48  ;;  %5058 = vmatpush3.msra.mxu1 %v2341_v21  ;;  %v6418_v21 = vmul.f32 %v4340_v58, %v1414_v62  ;;  %v1521_v58 = vsel %vm1503_vm2, %v1484_v60, %v1485_v45  ;;  %v696_v62 = vadd.s32 176, %v5862_v30  ;;  %v1378_v15 = vrot.slane %v5820_v2, 7 }
  0x74   : > { %5137 = vmatprep.subr.mxu0 %v2614_v50  ;;  %4937 = vmatprep.mubr.f32.mxu1 %v6328_v7  ;;  %v4341_v60 = vsel %vm6420_vm6, 1.0, %v7924_v4  ;;  %v6452_v29 = vsel %vm1503_vm2, %v1485_v45, %v1486_v10  ;;  %v1488_v27 = vrot.slane %v5832_v9, 1  ;;  %vm6459_vm7 = vcmp.ne.s32.totalorder %v847_v13, 15 }
  0x75   : > { %5138 = vmatpush3.msra.mxu0 %v2614_v50  ;;  %4938 = vmatmul.mubr.f32.gmra.mxu1 %v6324_v28  ;;  %v1487_v50 = vrot.slane %v5820_v2, 1  ;;  %7951 = vst [vmem:[#allocation44_spill] sm:$0xff] %v6452_v29  ;;  %vm6463_vm8 = vcmp.ne.s32.totalorder %v854_v37, 0  ;;  %v697_v45 = vadd.s32 184, %v5862_v30  ;;  %vm6473_vm9 = vcmp.ne.s32.totalorder %v861_v40, 15  ;;  %v2338_v40 = vld [vmem:[%s7760_s3 + $0x1b8] sm:$0xff] }
  0x76   : > { %5017 = vmatprep.mubr.f32.mxu0 %v6332_v23  ;;  %5059 = vmatprep.subr.mxu1 %v2340_v54  ;;  %v2612_v23 = vld [vmem:[%s7760_s3 + $0x240] sm:$0xff]  ;;  %v698_v37 = vadd.s32 192, %v5862_v30  ;;  %v6479_v32 = vmul.f32 %v4341_v60, %v1412_v36  ;;  %v1410_v2 = vsel %vm1394_vm4, %v1377_v49, %v1378_v15  ;;  %v4342_v36 = vsel %vm6463_vm8, 1.0, %v7924_v4 }
  0x77   : > { %5018 = vmatmul.mubr.f32.gmra.mxu0 %v6343_v6  ;;  %5060 = vmatpush3.msra.mxu1 %v2340_v54  ;;  %v6457_v54 = vmul.f32 %v4358_v12, %v1521_v58  ;;  %v1379_v12 = vrot.slane %v5832_v9, 7  ;;  %v868_v58 = vand.u32 15, %v696_v62  ;;  %v4359_v62 = vsel %vm6459_vm7, 1.0, %v7924_v4 }
  0x78   : > { %5139 = vmatprep.subr.mxu0 %v2613_v0  ;;  %4940 = vmatprep.mubr.f32.mxu1 %v6394_v24  ;;  %v1380_v60 = vrot.slane %v5856_v25, 7  ;;  %v1381_v6 = vrot.slane %v5870_v34, 7  ;;  %v699_v48 = vadd.s32 200, %v5862_v30  ;;  %v882_v13 = vand.u32 15, %v698_v37 }
  0x79   : > { %7952 = vst [vmem:[#allocation45_spill] sm:$0xff] %v6457_v54  ;;  %5140 = vmatpush3.msra.mxu0 %v2613_v0  ;;  %4941 = vmatmul.mubr.f32.gmra.mxu1 %v6355_v41  ;;  %v1519_v0 = vsel %vm1503_vm2, %v1486_v10, %v1487_v50  ;;  %v7959_v10 = vrot.slane %v5856_v25, 1  ;;  %vm6514_vm10 = vcmp.ne.s32.totalorder %v868_v58, 0  ;;  %v6524_v53 = vsel %vm1503_vm2, %v1487_v50, %v1488_v27  ;;  %v2337_v58 = vld [vmem:[%s7760_s3 + $0x1b0] sm:$0xff] }
  0x7a   : > { %5020 = vmatprep.mubr.f32.mxu0 %v6359_v26  ;;  %5061 = vmatprep.subr.mxu1 %v2339_v56  ;;  %v6512_v26 = vsel %vm1394_vm4, %v1378_v15, %v1379_v12  ;;  %7963 = vst [vmem:[#allocation47_spill] sm:$0xff] %v6524_v53  ;;  %v1490_v46 = vrot.slane %v5870_v34, 1  ;;  %v7833_v15 = vrot.slane %v5895_v51, 1  ;;  %v6532_v37 = vmul.f32 %v4342_v36, %v1410_v2  ;;  %v6601_v2 = vld [vmem:[%s7761_s4] ss:$0 sm:$0xff] }
  0x7b   : > { %5021 = vmatmul.mubr.f32.gmra.mxu0 %v6406_v35  ;;  %5062 = vmatpush3.msra.mxu1 %v2339_v56  ;;  %v1517_v49 = vsel %vm1503_vm2, %v1488_v27, %v7959_v10  ;;  %v4360_v56 = vsel %vm6473_vm9, 1.0, %v7924_v4  ;;  %v875_v35 = vand.u32 15, %v697_v45  ;;  %v2611_v10 = vld [vmem:[%s7760_s3 + $0x238] sm:$0xff]  ;;  %v700_v45 = vadd.s32 208, %v5862_v30  ;;  %v2336_v27 = vld [vmem:[%s7760_s3 + $0x1a8] sm:$0xff] }
  0x7c   : > { %5141 = vmatprep.subr.mxu0 %v2612_v23  ;;  %4943 = vmatprep.mubr.f32.mxu1 %v6418_v21  ;;  %v1408_v50 = vsel %vm1394_vm4, %v1379_v12, %v1380_v60  ;;  %v2610_v12 = vld [vmem:[%s7760_s3 + $0x230] sm:$0xff]  ;;  %vm6555_vm12 = vcmp.ne.s32.totalorder %v882_v13, 0  ;;  %v1383_v13 = vrot.slane %v5907_v61, 7 }
  0x7d   : > { %5142 = vmatpush3.msra.mxu0 %v2612_v23  ;;  %4944 = vmatmul.mubr.f32.gmra.mxu1 %v6410_v19  ;;  %v6520_v23 = vmul.f32 %v4359_v62, %v1519_v0  ;;  %v4343_v0 = vsel %vm6514_vm10, 1.0, %v7924_v4  ;;  %vm6547_vm11 = vcmp.ne.s32.totalorder %v875_v35, 15  ;;  %v889_v62 = vand.u32 15, %v699_v48 }
  0x7e   : > { %5023 = vmatprep.mubr.f32.mxu0 %v6414_v3  ;;  %5063 = vmatprep.subr.mxu1 %v2338_v40  ;;  %v6534_v3 = vmul.f32 %v4360_v56, %v1517_v49  ;;  %v896_v9 = vand.u32 15, %v700_v45  ;;  %v701_v49 = vadd.s32 216, %v5862_v30  ;;  %v702_v35 = vadd.s32 224, %v5862_v30 }
  0x7f   : > { %7962 = vst [vmem:[#allocation46_spill] sm:$0xff] %v6520_v23  ;;  %5024 = vmatmul.mubr.f32.gmra.mxu0 %v6457_v54  ;;  %5064 = vmatpush3.msra.mxu1 %v2338_v40  ;;  %v6545_v40 = vsel %vm1394_vm4, %v1380_v60, %v1381_v6  ;;  %v565_v60 = vld [vmem:[%s5713_s30 + $0xf0] sm:$0xff]  ;;  %v7969_v56 = vrot.slane %v5856_v25, 1  ;;  %v1492_v45 = vrot.slane %v5907_v61, 1  ;;  %v7971_v54 = vrot.slane %v5895_v51, 7 }
  0x80   : > { %7964 = vst [vmem:[#allocation48_spill] sm:$0xff] %v6534_v3  ;;  %5143 = vmatprep.subr.mxu0 %v2611_v10  ;;  %4946 = vmatprep.mubr.f32.mxu1 %v6479_v32  ;;  %vm6593_vm13 = vcmp.ne.s32.totalorder %v889_v62, 15  ;;  %vm6608_vm14 = vcmp.ne.s32.totalorder %v896_v9, 0  ;;  %v903_v36 = vand.u32 15, %v701_v49  ;;  %v704_v61 = vadd.s32 240, %v5862_v30  ;;  %v2335_v9 = vld [vmem:[%s7760_s3 + $0x1a0] sm:$0xff] }
  0x81   : > { %5144 = vmatpush3.msra.mxu0 %v2611_v10  ;;  %4947 = vmatmul.mubr.f32.gmra.mxu1 %v6439_v57  ;;  %v6567_v48 = vsel %vm1503_vm2, %v7969_v56, %v1490_v46  ;;  %v1515_v10 = vsel %vm1503_vm2, %v1490_v46, %v7833_v15  ;;  %v4361_v56 = vsel %vm6547_vm11, 1.0, %v7924_v4  ;;  %v1406_v46 = vsel %vm1394_vm4, %v1381_v6, %v7971_v54  ;;  %v2609_v6 = vld [vmem:[%s7760_s3 + $0x228] sm:$0xff] }
  0x82   : > { %5026 = vmatprep.mubr.f32.mxu0 %v6452_v29  ;;  %5065 = vmatprep.subr.mxu1 %v2337_v58  ;;  %7970 = vst [vmem:[#allocation49_spill] sm:$0xff] %v6567_v48  ;;  %v6579_v29 = vmul.f32 %v4343_v0, %v1408_v50  ;;  %v597_v54 = vmul.f32 %v6601_v2, %v565_v60  ;;  %v910_v0 = vand.u32 15, %v702_v35  ;;  %v703_v15 = vadd.s32 232, %v5862_v30 }
  0x83   : > { %5027 = vmatmul.mubr.f32.gmra.mxu0 %v6520_v23  ;;  %5066 = vmatpush3.msra.mxu1 %v2337_v58  ;;  %v4344_v58 = vsel %vm6555_vm12, 1.0, %v7924_v4  ;;  %v6614_v23 = vmul.f32 %v4361_v56, %v1515_v10  ;;  %v1494_v60 = vrot.slane %v5961_v38, 1  ;;  %v4362_v49 = vsel %vm6593_vm13, 1.0, %v7924_v4 }
  0x84   : > { %5145 = vmatprep.subr.mxu0 %v2610_v12  ;;  %4949 = vmatprep.mubr.f32.mxu1 %v6532_v37  ;;  %v7977_v35 = vrot.slane %v5934_v20, 1  ;;  %v7978_v50 = vrot.slane %v5934_v20, 7  ;;  %vm6652_vm15 = vcmp.ne.s32.totalorder %v903_v36, 15  ;;  %vm6656_vm0 = vcmp.ne.s32.totalorder %v910_v0, 0 }
  0x85   : > { %5146 = vmatpush3.msra.mxu0 %v2610_v12  ;;  %4950 = vmatmul.mubr.f32.gmra.mxu1 %v6512_v26  ;;  %7976 = vst [vmem:[#allocation50_spill] sm:$0xff] %v6614_v23  ;;  %v1385_v12 = vrot.slane %v5961_v38, 7  ;;  %v705_v56 = vadd.s32 248, %v5862_v30  ;;  %v7985_v36 = vrot.slane %v5895_v51, 1  ;;  %v7990_v62 = vrot.slane %v5934_v20, 7 }
  0x86   : > { %5029 = vmatprep.mubr.f32.mxu0 %v6524_v53  ;;  %5067 = vmatprep.subr.mxu1 %v2336_v27  ;;  %v1513_v10 = vsel %vm1503_vm2, %v1492_v45, %v7977_v35  ;;  %v1404_v38 = vsel %vm1394_vm4, %v1383_v13, %v7978_v50  ;;  %v6645_v35 = vld [vmem:[%s7762_s5] ss:$0 sm:$0xff]  ;;  %v917_v50 = vand.u32 15, %v703_v15  ;;  %v924_v15 = vand.u32 15, %v704_v61 }
  0x87   : > { %5030 = vmatmul.mubr.f32.gmra.mxu0 %v6534_v3  ;;  %5068 = vmatpush3.msra.mxu1 %v2336_v27  ;;  %v6633_v27 = vmul.f32 %v4344_v58, %v1406_v46  ;;  %v4345_v3 = vsel %vm6608_vm14, 1.0, %v7924_v4  ;;  %7979 = vst [vmem:[#allocation51_spill] sm:$0xff] %v6645_v35  ;;  %v629_v53 = vadd.f32 %v6645_v35, %v597_v54  ;;  %v2608_v46 = vld [vmem:[%s7760_s3 + $0x220] sm:$0xff]  ;;  %v7984_v54 = vrot.slane %v5895_v51, 7 }
  0x88   : > { %5147 = vmatprep.subr.mxu0 %v2609_v6  ;;  %4952 = vmatprep.mubr.f32.mxu1 %v6579_v29  ;;  %v6672_v0 = vsel %vm1503_vm2, %v7985_v36, %v1492_v45  ;;  %v6674_v35 = vmul.f32 %v4362_v49, %v1513_v10  ;;  %v6680_v34 = vmul.f32 %v4345_v3, %v1404_v38  ;;  %v7989_v45 = vrot.slane %v5994_v1, 7  ;;  %v2607_v36 = vld [vmem:[%s7760_s3 + $0x218] sm:$0xff] }
  0x89   : > { %5148 = vmatpush3.msra.mxu0 %v2609_v6  ;;  %4953 = vmatmul.mubr.f32.gmra.mxu1 %v6545_v40  ;;  %v6666_v6 = vsel %vm1394_vm4, %v7984_v54, %v1383_v13  ;;  %7986 = vst [vmem:[#allocation52_spill] sm:$0xff] %v6672_v0  ;;  %v7988_v13 = vrot.slane %v5994_v1, 1  ;;  %v1496_v61 = vrot.slane %v6011_v14, 1  ;;  %v4363_v38 = vsel %vm6652_vm15, 1.0, %v7924_v4 }
  0x8a   : > { %5032 = vmatprep.mubr.f32.mxu0 %v6567_v48  ;;  %5069 = vmatprep.subr.mxu1 %v2335_v9  ;;  %7987 = vst [vmem:[#allocation53_spill] sm:$0xff] %v6674_v35  ;;  %v2334_v48 = vld [vmem:[%s7760_s3 + $0x198] sm:$0xff]  ;;  %v1402_v49 = vsel %vm1394_vm4, %v1385_v12, %v7989_v45  ;;  %v4346_v3 = vsel %vm6656_vm0, 1.0, %v7924_v4  ;;  %v6699_v10 = vmax.f32 %v629_v53, 0.0  ;;  %vm1279_vm1 = vcmp.ne.s32.totalorder %v917_v50, 15 }
  0x8b   : > { %5033 = vmatmul.mubr.f32.gmra.mxu0 %v6614_v23  ;;  %5070 = vmatpush3.msra.mxu1 %v2335_v9  ;;  %v1511_v54 = vsel %vm1503_vm2, %v1494_v60, %v7988_v13  ;;  %v1497_v9 = vrot.slane %v6035_v39, 1  ;;  %v1387_v13 = vrot.slane %v6011_v14, 7  ;;  %v1388_v58 = vrot.slane %v6035_v39, 7 }
  0x8c   : > { %5149 = vmatprep.subr.mxu0 %v2608_v46  ;;  %4955 = vmatprep.mubr.f32.mxu1 %v6633_v27  ;;  %v931_v45 = vand.u32 15, %v705_v56  ;;  %v6712_v53 = vsel %vm1394_vm4, %v7990_v62, %v1385_v12  ;;  %vm6714_vm3 = vcmp.ne.s32.totalorder %v924_v15, 0  ;;  %v7993_v50 = vrot.slane %v5934_v20, 1 }
  0x8d   : > { %5150 = vmatpush3.msra.mxu0 %v2608_v46  ;;  %4956 = vmatmul.mubr.f32.gmra.mxu1 %v6666_v6  ;;  %v6728_v23 = vmul.f32 %v4363_v38, %v1511_v54  ;;  %v6730_v12 = vmul.f32 %v4346_v3, %v1402_v49  ;;  %v4364_v15 = vsel %vm1279_vm1, 1.0, %v7924_v4  ;;  %v1498_v62 = vrot.slane %v6050_v47, 1  ;;  %v2606_v54 = vld [vmem:[%s7760_s3 + $0x210] sm:$0xff] }
  0x8e   : > { %5035 = vmatprep.mubr.f32.mxu0 %v6672_v0  ;;  %5071 = vmatprep.subr.mxu1 %v2334_v48  ;;  %v6723_v56 = vsel %vm1503_vm2, %v7993_v50, %v1494_v60  ;;  %v2333_v0 = vld [vmem:[%s7760_s3 + $0x190] sm:$0xff]  ;;  %v4347_v49 = vsel %vm6714_vm3, 1.0, %v7924_v4  ;;  %v1400_v38 = vsel %vm1394_vm4, %v1387_v13, %v1388_v58  ;;  %vm1281_vm5 = vcmp.ne.s32.totalorder %v931_v45, 15  ;;  %v2332_v45 = vld [vmem:[%s7760_s3 + $0x188] sm:$0xff] }
  0x8f   : > { %5036 = vmatmul.mubr.f32.gmra.mxu0 %v6674_v35  ;;  %5072 = vmatpush3.msra.mxu1 %v2334_v48  ;;  %7994 = vst [vmem:[#allocation54_spill] sm:$0xff] %v6723_v56  ;;  %v1509_v48 = vsel %vm1503_vm2, %v1496_v61, %v1497_v9  ;;  %v7995_v3 = vrot.slane %v5994_v1, 7  ;;  %v7996_v46 = vrot.slane %v5994_v1, 1 }
  0x90   : > { %5151 = vmatprep.subr.mxu0 %v2607_v36  ;;  %4958 = vmatprep.mubr.f32.mxu1 %v6680_v34 }
  0x91   : > { %5152 = vmatpush3.msra.mxu0 %v2607_v36  ;;  %4959 = vmatmul.mubr.f32.gmra.mxu1 %v6712_v53  ;;  %v6752_v36 = vsel %vm1394_vm4, %v7995_v3, %v1387_v13  ;;  %v6760_v60 = vsel %vm1503_vm2, %v7996_v46, %v1496_v61  ;;  %v6768_v13 = vmul.f32 %v4347_v49, %v1400_v38  ;;  %v4365_v3 = vsel %vm1281_vm5, 1.0, %v7924_v4  ;;  %v2605_v61 = vld [vmem:[%s7760_s3 + $0x208] sm:$0xff]  ;;  %v2331_v49 = vld [vmem:[%s7760_s3 + $0x180] sm:$0xff] }
  0x92   : > { %5038 = vmatprep.mubr.f32.mxu0 %v6723_v56  ;;  %5073 = vmatprep.subr.mxu1 %v2333_v0  ;;  %7997 = vst [vmem:[#allocation55_spill] sm:$0xff] %v6760_v60  ;;  %v6765_v56 = vmul.f32 %v4364_v15, %v1509_v48  ;;  %v8000_v15 = vrot.slane %v6050_v47, 7  ;;  %v2889_v46 = vld [vmem:[%s7760_s3 + $0x2e0] sm:$0xff] }
  0x93   : > { %5039 = vmatmul.mubr.f32.gmra.mxu0 %v6728_v23  ;;  %5074 = vmatpush3.msra.mxu1 %v2333_v0  ;;  %v7999_v0 = vrot.slane %v6699_v10, 1 }
  0x94   : > { %7998 = vst [vmem:[#allocation56_spill] sm:$0xff] %v6765_v56  ;;  %5153 = vmatprep.subr.mxu0 %v2606_v54  ;;  %4961 = vmatprep.mubr.f32.mxu1 %v6730_v12  ;;  %v6784_v48 = vsel %vm1394_vm4, %v1388_v58, %v8000_v15  ;;  %v2604_v58 = vld [vmem:[%s7760_s3 + $0x200] sm:$0xff]  ;;  %v3161_v15 = vld [vmem:[%s7760_s3 + $0x358] sm:$0xff] }
  0x95   : > { %v1507_v50 = vsel %vm1503_vm2, %v1498_v62, %v7999_v0  ;;  %5154 = vmatpush3.msra.mxu0 %v2606_v54  ;;  %4962 = vmatmul.mubr.f32.gmra.mxu1 %v6752_v36  ;;  %v6789_v54 = vsel %vm1503_vm2, %v1497_v9, %v1498_v62  ;;  %v2892_v9 = vld [vmem:[%s7760_s3 + $0x2f8] sm:$0xff]  ;;  %v8003_v0 = vld [vmem:[#allocation14_spill] sm:$0xff] }
  0x96   : > { %5041 = vmatprep.mubr.f32.mxu0 %v6760_v60  ;;  %5075 = vmatprep.subr.mxu1 %v2332_v45  ;;  %v6794_v38 = vmul.f32 %v4365_v3, %v1507_v50  ;;  %v3165_v62 = vld [vmem:[%s7760_s3 + $0x378] sm:$0xff]  ;;  %v2891_v50 = vld [vmem:[%s7760_s3 + $0x2f0] sm:$0xff] }
  0x97   : > { %5042 = vmatmul.mubr.f32.gmra.mxu0 %v6765_v56  ;;  %5076 = vmatpush3.msra.mxu1 %v2332_v45  ;;  %v3162_v45 = vld [vmem:[%s7760_s3 + $0x360] sm:$0xff]  ;;  %v8002_v3 = vld [vmem:[#allocation12_spill] sm:$0xff] }
  0x98   : > { %5155 = vmatprep.subr.mxu0 %v2605_v61  ;;  %4964 = vmatprep.mubr.f32.mxu1 %v6768_v13 }
  0x99   : > { %5156 = vmatpush3.msra.mxu0 %v2605_v61  ;;  %4965 = vmatmul.mubr.f32.gmra.mxu1 %v6784_v48  ;;  %v2888_v61 = vld [vmem:[%s7760_s3 + $0x2d8] sm:$0xff] }
  0x9a   : > { %5044 = vmatprep.mubr.f32.mxu0 %v6789_v54  ;;  %5077 = vmatprep.subr.mxu1 %v2331_v49 }
  0x9b   : > { %5045 = vmatmul.mubr.f32.gmra.mxu0 %v6794_v38  ;;  %5078 = vmatpush3.msra.mxu1 %v2331_v49  ;;  %v8004_v49 = vld [vmem:[#allocation18_spill] sm:$0xff] }
  0x9c   : > { %5157 = vmatprep.subr.mxu0 %v2604_v58  ;;  %5079 = vmatprep.mubr.f32.mxu1 %v6086_v17  ;;  %v8001_v17 = vld [vmem:[#allocation10_spill] sm:$0xff] }
  0x9d   : > { %5158 = vmatpush3.msra.mxu0 %v2604_v58  ;;  %5080 = vmatmul.mubr.f32.vlgmr.msra.gmra.mxu1 %v6077_v11  ;;  %v3164_v11 = vld [vmem:[%s7760_s3 + $0x370] sm:$0xff] }
  0x9e   : > { %5159 = vmatprep.mubr.f32.mxu0 %v5794_v52  ;;  %5207 = vmatprep.subr.mxu1 %v2892_v9  ;;  %v2890_v52 = vld [vmem:[%s7760_s3 + $0x2e8] sm:$0xff]  ;;  %v8005_v58 = vld [vmem:[#allocation20_spill] sm:$0xff] }
  0x9f   : > { %5160 = vmatmul.mubr.f32.vlgmr.msra.gmra.mxu0 %v5806_v59  ;;  %5208 = vmatpush3.msra.mxu1 %v2892_v9  ;;  %v3163_v59 = vld [vmem:[%s7760_s3 + $0x368] sm:$0xff]  ;;  %v2887_v9 = vld [vmem:[%s7760_s3 + $0x2d0] sm:$0xff] }
  0xa0   : > { %5287 = vmatprep.subr.mxu0 %v3165_v62  ;;  %5082 = vmatprep.mubr.f32.mxu1 %v6136_v5 }
  0xa1   : > { %5288 = vmatpush3.msra.mxu0 %v3165_v62  ;;  %5083 = vmatmul.mubr.f32.gmra.mxu1 %v6119_v55  ;;  %v3160_v62 = vld [vmem:[%s7760_s3 + $0x350] sm:$0xff] }
  0xa2   : > { %5162 = vmatprep.mubr.f32.mxu0 %v5830_v8  ;;  %5209 = vmatprep.subr.mxu1 %v2891_v50 }
  0xa3   : > { %5163 = vmatmul.mubr.f32.gmra.mxu0 %v5842_v18  ;;  %5210 = vmatpush3.msra.mxu1 %v2891_v50  ;;  %v8006_v50 = vld [vmem:[#allocation22_spill] sm:$0xff] }
  0xa4   : > { %5289 = vmatprep.subr.mxu0 %v3164_v11  ;;  %5085 = vmatprep.mubr.f32.mxu1 %v6206_v42 }
  0xa5   : > { %5290 = vmatpush3.msra.mxu0 %v3164_v11  ;;  %5086 = vmatmul.mubr.f32.gmra.mxu1 %v6157_v22  ;;  %v8007_v11 = vld [vmem:[#allocation24_spill] sm:$0xff] }
  0xa6   : > { %5165 = vmatprep.mubr.f32.mxu0 %v5868_v33  ;;  %5211 = vmatprep.subr.mxu1 %v2890_v52 }
  0xa7   : > { %5166 = vmatmul.mubr.f32.gmra.mxu0 %v8001_v17  ;;  %5212 = vmatpush3.msra.mxu1 %v2890_v52  ;;  %v2886_v52 = vld [vmem:[%s7760_s3 + $0x2c8] sm:$0xff] }
  0xa8   : > { %5291 = vmatprep.subr.mxu0 %v3163_v59  ;;  %5088 = vmatprep.mubr.f32.mxu1 %v6227_v16 }
  0xa9   : > { %5292 = vmatpush3.msra.mxu0 %v3163_v59  ;;  %5089 = vmatmul.mubr.f32.gmra.mxu1 %v6220_v43  ;;  %v3159_v59 = vld [vmem:[%s7760_s3 + $0x348] sm:$0xff] }
  0xaa   : > { %5168 = vmatprep.mubr.f32.mxu0 %v8002_v3  ;;  %5213 = vmatprep.subr.mxu1 %v2889_v46 }
  0xab   : > { %5169 = vmatmul.mubr.f32.gmra.mxu0 %v8003_v0  ;;  %5214 = vmatpush3.msra.mxu1 %v2889_v46  ;;  %v8008_v46 = vld [vmem:[#allocation26_spill] sm:$0xff] }
  0xac   : > { %5293 = vmatprep.subr.mxu0 %v3162_v45  ;;  %5091 = vmatprep.mubr.f32.mxu1 %v6318_v63 }
  0xad   : > { %5294 = vmatpush3.msra.mxu0 %v3162_v45  ;;  %5092 = vmatmul.mubr.f32.gmra.mxu1 %v6270_v44  ;;  %v8009_v45 = vld [vmem:[#allocation28_spill] sm:$0xff] }
  0xae   : > { %5171 = vmatprep.mubr.f32.mxu0 %v8004_v49  ;;  %5215 = vmatprep.subr.mxu1 %v2888_v61 }
  0xaf   : > { %5172 = vmatmul.mubr.f32.gmra.mxu0 %v8005_v58  ;;  %5216 = vmatpush3.msra.mxu1 %v2888_v61  ;;  %v2885_v61 = vld [vmem:[%s7760_s3 + $0x2c0] sm:$0xff] }
  0xb0   : > { %5295 = vmatprep.subr.mxu0 %v3161_v15  ;;  %5094 = vmatprep.mubr.f32.mxu1 %v6328_v7 }
  0xb1   : > { %5296 = vmatpush3.msra.mxu0 %v3161_v15  ;;  %5095 = vmatmul.mubr.f32.gmra.mxu1 %v6324_v28  ;;  %v3158_v15 = vld [vmem:[%s7760_s3 + $0x340] sm:$0xff] }
  0xb2   : > { %5174 = vmatprep.mubr.f32.mxu0 %v8006_v50  ;;  %5217 = vmatprep.subr.mxu1 %v2887_v9 }
  0xb3   : > { %5175 = vmatmul.mubr.f32.gmra.mxu0 %v8007_v11  ;;  %5218 = vmatpush3.msra.mxu1 %v2887_v9  ;;  %v8010_v9 = vld [vmem:[#allocation3_spill] sm:$0xff] }
  0xb4   : > { %5297 = vmatprep.subr.mxu0 %v3160_v62  ;;  %5097 = vmatprep.mubr.f32.mxu1 %v6394_v24 }
  0xb5   : > { %5298 = vmatpush3.msra.mxu0 %v3160_v62  ;;  %5098 = vmatmul.mubr.f32.gmra.mxu1 %v6355_v41  ;;  %v2884_v62 = vld [vmem:[%s7760_s3 + $0x2b8] sm:$0xff] }
  0xb6   : > { %5177 = vmatprep.mubr.f32.mxu0 %v8008_v46  ;;  %5219 = vmatprep.subr.mxu1 %v2886_v52 }
  0xb7   : > { %5178 = vmatmul.mubr.f32.gmra.mxu0 %v8009_v45  ;;  %5220 = vmatpush3.msra.mxu1 %v2886_v52  ;;  %v3157_v52 = vld [vmem:[%s7760_s3 + $0x338] sm:$0xff] }
  0xb8   : > { %5299 = vmatprep.subr.mxu0 %v3159_v59  ;;  %5100 = vmatprep.mubr.f32.mxu1 %v6418_v21  ;;  %v2880_v45 = vld [vmem:[%s7760_s3 + $0x298] sm:$0xff] }
  0xb9   : > { %5300 = vmatpush3.msra.mxu0 %v3159_v59  ;;  %5101 = vmatmul.mubr.f32.gmra.mxu1 %v6410_v19  ;;  %v8011_v59 = vld [vmem:[#allocation4_spill] sm:$0xff] }
  0xba   : > { %5180 = vmatprep.mubr.f32.mxu0 %v5759_v31  ;;  %5221 = vmatprep.subr.mxu1 %v2885_v61  ;;  %v8013_v31 = vld [vmem:[#allocation6_spill] sm:$0xff] }
  0xbb   : > { %5181 = vmatmul.mubr.f32.gmra.mxu0 %v8010_v9  ;;  %5222 = vmatpush3.msra.mxu1 %v2885_v61  ;;  %v8012_v9 = vld [vmem:[#allocation5_spill] sm:$0xff]  ;;  %v2883_v61 = vld [vmem:[%s7760_s3 + $0x2b0] sm:$0xff] }
  0xbc   : > { %5301 = vmatprep.subr.mxu0 %v3158_v15  ;;  %5103 = vmatprep.mubr.f32.mxu1 %v6479_v32 }
  0xbd   : > { %5302 = vmatpush3.msra.mxu0 %v3158_v15  ;;  %5104 = vmatmul.mubr.f32.gmra.mxu1 %v6439_v57  ;;  %v3156_v15 = vld [vmem:[%s7760_s3 + $0x330] sm:$0xff] }
  0xbe   : > { %5183 = vmatprep.mubr.f32.mxu0 %v8011_v59  ;;  %5223 = vmatprep.subr.mxu1 %v2884_v62  ;;  %v8014_v59 = vld [vmem:[#allocation7_spill] sm:$0xff] }
  0xbf   : > { %5184 = vmatmul.mubr.f32.gmra.mxu0 %v8012_v9  ;;  %5224 = vmatpush3.msra.mxu1 %v2884_v62  ;;  %v2882_v62 = vld [vmem:[%s7760_s3 + $0x2a8] sm:$0xff]  ;;  %v566_v9 = vld [vmem:[%s5713_s30 + $0xf8] sm:$0xff] }
  0xc0   : > { %5303 = vmatprep.subr.mxu0 %v3157_v52  ;;  %5106 = vmatprep.mubr.f32.mxu1 %v6532_v37 }
  0xc1   : > { %5304 = vmatpush3.msra.mxu0 %v3157_v52  ;;  %5107 = vmatmul.mubr.f32.gmra.mxu1 %v6512_v26  ;;  %v3155_v52 = vld [vmem:[%s7760_s3 + $0x328] sm:$0xff] }
  0xc2   : > { %5186 = vmatprep.mubr.f32.mxu0 %v8013_v31  ;;  %5225 = vmatprep.subr.mxu1 %v2883_v61  ;;  %v8015_v31 = vld [vmem:[#allocation9_spill] sm:$0xff] }
  0xc3   : > { %5187 = vmatmul.mubr.f32.gmra.mxu0 %v8014_v59  ;;  %5226 = vmatpush3.msra.mxu1 %v2883_v61  ;;  %v706_v61 = vadd.s32 256, %v5862_v30  ;;  %v598_v59 = vmul.f32 %v6601_v2, %v566_v9  ;;  %v8016_v9 = vld [vmem:[#allocation51_spill] sm:$0xff] }
  0xc4   : > { %5305 = vmatprep.subr.mxu0 %v3156_v15  ;;  %5109 = vmatprep.mubr.f32.mxu1 %v6579_v29 }
  0xc5   : > { %5306 = vmatpush3.msra.mxu0 %v3156_v15  ;;  %5110 = vmatmul.mubr.f32.gmra.mxu1 %v6545_v40  ;;  %v2881_v15 = vld [vmem:[%s7760_s3 + $0x2a0] sm:$0xff]  ;;  %v938_v2 = vand.u32 15, %v706_v61  ;;  %v1390_v61 = vrot.slane %v6699_v10, 7 }
  0xc6   : > { %5189 = vmatprep.mubr.f32.mxu0 %v5856_v25  ;;  %5227 = vmatprep.subr.mxu1 %v2882_v62  ;;  %v3154_v25 = vld [vmem:[%s7760_s3 + $0x320] sm:$0xff] }
  0xc7   : > { %5190 = vmatmul.mubr.f32.gmra.mxu0 %v8015_v31  ;;  %5228 = vmatpush3.msra.mxu1 %v2882_v62  ;;  %v630_v62 = vadd.f32 %v8016_v9, %v598_v59  ;;  %v8017_v31 = vld [vmem:[#allocation13_spill] sm:$0xff]  ;;  %vm1174_vm6 = vcmp.ne.s32.totalorder %v938_v2, 0  ;;  %v3152_v9 = vld [vmem:[%s7760_s3 + $0x310] sm:$0xff] }
  0xc8   : > { %5307 = vmatprep.subr.mxu0 %v3155_v52  ;;  %5112 = vmatprep.mubr.f32.mxu1 %v6633_v27  ;;  %v4348_v2 = vsel %vm1174_vm6, 1.0, %v7924_v4 }
  0xc9   : > { %5308 = vmatpush3.msra.mxu0 %v3155_v52  ;;  %5113 = vmatmul.mubr.f32.gmra.mxu1 %v6666_v6  ;;  %v3153_v52 = vld [vmem:[%s7760_s3 + $0x318] sm:$0xff]  ;;  %v6937_v59 = vmax.f32 %v630_v62, 0.0  ;;  %v8020_v62 = vrot.slane %v6050_v47, 7 }
  0xca   : > { %5192 = vmatprep.mubr.f32.mxu0 %v5895_v51  ;;  %5229 = vmatprep.subr.mxu1 %v2881_v15  ;;  %v8040_v51 = vld [vmem:[#allocation45_spill] sm:$0xff] }
  0xcb   : > { %5193 = vmatmul.mubr.f32.gmra.mxu0 %v8017_v31  ;;  %5230 = vmatpush3.msra.mxu1 %v2881_v15  ;;  %8018 = vst [vmem:[#allocation10_spill] sm:$0xff] %v6937_v59  ;;  %v8019_v15 = vld [vmem:[#allocation19_spill] sm:$0xff] }
  0xcc   : > { %5309 = vmatprep.subr.mxu0 %v3154_v25  ;;  %5115 = vmatprep.mubr.f32.mxu1 %v6680_v34  ;;  %v8039_v31 = vld [vmem:[#allocation43_spill] sm:$0xff] }
  0xcd   : > { %5310 = vmatpush3.msra.mxu0 %v3154_v25  ;;  %5116 = vmatmul.mubr.f32.gmra.mxu1 %v6712_v53  ;;  %v2879_v25 = vld [vmem:[%s7760_s3 + $0x290] sm:$0xff] }
  0xce   : > { %5195 = vmatprep.mubr.f32.mxu0 %v5934_v20  ;;  %5231 = vmatprep.subr.mxu1 %v2880_v45 }
  0xcf   : > { %5196 = vmatmul.mubr.f32.gmra.mxu0 %v8019_v15  ;;  %5232 = vmatpush3.msra.mxu1 %v2880_v45  ;;  %v1398_v45 = vsel %vm1394_vm4, %v8020_v62, %v1390_v61  ;;  %v7858_v15 = vrot.slane %v6937_v59, 7  ;;  %v3151_v62 = vld [vmem:[%s7760_s3 + $0x308] sm:$0xff] }
  0xd0   : > { %5311 = vmatprep.subr.mxu0 %v3153_v52  ;;  %5118 = vmatprep.mubr.f32.mxu1 %v6730_v12  ;;  %v6960_v20 = vmul.f32 %v4348_v2, %v1398_v45  ;;  %v3150_v2 = vld [vmem:[%s7760_s3 + $0x300] sm:$0xff]  ;;  %v8021_v45 = vld [vmem:[#allocation29_spill] sm:$0xff] }
  0xd1   : > { %5312 = vmatpush3.msra.mxu0 %v3153_v52  ;;  %5119 = vmatmul.mubr.f32.gmra.mxu1 %v6752_v36  ;;  %v2878_v52 = vld [vmem:[%s7760_s3 + $0x288] sm:$0xff] }
  0xd2   : > { %5198 = vmatprep.mubr.f32.mxu0 %v5994_v1  ;;  %5233 = vmatprep.subr.mxu1 %v2879_v25 }
  0xd3   : > { %5199 = vmatmul.mubr.f32.gmra.mxu0 %v6011_v14  ;;  %5234 = vmatpush3.msra.mxu1 %v2879_v25  ;;  %v6971_v25 = vsel %vm1394_vm4, %v1390_v61, %v7858_v15  ;;  %v3438_v61 = vld [vmem:[%s7760_s3 + $0x3f8] sm:$0xff]  ;;  %v8023_v15 = vld [vmem:[#allocation31_spill] sm:$0xff]  ;;  %v8037_v14 = vld [vmem:[#allocation42_spill] sm:$0xff] }
  0xd4   : > { %5313 = vmatprep.subr.mxu0 %v3152_v9  ;;  %5121 = vmatprep.mubr.f32.mxu1 %v6768_v13 }
  0xd5   : > { %5314 = vmatpush3.msra.mxu0 %v3152_v9  ;;  %5122 = vmatmul.mubr.f32.gmra.mxu1 %v6784_v48  ;;  %v2877_v9 = vld [vmem:[%s7760_s3 + $0x280] sm:$0xff] }
  0xd6   : > { %5201 = vmatprep.mubr.f32.mxu0 %v6035_v39  ;;  %5235 = vmatprep.subr.mxu1 %v2878_v52 }
  0xd7   : > { %5202 = vmatmul.mubr.f32.gmra.mxu0 %v6050_v47  ;;  %5236 = vmatpush3.msra.mxu1 %v2878_v52  ;;  %v8022_v52 = vld [vmem:[#allocation30_spill] sm:$0xff]  ;;  %v8034_v47 = vld [vmem:[#allocation40_spill] sm:$0xff] }
  0xd8   : > { %5315 = vmatprep.subr.mxu0 %v3151_v62  ;;  %5124 = vmatprep.mubr.f32.mxu1 %v6960_v20 }
  0xd9   : > { %5316 = vmatpush3.msra.mxu0 %v3151_v62  ;;  %5125 = vmatmul.mubr.f32.gmra.mxu1 %v6971_v25  ;;  %v3711_v62 = vld [vmem:[%s7760_s3 + $0x478] sm:$0xff] }
  0xda   : > { %5204 = vmatprep.mubr.f32.mxu0 %v6699_v10  ;;  %5237 = vmatprep.subr.mxu1 %v2877_v9 }
  0xdb   : > { %5205 = vmatmul.mubr.f32.gmra.mxu0 %v6937_v59  ;;  %5238 = vmatpush3.msra.mxu1 %v2877_v9  ;;  %v3437_v9 = vld [vmem:[%s7760_s3 + $0x3f0] sm:$0xff] }
  0xdc   : > { %5317 = vmatprep.subr.mxu0 %v3150_v2  ;;  %5239 = vmatprep.mubr.f32.mxu1 %v8021_v45  ;;  %v3710_v45 = vld [vmem:[%s7760_s3 + $0x470] sm:$0xff] }
  0xdd   : > { %5318 = vmatpush3.msra.mxu0 %v3150_v2  ;;  %5240 = vmatmul.mubr.f32.vlgmr.msra.gmra.mxu1 %v8022_v52  ;;  %v8024_v2 = vld [vmem:[#allocation32_spill] sm:$0xff]  ;;  %v3709_v52 = vld [vmem:[%s7760_s3 + $0x468] sm:$0xff] }
  0xde   : > { %5319 = vmatprep.mubr.f32.mxu0 %v6136_v5  ;;  %5367 = vmatprep.subr.mxu1 %v3438_v61  ;;  %v8025_v5 = vld [vmem:[#allocation33_spill] sm:$0xff] }
  0xdf   : > { %5320 = vmatmul.mubr.f32.vlgmr.msra.gmra.mxu0 %v6119_v55  ;;  %5368 = vmatpush3.msra.mxu1 %v3438_v61  ;;  %v3436_v55 = vld [vmem:[%s7760_s3 + $0x3e8] sm:$0xff]  ;;  %v8026_v61 = vld [vmem:[#allocation34_spill] sm:$0xff] }
  0xe0   : > { %5447 = vmatprep.subr.mxu0 %v3711_v62  ;;  %5242 = vmatprep.mubr.f32.mxu1 %v8023_v15 }
  0xe1   : > { %5448 = vmatpush3.msra.mxu0 %v3711_v62  ;;  %5243 = vmatmul.mubr.f32.gmra.mxu1 %v8024_v2  ;;  %v8028_v62 = vld [vmem:[#allocation36_spill] sm:$0xff] }
  0xe2   : > { %5322 = vmatprep.mubr.f32.mxu0 %v6206_v42  ;;  %5369 = vmatprep.subr.mxu1 %v3437_v9  ;;  %v8027_v42 = vld [vmem:[#allocation35_spill] sm:$0xff] }
  0xe3   : > { %5323 = vmatmul.mubr.f32.gmra.mxu0 %v6157_v22  ;;  %5370 = vmatpush3.msra.mxu1 %v3437_v9  ;;  %v3435_v22 = vld [vmem:[%s7760_s3 + $0x3e0] sm:$0xff] }
  0xe4   : > { %5449 = vmatprep.subr.mxu0 %v3710_v45  ;;  %5245 = vmatprep.mubr.f32.mxu1 %v8025_v5  ;;  %v3708_v9 = vld [vmem:[%s7760_s3 + $0x460] sm:$0xff] }
  0xe5   : > { %5450 = vmatpush3.msra.mxu0 %v3710_v45  ;;  %5246 = vmatmul.mubr.f32.gmra.mxu1 %v8026_v61  ;;  %v8030_v45 = vld [vmem:[#allocation38_spill] sm:$0xff] }
  0xe6   : > { %5325 = vmatprep.mubr.f32.mxu0 %v6227_v16  ;;  %5371 = vmatprep.subr.mxu1 %v3436_v55  ;;  %v8029_v16 = vld [vmem:[#allocation37_spill] sm:$0xff] }
  0xe7   : > { %5326 = vmatmul.mubr.f32.gmra.mxu0 %v6220_v43  ;;  %5372 = vmatpush3.msra.mxu1 %v3436_v55  ;;  %v3434_v43 = vld [vmem:[%s7760_s3 + $0x3d8] sm:$0xff] }
  0xe8   : > { %5451 = vmatprep.subr.mxu0 %v3709_v52  ;;  %5248 = vmatprep.mubr.f32.mxu1 %v8027_v42  ;;  %v3707_v55 = vld [vmem:[%s7760_s3 + $0x458] sm:$0xff] }
  0xe9   : > { %5452 = vmatpush3.msra.mxu0 %v3709_v52  ;;  %5249 = vmatmul.mubr.f32.gmra.mxu1 %v8028_v62 }
  0xea   : > { %5328 = vmatprep.mubr.f32.mxu0 %v6318_v63  ;;  %5373 = vmatprep.subr.mxu1 %v3435_v22 }
  0xeb   : > { %5329 = vmatmul.mubr.f32.gmra.mxu0 %v6270_v44  ;;  %5374 = vmatpush3.msra.mxu1 %v3435_v22  ;;  %v3433_v44 = vld [vmem:[%s7760_s3 + $0x3d0] sm:$0xff]  ;;  %v8032_v22 = vld [vmem:[#allocation39_spill] sm:$0xff] }
  0xec   : > { %5453 = vmatprep.subr.mxu0 %v3708_v9  ;;  %5251 = vmatprep.mubr.f32.mxu1 %v8029_v16 }
  0xed   : > { %5454 = vmatpush3.msra.mxu0 %v3708_v9  ;;  %5252 = vmatmul.mubr.f32.gmra.mxu1 %v8030_v45 }
  0xee   : > { %5331 = vmatprep.mubr.f32.mxu0 %v6328_v7  ;;  %5375 = vmatprep.subr.mxu1 %v3434_v43  ;;  %v7033_v63 = vpop.f32.mrf.mxu1  ;;  %v3706_v7 = vld [vmem:[%s7760_s3 + $0x450] sm:$0xff] }
  0xef   : > { %8031 = vst [vmem:[#allocation12_spill] sm:$0xff] %v7033_v63  ;;  %5332 = vmatmul.mubr.f32.gmra.mxu0 %v6324_v28  ;;  %5376 = vmatpush3.msra.mxu1 %v3434_v43  ;;  %v7039_v52 = vpop.f32.mrf.mxu0  ;;  %v3432_v43 = vld [vmem:[%s7760_s3 + $0x3c8] sm:$0xff] }
  0xf0   : > { %5455 = vmatprep.subr.mxu0 %v3707_v55  ;;  %5254 = vmatprep.mubr.f32.mxu1 %v8032_v22  ;;  %v7042_v9 = vpop.f32.mrf.mxu1 }
  0xf1   : > { %8033 = vst [vmem:[#allocation14_spill] sm:$0xff] %v7042_v9  ;;  %5456 = vmatpush3.msra.mxu0 %v3707_v55  ;;  %5255 = vmatmul.mubr.f32.gmra.mxu1 %v8034_v47  ;;  %v7048_v28 = vpop.f32.mrf.mxu0  ;;  %v8036_v55 = vld [vmem:[#allocation41_spill] sm:$0xff]  ;;  %v8044_v9 = vld [vmem:[#allocation46_spill] sm:$0xff] }
  0xf2   : > { %5334 = vmatprep.mubr.f32.mxu0 %v6394_v24  ;;  %5377 = vmatprep.subr.mxu1 %v3433_v44  ;;  %v3705_v24 = vld [vmem:[%s7760_s3 + $0x448] sm:$0xff] }
  0xf3   : > { %5335 = vmatmul.mubr.f32.gmra.mxu0 %v6355_v41  ;;  %5378 = vmatpush3.msra.mxu1 %v3433_v44  ;;  %v7055_v39 = vpop.f32.mrf.mxu1  ;;  %v3431_v44 = vld [vmem:[%s7760_s3 + $0x3c0] sm:$0xff] }
  0xf4   : > { %8035 = vst [vmem:[#allocation18_spill] sm:$0xff] %v7055_v39  ;;  %5457 = vmatprep.subr.mxu0 %v3706_v7  ;;  %5257 = vmatprep.mubr.f32.mxu1 %v8036_v55  ;;  %v8043_v39 = vld [vmem:[#allocation44_spill] sm:$0xff] }
  0xf5   : > { %5458 = vmatpush3.msra.mxu0 %v3706_v7  ;;  %5258 = vmatmul.mubr.f32.gmra.mxu1 %v8037_v14  ;;  %v7062_v1 = vpop.f32.mrf.mxu0  ;;  %v7064_v41 = vpop.f32.mrf.mxu1 }
  0xf6   : > { %8038 = vst [vmem:[#allocation20_spill] sm:$0xff] %v7064_v41  ;;  %5337 = vmatprep.mubr.f32.mxu0 %v6418_v21  ;;  %5379 = vmatprep.subr.mxu1 %v3432_v43  ;;  %v3704_v21 = vld [vmem:[%s7760_s3 + $0x440] sm:$0xff] }
  0xf7   : > { %5338 = vmatmul.mubr.f32.gmra.mxu0 %v6410_v19  ;;  %5380 = vmatpush3.msra.mxu1 %v3432_v43  ;;  %v7071_v7 = vpop.f32.mrf.mxu0  ;;  %v3430_v19 = vld [vmem:[%s7760_s3 + $0x3b8] sm:$0xff] }
  0xf8   : > { %5459 = vmatprep.subr.mxu0 %v3705_v24  ;;  %5260 = vmatprep.mubr.f32.mxu1 %v8039_v31 }
  0xf9   : > { %5460 = vmatpush3.msra.mxu0 %v3705_v24  ;;  %5261 = vmatmul.mubr.f32.gmra.mxu1 %v8040_v51  ;;  %v7078_v41 = vpop.f32.mrf.mxu1 }
  0xfa   : > { %8041 = vst [vmem:[#allocation22_spill] sm:$0xff] %v7078_v41  ;;  %5340 = vmatprep.mubr.f32.mxu0 %v6479_v32  ;;  %5381 = vmatprep.subr.mxu1 %v3431_v44  ;;  %v3703_v32 = vld [vmem:[%s7760_s3 + $0x438] sm:$0xff]  ;;  %v8047_v41 = vld [vmem:[#allocation48_spill] sm:$0xff] }
  0xfb   : > { %5341 = vmatmul.mubr.f32.gmra.mxu0 %v6439_v57  ;;  %5382 = vmatpush3.msra.mxu1 %v3431_v44  ;;  %v7085_v43 = vpop.f32.mrf.mxu0  ;;  %v7087_v24 = vpop.f32.mrf.mxu1  ;;  %v3429_v44 = vld [vmem:[%s7760_s3 + $0x3b0] sm:$0xff] }
  0xfc   : > { %8042 = vst [vmem:[#allocation24_spill] sm:$0xff] %v7087_v24  ;;  %5461 = vmatprep.subr.mxu0 %v3704_v21  ;;  %5263 = vmatprep.mubr.f32.mxu1 %v8043_v39 }
  0xfd   : > { %5462 = vmatpush3.msra.mxu0 %v3704_v21  ;;  %5264 = vmatmul.mubr.f32.gmra.mxu1 %v8044_v9  ;;  %v7094_v57 = vpop.f32.mrf.mxu0  ;;  %v8046_v21 = vld [vmem:[#allocation47_spill] sm:$0xff] }
  0xfe   : > { %5343 = vmatprep.mubr.f32.mxu0 %v6532_v37  ;;  %5383 = vmatprep.subr.mxu1 %v3430_v19  ;;  %v3702_v37 = vld [vmem:[%s7760_s3 + $0x430] sm:$0xff] }
  0xff   : > { %5344 = vmatmul.mubr.f32.gmra.mxu0 %v6512_v26  ;;  %5384 = vmatpush3.msra.mxu1 %v3430_v19  ;;  %v7101_v24 = vpop.f32.mrf.mxu1  ;;  %v3428_v19 = vld [vmem:[%s7760_s3 + $0x3a8] sm:$0xff] }
 0x100   : > { %8045 = vst [vmem:[#allocation26_spill] sm:$0xff] %v7101_v24  ;;  %5463 = vmatprep.subr.mxu0 %v3703_v32  ;;  %5266 = vmatprep.mubr.f32.mxu1 %v8046_v21  ;;  %v8049_v24 = vld [vmem:[#allocation49_spill] sm:$0xff] }
 0x101   : > { %5464 = vmatpush3.msra.mxu0 %v3703_v32  ;;  %5267 = vmatmul.mubr.f32.gmra.mxu1 %v8047_v41  ;;  %v7108_v63 = vpop.f32.mrf.mxu0  ;;  %v7110_v26 = vpop.f32.mrf.mxu1  ;;  %v8050_v41 = vld [vmem:[#allocation50_spill] sm:$0xff] }
 0x102   : > { %8048 = vst [vmem:[#allocation51_spill] sm:$0xff] %v7110_v26  ;;  %5346 = vmatprep.mubr.f32.mxu0 %v6579_v29  ;;  %5385 = vmatprep.subr.mxu1 %v3429_v44  ;;  %v3701_v29 = vld [vmem:[%s7760_s3 + $0x428] sm:$0xff] }
 0x103   : > { %5347 = vmatmul.mubr.f32.gmra.mxu0 %v6545_v40  ;;  %5386 = vmatpush3.msra.mxu1 %v3429_v44  ;;  %v7117_v32 = vpop.f32.mrf.mxu0  ;;  %v3427_v40 = vld [vmem:[%s7760_s3 + $0x3a0] sm:$0xff] }
 0x104   : > { %5465 = vmatprep.subr.mxu0 %v3702_v37  ;;  %5269 = vmatprep.mubr.f32.mxu1 %v8049_v24  ;;  %v8053_v24 = vld [vmem:[#allocation52_spill] sm:$0xff] }
 0x105   : > { %5466 = vmatpush3.msra.mxu0 %v3702_v37  ;;  %5270 = vmatmul.mubr.f32.gmra.mxu1 %v8050_v41  ;;  %v7124_v26 = vpop.f32.mrf.mxu1  ;;  %v707_v41 = vadd.s32 264, %v5862_v30 }
 0x106   : > { %8051 = vst [vmem:[#allocation29_spill] sm:$0xff] %v7124_v26  ;;  %5349 = vmatprep.mubr.f32.mxu0 %v6633_v27  ;;  %5387 = vmatprep.subr.mxu1 %v3428_v19  ;;  %v708_v26 = vadd.s32 272, %v5862_v30  ;;  %v3700_v27 = vld [vmem:[%s7760_s3 + $0x420] sm:$0xff] }
 0x107   : > { %5350 = vmatmul.mubr.f32.gmra.mxu0 %v6666_v6  ;;  %5388 = vmatpush3.msra.mxu1 %v3428_v19  ;;  %v7131_v44 = vpop.f32.mrf.mxu0  ;;  %v7133_v37 = vpop.f32.mrf.mxu1  ;;  %v3426_v19 = vld [vmem:[%s7760_s3 + $0x398] sm:$0xff] }
 0x108   : > { %8052 = vst [vmem:[#allocation30_spill] sm:$0xff] %v7133_v37  ;;  %5467 = vmatprep.subr.mxu0 %v3701_v29  ;;  %5272 = vmatprep.mubr.f32.mxu1 %v8053_v24  ;;  %v952_v24 = vand.u32 15, %v708_v26  ;;  %v3425_v26 = vld [vmem:[%s7760_s3 + $0x390] sm:$0xff] }
 0x109   : > { %5468 = vmatpush3.msra.mxu0 %v3701_v29  ;;  %5273 = vmatmul.mubr.f32.gmra.mxu1 %v6674_v35  ;;  %v7142_v6 = vpop.f32.mrf.mxu0  ;;  %v945_v29 = vand.u32 15, %v707_v41  ;;  %v8055_v35 = vld [vmem:[#allocation54_spill] sm:$0xff]  ;;  %v1500_v41 = vrot.slane %v6937_v59, 1 }
 0x10a   : > { %5352 = vmatprep.mubr.f32.mxu0 %v6680_v34  ;;  %5389 = vmatprep.subr.mxu1 %v3427_v40  ;;  %v3699_v34 = vld [vmem:[%s7760_s3 + $0x418] sm:$0xff]  ;;  %vm1176_vm8 = vcmp.ne.s32.totalorder %v952_v24, 0  ;;  %v3424_v24 = vld [vmem:[%s7760_s3 + $0x388] sm:$0xff] }
 0x10b   : > { %5353 = vmatmul.mubr.f32.gmra.mxu0 %v6712_v53  ;;  %5390 = vmatpush3.msra.mxu1 %v3427_v40  ;;  %v7149_v37 = vpop.f32.mrf.mxu1  ;;  %vm1283_vm7 = vcmp.ne.s32.totalorder %v945_v29, 15 }
 0x10c   : > { %8054 = vst [vmem:[#allocation31_spill] sm:$0xff] %v7149_v37  ;;  %5469 = vmatprep.subr.mxu0 %v3700_v27  ;;  %5275 = vmatprep.mubr.f32.mxu1 %v8055_v35 }
 0x10d   : > { %5470 = vmatpush3.msra.mxu0 %v3700_v27  ;;  %5276 = vmatmul.mubr.f32.gmra.mxu1 %v6728_v23  ;;  %v7156_v53 = vpop.f32.mrf.mxu0  ;;  %v7158_v40 = vpop.f32.mrf.mxu1 }
 0x10e   : > { %8056 = vst [vmem:[#allocation32_spill] sm:$0xff] %v7158_v40  ;;  %5355 = vmatprep.mubr.f32.mxu0 %v6730_v12  ;;  %5391 = vmatprep.subr.mxu1 %v3426_v19  ;;  %v3698_v12 = vld [vmem:[%s7760_s3 + $0x410] sm:$0xff]  ;;  %v8058_v40 = vld [vmem:[#allocation17_spill] sm:$0xff] }
 0x10f   : > { %5356 = vmatmul.mubr.f32.gmra.mxu0 %v6752_v36  ;;  %5392 = vmatpush3.msra.mxu1 %v3426_v19  ;;  %v7166_v27 = vpop.f32.mrf.mxu0  ;;  %v4366_v19 = vsel %vm1283_vm7, 1.0, %v7924_v4  ;;  %v1505_v29 = vsel %vm1503_vm2, %v1500_v41, %v8058_v40 }
 0x110   : > { %5471 = vmatprep.subr.mxu0 %v3699_v34  ;;  %5278 = vmatprep.mubr.f32.mxu1 %v6760_v60 }
 0x111   : > { %5472 = vmatpush3.msra.mxu0 %v3699_v34  ;;  %5279 = vmatmul.mubr.f32.gmra.mxu1 %v6765_v56  ;;  %v7173_v36 = vpop.f32.mrf.mxu1  ;;  %v8061_v56 = vrot.slane %v6937_v59, 7  ;;  %v7207_v59 = vmul.f32 %v4366_v19, %v1505_v29 }
 0x112   : > { %8057 = vst [vmem:[#allocation33_spill] sm:$0xff] %v7173_v36  ;;  %5358 = vmatprep.mubr.f32.mxu0 %v6768_v13  ;;  %5393 = vmatprep.subr.mxu1 %v3425_v26  ;;  %v4349_v13 = vsel %vm1176_vm8, 1.0, %v7924_v4  ;;  %v8060_v36 = vld [vmem:[#allocation16_spill] sm:$0xff]  ;;  %v3423_v4 = vld [vmem:[%s7760_s3 + $0x380] sm:$0xff] }
 0x113   : > { %5359 = vmatmul.mubr.f32.gmra.mxu0 %v6784_v48  ;;  %5394 = vmatpush3.msra.mxu1 %v3425_v26  ;;  %v7184_v34 = vpop.f32.mrf.mxu0  ;;  %v7186_v37 = vpop.f32.mrf.mxu1  ;;  %v1396_v60 = vsel %vm1394_vm4, %v8061_v56, %v8060_v36  ;;  %v3697_v48 = vld [vmem:[%s7760_s3 + $0x408] sm:$0xff] }
 0x114   : > { %8059 = vst [vmem:[#allocation34_spill] sm:$0xff] %v7186_v37  ;;  %5473 = vmatprep.subr.mxu0 %v3698_v12  ;;  %5281 = vmatprep.mubr.f32.mxu1 %v6789_v54  ;;  %v8062_v37 = vrot.slane %v6699_v10, 1  ;;  %v1465_v56 = vmul.f32 %v4349_v13, %v1396_v60  ;;  %v3696_v60 = vld [vmem:[%s7760_s3 + $0x400] sm:$0xff] }
 0x115   : > { %5474 = vmatpush3.msra.mxu0 %v3698_v12  ;;  %5282 = vmatmul.mubr.f32.gmra.mxu1 %v6794_v38  ;;  %v7199_v26 = vpop.f32.mrf.mxu0 }
 0x116   : > { %v7205_v40 = vsel %vm1503_vm2, %v8062_v37, %v1500_v41  ;;  %5361 = vmatprep.mubr.f32.mxu0 %v6960_v20  ;;  %5395 = vmatprep.subr.mxu1 %v3424_v24 }
 0x117   : > { %5362 = vmatmul.mubr.f32.gmra.mxu0 %v6971_v25  ;;  %5396 = vmatpush3.msra.mxu1 %v3424_v24  ;;  %v7211_v12 = vpop.f32.mrf.mxu1 }
 0x118   : > { %5475 = vmatprep.subr.mxu0 %v3697_v48  ;;  %5284 = vmatprep.mubr.f32.mxu1 %v7205_v40 }
 0x119   : > { %5476 = vmatpush3.msra.mxu0 %v3697_v48  ;;  %5285 = vmatmul.mubr.f32.gmra.mxu1 %v7207_v59  ;;  %v7218_v37 = vpop.f32.mrf.mxu0  ;;  %v7220_v20 = vpop.f32.mrf.mxu1 }
 0x11a   : > { %5364 = vmatprep.mubr.f32.mxu0 %v1465_v56  ;;  %5397 = vmatprep.subr.mxu1 %v3423_v4 }
 0x11b   : > { %5365 = vmatmul.mubr.f32.gmra.mxu0 %v8060_v36  ;;  %5398 = vmatpush3.msra.mxu1 %v3423_v4  ;;  %v7226_v25 = vpop.f32.mrf.mxu0 }
 0x11c   : > { %5477 = vmatprep.subr.mxu0 %v3696_v60  ;;  %5399 = vmatprep.mubr.f32.mxu1 %v5830_v8 }
 0x11d   : > { %5478 = vmatpush3.msra.mxu0 %v3696_v60  ;;  %v4921_v41 = vpop.f32.mrf.mxu1  ;;  %5400 = vmatmul.mubr.f32.vlgmr.msra.gmra.mxu1 %v5842_v18 }
 0x11e   : > { %v1905_v19 = vadd.f32 %v4921_v41, %v7039_v52  ;;  %5479 = vmatprep.mubr.f32.mxu0 %v8023_v15  ;;  %5402 = vmatprep.mubr.f32.mxu1 %v5868_v33 }
 0x11f   : > { %v5001_v29 = vpop.f32.mrf.mxu0  ;;  %5480 = vmatmul.mubr.f32.vlgmr.msra.gmra.mxu0 %v8024_v2  ;;  %v1899_v36 = vpop.f32.mrf.mxu1 }
 0x120   : > { %v7234_v4 = vadd.f32 %v5001_v29, %v1905_v19  ;;  %v1900_v24 = vadd.f32 %v1899_v36, %v7048_v28  ;;  %5482 = vmatprep.mubr.f32.mxu0 %v8025_v5 }
 0x121   : > { %v2140_v8 = vpop.f32.mrf.mxu0  ;;  %v4924_v13 = vpop.f32.mrf.mxu1  ;;  %5403 = vmatmul.mubr.f32.gmra.mxu1 %v8001_v17 }
 0x122   : > { %v7239_v18 = vadd.f32 %v2140_v8, %v1900_v24  ;;  %v1915_v15 = vadd.f32 %v4924_v13, %v7062_v1  ;;  %5405 = vmatprep.mubr.f32.mxu1 %v8002_v3  ;;  %v8063_v24 = vld [vmem:[#allocation28_spill] sm:$0xff]  ;;  %v8064_v8 = vld [vmem:[#allocation2_spill] sm:$0xff] }
 0x123   : > { %v5004_v33 = vpop.f32.mrf.mxu0  ;;  %5483 = vmatmul.mubr.f32.gmra.mxu0 %v8026_v61  ;;  %v1909_v2 = vpop.f32.mrf.mxu1 }
 0x124   : > { %v7244_v52 = vadd.f32 %v5004_v33, %v1915_v15  ;;  %v1910_v28 = vadd.f32 %v1909_v2, %v7071_v7  ;;  %5485 = vmatprep.mubr.f32.mxu0 %v8027_v42  ;;  %v8065_v33 = vld [vmem:[#allocation3_spill] sm:$0xff] }
 0x125   : > { %v2150_v5 = vpop.f32.mrf.mxu0  ;;  %v4927_v48 = vpop.f32.mrf.mxu1  ;;  %5406 = vmatmul.mubr.f32.gmra.mxu1 %v8003_v0 }
 0x126   : > { %v7249_v17 = vadd.f32 %v2150_v5, %v1910_v28  ;;  %v1925_v1 = vadd.f32 %v4927_v48, %v7085_v43  ;;  %5408 = vmatprep.mubr.f32.mxu1 %v8004_v49  ;;  %v8066_v28 = vld [vmem:[#allocation4_spill] sm:$0xff] }
 0x127   : > { %v5007_v3 = vpop.f32.mrf.mxu0  ;;  %5486 = vmatmul.mubr.f32.gmra.mxu0 %v8028_v62  ;;  %v1919_v61 = vpop.f32.mrf.mxu1 }
 0x128   : > { %v7254_v56 = vadd.f32 %v5007_v3, %v1925_v1  ;;  %v1920_v7 = vadd.f32 %v1919_v61, %v7094_v57  ;;  %5488 = vmatprep.mubr.f32.mxu0 %v8029_v16  ;;  %v8067_v3 = vld [vmem:[#allocation5_spill] sm:$0xff] }
 0x129   : > { %v2160_v42 = vpop.f32.mrf.mxu0  ;;  %v4930_v60 = vpop.f32.mrf.mxu1  ;;  %5409 = vmatmul.mubr.f32.gmra.mxu1 %v8005_v58 }
 0x12a   : > { %v7259_v0 = vadd.f32 %v2160_v42, %v1920_v7  ;;  %v1935_v43 = vadd.f32 %v4930_v60, %v7108_v63  ;;  %5411 = vmatprep.mubr.f32.mxu1 %v8006_v50  ;;  %v8068_v7 = vld [vmem:[#allocation6_spill] sm:$0xff] }
 0x12b   : > { %v5010_v49 = vpop.f32.mrf.mxu0  ;;  %5489 = vmatmul.mubr.f32.gmra.mxu0 %v8030_v45  ;;  %v1929_v62 = vpop.f32.mrf.mxu1 }
 0x12c   : > { %v7264_v41 = vadd.f32 %v5010_v49, %v1935_v43  ;;  %v1930_v57 = vadd.f32 %v1929_v62, %v7117_v32  ;;  %5491 = vmatprep.mubr.f32.mxu0 %v8032_v22  ;;  %v8069_v49 = vld [vmem:[#allocation7_spill] sm:$0xff] }
 0x12d   : > { %v2170_v16 = vpop.f32.mrf.mxu0  ;;  %v4933_v19 = vpop.f32.mrf.mxu1  ;;  %5412 = vmatmul.mubr.f32.gmra.mxu1 %v8007_v11 }
 0x12e   : > { %v7269_v58 = vadd.f32 %v2170_v16, %v1930_v57  ;;  %v1945_v63 = vadd.f32 %v4933_v19, %v7131_v44  ;;  %5414 = vmatprep.mubr.f32.mxu1 %v8008_v46  ;;  %v8070_v57 = vld [vmem:[#allocation12_spill] sm:$0xff] }
 0x12f   : > { %v5013_v50 = vpop.f32.mrf.mxu0  ;;  %5492 = vmatmul.mubr.f32.gmra.mxu0 %v8034_v47  ;;  %v1939_v45 = vpop.f32.mrf.mxu1  ;;  %v8071_v16 = vld [vmem:[#allocation8_spill] sm:$0xff] }
 0x130   : > { %v7274_v29 = vadd.f32 %v5013_v50, %v1945_v63  ;;  %v1940_v32 = vadd.f32 %v1939_v45, %v7142_v6  ;;  %5494 = vmatprep.mubr.f32.mxu0 %v8036_v55  ;;  %v8072_v63 = vld [vmem:[#allocation48_spill] sm:$0xff]  ;;  %v8073_v45 = vld [vmem:[#allocation14_spill] sm:$0xff] }
 0x131   : > { %v2180_v22 = vpop.f32.mrf.mxu0  ;;  %v4936_v36 = vpop.f32.mrf.mxu1  ;;  %5415 = vmatmul.mubr.f32.gmra.mxu1 %v8063_v24 }
 0x132   : > { %v7279_v11 = vadd.f32 %v2180_v22, %v1940_v32  ;;  %v1955_v44 = vadd.f32 %v4936_v36, %v7156_v53  ;;  %5417 = vmatprep.mubr.f32.mxu1 %v8064_v8  ;;  %v8074_v32 = vld [vmem:[#allocation49_spill] sm:$0xff] }
 0x133   : > { %v5016_v46 = vpop.f32.mrf.mxu0  ;;  %5495 = vmatmul.mubr.f32.gmra.mxu0 %v8037_v14  ;;  %v1949_v47 = vpop.f32.mrf.mxu1  ;;  %v8075_v36 = vld [vmem:[#allocation9_spill] sm:$0xff] }
 0x134   : > { %v7284_v13 = vadd.f32 %v5016_v46, %v1955_v44  ;;  %v1950_v6 = vadd.f32 %v1949_v47, %v7166_v27  ;;  %5497 = vmatprep.mubr.f32.mxu0 %v8039_v31  ;;  %v8076_v44 = vld [vmem:[#allocation18_spill] sm:$0xff]  ;;  %v8077_v46 = vld [vmem:[#allocation11_spill] sm:$0xff] }
 0x135   : > { %v2190_v55 = vpop.f32.mrf.mxu0  ;;  %v4939_v15 = vpop.f32.mrf.mxu1  ;;  %5418 = vmatmul.mubr.f32.gmra.mxu1 %v8065_v33  ;;  %v8079_v33 = vld [vmem:[#allocation20_spill] sm:$0xff] }
 0x136   : > { %v7289_v2 = vadd.f32 %v2190_v55, %v1950_v6  ;;  %v1965_v53 = vadd.f32 %v4939_v15, %v7184_v34  ;;  %5420 = vmatprep.mubr.f32.mxu1 %v8066_v28  ;;  %v8078_v6 = vld [vmem:[#allocation50_spill] sm:$0xff]  ;;  %v8080_v28 = vld [vmem:[#allocation52_spill] sm:$0xff] }
 0x137   : > { %v5019_v5 = vpop.f32.mrf.mxu0  ;;  %5498 = vmatmul.mubr.f32.gmra.mxu0 %v8040_v51  ;;  %v1959_v14 = vpop.f32.mrf.mxu1 }
 0x138   : > { %v7294_v48 = vadd.f32 %v5019_v5, %v1965_v53  ;;  %v1960_v27 = vadd.f32 %v1959_v14, %v7199_v26  ;;  %5500 = vmatprep.mubr.f32.mxu0 %v8043_v39 }
 0x139   : > { %v2200_v31 = vpop.f32.mrf.mxu0  ;;  %v4942_v1 = vpop.f32.mrf.mxu1  ;;  %5421 = vmatmul.mubr.f32.gmra.mxu1 %v8067_v3 }
 0x13a   : > { %v7299_v61 = vadd.f32 %v2200_v31, %v1960_v27  ;;  %v1975_v34 = vadd.f32 %v4942_v1, %v7218_v37  ;;  %5423 = vmatprep.mubr.f32.mxu1 %v8068_v7  ;;  %v8081_v27 = vld [vmem:[#allocation13_spill] sm:$0xff]  ;;  %v8082_v1 = vld [vmem:[#allocation22_spill] sm:$0xff] }
 0x13b   : > { %v5022_v42 = vpop.f32.mrf.mxu0  ;;  %5501 = vmatmul.mubr.f32.gmra.mxu0 %v8044_v9  ;;  %v1969_v51 = vpop.f32.mrf.mxu1 }
 0x13c   : > { %v7304_v60 = vadd.f32 %v5022_v42, %v1975_v34  ;;  %v1970_v26 = vadd.f32 %v1969_v51, %v7226_v25  ;;  %5503 = vmatprep.mubr.f32.mxu0 %v8046_v21  ;;  %v8083_v34 = vld [vmem:[#allocation15_spill] sm:$0xff]  ;;  %v8084_v42 = vld [vmem:[#allocation53_spill] sm:$0xff] }
 0x13d   : > { %v2210_v39 = vpop.f32.mrf.mxu0  ;;  %v4945_v43 = vpop.f32.mrf.mxu1  ;;  %5424 = vmatmul.mubr.f32.gmra.mxu1 %v8069_v49 }
 0x13e   : > { %v7309_v62 = vadd.f32 %v2210_v39, %v1970_v26  ;;  %v1985_v37 = vadd.f32 %v4945_v43, %v8070_v57  ;;  %5426 = vmatprep.mubr.f32.mxu1 %v8071_v16  ;;  %v8085_v39 = vld [vmem:[#allocation24_spill] sm:$0xff]  ;;  %v709_v16 = vadd.s32 280, %v5862_v30 }
 0x13f   : > { %v5025_v19 = vpop.f32.mrf.mxu0  ;;  %5504 = vmatmul.mubr.f32.gmra.mxu0 %v8072_v63  ;;  %v1979_v9 = vpop.f32.mrf.mxu1  ;;  %v8087_v63 = vld [vmem:[#allocation26_spill] sm:$0xff] }
 0x140   : > { %v7314_v50 = vadd.f32 %v5025_v19, %v1985_v37  ;;  %v1980_v25 = vadd.f32 %v1979_v9, %v8073_v45  ;;  %5506 = vmatprep.mubr.f32.mxu0 %v8074_v32  ;;  %v8086_v37 = vld [vmem:[#allocation19_spill] sm:$0xff]  ;;  %v8088_v45 = vld [vmem:[#allocation21_spill] sm:$0xff]  ;;  %v959_v30 = vand.u32 15, %v709_v16 }
 0x141   : > { %v2220_v21 = vpop.f32.mrf.mxu0  ;;  %v4948_v22 = vpop.f32.mrf.mxu1  ;;  %5427 = vmatmul.mubr.f32.gmra.mxu1 %v8075_v36  ;;  %v8090_v36 = vld [vmem:[#allocation55_spill] sm:$0xff] }
 0x142   : > { %v7319_v24 = vadd.f32 %v2220_v21, %v1980_v25  ;;  %v1995_v8 = vadd.f32 %v4948_v22, %v8076_v44  ;;  %5429 = vmatprep.mubr.f32.mxu1 %v8077_v46  ;;  %v8089_v22 = vld [vmem:[#allocation51_spill] sm:$0xff]  ;;  %vm1285_vm2 = vcmp.ne.s32.totalorder %v959_v30, 15 }
 0x143   : > { %v5028_v47 = vpop.f32.mrf.mxu0  ;;  %5507 = vmatmul.mubr.f32.gmra.mxu0 %v8078_v6  ;;  %v1989_v55 = vpop.f32.mrf.mxu1  ;;  %v8091_v46 = vld [vmem:[#allocation23_spill] sm:$0xff]  ;;  %v8092_v6 = vld [vmem:[#allocation29_spill] sm:$0xff] }
 0x144   : > { %v7324_v15 = vadd.f32 %v5028_v47, %v1995_v8  ;;  %v1990_v53 = vadd.f32 %v1989_v55, %v8079_v33  ;;  %5509 = vmatprep.mubr.f32.mxu0 %v8080_v28  ;;  %v8093_v33 = vld [vmem:[#allocation25_spill] sm:$0xff] }
 0x145   : > { %v2230_v5 = vpop.f32.mrf.mxu0  ;;  %v4951_v14 = vpop.f32.mrf.mxu1  ;;  %5430 = vmatmul.mubr.f32.gmra.mxu1 %v8081_v27 }
 0x146   : > { %v7329_v31 = vadd.f32 %v2230_v5, %v1990_v53  ;;  %v2005_v3 = vadd.f32 %v4951_v14, %v8082_v1  ;;  %5432 = vmatprep.mubr.f32.mxu1 %v8083_v34  ;;  %v8095_v14 = vld [vmem:[#allocation30_spill] sm:$0xff]  ;;  %v8096_v34 = vld [vmem:[#allocation27_spill] sm:$0xff] }
 0x147   : > { %v5031_v7 = vpop.f32.mrf.mxu0  ;;  %5510 = vmatmul.mubr.f32.gmra.mxu0 %v8084_v42  ;;  %v1999_v51 = vpop.f32.mrf.mxu1  ;;  %v8097_v42 = vld [vmem:[#allocation31_spill] sm:$0xff] }
 0x148   : > { %v7334_v26 = vadd.f32 %v5031_v7, %v2005_v3  ;;  %v2000_v43 = vadd.f32 %v1999_v51, %v8085_v39  ;;  %5512 = vmatprep.mubr.f32.mxu0 %v8055_v35 }
 0x149   : > { %v2240_v49 = vpop.f32.mrf.mxu0  ;;  %v4954_v57 = vpop.f32.mrf.mxu1  ;;  %5433 = vmatmul.mubr.f32.gmra.mxu1 %v8086_v37 }
 0x14a   : > { %v7340_v19 = vadd.f32 %v2240_v49, %v2000_v43  ;;  %v2015_v9 = vadd.f32 %v4954_v57, %v8087_v63  ;;  %5435 = vmatprep.mubr.f32.mxu1 %v8088_v45  ;;  %v8098_v57 = vld [vmem:[#allocation32_spill] sm:$0xff]  ;;  %v8100_v45 = vld [vmem:[#allocation10_spill] sm:$0xff] }
 0x14b   : > { %v5034_v25 = vpop.f32.mrf.mxu0  ;;  %5513 = vmatmul.mubr.f32.gmra.mxu0 %v6728_v23  ;;  %v2009_v32 = vpop.f32.mrf.mxu1  ;;  %v8094_v23 = vld [vmem:[#allocation56_spill] sm:$0xff] }
 0x14c   : > { %v7345_v21 = vadd.f32 %v5034_v25, %v2015_v9  ;;  %v2010_v35 = vadd.f32 %v2009_v32, %v8089_v22  ;;  %5515 = vmatprep.mubr.f32.mxu0 %v8090_v36  ;;  %v8101_v32 = vld [vmem:[#allocation33_spill] sm:$0xff] }
 0x14d   : > { %v2250_v44 = vpop.f32.mrf.mxu0  ;;  %v4957_v8 = vpop.f32.mrf.mxu1  ;;  %5436 = vmatmul.mubr.f32.gmra.mxu1 %v8091_v46 }
 0x14e   : > { %v7350_v47 = vadd.f32 %v2250_v44, %v2010_v35  ;;  %v2025_v55 = vadd.f32 %v4957_v8, %v8092_v6  ;;  %5438 = vmatprep.mubr.f32.mxu1 %v8093_v33  ;;  %v8102_v35 = vld [vmem:[#allocation17_spill] sm:$0xff] }
 0x14f   : > { %v5037_v53 = vpop.f32.mrf.mxu0  ;;  %5516 = vmatmul.mubr.f32.gmra.mxu0 %v8094_v23  ;;  %v2019_v28 = vpop.f32.mrf.mxu1 }
 0x150   : > { %v7355_v5 = vadd.f32 %v5037_v53, %v2025_v55  ;;  %v2020_v27 = vadd.f32 %v2019_v28, %v8095_v14  ;;  %5518 = vmatprep.mubr.f32.mxu0 %v6789_v54  ;;  %v8099_v54 = vmov 0.0  }
 0x151   : > { %v2260_v1 = vpop.f32.mrf.mxu0  ;;  %v4960_v3 = vpop.f32.mrf.mxu1  ;;  %5439 = vmatmul.mubr.f32.gmra.mxu1 %v8096_v34  ;;  %v4367_v16 = vsel %vm1285_vm2, 1.0, %v8099_v54 }
 0x152   : > { %v7360_v7 = vadd.f32 %v2260_v1, %v2020_v27  ;;  %v2035_v51 = vadd.f32 %v4960_v3, %v8097_v42  ;;  %5441 = vmatprep.mubr.f32.mxu1 %v6699_v10  ;;  %v1575_v36 = vmul.f32 %v4367_v16, %v8102_v35 }
 0x153   : > { %v5040_v39 = vpop.f32.mrf.mxu0  ;;  %5519 = vmatmul.mubr.f32.gmra.mxu0 %v6794_v38  ;;  %v2029_v43 = vpop.f32.mrf.mxu1 }
 0x154   : > { %v7365_v49 = vadd.f32 %v5040_v39, %v2035_v51  ;;  %v2030_v37 = vadd.f32 %v2029_v43, %v8098_v57  ;;  %5521 = vmatprep.mubr.f32.mxu0 %v7205_v40  ;;  %v8103_v40 = vld [vmem:[#allocation34_spill] sm:$0xff] }
 0x155   : > { %v2270_v63 = vpop.f32.mrf.mxu0  ;;  %v4963_v9 = vpop.f32.mrf.mxu1  ;;  %5442 = vmatmul.mubr.f32.gmra.mxu1 %v8100_v45 }
 0x156   : > { %v7371_v25 = vadd.f32 %v2270_v63, %v2030_v37  ;;  %v2045_v10 = vadd.f32 %v4963_v9, %v8101_v32  ;;  %5444 = vmatprep.mubr.f32.mxu1 %v8099_v54 }
 0x157   : > { %v5043_v38 = vpop.f32.mrf.mxu0  ;;  %5522 = vmatmul.mubr.f32.gmra.mxu0 %v7207_v59  ;;  %v2039_v22 = vpop.f32.mrf.mxu1 }
 0x158   : > { %v7377_v44 = vadd.f32 %v5043_v38, %v2045_v10  ;;  %v2040_v8 = vadd.f32 %v2039_v22, %v8103_v40  ;;  %5524 = vmatprep.mubr.f32.mxu0 %v8102_v35 }
 0x159   : > { %v2280_v46 = vpop.f32.mrf.mxu0  ;;  %v4966_v30 = vpop.f32.mrf.mxu1  ;;  %5445 = vmatmul.mubr.f32.gmra.mxu1 %v8099_v54 }
 0x15a   : > { %v7382_v6 = vadd.f32 %v2280_v46, %v2040_v8  ;;  %v2055_v55 = vadd.f32 %v4966_v30, %v7211_v12 }
 0x15b   : > { %v5046_v33 = vpop.f32.mrf.mxu0  ;;  %5525 = vmatmul.mubr.f32.gmra.mxu0 %v1575_v36  ;;  %v2049_v59 = vpop.f32.mrf.mxu1 }
 0x15c   : > { %v7385_v53 = vadd.f32 %v5046_v33, %v2055_v55  ;;  %v2050_v23 = vadd.f32 %v2049_v59, %v7220_v20 }
 0x15d   : > { %v2290_v28 = vpop.f32.mrf.mxu0  ;;  %v5081_v14 = vpop.f32.mrf.mxu1 }
 0x15e   : > { %v7388_v27 = vadd.f32 %v2290_v28, %v2050_v23  ;;  %v2573_v1 = vadd.f32 %v5081_v14, %v7234_v4 }
 0x15f   : > { %v5161_v3 = vpop.f32.mrf.mxu0  ;;  %v2413_v34 = vpop.f32.mrf.mxu1 }
 0x160   : > { %v7391_v42 = vadd.f32 %v5161_v3, %v2573_v1  ;;  %v2572_v51 = vadd.f32 %v2413_v34, %v7239_v18 }
 0x161   : > { %v2686_v12 = vpop.f32.mrf.mxu0  ;;  %v5084_v39 = vpop.f32.mrf.mxu1 }
 0x162   : > { %v7394_v43 = vadd.f32 %v2686_v12, %v2572_v51  ;;  %v2575_v57 = vadd.f32 %v5084_v39, %v7244_v52 }
 0x163   : > { %v5164_v37 = vpop.f32.mrf.mxu0  ;;  %v2423_v20 = vpop.f32.mrf.mxu1 }
 0x164   : > { %v7397_v54 = vadd.f32 %v5164_v37, %v2575_v57  ;;  %v2574_v16 = vadd.f32 %v2423_v20, %v7249_v17 }
 0x165   : > { %v2696_v63 = vpop.f32.mrf.mxu0  ;;  %v5087_v4 = vpop.f32.mrf.mxu1 }
 0x166   : > { %v7400_v9 = vadd.f32 %v2696_v63, %v2574_v16  ;;  %v2577_v45 = vadd.f32 %v5087_v4, %v7254_v56 }
 0x167   : > { %v5167_v32 = vpop.f32.mrf.mxu0  ;;  %v2433_v18 = vpop.f32.mrf.mxu1 }
 0x168   : > { %v7403_v10 = vadd.f32 %v5167_v32, %v2577_v45  ;;  %v2576_v38 = vadd.f32 %v2433_v18, %v7259_v0 }
 0x169   : > { %v2706_v22 = vpop.f32.mrf.mxu0  ;;  %v5090_v52 = vpop.f32.mrf.mxu1 }
 0x16a   : > { %v7406_v35 = vadd.f32 %v2706_v22, %v2576_v38  ;;  %v2579_v36 = vadd.f32 %v5090_v52, %v7264_v41 }
 0x16b   : > { %v5170_v40 = vpop.f32.mrf.mxu0  ;;  %v2443_v17 = vpop.f32.mrf.mxu1 }
 0x16c   : > { %v7409_v8 = vadd.f32 %v5170_v40, %v2579_v36  ;;  %v2578_v46 = vadd.f32 %v2443_v17, %v7269_v58 }
 0x16d   : > { %v2716_v30 = vpop.f32.mrf.mxu0  ;;  %v5093_v56 = vpop.f32.mrf.mxu1 }
 0x16e   : > { %v7412_v55 = vadd.f32 %v2716_v30, %v2578_v46  ;;  %v2581_v33 = vadd.f32 %v5093_v56, %v7274_v29 }
 0x16f   : > { %v5173_v59 = vpop.f32.mrf.mxu0  ;;  %v2453_v0 = vpop.f32.mrf.mxu1 }
 0x170   : > { %v7415_v23 = vadd.f32 %v5173_v59, %v2581_v33  ;;  %v2580_v28 = vadd.f32 %v2453_v0, %v7279_v11 }
 0x171   : > { %v2726_v14 = vpop.f32.mrf.mxu0  ;;  %v5096_v41 = vpop.f32.mrf.mxu1 }
 0x172   : > { %v7418_v1 = vadd.f32 %v2726_v14, %v2580_v28  ;;  %v2583_v3 = vadd.f32 %v5096_v41, %v7284_v13 }
 0x173   : > { %v5176_v34 = vpop.f32.mrf.mxu0  ;;  %v2463_v58 = vpop.f32.mrf.mxu1 }
 0x174   : > { %v7421_v51 = vadd.f32 %v5176_v34, %v2583_v3  ;;  %v2582_v12 = vadd.f32 %v2463_v58, %v7289_v2 }
 0x175   : > { %v2736_v39 = vpop.f32.mrf.mxu0  ;;  %v5099_v29 = vpop.f32.mrf.mxu1 }
 0x176   : > { %v7424_v57 = vadd.f32 %v2736_v39, %v2582_v12  ;;  %v2585_v37 = vadd.f32 %v5099_v29, %v7294_v48 }
 0x177   : > { %v5179_v20 = vpop.f32.mrf.mxu0  ;;  %v2473_v11 = vpop.f32.mrf.mxu1 }
 0x178   : > { %v7427_v16 = vadd.f32 %v5179_v20, %v2585_v37  ;;  %v2584_v63 = vadd.f32 %v2473_v11, %v7299_v61 }
 0x179   : > { %v2746_v4 = vpop.f32.mrf.mxu0  ;;  %v5102_v13 = vpop.f32.mrf.mxu1 }
 0x17a   : > { %v7430_v45 = vadd.f32 %v2746_v4, %v2584_v63  ;;  %v2587_v32 = vadd.f32 %v5102_v13, %v7304_v60 }
 0x17b   : > { %v5182_v18 = vpop.f32.mrf.mxu0  ;;  %v2483_v2 = vpop.f32.mrf.mxu1 }
 0x17c   : > { %v7433_v38 = vadd.f32 %v5182_v18, %v2587_v32  ;;  %v2586_v22 = vadd.f32 %v2483_v2, %v7309_v62 }
 0x17d   : > { %v2756_v52 = vpop.f32.mrf.mxu0  ;;  %v5105_v48 = vpop.f32.mrf.mxu1 }
 0x17e   : > { %v7436_v36 = vadd.f32 %v2756_v52, %v2586_v22  ;;  %v2589_v40 = vadd.f32 %v5105_v48, %v7314_v50 }
 0x17f   : > { %v5185_v17 = vpop.f32.mrf.mxu0  ;;  %v2493_v61 = vpop.f32.mrf.mxu1 }
 0x180   : > { %v7439_v46 = vadd.f32 %v5185_v17, %v2589_v40  ;;  %v2588_v30 = vadd.f32 %v2493_v61, %v7319_v24 }
 0x181   : > { %v2766_v56 = vpop.f32.mrf.mxu0  ;;  %v5108_v60 = vpop.f32.mrf.mxu1 }
 0x182   : > { %v7442_v33 = vadd.f32 %v2766_v56, %v2588_v30  ;;  %v2591_v59 = vadd.f32 %v5108_v60, %v7324_v15 }
 0x183   : > { %v5188_v0 = vpop.f32.mrf.mxu0  ;;  %v2503_v62 = vpop.f32.mrf.mxu1 }
 0x184   : > { %v7445_v28 = vadd.f32 %v5188_v0, %v2591_v59  ;;  %v2590_v14 = vadd.f32 %v2503_v62, %v7329_v31 }
 0x185   : > { %v2776_v41 = vpop.f32.mrf.mxu0  ;;  %v5111_v50 = vpop.f32.mrf.mxu1 }
 0x186   : > { %8104 = vst [vmem:[#allocation35_spill] sm:$0xff] %v7445_v28  ;;  %v7448_v3 = vadd.f32 %v2776_v41, %v2590_v14  ;;  %v2593_v34 = vadd.f32 %v5111_v50, %v7334_v26 }
 0x187   : > { %v5191_v58 = vpop.f32.mrf.mxu0  ;;  %v2513_v24 = vpop.f32.mrf.mxu1 }
 0x188   : > { %8105 = vst [vmem:[#allocation36_spill] sm:$0xff] %v7448_v3  ;;  %v7451_v12 = vadd.f32 %v5191_v58, %v2593_v34  ;;  %v2592_v39 = vadd.f32 %v2513_v24, %v7340_v19 }
 0x189   : > { %v2786_v29 = vpop.f32.mrf.mxu0  ;;  %v5114_v15 = vpop.f32.mrf.mxu1 }
 0x18a   : > { %8106 = vst [vmem:[#allocation37_spill] sm:$0xff] %v7451_v12  ;;  %v7454_v37 = vadd.f32 %v2786_v29, %v2592_v39  ;;  %v2595_v20 = vadd.f32 %v5114_v15, %v7345_v21 }
 0x18b   : > { %v5194_v11 = vpop.f32.mrf.mxu0  ;;  %v2523_v31 = vpop.f32.mrf.mxu1 }
 0x18c   : > { %8107 = vst [vmem:[#allocation38_spill] sm:$0xff] %v7454_v37  ;;  %v7457_v63 = vadd.f32 %v5194_v11, %v2595_v20  ;;  %v2594_v4 = vadd.f32 %v2523_v31, %v7350_v47 }
 0x18d   : > { %v2796_v13 = vpop.f32.mrf.mxu0  ;;  %v5117_v26 = vpop.f32.mrf.mxu1 }
 0x18e   : > { %8108 = vst [vmem:[#allocation39_spill] sm:$0xff] %v7457_v63  ;;  %v7460_v32 = vadd.f32 %v2796_v13, %v2594_v4  ;;  %v2597_v18 = vadd.f32 %v5117_v26, %v7355_v5 }
 0x18f   : > { %v5197_v2 = vpop.f32.mrf.mxu0  ;;  %v2533_v19 = vpop.f32.mrf.mxu1 }
 0x190   : > { %8109 = vst [vmem:[#allocation40_spill] sm:$0xff] %v7460_v32  ;;  %v7463_v22 = vadd.f32 %v5197_v2, %v2597_v18  ;;  %v2596_v52 = vadd.f32 %v2533_v19, %v7360_v7 }
 0x191   : > { %v2806_v48 = vpop.f32.mrf.mxu0  ;;  %v5120_v21 = vpop.f32.mrf.mxu1 }
 0x192   : > { %8110 = vst [vmem:[#allocation41_spill] sm:$0xff] %v7463_v22  ;;  %v7466_v40 = vadd.f32 %v2806_v48, %v2596_v52  ;;  %v2599_v17 = vadd.f32 %v5120_v21, %v7365_v49 }
 0x193   : > { %v5200_v61 = vpop.f32.mrf.mxu0  ;;  %v2543_v47 = vpop.f32.mrf.mxu1 }
 0x194   : > { %8111 = vst [vmem:[#allocation42_spill] sm:$0xff] %v7466_v40  ;;  %v7469_v30 = vadd.f32 %v5200_v61, %v2599_v17  ;;  %v2598_v56 = vadd.f32 %v2543_v47, %v7371_v25 }
 0x195   : > { %v2816_v60 = vpop.f32.mrf.mxu0  ;;  %v5123_v5 = vpop.f32.mrf.mxu1 }
 0x196   : > { %8112 = vst [vmem:[#allocation43_spill] sm:$0xff] %v7469_v30  ;;  %v7472_v59 = vadd.f32 %v2816_v60, %v2598_v56  ;;  %v2601_v0 = vadd.f32 %v5123_v5, %v7377_v44 }
 0x197   : > { %v5203_v62 = vpop.f32.mrf.mxu0  ;;  %v2553_v7 = vpop.f32.mrf.mxu1 }
 0x198   : > { %8113 = vst [vmem:[#allocation45_spill] sm:$0xff] %v7472_v59  ;;  %v7475_v14 = vadd.f32 %v5203_v62, %v2601_v0  ;;  %v2600_v41 = vadd.f32 %v2553_v7, %v7382_v6 }
 0x199   : > { %v2826_v50 = vpop.f32.mrf.mxu0  ;;  %v5126_v49 = vpop.f32.mrf.mxu1 }
 0x19a   : > { %8114 = vst [vmem:[#allocation44_spill] sm:$0xff] %v7475_v14  ;;  %v7478_v34 = vadd.f32 %v2826_v50, %v2600_v41  ;;  %v2603_v58 = vadd.f32 %v5126_v49, %v7385_v53 }
 0x19b   : > { %v5206_v24 = vpop.f32.mrf.mxu0  ;;  %v2563_v25 = vpop.f32.mrf.mxu1 }
 0x19c   : > { %8115 = vst [vmem:[#allocation46_spill] sm:$0xff] %v7478_v34  ;;  %v7481_v39 = vadd.f32 %v5206_v24, %v2603_v58  ;;  %v2602_v29 = vadd.f32 %v2563_v25, %v7388_v27 }
 0x19d   : > { %v2836_v15 = vpop.f32.mrf.mxu0  ;;  %v5241_v44 = vpop.f32.mrf.mxu1 }
 0x19e   : > { %8116 = vst [vmem:[#allocation47_spill] sm:$0xff] %v7481_v39  ;;  %v7484_v20 = vadd.f32 %v2836_v15, %v2602_v29 }
 0x19f   : > { %v7486_v11 = vpop.f32.mrf.mxu0  ;;  %v2959_v31 = vpop.f32.mrf.mxu1 }
 0x1a0   : > { %8117 = vst [vmem:[#allocation54_spill] sm:$0xff] %v7484_v20 }
 0x1a1   : > { %v7488_v6 = vpop.f32.mrf.mxu0  ;;  %v5244_v4 = vpop.f32.mrf.mxu1 }
 0x1a3   : > { %v7490_v13 = vpop.f32.mrf.mxu0  ;;  %v7492_v26 = vpop.f32.mrf.mxu1 }
 0x1a5   : > { %v7494_v53 = vpop.f32.mrf.mxu0  ;;  %v7496_v18 = vpop.f32.mrf.mxu1 }
 0x1a7   : > { %v7498_v2 = vpop.f32.mrf.mxu0  ;;  %v7500_v27 = vpop.f32.mrf.mxu1 }
 0x1a9   : > { %v7502_v19 = vpop.f32.mrf.mxu0  ;;  %v7504_v52 = vpop.f32.mrf.mxu1 }
 0x1ab   : > { %v7506_v48 = vpop.f32.mrf.mxu0  ;;  %v7508_v21 = vpop.f32.mrf.mxu1 }
 0x1ad   : > { %v7510_v17 = vpop.f32.mrf.mxu0  ;;  %v7512_v61 = vpop.f32.mrf.mxu1 }
 0x1af   : > { %v7514_v47 = vpop.f32.mrf.mxu0  ;;  %v7516_v56 = vpop.f32.mrf.mxu1 }
 0x1b1   : > { %v7518_v60 = vpop.f32.mrf.mxu0  ;;  %v7520_v5 = vpop.f32.mrf.mxu1 }
 0x1b3   : > { %v7522_v0 = vpop.f32.mrf.mxu0  ;;  %v7524_v62 = vpop.f32.mrf.mxu1 }
 0x1b5   : > { %v7526_v7 = vpop.f32.mrf.mxu0  ;;  %v7528_v41 = vpop.f32.mrf.mxu1 }
 0x1b7   : > { %v7530_v50 = vpop.f32.mrf.mxu0  ;;  %v7532_v49 = vpop.f32.mrf.mxu1 }
 0x1b9   : > { %v7534_v58 = vpop.f32.mrf.mxu0  ;;  %v7536_v24 = vpop.f32.mrf.mxu1 }
 0x1bb   : > { %v7538_v25 = vpop.f32.mrf.mxu0  ;;  %v7540_v29 = vpop.f32.mrf.mxu1 }
 0x1bd   : > { %v7542_v15 = vpop.f32.mrf.mxu0  ;;  %v7544_v20 = vpop.f32.mrf.mxu1 }
 0x1bf   : > { %v7546_v39 = vpop.f32.mrf.mxu0  ;;  %v7548_v34 = vpop.f32.mrf.mxu1 }
 0x1c1   : > { %v7550_v14 = vpop.f32.mrf.mxu0  ;;  %v7552_v59 = vpop.f32.mrf.mxu1 }
 0x1c2   : > { %8118 = vst [vmem:[#allocation16_spill] sm:$0xff] %v7550_v14  ;;  %8119 = vst [vmem:[#allocation28_spill] sm:$0xff] %v7552_v59 }
 0x1c3   : > { %v7554_v30 = vpop.f32.mrf.mxu0  ;;  %v7556_v40 = vpop.f32.mrf.mxu1 }
 0x1c4   : > { %8120 = vst [vmem:[#allocation2_spill] sm:$0xff] %v7554_v30  ;;  %8121 = vst [vmem:[#allocation3_spill] sm:$0xff] %v7556_v40 }
 0x1c5   : > { %v7558_v22 = vpop.f32.mrf.mxu0  ;;  %v7560_v32 = vpop.f32.mrf.mxu1 }
 0x1c6   : > { %8122 = vst [vmem:[#allocation4_spill] sm:$0xff] %v7558_v22  ;;  %8123 = vst [vmem:[#allocation5_spill] sm:$0xff] %v7560_v32 }
 0x1c7   : > { %v7562_v63 = vpop.f32.mrf.mxu0  ;;  %v7564_v37 = vpop.f32.mrf.mxu1 }
 0x1c8   : > { %8124 = vst [vmem:[#allocation6_spill] sm:$0xff] %v7562_v63  ;;  %8125 = vst [vmem:[#allocation7_spill] sm:$0xff] %v7564_v37 }
 0x1c9   : > { %v7566_v12 = vpop.f32.mrf.mxu0  ;;  %v7568_v3 = vpop.f32.mrf.mxu1 }
 0x1ca   : > { %8126 = vst [vmem:[#allocation12_spill] sm:$0xff] %v7566_v12  ;;  %8127 = vst [vmem:[#allocation8_spill] sm:$0xff] %v7568_v3 }
 0x1cb   : > { %v7570_v28 = vpop.f32.mrf.mxu0  ;;  %v7572_v14 = vpop.f32.mrf.mxu1 }
 0x1cc   : > { %8128 = vst [vmem:[#allocation48_spill] sm:$0xff] %v7570_v28  ;;  %8129 = vst [vmem:[#allocation14_spill] sm:$0xff] %v7572_v14 }
 0x1cd   : > { %v7574_v59 = vpop.f32.mrf.mxu0  ;;  %v7576_v30 = vpop.f32.mrf.mxu1 }
 0x1ce   : > { %8130 = vst [vmem:[#allocation49_spill] sm:$0xff] %v7574_v59  ;;  %8131 = vst [vmem:[#allocation9_spill] sm:$0xff] %v7576_v30 }
 0x1cf   : > { %v7578_v40 = vpop.f32.mrf.mxu0  ;;  %v7580_v22 = vpop.f32.mrf.mxu1 }
 0x1d0   : > { %8132 = vst [vmem:[#allocation18_spill] sm:$0xff] %v7578_v40  ;;  %8133 = vst [vmem:[#allocation11_spill] sm:$0xff] %v7580_v22  ;;  %v3119_v40 = vadd.f32 %v5241_v44, %v7391_v42  ;;  %v3120_v42 = vadd.f32 %v7492_v26, %v7400_v9 }
 0x1d1   : > { %v7582_v32 = vpop.f32.mrf.mxu0  ;;  %v7584_v63 = vpop.f32.mrf.mxu1 }
 0x1d2   : > { %8134 = vst [vmem:[#allocation50_spill] sm:$0xff] %v7582_v32  ;;  %8135 = vst [vmem:[#allocation20_spill] sm:$0xff] %v7584_v63  ;;  %v3118_v63 = vadd.f32 %v2959_v31, %v7394_v43  ;;  %v3123_v43 = vadd.f32 %v7496_v18, %v7403_v10  ;;  %v3122_v10 = vadd.f32 %v7500_v27, %v7406_v35 }
 0x1d3   : > { %v7586_v37 = vpop.f32.mrf.mxu0  ;;  %v7588_v12 = vpop.f32.mrf.mxu1  ;;  %v3124_v35 = vadd.f32 %v7508_v21, %v7412_v55 }
 0x1d4   : > { %8136 = vst [vmem:[#allocation52_spill] sm:$0xff] %v7586_v37  ;;  %8137 = vst [vmem:[#allocation13_spill] sm:$0xff] %v7588_v12  ;;  %v3396_v26 = vadd.f32 %v7498_v2, %v3123_v43 }
 0x1d5   : > { %v7590_v3 = vpop.f32.mrf.mxu0  ;;  %v7592_v28 = vpop.f32.mrf.mxu1 }
 0x1d6   : > { %8138 = vst [vmem:[#allocation22_spill] sm:$0xff] %v7590_v3  ;;  %8139 = vst [vmem:[#allocation15_spill] sm:$0xff] %v7592_v28  ;;  %v3392_v3 = vadd.f32 %v7486_v11, %v3119_v40  ;;  %v3121_v28 = vadd.f32 %v5244_v4, %v7397_v54 }
 0x1d7   : > { %v7594_v14 = vpop.f32.mrf.mxu0  ;;  %v7596_v59 = vpop.f32.mrf.mxu1 }
 0x1d8   : > { %8140 = vst [vmem:[#allocation53_spill] sm:$0xff] %v7594_v14  ;;  %8141 = vst [vmem:[#allocation24_spill] sm:$0xff] %v7596_v59  ;;  %v3391_v59 = vadd.f32 %v7488_v6, %v3118_v63  ;;  %v3394_v11 = vadd.f32 %v7490_v13, %v3121_v28 }
 0x1d9   : > { %v7599_v22 = vpop.f32.mrf.mxu0  ;;  %v7601_v32 = vpop.f32.mrf.mxu1 }
 0x1db   : > { %v7604_v37 = vpop.f32.mrf.mxu0  ;;  %v7606_v12 = vpop.f32.mrf.mxu1 }
 0x1dc   : > { %8142 = vst [vmem:[#allocation19_spill] sm:$0xff] %v7604_v37 }
 0x1dd   : > { %v7610_v14 = vpop.f32.mrf.mxu0  ;;  %v5401_v30 = vpop.f32.mrf.mxu1 }
 0x1de   : > { %8143 = vst [vmem:[#allocation26_spill] sm:$0xff] %v7610_v14  ;;  %v3665_v44 = vadd.f32 %v5401_v30, %v3392_v3  ;;  %v3393_v3 = vadd.f32 %v7494_v53, %v3120_v42  ;;  %v3125_v53 = vadd.f32 %v7504_v52, %v7409_v8 }
 0x1df   : > { %v5481_v54 = vpop.f32.mrf.mxu0  ;;  %v3505_v40 = vpop.f32.mrf.mxu1 }
 0x1e0   : > { %v3938_v63 = vadd.f32 %v5481_v54, %v3665_v44  ;;  %v3664_v31 = vadd.f32 %v3505_v40, %v3391_v59  ;;  %v3395_v54 = vadd.f32 %v7502_v19, %v3122_v10  ;;  %v3398_v55 = vadd.f32 %v7506_v48, %v3125_v53 }
 0x1e1   : > { %v3778_v6 = vpop.f32.mrf.mxu0  ;;  %v5404_v9 = vpop.f32.mrf.mxu1  ;;  %v3397_v19 = vadd.f32 %v7510_v17, %v3124_v35 }
 0x1e2   : > { %3970 = vst [vmem:[%s7622_s14 + $0x8] sm:$0xff] %v3938_v63  ;;  %v3937_v30 = vadd.f32 %v3778_v6, %v3664_v31  ;;  %v3667_v4 = vadd.f32 %v5404_v9, %v3394_v11  ;;  %v4040_v18 = vmul.f32 %v3938_v63, %v3938_v63  ;;  %v3127_v11 = vadd.f32 %v7512_v61, %v7415_v23 }
 0x1e3   : > { %v5484_v14 = vpop.f32.mrf.mxu0  ;;  %v3515_v37 = vpop.f32.mrf.mxu1  ;;  %v3126_v61 = vadd.f32 %v7516_v56, %v7418_v1 }
 0x1e4   : > { %3969 = vst [vmem:[%s7622_s14] sm:$0xff] %v3937_v30  ;;  %v4001_v28 = vadd.f32 %v3938_v63, %v3937_v30  ;;  %v4039_v59 = vmul.f32 %v3937_v30, %v3937_v30  ;;  %v3940_v13 = vadd.f32 %v5484_v14, %v3667_v4  ;;  %v3666_v44 = vadd.f32 %v3515_v37, %v3393_v3 }
 0x1e5   : > { %v3788_v27 = vpop.f32.mrf.mxu0  ;;  %v5407_v42 = vpop.f32.mrf.mxu1  ;;  %v3400_v23 = vadd.f32 %v7514_v47, %v3127_v11  ;;  %v3129_v4 = vadd.f32 %v7520_v5, %v7421_v51 }
 0x1e6   : > { %v4071_v2 = vadd.f32 %v4040_v18, %v4039_v59  ;;  %3972 = vst [vmem:[%s7622_s14 + $0x18] sm:$0xff] %v3940_v13  ;;  %v3939_v43 = vadd.f32 %v3788_v27, %v3666_v44  ;;  %v3669_v40 = vadd.f32 %v5407_v42, %v3396_v26  ;;  %v4042_v9 = vmul.f32 %v3940_v13, %v3940_v13 }
 0x1e7   : > { %v5487_v14 = vpop.f32.mrf.mxu0  ;;  %v3525_v37 = vpop.f32.mrf.mxu1  ;;  %v3399_v42 = vadd.f32 %v7518_v60, %v3126_v61 }
 0x1e8   : > { %3971 = vst [vmem:[%s7622_s14 + $0x10] sm:$0xff] %v3939_v43  ;;  %v4002_v63 = vadd.f32 %v4001_v28, %v3939_v43  ;;  %v4041_v8 = vmul.f32 %v3939_v43, %v3939_v43  ;;  %v3942_v52 = vadd.f32 %v5487_v14, %v3669_v40  ;;  %v3668_v31 = vadd.f32 %v3525_v37, %v3395_v54 }
 0x1e9   : > { %v3798_v21 = vpop.f32.mrf.mxu0  ;;  %v5410_v6 = vpop.f32.mrf.mxu1  ;;  %v3402_v54 = vadd.f32 %v7522_v0, %v3129_v4 }
 0x1ea   : > { %v4072_v3 = vadd.f32 %v4071_v2, %v4041_v8  ;;  %3974 = vst [vmem:[%s7622_s14 + $0x28] sm:$0xff] %v3942_v52  ;;  %v3941_v10 = vadd.f32 %v3798_v21, %v3668_v31  ;;  %v4003_v30 = vadd.f32 %v4002_v63, %v3940_v13  ;;  %v3671_v26 = vadd.f32 %v5410_v6, %v3398_v55 }
 0x1eb   : > { %v5490_v18 = vpop.f32.mrf.mxu0  ;;  %v3535_v48 = vpop.f32.mrf.mxu1  ;;  %v3128_v13 = vadd.f32 %v7524_v62, %v7424_v57  ;;  %v4044_v47 = vmul.f32 %v3942_v52, %v3942_v52  ;;  %v3131_v2 = vadd.f32 %v7528_v41, %v7427_v16  ;;  %v3130_v63 = vadd.f32 %v7532_v49, %v7430_v45 }
 0x1ec   : > { %3973 = vst [vmem:[%s7622_s14 + $0x20] sm:$0xff] %v3941_v10  ;;  %v4004_v17 = vadd.f32 %v4003_v30, %v3941_v10  ;;  %v4043_v28 = vmul.f32 %v3941_v10, %v3941_v10  ;;  %v4073_v59 = vadd.f32 %v4072_v3, %v4042_v9  ;;  %v3670_v44 = vadd.f32 %v3535_v48, %v3397_v19 }
 0x1ed   : > { %v3944_v53 = vadd.f32 %v5490_v18, %v3671_v26  ;;  %v3808_v35 = vpop.f32.mrf.mxu0  ;;  %v5413_v1 = vpop.f32.mrf.mxu1  ;;  %v3401_v37 = vadd.f32 %v7526_v7, %v3128_v13  ;;  %v3404_v55 = vadd.f32 %v7530_v50, %v3131_v2  ;;  %v3133_v7 = vadd.f32 %v7536_v24, %v7433_v38  ;;  %v8145_v2 = vld [vmem:[#allocation28_spill] sm:$0xff] }
 0x1ee   : > { %v4074_v56 = vadd.f32 %v4073_v59, %v4043_v28  ;;  %v3943_v27 = vadd.f32 %v3808_v35, %v3670_v44  ;;  %v4005_v51 = vadd.f32 %v4004_v17, %v3942_v52  ;;  %v3673_v5 = vadd.f32 %v5413_v1, %v3400_v23 }
 0x1ef   : > { %3976 = vst [vmem:[%s7622_s14 + $0x38] sm:$0xff] %v3944_v53  ;;  %v5493_v43 = vpop.f32.mrf.mxu0  ;;  %v3545_v40 = vpop.f32.mrf.mxu1  ;;  %v4046_v52 = vmul.f32 %v3944_v53, %v3944_v53  ;;  %v3403_v61 = vadd.f32 %v7534_v58, %v3130_v63  ;;  %v3132_v50 = vadd.f32 %v7540_v29, %v7436_v36  ;;  %v3135_v38 = vadd.f32 %v7544_v20, %v7439_v46  ;;  %v8148_v63 = vld [vmem:[#allocation3_spill] sm:$0xff] }
 0x1f0   : > { %3975 = vst [vmem:[%s7622_s14 + $0x30] sm:$0xff] %v3943_v27  ;;  %v4006_v57 = vadd.f32 %v4005_v51, %v3943_v27  ;;  %v4045_v62 = vmul.f32 %v3943_v27, %v3943_v27  ;;  %v4075_v11 = vadd.f32 %v4074_v56, %v4044_v47  ;;  %v3946_v14 = vadd.f32 %v5493_v43, %v3673_v5 }
 0x1f1   : > { %v3672_v60 = vadd.f32 %v3545_v40, %v3399_v42  ;;  %v3818_v0 = vpop.f32.mrf.mxu0  ;;  %v5416_v8 = vpop.f32.mrf.mxu1  ;;  %v3406_v59 = vadd.f32 %v7538_v25, %v3133_v7  ;;  %v3405_v35 = vadd.f32 %v7542_v15, %v3132_v50  ;;  %v3134_v46 = vadd.f32 %v7548_v34, %v7442_v33  ;;  %v8151_v7 = vld [vmem:[#allocation2_spill] sm:$0xff]  ;;  %v8152_v50 = vld [vmem:[#allocation4_spill] sm:$0xff] }
 0x1f2   : > { %v4076_v16 = vadd.f32 %v4075_v11, %v4045_v62  ;;  %3978 = vst [vmem:[%s7622_s14 + $0x48] sm:$0xff] %v3946_v14  ;;  %v4007_v41 = vadd.f32 %v4006_v57, %v3944_v53  ;;  %v3675_v31 = vadd.f32 %v5416_v8, %v3402_v54  ;;  %v4048_v24 = vmul.f32 %v3946_v14, %v3946_v14  ;;  %v8144_v54 = vld [vmem:[#allocation35_spill] sm:$0xff] }
 0x1f3   : > { %v3945_v19 = vadd.f32 %v3818_v0, %v3672_v60  ;;  %v5496_v21 = vpop.f32.mrf.mxu0  ;;  %v3555_v6 = vpop.f32.mrf.mxu1  ;;  %v3408_v56 = vadd.f32 %v7546_v39, %v3135_v38  ;;  %v3137_v43 = vadd.f32 %v8145_v2, %v8144_v54  ;;  %v8154_v38 = vld [vmem:[#allocation7_spill] sm:$0xff]  ;;  %v8160_v54 = vld [vmem:[#allocation14_spill] sm:$0xff] }
 0x1f4   : > { %v4077_v9 = vadd.f32 %v4076_v16, %v4046_v52  ;;  %v3948_v45 = vadd.f32 %v5496_v21, %v3675_v31  ;;  %v3674_v49 = vadd.f32 %v3555_v6, %v3401_v37  ;;  %v8147_v37 = vld [vmem:[#allocation36_spill] sm:$0xff]  ;;  %v8149_v52 = vld [vmem:[#allocation37_spill] sm:$0xff] }
 0x1f5   : > { %3977 = vst [vmem:[%s7622_s14 + $0x40] sm:$0xff] %v3945_v19  ;;  %v4008_v3 = vadd.f32 %v4007_v41, %v3945_v19  ;;  %v4047_v10 = vmul.f32 %v3945_v19, %v3945_v19  ;;  %v3828_v30 = vpop.f32.mrf.mxu0  ;;  %v5419_v23 = vpop.f32.mrf.mxu1  ;;  %v3136_v60 = vadd.f32 %v8148_v63, %v8147_v37  ;;  %v8150_v16 = vld [vmem:[#allocation5_spill] sm:$0xff]  ;;  %v8163_v37 = vld [vmem:[#allocation48_spill] sm:$0xff] }
 0x1f6   : > { %3980 = vst [vmem:[%s7622_s14 + $0x58] sm:$0xff] %v3948_v45  ;;  %v3947_v4 = vadd.f32 %v3828_v30, %v3674_v49  ;;  %v3677_v26 = vadd.f32 %v5419_v23, %v3404_v55  ;;  %v4050_v25 = vmul.f32 %v3948_v45, %v3948_v45  ;;  %v3139_v41 = vadd.f32 %v8150_v16, %v8149_v52 }
 0x1f7   : > { %v4078_v18 = vadd.f32 %v4077_v9, %v4047_v10  ;;  %v4009_v48 = vadd.f32 %v4008_v3, %v3946_v14  ;;  %v5499_v17 = vpop.f32.mrf.mxu0  ;;  %v3565_v28 = vpop.f32.mrf.mxu1  ;;  %v8146_v14 = vld [vmem:[#allocation16_spill] sm:$0xff]  ;;  %v3410_v9 = vadd.f32 %v8151_v7, %v3137_v43 }
 0x1f8   : > { %3979 = vst [vmem:[%s7622_s14 + $0x50] sm:$0xff] %v3947_v4  ;;  %v4049_v44 = vmul.f32 %v3947_v4, %v3947_v4  ;;  %v3950_v58 = vadd.f32 %v5499_v17, %v3677_v26  ;;  %v3676_v13 = vadd.f32 %v3565_v28, %v3403_v61  ;;  %v3407_v39 = vadd.f32 %v8146_v14, %v3134_v46  ;;  %v8153_v26 = vld [vmem:[#allocation38_spill] sm:$0xff] }
 0x1f9   : > { %v4010_v47 = vadd.f32 %v4009_v48, %v3947_v4  ;;  %v4079_v36 = vadd.f32 %v4078_v18, %v4048_v24  ;;  %v3838_v29 = vpop.f32.mrf.mxu0  ;;  %v5422_v53 = vpop.f32.mrf.mxu1  ;;  %v3409_v4 = vadd.f32 %v8152_v50, %v3136_v60  ;;  %v3138_v24 = vadd.f32 %v8154_v38, %v8153_v26  ;;  %v8155_v17 = vld [vmem:[#allocation6_spill] sm:$0xff]  ;;  %v8169_v26 = vld [vmem:[#allocation20_spill] sm:$0xff] }
 0x1fa   : > { %3982 = vst [vmem:[%s7622_s14 + $0x68] sm:$0xff] %v3950_v58  ;;  %v3949_v20 = vadd.f32 %v3838_v29, %v3676_v13  ;;  %v3679_v1 = vadd.f32 %v5422_v53, %v3406_v59  ;;  %v4052_v31 = vmul.f32 %v3950_v58, %v3950_v58  ;;  %v3412_v28 = vadd.f32 %v8155_v17, %v3139_v41  ;;  %v8157_v29 = vld [vmem:[#allocation8_spill] sm:$0xff] }
 0x1fb   : > { %v4080_v27 = vadd.f32 %v4079_v36, %v4049_v44  ;;  %v4011_v51 = vadd.f32 %v4010_v47, %v3948_v45  ;;  %v5502_v5 = vpop.f32.mrf.mxu0  ;;  %v3575_v42 = vpop.f32.mrf.mxu1  ;;  %v8156_v36 = vld [vmem:[#allocation39_spill] sm:$0xff] }
 0x1fc   : > { %3981 = vst [vmem:[%s7622_s14 + $0x60] sm:$0xff] %v3949_v20  ;;  %v4051_v40 = vmul.f32 %v3949_v20, %v3949_v20  ;;  %v3952_v15 = vadd.f32 %v5502_v5, %v3679_v1  ;;  %v3678_v57 = vadd.f32 %v3575_v42, %v3405_v35  ;;  %v3141_v53 = vadd.f32 %v8157_v29, %v8156_v36  ;;  %v8159_v42 = vld [vmem:[#allocation40_spill] sm:$0xff]  ;;  %v8172_v36 = vld [vmem:[#allocation13_spill] sm:$0xff] }
 0x1fd   : > { %v4012_v62 = vadd.f32 %v4011_v51, %v3949_v20  ;;  %v4081_v33 = vadd.f32 %v4080_v27, %v4050_v25  ;;  %v3848_v34 = vpop.f32.mrf.mxu0  ;;  %v5425_v11 = vpop.f32.mrf.mxu1  ;;  %v8158_v51 = vld [vmem:[#allocation12_spill] sm:$0xff]  ;;  %v3140_v2 = vadd.f32 %v8160_v54, %v8159_v42 }
 0x1fe   : > { %3984 = vst [vmem:[%s7622_s14 + $0x78] sm:$0xff] %v3952_v15  ;;  %v3951_v0 = vadd.f32 %v3848_v34, %v3678_v57  ;;  %v3681_v8 = vadd.f32 %v5425_v11, %v3408_v56  ;;  %v4054_v59 = vmul.f32 %v3952_v15, %v3952_v15  ;;  %v3411_v5 = vadd.f32 %v8158_v51, %v3138_v24  ;;  %v8162_v57 = vld [vmem:[#allocation9_spill] sm:$0xff]  ;;  %v8175_v42 = vld [vmem:[#allocation52_spill] sm:$0xff] }
 0x1ff   : > { %v4082_v55 = vadd.f32 %v4081_v33, %v4051_v40  ;;  %v4013_v19 = vadd.f32 %v4012_v62, %v3950_v58  ;;  %v5505_v21 = vpop.f32.mrf.mxu0  ;;  %v3585_v6 = vpop.f32.mrf.mxu1  ;;  %v3414_v63 = vadd.f32 %v8163_v37, %v3141_v53 }
 0x200   : > { %3983 = vst [vmem:[%s7622_s14 + $0x70] sm:$0xff] %v3951_v0  ;;  %v4053_v45 = vmul.f32 %v3951_v0, %v3951_v0  ;;  %v3954_v49 = vadd.f32 %v5505_v21, %v3681_v8  ;;  %v3680_v3 = vadd.f32 %v3585_v6, %v3407_v39  ;;  %v8165_v21 = vld [vmem:[#allocation42_spill] sm:$0xff]  ;;  %v8166_v6 = vld [vmem:[#allocation11_spill] sm:$0xff] }
 0x201   : > { %v4014_v10 = vadd.f32 %v4013_v19, %v3951_v0  ;;  %v4083_v30 = vadd.f32 %v4082_v55, %v4052_v31  ;;  %v3858_v23 = vpop.f32.mrf.mxu0  ;;  %v5428_v61 = vpop.f32.mrf.mxu1  ;;  %v8164_v55 = vld [vmem:[#allocation49_spill] sm:$0xff]  ;;  %v3142_v7 = vadd.f32 %v8166_v6, %v8165_v21 }
 0x202   : > { %3986 = vst [vmem:[%s7622_s14 + $0x88] sm:$0xff] %v3954_v49  ;;  %v3953_v18 = vadd.f32 %v3858_v23, %v3680_v3  ;;  %v3683_v48 = vadd.f32 %v5428_v61, %v3410_v9  ;;  %v4056_v33 = vmul.f32 %v3954_v49, %v3954_v49  ;;  %v3413_v19 = vadd.f32 %v8164_v55, %v3140_v2 }
 0x203   : > { %v4084_v44 = vadd.f32 %v4083_v30, %v4053_v45  ;;  %v4015_v58 = vadd.f32 %v4014_v10, %v3952_v15  ;;  %v5508_v13 = vpop.f32.mrf.mxu0  ;;  %v3595_v47 = vpop.f32.mrf.mxu1  ;;  %v8161_v15 = vld [vmem:[#allocation41_spill] sm:$0xff] }
 0x204   : > { %3985 = vst [vmem:[%s7622_s14 + $0x80] sm:$0xff] %v3953_v18  ;;  %v4055_v35 = vmul.f32 %v3953_v18, %v3953_v18  ;;  %v3956_v46 = vadd.f32 %v5508_v13, %v3683_v48  ;;  %v3682_v20 = vadd.f32 %v3595_v47, %v3409_v4  ;;  %v3143_v62 = vadd.f32 %v8162_v57, %v8161_v15  ;;  %v8168_v4 = vld [vmem:[#allocation43_spill] sm:$0xff]  ;;  %v8171_v47 = vld [vmem:[#allocation45_spill] sm:$0xff] }
 0x205   : > { %v4016_v1 = vadd.f32 %v4015_v58, %v3953_v18  ;;  %v4085_v56 = vadd.f32 %v4084_v44, %v4054_v59  ;;  %v3868_v25 = vpop.f32.mrf.mxu0  ;;  %v5431_v27 = vpop.f32.mrf.mxu1  ;;  %v3145_v38 = vadd.f32 %v8169_v26, %v8168_v4  ;;  %v8170_v58 = vld [vmem:[#allocation50_spill] sm:$0xff]  ;;  %v3144_v29 = vadd.f32 %v8172_v36, %v8171_v47 }
 0x206   : > { %3988 = vst [vmem:[%s7622_s14 + $0x98] sm:$0xff] %v3956_v46  ;;  %v3955_v43 = vadd.f32 %v3868_v25, %v3682_v20  ;;  %v3685_v40 = vadd.f32 %v5431_v27, %v3412_v28  ;;  %v4058_v10 = vmul.f32 %v3956_v46, %v3956_v46  ;;  %v3415_v13 = vadd.f32 %v8170_v58, %v3142_v7  ;;  %v8174_v20 = vld [vmem:[#allocation15_spill] sm:$0xff]  ;;  %v8183_v47 = vld [vmem:[#allocation26_spill] sm:$0xff] }
 0x207   : > { %v4086_v34 = vadd.f32 %v4085_v56, %v4055_v35  ;;  %v4017_v11 = vadd.f32 %v4016_v1, %v3954_v49  ;;  %v5511_v14 = vpop.f32.mrf.mxu0  ;;  %v3605_v39 = vpop.f32.mrf.mxu1  ;;  %v8167_v49 = vld [vmem:[#allocation18_spill] sm:$0xff]  ;;  %v3418_v54 = vadd.f32 %v8175_v42, %v3145_v38 }
 0x208   : > { %3987 = vst [vmem:[%s7622_s14 + $0x90] sm:$0xff] %v3955_v43  ;;  %v4057_v60 = vmul.f32 %v3955_v43, %v3955_v43  ;;  %v3958_v0 = vadd.f32 %v5511_v14, %v3685_v40  ;;  %v3684_v8 = vadd.f32 %v3605_v39, %v3411_v5  ;;  %v3416_v3 = vadd.f32 %v8167_v49, %v3143_v62  ;;  %v8177_v14 = vld [vmem:[#allocation46_spill] sm:$0xff]  ;;  %v8178_v39 = vld [vmem:[#allocation24_spill] sm:$0xff] }
 0x209   : > { %v4018_v52 = vadd.f32 %v4017_v11, %v3955_v43  ;;  %v4087_v16 = vadd.f32 %v4086_v34, %v4056_v33  ;;  %v3878_v41 = vpop.f32.mrf.mxu0  ;;  %v5434_v31 = vpop.f32.mrf.mxu1  ;;  %v8176_v34 = vld [vmem:[#allocation22_spill] sm:$0xff]  ;;  %v3146_v37 = vadd.f32 %v8178_v39, %v8177_v14 }
 0x20a   : > { %3990 = vst [vmem:[%s7622_s14 + $0xa8] sm:$0xff] %v3958_v0  ;;  %v3957_v9 = vadd.f32 %v3878_v41, %v3684_v8  ;;  %v3687_v45 = vadd.f32 %v5434_v31, %v3414_v63  ;;  %v4060_v56 = vmul.f32 %v3958_v0, %v3958_v0  ;;  %v3417_v11 = vadd.f32 %v8176_v34, %v3144_v29 }
 0x20b   : > { %v4088_v30 = vadd.f32 %v4087_v16, %v4057_v60  ;;  %v4019_v23 = vadd.f32 %v4018_v52, %v3956_v46  ;;  %v5514_v61 = vpop.f32.mrf.mxu0  ;;  %v3615_v50 = vpop.f32.mrf.mxu1  ;;  %v8173_v46 = vld [vmem:[#allocation44_spill] sm:$0xff] }
 0x20c   : > { %3989 = vst [vmem:[%s7622_s14 + $0xa0] sm:$0xff] %v3957_v9  ;;  %v4059_v24 = vmul.f32 %v3957_v9, %v3957_v9  ;;  %v3960_v18 = vadd.f32 %v5514_v61, %v3687_v45  ;;  %v3686_v48 = vadd.f32 %v3615_v50, %v3413_v19  ;;  %v3147_v1 = vadd.f32 %v8174_v20, %v8173_v46  ;;  %v8180_v19 = vld [vmem:[#allocation47_spill] sm:$0xff] }
 0x20d   : > { %v4020_v17 = vadd.f32 %v4019_v23, %v3957_v9  ;;  %v4089_v28 = vadd.f32 %v4088_v30, %v4058_v10  ;;  %v3888_v59 = vpop.f32.mrf.mxu0  ;;  %v5437_v44 = vpop.f32.mrf.mxu1  ;;  %v3149_v21 = vadd.f32 %v7601_v32, %v8180_v19  ;;  %v3419_v30 = vadd.f32 %v7599_v22, %v3146_v37  ;;  %v8181_v23 = vld [vmem:[#allocation54_spill] sm:$0xff] }
 0x20e   : > { %3992 = vst [vmem:[%s7622_s14 + $0xb8] sm:$0xff] %v3960_v18  ;;  %v3959_v53 = vadd.f32 %v3888_v59, %v3686_v48  ;;  %v3689_v35 = vadd.f32 %v5437_v44, %v3416_v3  ;;  %v4062_v52 = vmul.f32 %v3960_v18, %v3960_v18  ;;  %v3148_v61 = vadd.f32 %v7606_v12, %v8181_v23  ;;  %v8182_v48 = vld [vmem:[#allocation19_spill] sm:$0xff] }
 0x20f   : > { %v4090_v25 = vadd.f32 %v4089_v28, %v4059_v24  ;;  %v4021_v27 = vadd.f32 %v4020_v17, %v3958_v0  ;;  %v5517_v51 = vpop.f32.mrf.mxu0  ;;  %v3625_v5 = vpop.f32.mrf.mxu1  ;;  %v8179_v0 = vld [vmem:[#allocation53_spill] sm:$0xff]  ;;  %v3422_v17 = vadd.f32 %v8182_v48, %v3149_v21 }
 0x210   : > { %3991 = vst [vmem:[%s7622_s14 + $0xb0] sm:$0xff] %v3959_v53  ;;  %v4061_v2 = vmul.f32 %v3959_v53, %v3959_v53  ;;  %v3962_v43 = vadd.f32 %v5517_v51, %v3689_v35  ;;  %v3688_v40 = vadd.f32 %v3625_v5, %v3415_v13  ;;  %v3420_v8 = vadd.f32 %v8179_v0, %v3147_v1 }
 0x211   : > { %v4022_v15 = vadd.f32 %v4021_v27, %v3959_v53  ;;  %v4091_v57 = vadd.f32 %v4090_v25, %v4060_v56  ;;  %v3898_v62 = vpop.f32.mrf.mxu0  ;;  %v5440_v33 = vpop.f32.mrf.mxu1  ;;  %v3421_v36 = vadd.f32 %v8183_v47, %v3148_v61 }
 0x212   : > { %3994 = vst [vmem:[%s7622_s14 + $0xc8] sm:$0xff] %v3962_v43  ;;  %v3961_v63 = vadd.f32 %v3898_v62, %v3688_v40  ;;  %v3691_v60 = vadd.f32 %v5440_v33, %v3418_v54  ;;  %v4064_v26 = vmul.f32 %v3962_v43, %v3962_v43 }
 0x213   : > { %v4092_v16 = vadd.f32 %v4091_v57, %v4061_v2  ;;  %v4023_v41 = vadd.f32 %v4022_v15, %v3960_v18  ;;  %v5520_v31 = vpop.f32.mrf.mxu0  ;;  %v3635_v55 = vpop.f32.mrf.mxu1 }
 0x214   : > { %3993 = vst [vmem:[%s7622_s14 + $0xc0] sm:$0xff] %v3961_v63  ;;  %v4063_v6 = vmul.f32 %v3961_v63, %v3961_v63  ;;  %v3964_v7 = vadd.f32 %v5520_v31, %v3691_v60  ;;  %v3690_v9 = vadd.f32 %v3635_v55, %v3417_v11 }
 0x215   : > { %v4024_v45 = vadd.f32 %v4023_v41, %v3961_v63  ;;  %v4093_v49 = vadd.f32 %v4092_v16, %v4062_v52  ;;  %v3908_v3 = vpop.f32.mrf.mxu0  ;;  %v5443_v10 = vpop.f32.mrf.mxu1 }
 0x216   : > { %3996 = vst [vmem:[%s7622_s14 + $0xd8] sm:$0xff] %v3964_v7  ;;  %v3963_v50 = vadd.f32 %v3908_v3, %v3690_v9  ;;  %v3693_v4 = vadd.f32 %v5443_v10, %v3420_v8  ;;  %v4066_v35 = vmul.f32 %v3964_v7, %v3964_v7 }
 0x217   : > { %v4094_v32 = vadd.f32 %v4093_v49, %v4063_v6  ;;  %v4025_v38 = vadd.f32 %v4024_v45, %v3962_v43  ;;  %v5523_v24 = vpop.f32.mrf.mxu0  ;;  %v3645_v18 = vpop.f32.mrf.mxu1 }
 0x218   : > { %3995 = vst [vmem:[%s7622_s14 + $0xd0] sm:$0xff] %v3963_v50  ;;  %v4065_v28 = vmul.f32 %v3963_v50, %v3963_v50  ;;  %v3966_v59 = vadd.f32 %v5523_v24, %v3693_v4  ;;  %v3692_v44 = vadd.f32 %v3645_v18, %v3419_v30 }
 0x219   : > { %v4026_v22 = vadd.f32 %v4025_v38, %v3963_v50  ;;  %v4095_v58 = vadd.f32 %v4094_v32, %v4064_v26  ;;  %v3918_v13 = vpop.f32.mrf.mxu0  ;;  %v5446_v12 = vpop.f32.mrf.mxu1 }
 0x21a   : > { %3998 = vst [vmem:[%s7622_s14 + $0xe8] sm:$0xff] %v3966_v59  ;;  %v3965_v29 = vadd.f32 %v3918_v13, %v3692_v44  ;;  %v3695_v53 = vadd.f32 %v5446_v12, %v3422_v17  ;;  %v4068_v43 = vmul.f32 %v3966_v59, %v3966_v59 }
 0x21b   : > { %v4096_v46 = vadd.f32 %v4095_v58, %v4065_v28  ;;  %v4027_v20 = vadd.f32 %v4026_v22, %v3964_v7  ;;  %v5526_v1 = vpop.f32.mrf.mxu0  ;;  %v3655_v56 = vpop.f32.mrf.mxu1 }
 0x21c   : > { %3997 = vst [vmem:[%s7622_s14 + $0xe0] sm:$0xff] %v3965_v29  ;;  %v4067_v25 = vmul.f32 %v3965_v29, %v3965_v29  ;;  %v3968_v27 = vadd.f32 %v5526_v1, %v3695_v53  ;;  %v3694_v51 = vadd.f32 %v3655_v56, %v3421_v36 }
 0x21d   : > { %v4028_v5 = vadd.f32 %v4027_v20, %v3965_v29  ;;  %v4097_v42 = vadd.f32 %v4096_v46, %v4066_v35  ;;  %v3928_v54 = vpop.f32.mrf.mxu0 }
 0x21e   : > { %4000 = vst [vmem:[%s7622_s14 + $0xf8] sm:$0xff] %v3968_v27  ;;  %v3967_v2 = vadd.f32 %v3928_v54, %v3694_v51  ;;  %v4070_v34 = vmul.f32 %v3968_v27, %v3968_v27 }
 0x21f   : > { %v4098_v40 = vadd.f32 %v4097_v42, %v4067_v25  ;;  %v4029_v15 = vadd.f32 %v4028_v5, %v3966_v59 }
 0x220   : > { %3999 = vst [vmem:[%s7622_s14 + $0xf0] sm:$0xff] %v3967_v2  ;;  %v4069_v57 = vmul.f32 %v3967_v2, %v3967_v2 }
 0x221   : > { %v4030_v62 = vadd.f32 %v4029_v15, %v3967_v2  ;;  %v4099_v33 = vadd.f32 %v4098_v40, %v4068_v43 }
 0x223   : > { %v4031_v11 = vadd.f32 %v4030_v62, %v3968_v27  ;;  %v4100_v14 = vadd.f32 %v4099_v33, %v4069_v57 }
 0x225   : > { %v4032_v39 = vrot.slane %v4031_v11, 4  ;;  %v4101_v37 = vadd.f32 %v4100_v14, %v4070_v34 }
 0x227   : > { %v4033_v63 = vadd.f32 %v4032_v39, %v4031_v11  ;;  %v4102_v60 = vrot.slane %v4101_v37, 4 }
 0x229   : > { %v4034_v0 = vrot.slane %v4033_v63, 2  ;;  %v4103_v8 = vadd.f32 %v4102_v60, %v4101_v37 }
 0x22b   : > { %v4035_v52 = vadd.f32 %v4034_v0, %v4033_v63  ;;  %v4104_v16 = vrot.slane %v4103_v8, 2 }
 0x22d   : > { %v4036_v41 = vrot.slane %v4035_v52, 1  ;;  %v4105_v31 = vadd.f32 %v4104_v16, %v4103_v8 }
 0x22f   : > { %v4037_v55 = vadd.f32 %v4036_v41, %v4035_v52  ;;  %v4106_v19 = vrot.slane %v4105_v31, 1 }
 0x231   : > { %4038 = vst [vmem:[%s500_s16] sm:$0x1] %v4037_v55  ;;  %v4107_v21 = vadd.f32 %v4106_v19, %v4105_v31 }
 0x233   : > { %4108 = vst [vmem:[%s506_s19] sm:$0x1] %v4107_v21 }
 0x234 PF: > { %s19_s27 = sadd.s32 1, %s5608_s27   ;;  %s8184_s26 = smov %s5604_s2 }
 0x235   : > { %p16_p5 = scmp.ge.s32.totalorder %s19_s27, 4   ;;  %s8185_s2 = smov %s8187_s28 }
 0x237   :  { %18 = sbr.rel (!%p16_p5) target bundleno = 2 (0x2), region = 104 }

// kernel: double_conv2d_forward.3
= control target key start
LH: loop header
LB: loop body
LE: loop exit
PB: predicated region body
PF: predicated region fallthrough
CT: control target
= control target key end

     0   :  { %s5561_s26 = smov 0   ;;  %s5563_s2 = smov 0   ;;  %s7679_s0 = inlined_call_operand.vmem [shape: f32[2,16,16,128], index: 0, kind: input, shape index: {}, may-alias: {0,1,2}]   ;;  %s7680_s1 = inlined_call_operand.vmem [shape: f32[2,16,16,128], index: 1, kind: input, shape index: {}, may-alias: {0,1,2}]   ;;  %s7681_s2 = inlined_call_operand.vmem [shape: f32[2,16,16,128], index: 2, kind: input, shape index: {}, may-alias: {0,1,2}]   ;;  %s7682_s3 = inlined_call_operand.vmem [shape: f32[1152,128], index: 3, kind: input, shape index: {}]   ;;  %s7683_s4 = inlined_call_operand.vmem [shape: f32[1,128], index: 4, kind: input, shape index: {}]   ;;  %s7684_s5 = inlined_call_operand.vmem [shape: f32[1,128], index: 5, kind: input, shape index: {}]   ;;  %s7685_s6 = inlined_call_operand.vmem [shape: f32[2,16,16,128], index: 6, kind: output, shape index: {0}]   ;;  %s7686_s7 = inlined_call_operand.vmem [shape: f32[2,1,1,128], index: 7, kind: output, shape index: {1}]   ;;  %s7687_s8 = inlined_call_operand.vmem [shape: f32[2,1,1,128], index: 8, kind: output, shape index: {2}]  }
   0x1   :  { %s5565_s27 = smov 0  }
   0x2 LB: > { %s31_s4 = sadd.s32 1, %s5509_s2  ;;  %p4199_p0 = scmp.ge.s32.totalorder %s5513_s27, 1  ;;  %s5513_s27 = sphi %s5565_s27, %s19_s27   ;;  %s5509_s2 = sphi %s5563_s2, %s8031_s2   ;;  %s5505_s26 = sphi %s5561_s26, %s8030_s26  }
   0x3   : > { %p33_p1 = scmp.ge.s32.totalorder %s31_s4, 2  ;;  %p357_p2 = scmp.lt.s32.totalorder %s5513_s27, 3 }
   0x5   : > { %s8033_s4 = smov (%p33_p1, %s31_s4), 0  ;;  %p358_p3 = pnand %p4199_p0, %p357_p2 }
   0x7   : > { %361 = sbr.rel (%p358_p3) target bundleno = 564 (0x234), region = 44 }
   0xc   : > { %v1485_v0 = vld [vmem:[%s7682_s3 + $0xf8] sm:$0xff]  ;;  %v1484_v1 = vld [vmem:[%s7682_s3 + $0xf0] sm:$0xff]  ;;  %v1483_v2 = vld [vmem:[%s7682_s3 + $0xe8] sm:$0xff]  ;;  %p457_p4 = scmp.lt.s32.totalorder %s5505_s26, 1  ;;  %v7689_v19 = vmov 0.0   ;;  %v551_v43 = vlaneseq }
   0xd   : > { %5403 = vmatprep.subr.mxu1 %v1485_v0  ;;  %4683 = vmatprep.subr.mxu0 %v1485_v0  ;;  %v1482_v3 = vld [vmem:[%s7682_s3 + $0xe0] sm:$0xff]  ;;  %v1481_v4 = vld [vmem:[%s7682_s3 + $0xd8] sm:$0xff]  ;;  %v1480_v5 = vld [vmem:[%s7682_s3 + $0xd0] sm:$0xff] }
   0xe   : > { %5419 = vmatpush3.msra.mxu1 %v1485_v0  ;;  %4684 = vmatpush3.msra.mxu0 %v1485_v0  ;;  %v1479_v6 = vld [vmem:[%s7682_s3 + $0xc8] sm:$0xff]  ;;  %v1478_v7 = vld [vmem:[%s7682_s3 + $0xc0] sm:$0xff]  ;;  %v1477_v8 = vld [vmem:[%s7682_s3 + $0xb8] sm:$0xff]  ;;  %s8035_s26 = smov (!%p457_p4, %s5505_s26), 1  ;;  %v5750_v49 = vshrl.u32 %v551_v43, 7 }
   0xf   : > { %5404 = vmatprep.subr.mxu1 %v1484_v1  ;;  %4685 = vmatprep.subr.mxu0 %v1484_v1  ;;  %v1476_v9 = vld [vmem:[%s7682_s3 + $0xb0] sm:$0xff]  ;;  %v1475_v10 = vld [vmem:[%s7682_s3 + $0xa8] sm:$0xff]  ;;  %v1474_v11 = vld [vmem:[%s7682_s3 + $0xa0] sm:$0xff]  ;;  %s4247_s9 = sshll.u32 %s8035_s26, 8  ;;  %s500_s18 = scalar_lea.vmem %s7686_s7, %s8035_s26 }
  0x10   : > { %5420 = vmatpush3.msra.mxu1 %v1484_v1  ;;  %4686 = vmatpush3.msra.mxu0 %v1484_v1  ;;  %v1473_v12 = vld [vmem:[%s7682_s3 + $0x98] sm:$0xff]  ;;  %v1472_v13 = vld [vmem:[%s7682_s3 + $0x90] sm:$0xff]  ;;  %v1471_v14 = vld [vmem:[%s7682_s3 + $0x88] sm:$0xff]  ;;  %s5636_s16 = scalar_lea.vmem %s7680_s1, %s4247_s9  ;;  %v553_v57 = vadd.s32 8, %v5750_v49  ;;  %v554_v59 = vadd.s32 16, %v5750_v49  ;;  %v555_v62 = vadd.s32 24, %v5750_v49  ;;  %s7544_s15 = scalar_lea.vmem %s7685_s6, %s4247_s9 }
  0x11   : > { %5405 = vmatprep.subr.mxu1 %v1483_v2  ;;  %4687 = vmatprep.subr.mxu0 %v1483_v2  ;;  %v1470_v15 = vld [vmem:[%s7682_s3 + $0x80] sm:$0xff]  ;;  %v5642_v16 = vld [vmem:[%s5636_s16 + $0x70] sm:$0xff]  ;;  %v5645_v17 = vld [vmem:[%s5636_s16 + $0x78] sm:$0xff]  ;;  %v592_v0 = vand.u32 15, %v5750_v49  ;;  %vm1381_vm1 = vcmp.lt.s32.totalorder %v5750_v49, 7  ;;  %vm1272_vm4 = vcmp.lt.s32.totalorder %v5750_v49, 1  ;;  %s506_s21 = scalar_lea.vmem %s7687_s8, %s8035_s26 }
  0x12   : > { %5421 = vmatpush3.msra.mxu1 %v1483_v2  ;;  %4688 = vmatpush3.msra.mxu0 %v1483_v2  ;;  %v1469_v18 = vld [vmem:[%s7682_s3 + $0x78] sm:$0xff]  ;;  %v1468_v21 = vld [vmem:[%s7682_s3 + $0x70] sm:$0xff]  ;;  %v5660_v22 = vld [vmem:[%s5636_s16 + $0x80] sm:$0xff]  ;;  %v599_v2 = vand.u32 15, %v553_v57 }
  0x13   : > { %5406 = vmatprep.subr.mxu1 %v1482_v3  ;;  %4689 = vmatprep.subr.mxu0 %v1482_v3  ;;  %v1951_v20 = vld [vmem:[%s7682_s3 + $0x178] sm:$0xff]  ;;  %v1950_v23 = vld [vmem:[%s7682_s3 + $0x170] sm:$0xff]  ;;  %v5667_v24 = vld [vmem:[%s5636_s16] sm:$0xff]  ;;  %vm5817_vm0 = vcmp.ne.s32.totalorder %v592_v0, 0 }
  0x14   : > { %5422 = vmatpush3.msra.mxu1 %v1482_v3  ;;  %4690 = vmatpush3.msra.mxu0 %v1482_v3  ;;  %v5670_v25 = vld [vmem:[%s5636_s16 + $0x88] sm:$0xff]  ;;  %v1466_v29 = vld [vmem:[%s7682_s3 + $0x60] sm:$0xff]  ;;  %v5688_v30 = vld [vmem:[%s5636_s16 + $0x90] sm:$0xff]  ;;  %vm5832_vm2 = vcmp.ne.s32.totalorder %v599_v2, 15 }
  0x15   : > { %5407 = vmatprep.subr.mxu1 %v1481_v4  ;;  %4691 = vmatprep.subr.mxu0 %v1481_v4  ;;  %v1467_v26 = vld [vmem:[%s7682_s3 + $0x68] sm:$0xff]  ;;  %v1948_v31 = vld [vmem:[%s7682_s3 + $0x160] sm:$0xff]  ;;  %v5695_v32 = vld [vmem:[%s5636_s16 + $0x10] sm:$0xff] }
  0x16   : > { %5423 = vmatpush3.msra.mxu1 %v1481_v4  ;;  %4692 = vmatpush3.msra.mxu0 %v1481_v4  ;;  %v5677_v27 = vld [vmem:[%s5636_s16 + $0x8] sm:$0xff]  ;;  %v5698_v33 = vld [vmem:[%s5636_s16 + $0x98] sm:$0xff]  ;;  %v1464_v37 = vld [vmem:[%s7682_s3 + $0x50] sm:$0xff]  ;;  %v1240_v0 = vrot.slane %v5695_v32, 7 }
  0x17   : > { %5408 = vmatprep.subr.mxu1 %v1480_v5  ;;  %4693 = vmatprep.subr.mxu0 %v1480_v5  ;;  %v1949_v28 = vld [vmem:[%s7682_s3 + $0x168] sm:$0xff]  ;;  %v1465_v34 = vld [vmem:[%s7682_s3 + $0x58] sm:$0xff]  ;;  %v5716_v38 = vld [vmem:[%s5636_s16 + $0xa0] sm:$0xff] }
  0x18   : > { %5424 = vmatpush3.msra.mxu1 %v1480_v5  ;;  %4694 = vmatpush3.msra.mxu0 %v1480_v5  ;;  %v5705_v35 = vld [vmem:[%s5636_s16 + $0x18] sm:$0xff]  ;;  %v1946_v39 = vld [vmem:[%s7682_s3 + $0x150] sm:$0xff]  ;;  %v5723_v40 = vld [vmem:[%s5636_s16 + $0x20] sm:$0xff]  ;;  %v606_v5 = vand.u32 15, %v554_v59 }
  0x19   : > { %5409 = vmatprep.subr.mxu1 %v1479_v6  ;;  %4695 = vmatprep.subr.mxu0 %v1479_v6  ;;  %v1947_v36 = vld [vmem:[%s7682_s3 + $0x158] sm:$0xff]  ;;  %v5726_v41 = vld [vmem:[%s5636_s16 + $0xa8] sm:$0xff]  ;;  %v1462_v46 = vld [vmem:[%s7682_s3 + $0x40] sm:$0xff] }
  0x1a   : > { %5425 = vmatpush3.msra.mxu1 %v1479_v6  ;;  %4696 = vmatpush3.msra.mxu0 %v1479_v6  ;;  %v1463_v42 = vld [vmem:[%s7682_s3 + $0x48] sm:$0xff]  ;;  %v5744_v47 = vld [vmem:[%s5636_s16 + $0xb0] sm:$0xff]  ;;  %v1944_v48 = vld [vmem:[%s7682_s3 + $0x140] sm:$0xff]  ;;  %vm5841_vm3 = vcmp.ne.s32.totalorder %v606_v5, 0  ;;  %v1350_v5 = vrot.slane %v5705_v35, 1 }
  0x1b   : > { %5410 = vmatprep.subr.mxu1 %v1478_v7  ;;  %4697 = vmatprep.subr.mxu0 %v1478_v7  ;;  %v5733_v44 = vld [vmem:[%s5636_s16 + $0x28] sm:$0xff]  ;;  %v5753_v50 = vld [vmem:[%s5636_s16 + $0x30] sm:$0xff]  ;;  %v5756_v51 = vld [vmem:[%s5636_s16 + $0xb8] sm:$0xff] }
  0x1c   : > { %5426 = vmatpush3.msra.mxu1 %v1478_v7  ;;  %4698 = vmatpush3.msra.mxu0 %v1478_v7  ;;  %v1945_v45 = vld [vmem:[%s7682_s3 + $0x148] sm:$0xff]  ;;  %v1461_v52 = vld [vmem:[%s7682_s3 + $0x38] sm:$0xff]  ;;  %v1460_v55 = vld [vmem:[%s7682_s3 + $0x30] sm:$0xff]  ;;  %v613_v7 = vand.u32 15, %v555_v62 }
  0x1d   : > { %5411 = vmatprep.subr.mxu1 %v1477_v8  ;;  %4699 = vmatprep.subr.mxu0 %v1477_v8  ;;  %v5763_v53 = vld [vmem:[%s5636_s16 + $0x38] sm:$0xff]  ;;  %v5774_v56 = vld [vmem:[%s5636_s16 + $0xc0] sm:$0xff]  ;;  %v1942_v58 = vld [vmem:[%s7682_s3 + $0x130] sm:$0xff] }
  0x1e   : > { %5427 = vmatpush3.msra.mxu1 %v1477_v8  ;;  %4700 = vmatpush3.msra.mxu0 %v1477_v8  ;;  %v1943_v54 = vld [vmem:[%s7682_s3 + $0x138] sm:$0xff]  ;;  %v5783_v60 = vld [vmem:[%s5636_s16 + $0x40] sm:$0xff]  ;;  %v5786_v61 = vld [vmem:[%s5636_s16 + $0xc8] sm:$0xff]  ;;  %v556_v8 = vadd.s32 32, %v5750_v49  ;;  %vm5854_vm5 = vcmp.ne.s32.totalorder %v613_v7, 15  ;;  %v1351_v7 = vrot.slane %v5723_v40, 1 }
  0x1f   : > { %5412 = vmatprep.subr.mxu1 %v1476_v9  ;;  %4701 = vmatprep.subr.mxu0 %v1476_v9  ;;  %v1459_v63 = vld [vmem:[%s7682_s3 + $0x28] sm:$0xff]  ;;  %v1458_v4 = vld [vmem:[%s7682_s3 + $0x20] sm:$0xff]  ;;  %v5806_v6 = vld [vmem:[%s5636_s16 + $0xd0] sm:$0xff]  ;;  %v4227_v62 = vsel %vm5854_vm5, 1.0, %v7689_v19 }
  0x20   : > { %5428 = vmatpush3.msra.mxu1 %v1476_v9  ;;  %4702 = vmatpush3.msra.mxu0 %v1476_v9  ;;  %v5795_v1 = vld [vmem:[%s5636_s16 + $0x48] sm:$0xff]  ;;  %v5810_v9 = vrot.slane %v7689_v19, 1  ;;  %v1456_v43 = vld [vmem:[%s7682_s3 + $0x10] sm:$0xff]  ;;  %v5900_v2 = vld [vmem:[%s5636_s16 + $0x60] sm:$0xff] }
  0x21   : > { %5413 = vmatprep.subr.mxu1 %v1475_v10  ;;  %4703 = vmatprep.subr.mxu0 %v1475_v10  ;;  %v1941_v3 = vld [vmem:[%s7682_s3 + $0x128] sm:$0xff] }
  0x22   : > { %5429 = vmatpush3.msra.mxu1 %v1475_v10  ;;  %4704 = vmatpush3.msra.mxu0 %v1475_v10  ;;  %7755 = vst [vmem:[#allocation2_spill] sm:$0xff] %v5810_v9  ;;  %v1347_v10 = vrot.slane %v5667_v24, 1 }
  0x23   : > { %5414 = vmatprep.subr.mxu1 %v1474_v11  ;;  %4705 = vmatprep.subr.mxu0 %v1474_v11 }
  0x24   : > { %5430 = vmatpush3.msra.mxu1 %v1474_v11  ;;  %4706 = vmatpush3.msra.mxu0 %v1474_v11  ;;  %v1940_v11 = vld [vmem:[%s7682_s3 + $0x120] sm:$0xff] }
  0x25   : > { %5415 = vmatprep.subr.mxu1 %v1473_v12  ;;  %4707 = vmatprep.subr.mxu0 %v1473_v12 }
  0x26   : > { %5431 = vmatpush3.msra.mxu1 %v1473_v12  ;;  %4708 = vmatpush3.msra.mxu0 %v1473_v12 }
  0x27   : > { %5416 = vmatprep.subr.mxu1 %v1472_v13  ;;  %4709 = vmatprep.subr.mxu0 %v1472_v13 }
  0x28   : > { %5432 = vmatpush3.msra.mxu1 %v1472_v13  ;;  %4710 = vmatpush3.msra.mxu0 %v1472_v13  ;;  %v5822_v13 = vrot.slane %v7689_v19, 7 }
  0x29   : > { %5417 = vmatprep.subr.mxu1 %v1471_v14  ;;  %4711 = vmatprep.subr.mxu0 %v1471_v14 }
  0x2a   : > { %5433 = vmatpush3.msra.mxu1 %v1471_v14  ;;  %4712 = vmatpush3.msra.mxu0 %v1471_v14  ;;  %7758 = vst [vmem:[#allocation3_spill] sm:$0xff] %v5822_v13  ;;  %v1238_v14 = vrot.slane %v5667_v24, 7 }
  0x2b   : > { %5418 = vmatprep.subr.mxu1 %v1470_v15  ;;  %4713 = vmatprep.subr.mxu0 %v1470_v15 }
  0x2c   : > { %5434 = vmatpush3.msra.mxu1 %v1470_v15  ;;  %4739 = vmatprep.mubr.f32.mxu1 %v5642_v16 }
  0x2d   : > { %4714 = vmatpush3.msra.mxu0 %v1470_v15  ;;  %4715 = vmatprep.mubr.f32.mxu0 %v7689_v19  ;;  %v5827_v15 = vld [vmem:[%s5636_s16 + $0x50] sm:$0xff] }
  0x2e   : > { %4740 = vmatmul.mubr.f32.vlgmr.msra.gmra.mxu1 %v5645_v17  ;;  %4763 = vmatprep.subr.mxu1 %v1469_v18 }
  0x2f   : > { %4716 = vmatmul.mubr.f32.vlgmr.msra.gmra.mxu0 %v7689_v19  ;;  %4764 = vmatpush3.msra.mxu1 %v1469_v18  ;;  %v5830_v18 = vld [vmem:[%s5636_s16 + $0xd8] sm:$0xff] }
  0x30   : > { %4843 = vmatprep.subr.mxu0 %v1951_v20  ;;  %4765 = vmatprep.subr.mxu1 %v1468_v21 }
  0x31   : > { %4844 = vmatpush3.msra.mxu0 %v1951_v20  ;;  %4742 = vmatprep.mubr.f32.mxu1 %v5660_v22 }
  0x32   : > { %4766 = vmatpush3.msra.mxu1 %v1468_v21  ;;  %4845 = vmatprep.subr.mxu0 %v1950_v23  ;;  %v557_v21 = vadd.s32 40, %v5750_v49 }
  0x33   : > { %4718 = vmatprep.mubr.f32.mxu0 %v5667_v24  ;;  %4743 = vmatmul.mubr.f32.gmra.mxu1 %v5670_v25  ;;  %v1454_v24 = vld [vmem:[%s7682_s3] sm:$0xff] }
  0x34   : > { %4767 = vmatprep.subr.mxu1 %v1467_v26  ;;  %4846 = vmatpush3.msra.mxu0 %v1950_v23  ;;  %v1457_v23 = vld [vmem:[%s7682_s3 + $0x18] sm:$0xff]  ;;  %v627_v57 = vand.u32 15, %v557_v21 }
  0x35   : > { %4719 = vmatmul.mubr.f32.gmra.mxu0 %v5677_v27  ;;  %4768 = vmatpush3.msra.mxu1 %v1467_v26  ;;  %v5925_v26 = vld [vmem:[%s5636_s16 + $0x68] sm:$0xff] }
  0x36   : > { %4847 = vmatprep.subr.mxu0 %v1949_v28  ;;  %4769 = vmatprep.subr.mxu1 %v1466_v29  ;;  %vm5934_vm7 = vcmp.ne.s32.totalorder %v627_v57, 15 }
  0x37   : > { %4848 = vmatpush3.msra.mxu0 %v1949_v28  ;;  %4745 = vmatprep.mubr.f32.mxu1 %v5688_v30  ;;  %v1348_v28 = vrot.slane %v5677_v27, 1 }
  0x38   : > { %4770 = vmatpush3.msra.mxu1 %v1466_v29  ;;  %4849 = vmatprep.subr.mxu0 %v1948_v31  ;;  %v1349_v29 = vrot.slane %v5695_v32, 1 }
  0x39   : > { %4721 = vmatprep.mubr.f32.mxu0 %v5695_v32  ;;  %4746 = vmatmul.mubr.f32.gmra.mxu1 %v5698_v33 }
  0x3a   : > { %4771 = vmatprep.subr.mxu1 %v1465_v34  ;;  %4850 = vmatpush3.msra.mxu0 %v1948_v31  ;;  %v5849_v31 = vld [vmem:[%s5636_s16 + $0x58] sm:$0xff] }
  0x3b   : > { %4722 = vmatmul.mubr.f32.gmra.mxu0 %v5705_v35  ;;  %4772 = vmatpush3.msra.mxu1 %v1465_v34  ;;  %v4208_v34 = vsel %vm5817_vm0, 1.0, %v7689_v19 }
  0x3c   : > { %4851 = vmatprep.subr.mxu0 %v1947_v36  ;;  %4773 = vmatprep.subr.mxu1 %v1464_v37  ;;  %v1309_v59 = vmul.f32 %v4208_v34, %v5822_v13  ;;  %v5931_v34 = vsel %vm1381_vm1, %v1347_v10, %v1348_v28 }
  0x3d   : > { %4852 = vmatpush3.msra.mxu0 %v1947_v36  ;;  %4748 = vmatprep.mubr.f32.mxu1 %v5716_v38  ;;  %v1241_v36 = vrot.slane %v5705_v35, 7 }
  0x3e   : > { %4774 = vmatpush3.msra.mxu1 %v1464_v37  ;;  %4853 = vmatprep.subr.mxu0 %v1946_v39  ;;  %v620_v37 = vand.u32 15, %v556_v8  ;;  %v560_v8 = vadd.s32 64, %v5750_v49 }
  0x3f   : > { %4724 = vmatprep.mubr.f32.mxu0 %v5723_v40  ;;  %4749 = vmatmul.mubr.f32.gmra.mxu1 %v5726_v41 }
  0x40   : > { %4775 = vmatprep.subr.mxu1 %v1463_v42  ;;  %4854 = vmatpush3.msra.mxu0 %v1946_v39  ;;  %v1415_v39 = vsel %vm1381_vm1, %v5810_v9, %v1347_v10  ;;  %vm5905_vm6 = vcmp.ne.s32.totalorder %v620_v37, 0 }
  0x41   : > { %4725 = vmatmul.mubr.f32.gmra.mxu0 %v5733_v44  ;;  %4776 = vmatpush3.msra.mxu1 %v1463_v42  ;;  %v1939_v42 = vld [vmem:[%s7682_s3 + $0x118] sm:$0xff]  ;;  %v4210_v35 = vsel %vm5905_vm6, 1.0, %v7689_v19 }
  0x42   : > { %4855 = vmatprep.subr.mxu0 %v1945_v45  ;;  %4777 = vmatprep.subr.mxu1 %v1462_v46 }
  0x43   : > { %4856 = vmatpush3.msra.mxu0 %v1945_v45  ;;  %4751 = vmatprep.mubr.f32.mxu1 %v5744_v47  ;;  %v4226_v45 = vsel %vm5832_vm2, 1.0, %v7689_v19 }
  0x44   : > { %4778 = vmatpush3.msra.mxu1 %v1462_v46  ;;  %4857 = vmatprep.subr.mxu0 %v1944_v48  ;;  %v1239_v46 = vrot.slane %v5677_v27, 7  ;;  %v1938_v27 = vld [vmem:[%s7682_s3 + $0x110] sm:$0xff]  ;;  %v5916_v12 = vmul.f32 %v4226_v45, %v1415_v39  ;;  %v1243_v45 = vrot.slane %v5733_v44, 7 }
  0x45   : > { %4727 = vmatprep.mubr.f32.mxu0 %v5753_v50  ;;  %4752 = vmatmul.mubr.f32.gmra.mxu1 %v5756_v51 }
  0x46   : > { %4779 = vmatprep.subr.mxu1 %v1461_v52  ;;  %4858 = vmatpush3.msra.mxu0 %v1944_v48  ;;  %v558_v48 = vadd.s32 48, %v5750_v49  ;;  %v5922_v21 = vsel %vm1272_vm4, %v1238_v14, %v1239_v46 }
  0x47   : > { %4728 = vmatmul.mubr.f32.gmra.mxu0 %v5763_v53  ;;  %4780 = vmatpush3.msra.mxu1 %v1461_v52  ;;  %v5877_v52 = vld [vmem:[%s5636_s16 + $0xe0] sm:$0xff] }
  0x48   : > { %4859 = vmatprep.subr.mxu0 %v1943_v54  ;;  %4781 = vmatprep.subr.mxu1 %v1460_v55 }
  0x49   : > { %4860 = vmatpush3.msra.mxu0 %v1943_v54  ;;  %4754 = vmatprep.mubr.f32.mxu1 %v5774_v56  ;;  %v4209_v54 = vsel %vm5841_vm3, 1.0, %v7689_v19 }
  0x4a   : > { %4782 = vmatpush3.msra.mxu1 %v1460_v55  ;;  %4861 = vmatprep.subr.mxu0 %v1942_v58  ;;  %v1306_v55 = vsel %vm1272_vm4, %v5822_v13, %v1238_v14  ;;  %v1937_v14 = vld [vmem:[%s7682_s3 + $0x108] sm:$0xff] }
  0x4b   : > { %4730 = vmatprep.mubr.f32.mxu0 %v5783_v60  ;;  %4755 = vmatmul.mubr.f32.gmra.mxu1 %v5786_v61  ;;  %v5918_v20 = vmul.f32 %v4209_v54, %v1306_v55  ;;  %v648_v54 = vand.u32 15, %v560_v8  ;;  %v4228_v55 = vsel %vm5934_vm7, 1.0, %v7689_v19  ;;  %v2224_v8 = vld [vmem:[%s7682_s3 + $0x1f8] sm:$0xff] }
  0x4c   : > { %4783 = vmatprep.subr.mxu1 %v1459_v63  ;;  %4862 = vmatpush3.msra.mxu0 %v1942_v58  ;;  %v559_v58 = vadd.s32 56, %v5750_v49 }
  0x4d   : > { %4731 = vmatmul.mubr.f32.gmra.mxu0 %v5795_v1  ;;  %4784 = vmatpush3.msra.mxu1 %v1459_v63  ;;  %v1413_v63 = vsel %vm1381_vm1, %v1348_v28, %v1349_v29  ;;  %v1304_v28 = vsel %vm1272_vm4, %v1239_v46, %v1240_v0  ;;  %v1936_v46 = vld [vmem:[%s7682_s3 + $0x100] sm:$0xff]  ;;  %vm6006_vm10 = vcmp.ne.s32.totalorder %v648_v54, 0  ;;  %v2223_v54 = vld [vmem:[%s7682_s3 + $0x1f0] sm:$0xff] }
  0x4e   : > { %4863 = vmatprep.subr.mxu0 %v1941_v3  ;;  %4785 = vmatprep.subr.mxu1 %v1458_v4  ;;  %v641_v39 = vand.u32 15, %v559_v58  ;;  %v5946_v10 = vmul.f32 %v4227_v62, %v1413_v63  ;;  %v1353_v58 = vrot.slane %v5753_v50, 1  ;;  %v1244_v63 = vrot.slane %v5753_v50, 7 }
  0x4f   : > { %4864 = vmatpush3.msra.mxu0 %v1941_v3  ;;  %4757 = vmatprep.mubr.f32.mxu1 %v5806_v6  ;;  %v5903_v3 = vld [vmem:[%s5636_s16 + $0xe8] sm:$0xff]  ;;  %v563_v50 = vadd.s32 88, %v5750_v49  ;;  %v1246_v62 = vrot.slane %v5783_v60, 7 }
  0x50   : > { %4786 = vmatpush3.msra.mxu1 %v1458_v4  ;;  %4865 = vmatprep.subr.mxu0 %v1940_v11  ;;  %vm5977_vm9 = vcmp.ne.s32.totalorder %v641_v39, 15  ;;  %v562_v4 = vadd.s32 80, %v5750_v49 }
  0x51   : > { %4733 = vmatprep.mubr.f32.mxu0 %v5827_v15  ;;  %4758 = vmatmul.mubr.f32.gmra.mxu1 %v5830_v18  ;;  %v669_v57 = vand.u32 15, %v563_v50 }
  0x52   : > { %4787 = vmatprep.subr.mxu1 %v1457_v23  ;;  %4866 = vmatpush3.msra.mxu0 %v1940_v11  ;;  %v1455_v11 = vld [vmem:[%s7682_s3 + $0x8] sm:$0xff] }
  0x53   : > { %4734 = vmatmul.mubr.f32.gmra.mxu0 %v5849_v31  ;;  %4788 = vmatpush3.msra.mxu1 %v1457_v23  ;;  %v634_v23 = vand.u32 15, %v558_v48  ;;  %v1352_v48 = vrot.slane %v5733_v44, 1  ;;  %v561_v44 = vadd.s32 72, %v5750_v49  ;;  %vm6078_vm13 = vcmp.ne.s32.totalorder %v669_v57, 15 }
  0x54   : > { %4867 = vmatprep.subr.mxu0 %v1939_v42  ;;  %4789 = vmatprep.subr.mxu1 %v1456_v43  ;;  %v1360_v57 = vrot.slane %v5925_v26, 1 }
  0x55   : > { %4868 = vmatpush3.msra.mxu0 %v1939_v42  ;;  %4760 = vmatprep.mubr.f32.mxu1 %v5877_v52  ;;  %v1242_v42 = vrot.slane %v5723_v40, 7  ;;  %vm5967_vm8 = vcmp.ne.s32.totalorder %v634_v23, 0  ;;  %v2221_v40 = vld [vmem:[%s7682_s3 + $0x1e0] sm:$0xff] }
  0x56   : > { %4790 = vmatpush3.msra.mxu1 %v1456_v43  ;;  %4869 = vmatprep.subr.mxu0 %v1938_v27  ;;  %v1411_v43 = vsel %vm1381_vm1, %v1350_v5, %v1351_v7  ;;  %v4211_v39 = vsel %vm5967_vm8, 1.0, %v7689_v19 }
  0x57   : > { %4736 = vmatprep.mubr.f32.mxu0 %v5900_v2  ;;  %4761 = vmatmul.mubr.f32.gmra.mxu1 %v5903_v3  ;;  %v1302_v23 = vsel %vm1272_vm4, %v1241_v36, %v1242_v42  ;;  %v5997_v37 = vmul.f32 %v4228_v55, %v1411_v43  ;;  %v6004_v32 = vsel %vm1272_vm4, %v1242_v42, %v1243_v45  ;;  %v662_v42 = vand.u32 15, %v562_v4  ;;  %v2496_v4 = vld [vmem:[%s7682_s3 + $0x270] sm:$0xff] }
  0x58   : > { %4791 = vmatprep.subr.mxu1 %v1455_v11  ;;  %4870 = vmatpush3.msra.mxu0 %v1938_v27  ;;  %v5975_v27 = vsel %vm1272_vm4, %v1240_v0, %v1241_v36  ;;  %v5992_v0 = vsel %vm1381_vm1, %v1349_v29, %v1350_v5  ;;  %v4229_v5 = vsel %vm5977_vm9, 1.0, %v7689_v19  ;;  %v1409_v36 = vsel %vm1381_vm1, %v1352_v48, %v1353_v58 }
  0x59   : > { %4737 = vmatmul.mubr.f32.gmra.mxu0 %v5925_v26  ;;  %4792 = vmatpush3.msra.mxu1 %v1455_v11  ;;  %v5986_v11 = vmul.f32 %v4210_v35, %v1304_v28  ;;  %7773 = vst [vmem:[#allocation4_spill] sm:$0xff] %v5992_v0  ;;  %7774 = vst [vmem:[#allocation5_spill] sm:$0xff] %v5997_v37  ;;  %v1300_v35 = vsel %vm1272_vm4, %v1243_v45, %v1244_v63  ;;  %v1354_v28 = vrot.slane %v5763_v53, 1 }
  0x5a   : > { %4871 = vmatprep.subr.mxu0 %v1937_v14  ;;  %4793 = vmatprep.subr.mxu1 %v1454_v24  ;;  %v564_v43 = vadd.s32 96, %v5750_v49  ;;  %v1355_v55 = vrot.slane %v5783_v60, 1  ;;  %v565_v45 = vadd.s32 104, %v5750_v49  ;;  %vm6067_vm12 = vcmp.ne.s32.totalorder %v662_v42, 0 }
  0x5b   : > { %4872 = vmatpush3.msra.mxu0 %v1937_v14  ;;  %4794 = vmatpush3.msra.mxu1 %v1454_v24  ;;  %v1245_v14 = vrot.slane %v5763_v53, 7  ;;  %v655_v24 = vand.u32 15, %v561_v44  ;;  %v6035_v53 = vmul.f32 %v4211_v39, %v1302_v23  ;;  %v6043_v44 = vmul.f32 %v4229_v5, %v1409_v36  ;;  %v2222_v39 = vld [vmem:[%s7682_s3 + $0x1e8] sm:$0xff] }
  0x5c   : > { %4795 = vmatprep.mubr.f32.mxu1 %v1309_v59  ;;  %4873 = vmatprep.subr.mxu0 %v1936_v46  ;;  %v2497_v59 = vld [vmem:[%s7682_s3 + $0x278] sm:$0xff]  ;;  %v6065_v23 = vsel %vm1381_vm1, %v1353_v58, %v1354_v28  ;;  %v676_v50 = vand.u32 15, %v564_v43  ;;  %v1407_v29 = vsel %vm1381_vm1, %v1354_v28, %v1355_v55  ;;  %v683_v5 = vand.u32 15, %v565_v45 }
  0x5d   : > { %4796 = vmatmul.mubr.f32.vlgmr.msra.gmra.mxu1 %v5822_v13  ;;  %4874 = vmatpush3.msra.mxu0 %v1936_v46  ;;  %v4212_v46 = vsel %vm6006_vm10, 1.0, %v7689_v19  ;;  %7778 = vst [vmem:[#allocation7_spill] sm:$0xff] %v6043_v44  ;;  %vm6054_vm11 = vcmp.ne.s32.totalorder %v655_v24, 15  ;;  %7781 = vst [vmem:[#allocation8_spill] sm:$0xff] %v6065_v23  ;;  %v1298_v24 = vsel %vm1272_vm4, %v1245_v14, %v1246_v62  ;;  %v566_v28 = vadd.s32 112, %v5750_v49  ;;  %v2493_v13 = vld [vmem:[%s7682_s3 + $0x258] sm:$0xff] }
  0x5e   : > { %4875 = vmatprep.mubr.f32.mxu0 %v5810_v9  ;;  %4923 = vmatprep.subr.mxu1 %v2224_v8  ;;  %v6061_v60 = vmul.f32 %v4212_v46, %v1300_v35  ;;  %v4230_v36 = vsel %vm6054_vm11, 1.0, %v7689_v19  ;;  %v1248_v35 = vrot.slane %v5827_v15, 7  ;;  %v4213_v42 = vsel %vm6067_vm12, 1.0, %v7689_v19 }
  0x5f   : > { %4876 = vmatmul.mubr.f32.vlgmr.msra.gmra.mxu0 %v5916_v12  ;;  %4924 = vmatpush3.msra.mxu1 %v2224_v8  ;;  %v6041_v12 = vsel %vm1381_vm1, %v1351_v7, %v1352_v48  ;;  %v6052_v8 = vsel %vm1272_vm4, %v1244_v63, %v1245_v14  ;;  %v1356_v7 = vrot.slane %v5795_v1, 1  ;;  %v7688_v48 = vrot.slane %v5827_v15, 1 }
  0x60   : > { %5003 = vmatprep.subr.mxu0 %v2497_v59  ;;  %4798 = vmatprep.mubr.f32.mxu1 %v5918_v20  ;;  %7777 = vst [vmem:[#allocation6_spill] sm:$0xff] %v6041_v12  ;;  %v1358_v43 = vrot.slane %v5849_v31, 1  ;;  %v4231_v46 = vsel %vm6078_vm13, 1.0, %v7689_v19  ;;  %vm6107_vm14 = vcmp.ne.s32.totalorder %v676_v50, 0  ;;  %v567_v45 = vadd.s32 120, %v5750_v49 }
  0x61   : > { %5004 = vmatpush3.msra.mxu0 %v2497_v59  ;;  %4799 = vmatmul.mubr.f32.gmra.mxu1 %v5922_v21  ;;  %v1247_v59 = vrot.slane %v5795_v1, 7  ;;  %v2495_v1 = vld [vmem:[%s7682_s3 + $0x268] sm:$0xff]  ;;  %v1405_v14 = vsel %vm1381_vm1, %v1356_v7, %v7688_v48  ;;  %v6117_v63 = vmul.f32 %v4230_v36, %v1407_v29  ;;  %v1249_v50 = vrot.slane %v5849_v31, 7  ;;  %v2494_v31 = vld [vmem:[%s7682_s3 + $0x260] sm:$0xff] }
  0x62   : > { %4878 = vmatprep.mubr.f32.mxu0 %v5931_v34  ;;  %4925 = vmatprep.subr.mxu1 %v2223_v54  ;;  %vm6124_vm15 = vcmp.ne.s32.totalorder %v683_v5, 15  ;;  %v6141_v5 = vmul.f32 %v4231_v46, %v1405_v14  ;;  %v4214_v36 = vsel %vm6107_vm14, 1.0, %v7689_v19  ;;  %v2220_v14 = vld [vmem:[%s7682_s3 + $0x1d8] sm:$0xff]  ;;  %v569_v48 = vadd.s32 136, %v5750_v49 }
  0x63   : > { %4879 = vmatmul.mubr.f32.gmra.mxu0 %v5946_v10  ;;  %4926 = vmatpush3.msra.mxu1 %v2223_v54  ;;  %7788 = vst [vmem:[#allocation9_spill] sm:$0xff] %v6117_v63  ;;  %v6121_v58 = vsel %vm1272_vm4, %v1246_v62, %v1247_v59  ;;  %v6133_v54 = vsel %vm1381_vm1, %v1355_v55, %v1356_v7  ;;  %v690_v62 = vand.u32 15, %v566_v28  ;;  %v7793_v55 = vrot.slane %v5900_v2, 1 }
  0x64   : > { %5005 = vmatprep.subr.mxu0 %v2496_v4  ;;  %4801 = vmatprep.mubr.f32.mxu1 %v5986_v11  ;;  %7791 = vst [vmem:[#allocation10_spill] sm:$0xff] %v6133_v54  ;;  %v1296_v29 = vsel %vm1272_vm4, %v1247_v59, %v1248_v35  ;;  %7792 = vst [vmem:[#allocation11_spill] sm:$0xff] %v6141_v5  ;;  %v1250_v59 = vrot.slane %v5900_v2, 7  ;;  %v1251_v28 = vrot.slane %v5925_v26, 7 }
  0x65   : > { %5006 = vmatpush3.msra.mxu0 %v2496_v4  ;;  %4802 = vmatmul.mubr.f32.gmra.mxu1 %v5975_v27  ;;  %v568_v4 = vadd.s32 128, %v5750_v49  ;;  %v1403_v7 = vsel %vm1381_vm1, %v1358_v43, %v7793_v55  ;;  %v6162_v46 = vsel %vm1272_vm4, %v1248_v35, %v1249_v50  ;;  %v570_v55 = vadd.s32 144, %v5750_v49 }
  0x66   : > { %4881 = vmatprep.mubr.f32.mxu0 %v5992_v0  ;;  %4927 = vmatprep.subr.mxu1 %v2222_v39  ;;  %vm6174_vm0 = vcmp.ne.s32.totalorder %v690_v62, 0  ;;  %v571_v62 = vadd.s32 152, %v5750_v49 }
  0x67   : > { %4882 = vmatmul.mubr.f32.gmra.mxu0 %v5997_v37  ;;  %4928 = vmatpush3.msra.mxu1 %v2222_v39  ;;  %v6129_v39 = vmul.f32 %v4213_v42, %v1298_v24  ;;  %v4232_v24 = vsel %vm6124_vm15, 1.0, %v7689_v19  ;;  %v704_v42 = vand.u32 15, %v568_v4  ;;  %v1252_v19 = vrot.slane %v5642_v16, 7 }
  0x68   : > { %5007 = vmatprep.subr.mxu0 %v2495_v1  ;;  %4804 = vmatprep.mubr.f32.mxu1 %v6035_v53  ;;  %v6186_v9 = vmul.f32 %v4232_v24, %v1403_v7  ;;  %v7803_v7 = vmov 0.0   ;;  %v7804_v24 = vrot.slane %v5900_v2, 1  ;;  %v718_v35 = vand.u32 15, %v570_v55 }
  0x69   : > { %5008 = vmatpush3.msra.mxu0 %v2495_v1  ;;  %4805 = vmatmul.mubr.f32.gmra.mxu1 %v6004_v32  ;;  %v697_v1 = vand.u32 15, %v567_v45  ;;  %v7794_v45 = vrot.slane %v5827_v15, 1  ;;  %v6184_v15 = vmul.f32 %v4214_v36, %v1296_v29  ;;  %vm6200_vm3 = vcmp.ne.s32.totalorder %v704_v42, 0 }
  0x6a   : > { %4884 = vmatprep.mubr.f32.mxu0 %v6041_v12  ;;  %4929 = vmatprep.subr.mxu1 %v2221_v40  ;;  %7798 = vst [vmem:[#allocation13_spill] sm:$0xff] %v6186_v9  ;;  %v1253_v36 = vrot.slane %v5645_v17, 7  ;;  %v711_v42 = vand.u32 15, %v569_v48  ;;  %v2492_v48 = vld [vmem:[%s7682_s3 + $0x250] sm:$0xff]  ;;  %vm6255_vm6 = vcmp.ne.s32.totalorder %v718_v35, 0  ;;  %v2491_v35 = vld [vmem:[%s7682_s3 + $0x248] sm:$0xff] }
  0x6b   : > { %4885 = vmatmul.mubr.f32.gmra.mxu0 %v6043_v44  ;;  %4930 = vmatpush3.msra.mxu1 %v2221_v40  ;;  %v6172_v4 = vsel %vm1381_vm1, %v7794_v45, %v1358_v43  ;;  %v1294_v43 = vsel %vm1272_vm4, %v1249_v50, %v1250_v59  ;;  %vm6196_vm2 = vcmp.ne.s32.totalorder %v697_v1, 15  ;;  %v2219_v50 = vld [vmem:[%s7682_s3 + $0x1d0] sm:$0xff]  ;;  %v6216_v1 = vsel %vm1381_vm1, %v7804_v24, %v1360_v57 }
  0x6c   : > { %5009 = vmatprep.subr.mxu0 %v2494_v31  ;;  %4807 = vmatprep.mubr.f32.mxu1 %v6061_v60  ;;  %7795 = vst [vmem:[#allocation12_spill] sm:$0xff] %v6172_v4  ;;  %v1292_v40 = vsel %vm1272_vm4, %v1251_v28, %v1252_v19  ;;  %v4233_v55 = vsel %vm6196_vm2, 1.0, %v7803_v7  ;;  %v6243_v24 = vsel %vm1272_vm4, %v1252_v19, %v1253_v36  ;;  %v573_v45 = vadd.s32 168, %v5750_v49 }
  0x6d   : > { %5010 = vmatpush3.msra.mxu0 %v2494_v31  ;;  %4808 = vmatmul.mubr.f32.gmra.mxu1 %v6052_v8  ;;  %v6194_v31 = vsel %vm1272_vm4, %v1250_v59, %v1251_v28  ;;  %v4215_v59 = vsel %vm6174_vm0, 1.0, %v7803_v7  ;;  %v725_v28 = vand.u32 15, %v571_v62  ;;  %v2218_v62 = vld [vmem:[%s7682_s3 + $0x1c8] sm:$0xff]  ;;  %vm6251_vm5 = vcmp.ne.s32.totalorder %v711_v42, 15 }
  0x6e   : > { %4887 = vmatprep.mubr.f32.mxu0 %v6065_v23  ;;  %4931 = vmatprep.subr.mxu1 %v2220_v14  ;;  %v1362_v23 = vrot.slane %v5645_v17, 1  ;;  %v572_v17 = vadd.s32 160, %v5750_v49  ;;  %v1364_v19 = vrot.slane %v5670_v25, 1  ;;  %v7810_v42 = vrot.slane %v5660_v22, 1 }
  0x6f   : > { %4888 = vmatmul.mubr.f32.gmra.mxu0 %v6117_v63  ;;  %4932 = vmatpush3.msra.mxu1 %v2220_v14  ;;  %v7805_v14 = vrot.slane %v5642_v16, 1  ;;  %vm6275_vm7 = vcmp.ne.s32.totalorder %v725_v28, 15  ;;  %v2217_v28 = vld [vmem:[%s7682_s3 + $0x1c0] sm:$0xff] }
  0x70   : > { %5011 = vmatprep.subr.mxu0 %v2493_v13  ;;  %4810 = vmatprep.mubr.f32.mxu1 %v6129_v39 }
  0x71   : > { %v1401_v63 = vsel %vm1381_vm1, %v1360_v57, %v7805_v14  ;;  %5012 = vmatpush3.msra.mxu0 %v2493_v13  ;;  %4811 = vmatmul.mubr.f32.gmra.mxu1 %v6121_v58  ;;  %v4216_v57 = vsel %vm6200_vm3, 1.0, %v7803_v7  ;;  %v6239_v13 = vmul.f32 %v4215_v59, %v1294_v43  ;;  %v1254_v14 = vrot.slane %v5660_v22, 7 }
  0x72   : > { %4890 = vmatprep.mubr.f32.mxu0 %v6133_v54  ;;  %4933 = vmatprep.subr.mxu1 %v2219_v50  ;;  %v6264_v44 = vmul.f32 %v4216_v57, %v1292_v40  ;;  %v1255_v59 = vrot.slane %v5670_v25, 7  ;;  %v574_v40 = vadd.s32 176, %v5750_v49  ;;  %v739_v57 = vand.u32 15, %v573_v45 }
  0x73   : > { %4891 = vmatmul.mubr.f32.gmra.mxu0 %v6141_v5  ;;  %4934 = vmatpush3.msra.mxu1 %v2219_v50  ;;  %v6262_v50 = vmul.f32 %v4233_v55, %v1401_v63  ;;  %v1399_v5 = vsel %vm1381_vm1, %v1362_v23, %v7810_v42  ;;  %v732_v63 = vand.u32 15, %v572_v17  ;;  %v4217_v55 = vsel %vm6255_vm6, 1.0, %v7803_v7 }
  0x74   : > { %5013 = vmatprep.subr.mxu0 %v2492_v48  ;;  %4813 = vmatprep.mubr.f32.mxu1 %v6184_v15  ;;  %v1290_v25 = vsel %vm1272_vm4, %v1253_v36, %v1254_v14  ;;  %v7813_v17 = vrot.slane %v5688_v30, 1  ;;  %v1256_v42 = vrot.slane %v5688_v30, 7  ;;  %v1257_v43 = vrot.slane %v5698_v33, 7 }
  0x75   : > { %5014 = vmatpush3.msra.mxu0 %v2492_v48  ;;  %4814 = vmatmul.mubr.f32.gmra.mxu1 %v6162_v46  ;;  %v4234_v48 = vsel %vm6251_vm5, 1.0, %v7803_v7  ;;  %v4235_v36 = vsel %vm6275_vm7, 1.0, %v7803_v7  ;;  %v6319_v54 = vsel %vm1272_vm4, %v1254_v14, %v1255_v59  ;;  %vm6321_vm8 = vcmp.ne.s32.totalorder %v732_v63, 0 }
  0x76   : > { %4893 = vmatprep.mubr.f32.mxu0 %v6172_v4  ;;  %4935 = vmatprep.subr.mxu1 %v2218_v62  ;;  %v1397_v29 = vsel %vm1381_vm1, %v1364_v19, %v7813_v17  ;;  %v1366_v4 = vrot.slane %v5698_v33, 1  ;;  %v2490_v33 = vld [vmem:[%s7682_s3 + $0x240] sm:$0xff]  ;;  %v7814_v17 = vrot.slane %v5642_v16, 1  ;;  %v6326_v37 = vmul.f32 %v4234_v48, %v1399_v5  ;;  %v2216_v5 = vld [vmem:[%s7682_s3 + $0x1b8] sm:$0xff] }
  0x77   : > { %4894 = vmatmul.mubr.f32.gmra.mxu0 %v6186_v9  ;;  %4936 = vmatpush3.msra.mxu1 %v2218_v62  ;;  %v575_v62 = vadd.s32 184, %v5750_v49  ;;  %v576_v9 = vadd.s32 192, %v5750_v49  ;;  %v6328_v0 = vmul.f32 %v4217_v55, %v1290_v25  ;;  %v7817_v16 = vrot.slane %v5660_v22, 1 }
  0x78   : > { %5015 = vmatprep.subr.mxu0 %v2491_v35  ;;  %4816 = vmatprep.mubr.f32.mxu1 %v6239_v13  ;;  %v6315_v12 = vsel %vm1381_vm1, %v7814_v17, %v1362_v23  ;;  %vm6336_vm9 = vcmp.ne.s32.totalorder %v739_v57, 15  ;;  %v6344_v63 = vmul.f32 %v4235_v36, %v1397_v29  ;;  %v1288_v22 = vsel %vm1272_vm4, %v1255_v59, %v1256_v42 }
  0x79   : > { %5016 = vmatpush3.msra.mxu0 %v2491_v35  ;;  %4817 = vmatmul.mubr.f32.gmra.mxu1 %v6194_v31  ;;  %v746_v35 = vand.u32 15, %v574_v40  ;;  %v6334_v23 = vsel %vm1381_vm1, %v7817_v16, %v1364_v19  ;;  %v6350_v19 = vsel %vm1272_vm4, %v1256_v42, %v1257_v43  ;;  %v1258_v40 = vrot.slane %v5716_v38, 7 }
  0x7a   : > { %4896 = vmatprep.mubr.f32.mxu0 %v6216_v1  ;;  %4937 = vmatprep.subr.mxu1 %v2217_v28  ;;  %7818 = vst [vmem:[#allocation14_spill] sm:$0xff] %v6334_v23  ;;  %7821 = vst [vmem:[#allocation15_spill] sm:$0xff] %v6344_v63  ;;  %v4218_v48 = vsel %vm6321_vm8, 1.0, %v7803_v7  ;;  %v7822_v55 = vrot.slane %v5716_v38, 1  ;;  %v753_v57 = vand.u32 15, %v575_v62  ;;  %v760_v59 = vand.u32 15, %v576_v9 }
  0x7b   : > { %4897 = vmatmul.mubr.f32.gmra.mxu0 %v6262_v50  ;;  %4938 = vmatpush3.msra.mxu1 %v2217_v28  ;;  %v2489_v28 = vld [vmem:[%s7682_s3 + $0x238] sm:$0xff]  ;;  %v4236_v29 = vsel %vm6336_vm9, 1.0, %v7803_v7  ;;  %vm6368_vm10 = vcmp.ne.s32.totalorder %v746_v35, 0  ;;  %v577_v36 = vadd.s32 200, %v5750_v49  ;;  %v578_v45 = vadd.s32 208, %v5750_v49  ;;  %v2215_v35 = vld [vmem:[%s7682_s3 + $0x1b0] sm:$0xff] }
  0x7c   : > { %5017 = vmatprep.subr.mxu0 %v2490_v33  ;;  %4819 = vmatprep.mubr.f32.mxu1 %v6264_v44  ;;  %v1395_v25 = vsel %vm1381_vm1, %v1366_v4, %v7822_v55  ;;  %v1259_v9 = vrot.slane %v5726_v41, 7  ;;  %v1368_v62 = vrot.slane %v5726_v41, 1  ;;  %v6383_v16 = vmul.f32 %v4218_v48, %v1288_v22 }
  0x7d   : > { %5018 = vmatpush3.msra.mxu0 %v2490_v33  ;;  %4820 = vmatmul.mubr.f32.gmra.mxu1 %v6243_v24  ;;  %v7715_v33 = vrot.slane %v5744_v47, 1  ;;  %v7825_v14 = vrot.slane %v5688_v30, 1  ;;  %v1286_v41 = vsel %vm1272_vm4, %v1257_v43, %v1258_v40  ;;  %v6394_v17 = vmul.f32 %v4236_v29, %v1395_v25  ;;  %v2487_v30 = vld [vmem:[%s7682_s3 + $0x228] sm:$0xff] }
  0x7e   : > { %4899 = vmatprep.mubr.f32.mxu0 %v6315_v12  ;;  %4939 = vmatprep.subr.mxu1 %v2216_v5  ;;  %vm6399_vm11 = vcmp.ne.s32.totalorder %v753_v57, 15  ;;  %vm6403_vm12 = vcmp.ne.s32.totalorder %v760_v59, 0  ;;  %v1261_v43 = vrot.slane %v5756_v51, 7  ;;  %v767_v48 = vand.u32 15, %v577_v36 }
  0x7f   : > { %4900 = vmatmul.mubr.f32.gmra.mxu0 %v6326_v37  ;;  %4940 = vmatpush3.msra.mxu1 %v2216_v5  ;;  %v6389_v55 = vsel %vm1381_vm1, %v7825_v14, %v1366_v4  ;;  %7826 = vst [vmem:[#allocation16_spill] sm:$0xff] %v6394_v17  ;;  %v4219_v5 = vsel %vm6368_vm10, 1.0, %v7803_v7  ;;  %v2488_v4 = vld [vmem:[%s7682_s3 + $0x230] sm:$0xff]  ;;  %v774_v25 = vand.u32 15, %v578_v45  ;;  %v579_v57 = vadd.s32 216, %v5750_v49  ;;  %v2214_v45 = vld [vmem:[%s7682_s3 + $0x1a8] sm:$0xff] }
  0x80   : > { %5019 = vmatprep.subr.mxu0 %v2489_v28  ;;  %4822 = vmatprep.mubr.f32.mxu1 %v6328_v0  ;;  %v1393_v59 = vsel %vm1381_vm1, %v1368_v62, %v7715_v33  ;;  %v1370_v42 = vrot.slane %v5756_v51, 1  ;;  %v580_v36 = vadd.s32 224, %v5750_v49  ;;  %v4237_v14 = vsel %vm6399_vm11, 1.0, %v7803_v7 }
  0x81   : > { %5020 = vmatpush3.msra.mxu0 %v2489_v28  ;;  %4823 = vmatmul.mubr.f32.gmra.mxu1 %v6319_v54  ;;  %v7831_v28 = vrot.slane %v5744_v47, 7  ;;  %v4220_v33 = vsel %vm6403_vm12, 1.0, %v7803_v7  ;;  %v7721_v51 = vrot.slane %v5774_v56, 7  ;;  %v7832_v22 = vrot.slane %v5716_v38, 1 }
  0x82   : > { %4902 = vmatprep.mubr.f32.mxu0 %v6334_v23  ;;  %4941 = vmatprep.subr.mxu1 %v2215_v35  ;;  %vm6453_vm13 = vcmp.ne.s32.totalorder %v767_v48, 15  ;;  %vm6457_vm14 = vcmp.ne.s32.totalorder %v774_v25, 0  ;;  %v781_v38 = vand.u32 15, %v579_v57  ;;  %v582_v48 = vadd.s32 240, %v5750_v49  ;;  %v2213_v25 = vld [vmem:[%s7682_s3 + $0x1a0] sm:$0xff] }
  0x83   : > { %v1284_v29 = vsel %vm1272_vm4, %v1259_v9, %v7831_v28  ;;  %4903 = vmatmul.mubr.f32.gmra.mxu0 %v6344_v63  ;;  %4942 = vmatpush3.msra.mxu1 %v2215_v35  ;;  %v7720_v28 = vrot.slane %v5774_v56, 1  ;;  %v6437_v35 = vmul.f32 %v4219_v5, %v1286_v41  ;;  %v6441_v63 = vsel %vm1272_vm4, %v1258_v40, %v1259_v9 }
  0x84   : > { %5021 = vmatprep.subr.mxu0 %v2488_v4  ;;  %4825 = vmatprep.mubr.f32.mxu1 %v6383_v16  ;;  %v6447_v23 = vsel %vm1381_vm1, %v7832_v22, %v1368_v62  ;;  %v581_v9 = vadd.s32 232, %v5750_v49  ;;  %v6463_v62 = vmul.f32 %v4237_v14, %v1393_v59  ;;  %v6465_v5 = vmul.f32 %v4220_v33, %v1284_v29 }
  0x85   : > { %7833 = vst [vmem:[#allocation17_spill] sm:$0xff] %v6447_v23  ;;  %5022 = vmatpush3.msra.mxu0 %v2488_v4  ;;  %4826 = vmatmul.mubr.f32.gmra.mxu1 %v6350_v19  ;;  %v788_v4 = vand.u32 15, %v580_v36  ;;  %v1391_v57 = vsel %vm1381_vm1, %v1370_v42, %v7720_v28  ;;  %v1282_v33 = vsel %vm1272_vm4, %v1261_v43, %v7721_v51  ;;  %v1263_v59 = vrot.slane %v5786_v61, 7 }
  0x86   : > { %4905 = vmatprep.mubr.f32.mxu0 %v6389_v55  ;;  %4943 = vmatprep.subr.mxu1 %v2214_v45  ;;  %7838 = vst [vmem:[#allocation18_spill] sm:$0xff] %v6463_v62  ;;  %v1372_v29 = vrot.slane %v5786_v61, 1  ;;  %v4238_v36 = vsel %vm6453_vm13, 1.0, %v7803_v7  ;;  %v1264_v22 = vrot.slane %v5806_v6, 7  ;;  %v2486_v61 = vld [vmem:[%s7682_s3 + $0x220] sm:$0xff]  ;;  %vm6495_vm15 = vcmp.ne.s32.totalorder %v781_v38, 15 }
  0x87   : > { %4906 = vmatmul.mubr.f32.gmra.mxu0 %v6394_v17  ;;  %4944 = vmatpush3.msra.mxu1 %v2214_v45  ;;  %v4221_v45 = vsel %vm6457_vm14, 1.0, %v7803_v7  ;;  %v795_v41 = vand.u32 15, %v581_v9  ;;  %v583_v51 = vadd.s32 248, %v5750_v49  ;;  %v7841_v40 = vrot.slane %v5744_v47, 7 }
  0x88   : > { %5023 = vmatprep.subr.mxu0 %v2487_v30  ;;  %4828 = vmatprep.mubr.f32.mxu1 %v6437_v35  ;;  %v7842_v14 = vrot.slane %v5744_v47, 1  ;;  %vm6513_vm0 = vcmp.ne.s32.totalorder %v788_v4, 0  ;;  %v802_v9 = vand.u32 15, %v582_v48  ;;  %v6523_v47 = vmul.f32 %v4221_v45, %v1282_v33  ;;  %v2485_v45 = vld [vmem:[%s7682_s3 + $0x218] sm:$0xff] }
  0x89   : > { %5024 = vmatpush3.msra.mxu0 %v2487_v30  ;;  %4829 = vmatmul.mubr.f32.gmra.mxu1 %v6441_v63  ;;  %v6505_v30 = vsel %vm1272_vm4, %v7841_v40, %v1261_v43  ;;  %v6521_v43 = vmul.f32 %v4238_v36, %v1391_v57  ;;  %v1375_v4 = vrot.slane %v5877_v52, 1  ;;  %v4239_v48 = vsel %vm6495_vm15, 1.0, %v7803_v7 }
  0x8a   : > { %4908 = vmatprep.mubr.f32.mxu0 %v6447_v23  ;;  %4945 = vmatprep.subr.mxu1 %v2213_v25  ;;  %v6511_v38 = vsel %vm1381_vm1, %v7842_v14, %v1370_v42  ;;  %v2212_v23 = vld [vmem:[%s7682_s3 + $0x198] sm:$0xff]  ;;  %v1374_v42 = vrot.slane %v5830_v18, 1  ;;  %v1280_v33 = vsel %vm1272_vm4, %v1263_v59, %v1264_v22  ;;  %v1265_v36 = vrot.slane %v5830_v18, 7 }
  0x8b   : > { %7843 = vst [vmem:[#allocation19_spill] sm:$0xff] %v6511_v38  ;;  %4909 = vmatmul.mubr.f32.gmra.mxu0 %v6463_v62  ;;  %4946 = vmatpush3.msra.mxu1 %v2213_v25  ;;  %7846 = vst [vmem:[#allocation20_spill] sm:$0xff] %v6521_v43  ;;  %v7847_v25 = vrot.slane %v5806_v6, 1  ;;  %v4222_v28 = vsel %vm6513_vm0, 1.0, %v7803_v7  ;;  %vm6545_vm2 = vcmp.ne.s32.totalorder %v795_v41, 15  ;;  %v1266_v40 = vrot.slane %v5877_v52, 7 }
  0x8c   : > { %5025 = vmatprep.subr.mxu0 %v2486_v61  ;;  %4831 = vmatprep.mubr.f32.mxu1 %v6465_v5  ;;  %v809_v18 = vand.u32 15, %v583_v51  ;;  %vm6560_vm3 = vcmp.ne.s32.totalorder %v802_v9, 0  ;;  %v7853_v52 = vrot.slane %v5774_v56, 1  ;;  %v2211_v41 = vld [vmem:[%s7682_s3 + $0x190] sm:$0xff]  ;;  %v6579_v9 = vmul.f32 %v4222_v28, %v1280_v33 }
  0x8d   : > { %v1389_v57 = vsel %vm1381_vm1, %v1372_v29, %v7847_v25  ;;  %5026 = vmatpush3.msra.mxu0 %v2486_v61  ;;  %4832 = vmatmul.mubr.f32.gmra.mxu1 %v6505_v30  ;;  %v6551_v25 = vld [vmem:[%s5636_s16 + $0xf0] sm:$0xff]  ;;  %v7850_v61 = vrot.slane %v5774_v56, 7  ;;  %v4240_v56 = vsel %vm6545_vm2, 1.0, %v7803_v7  ;;  %v1278_v33 = vsel %vm1272_vm4, %v1265_v36, %v1266_v40 }
  0x8e   : > { %4911 = vmatprep.mubr.f32.mxu0 %v6511_v38  ;;  %4947 = vmatprep.subr.mxu1 %v2212_v23  ;;  %v6569_v51 = vsel %vm1381_vm1, %v7853_v52, %v1372_v29  ;;  %v6574_v38 = vmul.f32 %v4239_v48, %v1389_v57  ;;  %v7730_v29 = vrot.slane %v6551_v25, 1  ;;  %v2484_v48 = vld [vmem:[%s7682_s3 + $0x210] sm:$0xff]  ;;  %v4223_v57 = vsel %vm6560_vm3, 1.0, %v7803_v7 }
  0x8f   : > { %v6558_v62 = vsel %vm1272_vm4, %v7850_v61, %v1263_v59  ;;  %4912 = vmatmul.mubr.f32.gmra.mxu0 %v6521_v43  ;;  %4948 = vmatpush3.msra.mxu1 %v2212_v23  ;;  %v1387_v59 = vsel %vm1381_vm1, %v1374_v42, %v1375_v4  ;;  %v1376_v23 = vrot.slane %v5903_v3, 1  ;;  %vm1159_vm5 = vcmp.ne.s32.totalorder %v809_v18, 15  ;;  %v2210_v18 = vld [vmem:[%s7682_s3 + $0x188] sm:$0xff] }
  0x90   : > { %5027 = vmatprep.subr.mxu0 %v2485_v45  ;;  %4834 = vmatprep.mubr.f32.mxu1 %v6523_v47  ;;  %v7731_v28 = vrot.slane %v5903_v3, 7  ;;  %v7854_v14 = vrot.slane %v5806_v6, 1  ;;  %v6611_v17 = vmul.f32 %v4240_v56, %v1387_v59  ;;  %v2209_v59 = vld [vmem:[%s7682_s3 + $0x180] sm:$0xff] }
  0x91   : > { %5028 = vmatpush3.msra.mxu0 %v2485_v45  ;;  %4835 = vmatmul.mubr.f32.gmra.mxu1 %v6558_v62  ;;  %v6598_v45 = vsel %vm1272_vm4, %v1264_v22, %v1265_v36  ;;  %v6614_v22 = vmul.f32 %v4223_v57, %v1278_v33  ;;  %v4241_v36 = vsel %vm1159_vm5, 1.0, %v7803_v7  ;;  %v1385_v6 = vsel %vm1381_vm1, %v1376_v23, %v7730_v29  ;;  %v5461_v57 = vld [vmem:[%s5636_s16 + $0x8] sm:$0xff]  ;;  %v2769_v33 = vld [vmem:[%s7682_s3 + $0x2f0] sm:$0xff]  ;;  %v6774_v29 = vld [vmem:[%s5636_s16 + $0x80] sm:$0xff] }
  0x92   : > { %4914 = vmatprep.mubr.f32.mxu0 %v6569_v51  ;;  %4949 = vmatprep.subr.mxu1 %v2211_v41  ;;  %v6606_v61 = vsel %vm1381_vm1, %v7854_v14, %v1374_v42  ;;  %7856 = vst [vmem:[#allocation22_spill] sm:$0xff] %v6611_v17  ;;  %v2483_v42 = vld [vmem:[%s7682_s3 + $0x208] sm:$0xff]  ;;  %v6630_v52 = vsel %vm1272_vm4, %v1266_v40, %v7731_v28  ;;  %v2482_v40 = vld [vmem:[%s7682_s3 + $0x200] sm:$0xff]  ;;  %v6672_v14 = vld [vmem:[%s5636_s16 + $0x18] sm:$0xff] }
  0x93   : > { %4915 = vmatmul.mubr.f32.gmra.mxu0 %v6574_v38  ;;  %4950 = vmatpush3.msra.mxu1 %v2211_v41  ;;  %7855 = vst [vmem:[#allocation21_spill] sm:$0xff] %v6606_v61  ;;  %v6635_v41 = vsel %vm1381_vm1, %v1375_v4, %v1376_v23  ;;  %v6640_v56 = vmul.f32 %v4241_v36, %v1385_v6  ;;  %v2770_v4 = vld [vmem:[%s7682_s3 + $0x2f8] sm:$0xff]  ;;  %v3041_v36 = vld [vmem:[%s7682_s3 + $0x368] sm:$0xff]  ;;  %v6684_v6 = vld [vmem:[%s5636_s16 + $0x20] sm:$0xff] }
  0x94   : > { %5029 = vmatprep.subr.mxu0 %v2484_v48  ;;  %4837 = vmatprep.mubr.f32.mxu1 %v6579_v9  ;;  %v3043_v23 = vld [vmem:[%s7682_s3 + $0x378] sm:$0xff]  ;;  %7861 = vst [vmem:[#allocation27_spill] sm:$0xff] %v6774_v29  ;;  %v3034_v28 = vld [vmem:[%s7682_s3 + $0x330] sm:$0xff] }
  0x95   : > { %5030 = vmatpush3.msra.mxu0 %v2484_v48  ;;  %4838 = vmatmul.mubr.f32.gmra.mxu1 %v6598_v45  ;;  %v5460_v48 = vld [vmem:[%s5636_s16] sm:$0xff] }
  0x96   : > { %4917 = vmatprep.mubr.f32.mxu0 %v6606_v61  ;;  %4951 = vmatprep.subr.mxu1 %v2210_v18 }
  0x97   : > { %4918 = vmatmul.mubr.f32.gmra.mxu0 %v6611_v17  ;;  %4952 = vmatpush3.msra.mxu1 %v2210_v18  ;;  %v2768_v18 = vld [vmem:[%s7682_s3 + $0x2e8] sm:$0xff] }
  0x98   : > { %5031 = vmatprep.subr.mxu0 %v2483_v42  ;;  %4840 = vmatprep.mubr.f32.mxu1 %v6614_v22 }
  0x99   : > { %5032 = vmatpush3.msra.mxu0 %v2483_v42  ;;  %4841 = vmatmul.mubr.f32.gmra.mxu1 %v6630_v52  ;;  %v6688_v42 = vld [vmem:[%s5636_s16 + $0x28] sm:$0xff] }
  0x9a   : > { %4920 = vmatprep.mubr.f32.mxu0 %v6635_v41  ;;  %4953 = vmatprep.subr.mxu1 %v2209_v59 }
  0x9b   : > { %4921 = vmatmul.mubr.f32.gmra.mxu0 %v6640_v56  ;;  %4954 = vmatpush3.msra.mxu1 %v2209_v59  ;;  %v2767_v59 = vld [vmem:[%s7682_s3 + $0x2e0] sm:$0xff] }
  0x9c   : > { %5033 = vmatprep.subr.mxu0 %v2482_v40  ;;  %4955 = vmatprep.mubr.f32.mxu1 %v5918_v20  ;;  %v3042_v20 = vld [vmem:[%s7682_s3 + $0x370] sm:$0xff] }
  0x9d   : > { %5034 = vmatpush3.msra.mxu0 %v2482_v40  ;;  %4956 = vmatmul.mubr.f32.vlgmr.msra.gmra.mxu1 %v5922_v21  ;;  %v6668_v21 = vld [vmem:[%s5636_s16 + $0x10] sm:$0xff]  ;;  %v3040_v40 = vld [vmem:[%s7682_s3 + $0x360] sm:$0xff] }
  0x9e   : > { %5035 = vmatprep.mubr.f32.mxu0 %v5460_v48  ;;  %5083 = vmatprep.subr.mxu1 %v2770_v4  ;;  %v2766_v48 = vld [vmem:[%s7682_s3 + $0x2d8] sm:$0xff] }
  0x9f   : > { %5036 = vmatmul.mubr.f32.vlgmr.msra.gmra.mxu0 %v5461_v57  ;;  %5084 = vmatpush3.msra.mxu1 %v2770_v4  ;;  %v6700_v4 = vld [vmem:[%s5636_s16 + $0x30] sm:$0xff]  ;;  %v3039_v57 = vld [vmem:[%s7682_s3 + $0x358] sm:$0xff] }
  0xa0   : > { %5163 = vmatprep.subr.mxu0 %v3043_v23  ;;  %4958 = vmatprep.mubr.f32.mxu1 %v5986_v11 }
  0xa1   : > { %5164 = vmatpush3.msra.mxu0 %v3043_v23  ;;  %4959 = vmatmul.mubr.f32.gmra.mxu1 %v5975_v27  ;;  %v6704_v23 = vld [vmem:[%s5636_s16 + $0x38] sm:$0xff] }
  0xa2   : > { %5038 = vmatprep.mubr.f32.mxu0 %v6668_v21  ;;  %5085 = vmatprep.subr.mxu1 %v2769_v33 }
  0xa3   : > { %5039 = vmatmul.mubr.f32.gmra.mxu0 %v6672_v14  ;;  %5086 = vmatpush3.msra.mxu1 %v2769_v33  ;;  %v6716_v33 = vld [vmem:[%s5636_s16 + $0x40] sm:$0xff] }
  0xa4   : > { %5165 = vmatprep.subr.mxu0 %v3042_v20  ;;  %4961 = vmatprep.mubr.f32.mxu1 %v6035_v53 }
  0xa5   : > { %5166 = vmatpush3.msra.mxu0 %v3042_v20  ;;  %4962 = vmatmul.mubr.f32.gmra.mxu1 %v6004_v32  ;;  %v6720_v20 = vld [vmem:[%s5636_s16 + $0x48] sm:$0xff] }
  0xa6   : > { %5041 = vmatprep.mubr.f32.mxu0 %v6684_v6  ;;  %5087 = vmatprep.subr.mxu1 %v2768_v18 }
  0xa7   : > { %5042 = vmatmul.mubr.f32.gmra.mxu0 %v6688_v42  ;;  %5088 = vmatpush3.msra.mxu1 %v2768_v18  ;;  %v2765_v18 = vld [vmem:[%s7682_s3 + $0x2d0] sm:$0xff] }
  0xa8   : > { %5167 = vmatprep.subr.mxu0 %v3041_v36  ;;  %4964 = vmatprep.mubr.f32.mxu1 %v6061_v60 }
  0xa9   : > { %5168 = vmatpush3.msra.mxu0 %v3041_v36  ;;  %4965 = vmatmul.mubr.f32.gmra.mxu1 %v6052_v8  ;;  %v3038_v36 = vld [vmem:[%s7682_s3 + $0x350] sm:$0xff] }
  0xaa   : > { %5044 = vmatprep.mubr.f32.mxu0 %v6700_v4  ;;  %5089 = vmatprep.subr.mxu1 %v2767_v59 }
  0xab   : > { %5045 = vmatmul.mubr.f32.gmra.mxu0 %v6704_v23  ;;  %5090 = vmatpush3.msra.mxu1 %v2767_v59  ;;  %v6732_v59 = vld [vmem:[%s5636_s16 + $0x50] sm:$0xff] }
  0xac   : > { %5169 = vmatprep.subr.mxu0 %v3040_v40  ;;  %4967 = vmatprep.mubr.f32.mxu1 %v6129_v39  ;;  %7857 = vst [vmem:[#allocation23_spill] sm:$0xff] %v6732_v59 }
  0xad   : > { %5170 = vmatpush3.msra.mxu0 %v3040_v40  ;;  %4968 = vmatmul.mubr.f32.gmra.mxu1 %v6121_v58  ;;  %v6736_v40 = vld [vmem:[%s5636_s16 + $0x58] sm:$0xff] }
  0xae   : > { %5047 = vmatprep.mubr.f32.mxu0 %v6716_v33  ;;  %5091 = vmatprep.subr.mxu1 %v2766_v48  ;;  %7858 = vst [vmem:[#allocation24_spill] sm:$0xff] %v6736_v40 }
  0xaf   : > { %5048 = vmatmul.mubr.f32.gmra.mxu0 %v6720_v20  ;;  %5092 = vmatpush3.msra.mxu1 %v2766_v48  ;;  %v2764_v48 = vld [vmem:[%s7682_s3 + $0x2c8] sm:$0xff] }
  0xb0   : > { %5171 = vmatprep.subr.mxu0 %v3039_v57  ;;  %4970 = vmatprep.mubr.f32.mxu1 %v6184_v15 }
  0xb1   : > { %5172 = vmatpush3.msra.mxu0 %v3039_v57  ;;  %4971 = vmatmul.mubr.f32.gmra.mxu1 %v6162_v46  ;;  %v3037_v57 = vld [vmem:[%s7682_s3 + $0x348] sm:$0xff] }
  0xb2   : > { %5050 = vmatprep.mubr.f32.mxu0 %v6732_v59  ;;  %5093 = vmatprep.subr.mxu1 %v2765_v18  ;;  %v6869_v59 = vld [vmem:[%s5636_s16 + $0xd8] sm:$0xff] }
  0xb3   : > { %5051 = vmatmul.mubr.f32.gmra.mxu0 %v6736_v40  ;;  %5094 = vmatpush3.msra.mxu1 %v2765_v18  ;;  %v2763_v18 = vld [vmem:[%s7682_s3 + $0x2c0] sm:$0xff]  ;;  %v6864_v40 = vld [vmem:[%s5636_s16 + $0xd0] sm:$0xff]  ;;  %7874 = vst [vmem:[#allocation39_spill] sm:$0xff] %v6869_v59 }
  0xb4   : > { %5173 = vmatprep.subr.mxu0 %v3038_v36  ;;  %4973 = vmatprep.mubr.f32.mxu1 %v6239_v13  ;;  %7873 = vst [vmem:[#allocation38_spill] sm:$0xff] %v6864_v40 }
  0xb5   : > { %5174 = vmatpush3.msra.mxu0 %v3038_v36  ;;  %4974 = vmatmul.mubr.f32.gmra.mxu1 %v6194_v31  ;;  %v3036_v36 = vld [vmem:[%s7682_s3 + $0x340] sm:$0xff] }
  0xb6   : > { %5053 = vmatprep.mubr.f32.mxu0 %v5900_v2  ;;  %5095 = vmatprep.subr.mxu1 %v2764_v48  ;;  %v6758_v2 = vld [vmem:[%s5636_s16 + $0x70] sm:$0xff] }
  0xb7   : > { %5054 = vmatmul.mubr.f32.gmra.mxu0 %v5925_v26  ;;  %5096 = vmatpush3.msra.mxu1 %v2764_v48  ;;  %7859 = vst [vmem:[#allocation25_spill] sm:$0xff] %v6758_v2  ;;  %v6762_v26 = vld [vmem:[%s5636_s16 + $0x78] sm:$0xff] }
  0xb8   : > { %5175 = vmatprep.subr.mxu0 %v3037_v57  ;;  %4976 = vmatprep.mubr.f32.mxu1 %v6264_v44  ;;  %7860 = vst [vmem:[#allocation26_spill] sm:$0xff] %v6762_v26  ;;  %v2762_v48 = vld [vmem:[%s7682_s3 + $0x2b8] sm:$0xff] }
  0xb9   : > { %5176 = vmatpush3.msra.mxu0 %v3037_v57  ;;  %4977 = vmatmul.mubr.f32.gmra.mxu1 %v6243_v24  ;;  %v3035_v57 = vld [vmem:[%s7682_s3 + $0x338] sm:$0xff] }
  0xba   : > { %5056 = vmatprep.mubr.f32.mxu0 %v6758_v2  ;;  %5097 = vmatprep.subr.mxu1 %v2763_v18  ;;  %v6840_v2 = vld [vmem:[%s5636_s16 + $0xc0] sm:$0xff] }
  0xbb   : > { %5057 = vmatmul.mubr.f32.gmra.mxu0 %v6762_v26  ;;  %5098 = vmatpush3.msra.mxu1 %v2763_v18  ;;  %v6778_v18 = vld [vmem:[%s5636_s16 + $0x88] sm:$0xff]  ;;  %v6823_v26 = vld [vmem:[%s5636_s16 + $0xb0] sm:$0xff]  ;;  %7869 = vst [vmem:[#allocation35_spill] sm:$0xff] %v6840_v2 }
  0xbc   : > { %5177 = vmatprep.subr.mxu0 %v3036_v36  ;;  %4979 = vmatprep.mubr.f32.mxu1 %v6328_v0  ;;  %7862 = vst [vmem:[#allocation28_spill] sm:$0xff] %v6778_v18  ;;  %7867 = vst [vmem:[#allocation33_spill] sm:$0xff] %v6823_v26 }
  0xbd   : > { %5178 = vmatpush3.msra.mxu0 %v3036_v36  ;;  %4980 = vmatmul.mubr.f32.gmra.mxu1 %v6319_v54  ;;  %v2761_v36 = vld [vmem:[%s7682_s3 + $0x2b0] sm:$0xff] }
  0xbe   : > { %5059 = vmatprep.mubr.f32.mxu0 %v6774_v29  ;;  %5099 = vmatprep.subr.mxu1 %v2762_v48  ;;  %v6790_v29 = vld [vmem:[%s5636_s16 + $0x90] sm:$0xff] }
  0xbf   : > { %5060 = vmatmul.mubr.f32.gmra.mxu0 %v6778_v18  ;;  %5100 = vmatpush3.msra.mxu1 %v2762_v48  ;;  %7863 = vst [vmem:[#allocation29_spill] sm:$0xff] %v6790_v29  ;;  %v6794_v48 = vld [vmem:[%s5636_s16 + $0x98] sm:$0xff]  ;;  %v6806_v18 = vld [vmem:[%s5636_s16 + $0xa0] sm:$0xff] }
  0xc0   : > { %5179 = vmatprep.subr.mxu0 %v3035_v57  ;;  %4982 = vmatprep.mubr.f32.mxu1 %v6383_v16  ;;  %7864 = vst [vmem:[#allocation30_spill] sm:$0xff] %v6794_v48  ;;  %7865 = vst [vmem:[#allocation31_spill] sm:$0xff] %v6806_v18 }
  0xc1   : > { %5180 = vmatpush3.msra.mxu0 %v3035_v57  ;;  %4983 = vmatmul.mubr.f32.gmra.mxu1 %v6350_v19  ;;  %v2760_v57 = vld [vmem:[%s7682_s3 + $0x2a8] sm:$0xff] }
  0xc2   : > { %5062 = vmatprep.mubr.f32.mxu0 %v6790_v29  ;;  %5101 = vmatprep.subr.mxu1 %v2761_v36  ;;  %v3033_v29 = vld [vmem:[%s7682_s3 + $0x328] sm:$0xff] }
  0xc3   : > { %5063 = vmatmul.mubr.f32.gmra.mxu0 %v6794_v48  ;;  %5102 = vmatpush3.msra.mxu1 %v2761_v36  ;;  %v584_v36 = vadd.s32 256, %v5750_v49  ;;  %v6811_v48 = vld [vmem:[%s5636_s16 + $0xa8] sm:$0xff] }
  0xc4   : > { %5181 = vmatprep.subr.mxu0 %v3034_v28  ;;  %4985 = vmatprep.mubr.f32.mxu1 %v6437_v35  ;;  %7866 = vst [vmem:[#allocation32_spill] sm:$0xff] %v6811_v48 }
  0xc5   : > { %5182 = vmatpush3.msra.mxu0 %v3034_v28  ;;  %4986 = vmatmul.mubr.f32.gmra.mxu1 %v6441_v63  ;;  %v2759_v28 = vld [vmem:[%s7682_s3 + $0x2a0] sm:$0xff] }
  0xc6   : > { %5065 = vmatprep.mubr.f32.mxu0 %v6806_v18  ;;  %5103 = vmatprep.subr.mxu1 %v2760_v57  ;;  %v3032_v18 = vld [vmem:[%s7682_s3 + $0x320] sm:$0xff] }
  0xc7   : > { %5066 = vmatmul.mubr.f32.gmra.mxu0 %v6811_v48  ;;  %5104 = vmatpush3.msra.mxu1 %v2760_v57  ;;  %v816_v57 = vand.u32 15, %v584_v36  ;;  %v6827_v48 = vld [vmem:[%s5636_s16 + $0xb8] sm:$0xff] }
  0xc8   : > { %5183 = vmatprep.subr.mxu0 %v3033_v29  ;;  %4988 = vmatprep.mubr.f32.mxu1 %v6465_v5  ;;  %7868 = vst [vmem:[#allocation34_spill] sm:$0xff] %v6827_v48  ;;  %v3031_v36 = vld [vmem:[%s7682_s3 + $0x318] sm:$0xff] }
  0xc9   : > { %5184 = vmatpush3.msra.mxu0 %v3033_v29  ;;  %4989 = vmatmul.mubr.f32.gmra.mxu1 %v6505_v30  ;;  %v2758_v29 = vld [vmem:[%s7682_s3 + $0x298] sm:$0xff]  ;;  %vm1052_vm6 = vcmp.ne.s32.totalorder %v816_v57, 0  ;;  %v3030_v57 = vld [vmem:[%s7682_s3 + $0x310] sm:$0xff] }
  0xca   : > { %5068 = vmatprep.mubr.f32.mxu0 %v6823_v26  ;;  %5105 = vmatprep.subr.mxu1 %v2759_v28  ;;  %v1268_v26 = vrot.slane %v6551_v25, 7 }
  0xcb   : > { %5069 = vmatmul.mubr.f32.gmra.mxu0 %v6827_v48  ;;  %5106 = vmatpush3.msra.mxu1 %v2759_v28  ;;  %v6844_v28 = vld [vmem:[%s5636_s16 + $0xc8] sm:$0xff]  ;;  %v6851_v48 = vld [vmem:[%s5636_s16 + $0xf8] sm:$0xff] }
  0xcc   : > { %5185 = vmatprep.subr.mxu0 %v3032_v18  ;;  %4991 = vmatprep.mubr.f32.mxu1 %v6523_v47  ;;  %7870 = vst [vmem:[#allocation36_spill] sm:$0xff] %v6844_v28  ;;  %7871 = vst [vmem:[#allocation37_spill] sm:$0xff] %v6851_v48 }
  0xcd   : > { %5186 = vmatpush3.msra.mxu0 %v3032_v18  ;;  %4992 = vmatmul.mubr.f32.gmra.mxu1 %v6558_v62  ;;  %v2757_v18 = vld [vmem:[%s7682_s3 + $0x290] sm:$0xff] }
  0xce   : > { %5071 = vmatprep.mubr.f32.mxu0 %v6840_v2  ;;  %5107 = vmatprep.subr.mxu1 %v2758_v29  ;;  %v4224_v2 = vsel %vm1052_vm6, 1.0, %v7803_v7 }
  0xcf   : > { %5072 = vmatmul.mubr.f32.gmra.mxu0 %v6844_v28  ;;  %5108 = vmatpush3.msra.mxu1 %v2758_v29  ;;  %v7872_v29 = vrot.slane %v5903_v3, 7  ;;  %v2756_v3 = vld [vmem:[%s7682_s3 + $0x288] sm:$0xff] }
  0xd0   : > { %5187 = vmatprep.subr.mxu0 %v3031_v36  ;;  %4994 = vmatprep.mubr.f32.mxu1 %v6579_v9 }
  0xd1   : > { %5188 = vmatpush3.msra.mxu0 %v3031_v36  ;;  %4995 = vmatmul.mubr.f32.gmra.mxu1 %v6598_v45  ;;  %v1276_v28 = vsel %vm1272_vm4, %v7872_v29, %v1268_v26  ;;  %v3029_v36 = vld [vmem:[%s7682_s3 + $0x308] sm:$0xff] }
  0xd2   : > { %5074 = vmatprep.mubr.f32.mxu0 %v6864_v40  ;;  %5109 = vmatprep.subr.mxu1 %v2757_v18  ;;  %v6876_v29 = vmul.f32 %v4224_v2, %v1276_v28  ;;  %v6883_v40 = vld [vmem:[%s5636_s16 + $0xe0] sm:$0xff]  ;;  %v6893_v2 = vld [vmem:[%s5636_s16 + $0xe8] sm:$0xff] }
  0xd3   : > { %5075 = vmatmul.mubr.f32.gmra.mxu0 %v6869_v59  ;;  %5110 = vmatpush3.msra.mxu1 %v2757_v18  ;;  %7875 = vst [vmem:[#allocation40_spill] sm:$0xff] %v6883_v40  ;;  %v7876_v18 = vrot.slane %v6851_v48, 7  ;;  %7877 = vst [vmem:[#allocation41_spill] sm:$0xff] %v6893_v2  ;;  %v2755_v28 = vld [vmem:[%s7682_s3 + $0x280] sm:$0xff] }
  0xd4   : > { %5189 = vmatprep.subr.mxu0 %v3030_v57  ;;  %4997 = vmatprep.mubr.f32.mxu1 %v6614_v22 }
  0xd5   : > { %5190 = vmatpush3.msra.mxu0 %v3030_v57  ;;  %4998 = vmatmul.mubr.f32.gmra.mxu1 %v6630_v52  ;;  %v6890_v59 = vsel %vm1272_vm4, %v1268_v26, %v7876_v18  ;;  %v3028_v26 = vld [vmem:[%s7682_s3 + $0x300] sm:$0xff]  ;;  %v3316_v57 = vld [vmem:[%s7682_s3 + $0x3f8] sm:$0xff]  ;;  %v7878_v18 = vld [vmem:[#allocation4_spill] sm:$0xff] }
  0xd6   : > { %5077 = vmatprep.mubr.f32.mxu0 %v6883_v40  ;;  %5111 = vmatprep.subr.mxu1 %v2756_v3 }
  0xd7   : > { %5078 = vmatmul.mubr.f32.gmra.mxu0 %v6893_v2  ;;  %5112 = vmatpush3.msra.mxu1 %v2756_v3  ;;  %v3315_v3 = vld [vmem:[%s7682_s3 + $0x3f0] sm:$0xff] }
  0xd8   : > { %5191 = vmatprep.subr.mxu0 %v3029_v36  ;;  %5000 = vmatprep.mubr.f32.mxu1 %v6876_v29 }
  0xd9   : > { %5192 = vmatpush3.msra.mxu0 %v3029_v36  ;;  %5001 = vmatmul.mubr.f32.gmra.mxu1 %v6890_v59  ;;  %v3589_v36 = vld [vmem:[%s7682_s3 + $0x478] sm:$0xff] }
  0xda   : > { %5080 = vmatprep.mubr.f32.mxu0 %v6551_v25  ;;  %5113 = vmatprep.subr.mxu1 %v2755_v28 }
  0xdb   : > { %5081 = vmatmul.mubr.f32.gmra.mxu0 %v6851_v48  ;;  %5114 = vmatpush3.msra.mxu1 %v2755_v28  ;;  %v7881_v28 = vld [vmem:[#allocation7_spill] sm:$0xff] }
  0xdc   : > { %5193 = vmatprep.subr.mxu0 %v3028_v26  ;;  %5115 = vmatprep.mubr.f32.mxu1 %v5931_v34  ;;  %v7879_v34 = vld [vmem:[#allocation5_spill] sm:$0xff] }
  0xdd   : > { %5194 = vmatpush3.msra.mxu0 %v3028_v26  ;;  %5116 = vmatmul.mubr.f32.vlgmr.msra.gmra.mxu1 %v5946_v10  ;;  %v3588_v10 = vld [vmem:[%s7682_s3 + $0x470] sm:$0xff]  ;;  %v3587_v26 = vld [vmem:[%s7682_s3 + $0x468] sm:$0xff] }
  0xde   : > { %5195 = vmatprep.mubr.f32.mxu0 %v5986_v11  ;;  %5243 = vmatprep.subr.mxu1 %v3316_v57  ;;  %v7880_v11 = vld [vmem:[#allocation6_spill] sm:$0xff] }
  0xdf   : > { %5196 = vmatmul.mubr.f32.vlgmr.msra.gmra.mxu0 %v5975_v27  ;;  %5244 = vmatpush3.msra.mxu1 %v3316_v57  ;;  %v3314_v27 = vld [vmem:[%s7682_s3 + $0x3e8] sm:$0xff]  ;;  %v7883_v57 = vld [vmem:[#allocation9_spill] sm:$0xff] }
  0xe0   : > { %5323 = vmatprep.subr.mxu0 %v3589_v36  ;;  %5118 = vmatprep.mubr.f32.mxu1 %v7878_v18 }
  0xe1   : > { %5324 = vmatpush3.msra.mxu0 %v3589_v36  ;;  %5119 = vmatmul.mubr.f32.gmra.mxu1 %v7879_v34  ;;  %v3586_v36 = vld [vmem:[%s7682_s3 + $0x460] sm:$0xff] }
  0xe2   : > { %5198 = vmatprep.mubr.f32.mxu0 %v6035_v53  ;;  %5245 = vmatprep.subr.mxu1 %v3315_v3  ;;  %v7882_v53 = vld [vmem:[#allocation8_spill] sm:$0xff] }
  0xe3   : > { %5199 = vmatmul.mubr.f32.gmra.mxu0 %v6004_v32  ;;  %5246 = vmatpush3.msra.mxu1 %v3315_v3  ;;  %v3313_v32 = vld [vmem:[%s7682_s3 + $0x3e0] sm:$0xff]  ;;  %v7885_v3 = vld [vmem:[#allocation11_spill] sm:$0xff] }
  0xe4   : > { %5325 = vmatprep.subr.mxu0 %v3588_v10  ;;  %5121 = vmatprep.mubr.f32.mxu1 %v7880_v11 }
  0xe5   : > { %5326 = vmatpush3.msra.mxu0 %v3588_v10  ;;  %5122 = vmatmul.mubr.f32.gmra.mxu1 %v7881_v28  ;;  %v3585_v10 = vld [vmem:[%s7682_s3 + $0x458] sm:$0xff] }
  0xe6   : > { %5201 = vmatprep.mubr.f32.mxu0 %v6061_v60  ;;  %5247 = vmatprep.subr.mxu1 %v3314_v27  ;;  %v7884_v60 = vld [vmem:[#allocation10_spill] sm:$0xff] }
  0xe7   : > { %5202 = vmatmul.mubr.f32.gmra.mxu0 %v6052_v8  ;;  %5248 = vmatpush3.msra.mxu1 %v3314_v27  ;;  %v3312_v8 = vld [vmem:[%s7682_s3 + $0x3d8] sm:$0xff] }
  0xe8   : > { %5327 = vmatprep.subr.mxu0 %v3587_v26  ;;  %5124 = vmatprep.mubr.f32.mxu1 %v7882_v53 }
  0xe9   : > { %5328 = vmatpush3.msra.mxu0 %v3587_v26  ;;  %5125 = vmatmul.mubr.f32.gmra.mxu1 %v7883_v57  ;;  %v7886_v26 = vld [vmem:[#allocation12_spill] sm:$0xff] }
  0xea   : > { %5204 = vmatprep.mubr.f32.mxu0 %v6129_v39  ;;  %5249 = vmatprep.subr.mxu1 %v3313_v32 }
  0xeb   : > { %5205 = vmatmul.mubr.f32.gmra.mxu0 %v6121_v58  ;;  %5250 = vmatpush3.msra.mxu1 %v3313_v32  ;;  %v3311_v58 = vld [vmem:[%s7682_s3 + $0x3d0] sm:$0xff] }
  0xec   : > { %5329 = vmatprep.subr.mxu0 %v3586_v36  ;;  %5127 = vmatprep.mubr.f32.mxu1 %v7884_v60 }
  0xed   : > { %5330 = vmatpush3.msra.mxu0 %v3586_v36  ;;  %5128 = vmatmul.mubr.f32.gmra.mxu1 %v7885_v3  ;;  %v7888_v36 = vld [vmem:[#allocation13_spill] sm:$0xff] }
  0xee   : > { %5207 = vmatprep.mubr.f32.mxu0 %v6184_v15  ;;  %5251 = vmatprep.subr.mxu1 %v3312_v8  ;;  %v6955_v39 = vpop.f32.mrf.mxu1  ;;  %v3584_v15 = vld [vmem:[%s7682_s3 + $0x450] sm:$0xff] }
  0xef   : > { %5208 = vmatmul.mubr.f32.gmra.mxu0 %v6162_v46  ;;  %5252 = vmatpush3.msra.mxu1 %v3312_v8  ;;  %v6961_v27 = vpop.f32.mrf.mxu0  ;;  %v3310_v8 = vld [vmem:[%s7682_s3 + $0x3c8] sm:$0xff] }
  0xf0   : > { %5331 = vmatprep.subr.mxu0 %v3585_v10  ;;  %5130 = vmatprep.mubr.f32.mxu1 %v7886_v26  ;;  %v6964_v32 = vpop.f32.mrf.mxu1 }
  0xf1   : > { %7887 = vst [vmem:[#allocation4_spill] sm:$0xff] %v6964_v32  ;;  %5332 = vmatpush3.msra.mxu0 %v3585_v10  ;;  %5131 = vmatmul.mubr.f32.gmra.mxu1 %v7888_v36  ;;  %v6970_v46 = vpop.f32.mrf.mxu0  ;;  %v7899_v32 = vld [vmem:[#allocation18_spill] sm:$0xff] }
  0xf2   : > { %5210 = vmatprep.mubr.f32.mxu0 %v6239_v13  ;;  %5253 = vmatprep.subr.mxu1 %v3311_v58  ;;  %v3583_v13 = vld [vmem:[%s7682_s3 + $0x448] sm:$0xff] }
  0xf3   : > { %5211 = vmatmul.mubr.f32.gmra.mxu0 %v6194_v31  ;;  %5254 = vmatpush3.msra.mxu1 %v3311_v58  ;;  %v6977_v2 = vpop.f32.mrf.mxu1  ;;  %v3309_v58 = vld [vmem:[%s7682_s3 + $0x3c0] sm:$0xff] }
  0xf4   : > { %7889 = vst [vmem:[#allocation5_spill] sm:$0xff] %v6977_v2  ;;  %5333 = vmatprep.subr.mxu0 %v3584_v15  ;;  %5133 = vmatprep.mubr.f32.mxu1 %v6216_v1  ;;  %v7894_v2 = vld [vmem:[#allocation15_spill] sm:$0xff] }
  0xf5   : > { %5334 = vmatpush3.msra.mxu0 %v3584_v15  ;;  %5134 = vmatmul.mubr.f32.gmra.mxu1 %v6262_v50  ;;  %v6984_v10 = vpop.f32.mrf.mxu0  ;;  %v6986_v31 = vpop.f32.mrf.mxu1 }
  0xf6   : > { %7890 = vst [vmem:[#allocation6_spill] sm:$0xff] %v6986_v31  ;;  %5213 = vmatprep.mubr.f32.mxu0 %v6264_v44  ;;  %5255 = vmatprep.subr.mxu1 %v3310_v8  ;;  %v3582_v44 = vld [vmem:[%s7682_s3 + $0x440] sm:$0xff] }
  0xf7   : > { %5214 = vmatmul.mubr.f32.gmra.mxu0 %v6243_v24  ;;  %5256 = vmatpush3.msra.mxu1 %v3310_v8  ;;  %v6993_v15 = vpop.f32.mrf.mxu0  ;;  %v3308_v24 = vld [vmem:[%s7682_s3 + $0x3b8] sm:$0xff]  ;;  %v7893_v31 = vld [vmem:[#allocation14_spill] sm:$0xff] }
  0xf8   : > { %5335 = vmatprep.subr.mxu0 %v3583_v13  ;;  %5136 = vmatprep.mubr.f32.mxu1 %v6315_v12 }
  0xf9   : > { %5336 = vmatpush3.msra.mxu0 %v3583_v13  ;;  %5137 = vmatmul.mubr.f32.gmra.mxu1 %v6326_v37  ;;  %v7000_v40 = vpop.f32.mrf.mxu1 }
  0xfa   : > { %7891 = vst [vmem:[#allocation7_spill] sm:$0xff] %v7000_v40  ;;  %5216 = vmatprep.mubr.f32.mxu0 %v6328_v0  ;;  %5257 = vmatprep.subr.mxu1 %v3309_v58  ;;  %v3581_v0 = vld [vmem:[%s7682_s3 + $0x438] sm:$0xff] }
  0xfb   : > { %5217 = vmatmul.mubr.f32.gmra.mxu0 %v6319_v54  ;;  %5258 = vmatpush3.msra.mxu1 %v3309_v58  ;;  %v7007_v8 = vpop.f32.mrf.mxu0  ;;  %v7009_v13 = vpop.f32.mrf.mxu1  ;;  %v3307_v58 = vld [vmem:[%s7682_s3 + $0x3b0] sm:$0xff] }
  0xfc   : > { %7892 = vst [vmem:[#allocation8_spill] sm:$0xff] %v7009_v13  ;;  %5337 = vmatprep.subr.mxu0 %v3582_v44  ;;  %5139 = vmatprep.mubr.f32.mxu1 %v7893_v31 }
  0xfd   : > { %5338 = vmatpush3.msra.mxu0 %v3582_v44  ;;  %5140 = vmatmul.mubr.f32.gmra.mxu1 %v7894_v2  ;;  %v7016_v54 = vpop.f32.mrf.mxu0  ;;  %v7896_v44 = vld [vmem:[#allocation16_spill] sm:$0xff] }
  0xfe   : > { %5219 = vmatprep.mubr.f32.mxu0 %v6383_v16  ;;  %5259 = vmatprep.subr.mxu1 %v3308_v24  ;;  %v3580_v16 = vld [vmem:[%s7682_s3 + $0x430] sm:$0xff] }
  0xff   : > { %5220 = vmatmul.mubr.f32.gmra.mxu0 %v6350_v19  ;;  %5260 = vmatpush3.msra.mxu1 %v3308_v24  ;;  %v7023_v13 = vpop.f32.mrf.mxu1  ;;  %v3306_v24 = vld [vmem:[%s7682_s3 + $0x3a8] sm:$0xff] }
 0x100   : > { %7895 = vst [vmem:[#allocation9_spill] sm:$0xff] %v7023_v13  ;;  %5339 = vmatprep.subr.mxu0 %v3581_v0  ;;  %5142 = vmatprep.mubr.f32.mxu1 %v6389_v55  ;;  %v7898_v13 = vld [vmem:[#allocation17_spill] sm:$0xff] }
 0x101   : > { %5340 = vmatpush3.msra.mxu0 %v3581_v0  ;;  %5143 = vmatmul.mubr.f32.gmra.mxu1 %v7896_v44  ;;  %v7030_v40 = vpop.f32.mrf.mxu0  ;;  %v7032_v19 = vpop.f32.mrf.mxu1 }
 0x102   : > { %7897 = vst [vmem:[#allocation10_spill] sm:$0xff] %v7032_v19  ;;  %5222 = vmatprep.mubr.f32.mxu0 %v6437_v35  ;;  %5261 = vmatprep.subr.mxu1 %v3307_v58  ;;  %v3579_v35 = vld [vmem:[%s7682_s3 + $0x428] sm:$0xff] }
 0x103   : > { %5223 = vmatmul.mubr.f32.gmra.mxu0 %v6441_v63  ;;  %5262 = vmatpush3.msra.mxu1 %v3307_v58  ;;  %v7039_v0 = vpop.f32.mrf.mxu0  ;;  %v3305_v63 = vld [vmem:[%s7682_s3 + $0x3a0] sm:$0xff] }
 0x104   : > { %5341 = vmatprep.subr.mxu0 %v3580_v16  ;;  %5145 = vmatprep.mubr.f32.mxu1 %v7898_v13  ;;  %v7902_v13 = vld [vmem:[#allocation19_spill] sm:$0xff] }
 0x105   : > { %5342 = vmatpush3.msra.mxu0 %v3580_v16  ;;  %5146 = vmatmul.mubr.f32.gmra.mxu1 %v7899_v32  ;;  %v7046_v19 = vpop.f32.mrf.mxu1  ;;  %v585_v32 = vadd.s32 264, %v5750_v49 }
 0x106   : > { %7900 = vst [vmem:[#allocation11_spill] sm:$0xff] %v7046_v19  ;;  %5225 = vmatprep.mubr.f32.mxu0 %v6465_v5  ;;  %5263 = vmatprep.subr.mxu1 %v3306_v24  ;;  %v586_v19 = vadd.s32 272, %v5750_v49  ;;  %v3578_v5 = vld [vmem:[%s7682_s3 + $0x420] sm:$0xff] }
 0x107   : > { %5226 = vmatmul.mubr.f32.gmra.mxu0 %v6505_v30  ;;  %5264 = vmatpush3.msra.mxu1 %v3306_v24  ;;  %v7053_v58 = vpop.f32.mrf.mxu0  ;;  %v7055_v16 = vpop.f32.mrf.mxu1  ;;  %v3304_v24 = vld [vmem:[%s7682_s3 + $0x398] sm:$0xff] }
 0x108   : > { %7901 = vst [vmem:[#allocation12_spill] sm:$0xff] %v7055_v16  ;;  %5343 = vmatprep.subr.mxu0 %v3579_v35  ;;  %5148 = vmatprep.mubr.f32.mxu1 %v7902_v13 }
 0x109   : > { %5344 = vmatpush3.msra.mxu0 %v3579_v35  ;;  %5149 = vmatmul.mubr.f32.gmra.mxu1 %v6521_v43  ;;  %v7064_v30 = vpop.f32.mrf.mxu0  ;;  %v823_v35 = vand.u32 15, %v585_v32  ;;  %v830_v43 = vand.u32 15, %v586_v19  ;;  %v1378_v32 = vrot.slane %v6851_v48, 1  ;;  %v3303_v19 = vld [vmem:[%s7682_s3 + $0x390] sm:$0xff] }
 0x10a   : > { %5228 = vmatprep.mubr.f32.mxu0 %v6523_v47  ;;  %5265 = vmatprep.subr.mxu1 %v3305_v63  ;;  %v3577_v47 = vld [vmem:[%s7682_s3 + $0x418] sm:$0xff] }
 0x10b   : > { %5229 = vmatmul.mubr.f32.gmra.mxu0 %v6558_v62  ;;  %5266 = vmatpush3.msra.mxu1 %v3305_v63  ;;  %v7071_v16 = vpop.f32.mrf.mxu1  ;;  %vm1161_vm7 = vcmp.ne.s32.totalorder %v823_v35, 15  ;;  %vm1054_vm8 = vcmp.ne.s32.totalorder %v830_v43, 0  ;;  %v3302_v43 = vld [vmem:[%s7682_s3 + $0x388] sm:$0xff] }
 0x10c   : > { %7903 = vst [vmem:[#allocation13_spill] sm:$0xff] %v7071_v16  ;;  %5345 = vmatprep.subr.mxu0 %v3578_v5  ;;  %5151 = vmatprep.mubr.f32.mxu1 %v6569_v51 }
 0x10d   : > { %5346 = vmatpush3.msra.mxu0 %v3578_v5  ;;  %5152 = vmatmul.mubr.f32.gmra.mxu1 %v6574_v38  ;;  %v7078_v62 = vpop.f32.mrf.mxu0  ;;  %v7080_v63 = vpop.f32.mrf.mxu1 }
 0x10e   : > { %7904 = vst [vmem:[#allocation14_spill] sm:$0xff] %v7080_v63  ;;  %5231 = vmatprep.mubr.f32.mxu0 %v6579_v9  ;;  %5267 = vmatprep.subr.mxu1 %v3304_v24  ;;  %v3576_v9 = vld [vmem:[%s7682_s3 + $0x410] sm:$0xff]  ;;  %v7906_v63 = vld [vmem:[#allocation2_spill] sm:$0xff] }
 0x10f   : > { %5232 = vmatmul.mubr.f32.gmra.mxu0 %v6598_v45  ;;  %5268 = vmatpush3.msra.mxu1 %v3304_v24  ;;  %v7088_v5 = vpop.f32.mrf.mxu0  ;;  %v4242_v24 = vsel %vm1161_vm7, 1.0, %v7803_v7  ;;  %v1383_v35 = vsel %vm1381_vm1, %v1378_v32, %v7906_v63 }
 0x110   : > { %5347 = vmatprep.subr.mxu0 %v3577_v47  ;;  %5154 = vmatprep.mubr.f32.mxu1 %v6606_v61 }
 0x111   : > { %5348 = vmatpush3.msra.mxu0 %v3577_v47  ;;  %5155 = vmatmul.mubr.f32.gmra.mxu1 %v6611_v17  ;;  %v7095_v45 = vpop.f32.mrf.mxu1  ;;  %v7909_v17 = vrot.slane %v6851_v48, 7  ;;  %v7129_v48 = vmul.f32 %v4242_v24, %v1383_v35 }
 0x112   : > { %7905 = vst [vmem:[#allocation15_spill] sm:$0xff] %v7095_v45  ;;  %5234 = vmatprep.mubr.f32.mxu0 %v6614_v22  ;;  %5269 = vmatprep.subr.mxu1 %v3303_v19  ;;  %v4225_v22 = vsel %vm1054_vm8, 1.0, %v7803_v7  ;;  %v7908_v45 = vld [vmem:[#allocation3_spill] sm:$0xff]  ;;  %v3301_v7 = vld [vmem:[%s7682_s3 + $0x380] sm:$0xff] }
 0x113   : > { %5235 = vmatmul.mubr.f32.gmra.mxu0 %v6630_v52  ;;  %5270 = vmatpush3.msra.mxu1 %v3303_v19  ;;  %v7106_v47 = vpop.f32.mrf.mxu0  ;;  %v7108_v16 = vpop.f32.mrf.mxu1  ;;  %v1274_v61 = vsel %vm1272_vm4, %v7909_v17, %v7908_v45  ;;  %v3575_v52 = vld [vmem:[%s7682_s3 + $0x408] sm:$0xff] }
 0x114   : > { %7907 = vst [vmem:[#allocation16_spill] sm:$0xff] %v7108_v16  ;;  %5349 = vmatprep.subr.mxu0 %v3576_v9  ;;  %5157 = vmatprep.mubr.f32.mxu1 %v6635_v41  ;;  %v7910_v16 = vrot.slane %v6551_v25, 1  ;;  %v1343_v17 = vmul.f32 %v4225_v22, %v1274_v61  ;;  %v3574_v61 = vld [vmem:[%s7682_s3 + $0x400] sm:$0xff] }
 0x115   : > { %5350 = vmatpush3.msra.mxu0 %v3576_v9  ;;  %5158 = vmatmul.mubr.f32.gmra.mxu1 %v6640_v56  ;;  %v7121_v19 = vpop.f32.mrf.mxu0 }
 0x116   : > { %v7127_v63 = vsel %vm1381_vm1, %v7910_v16, %v1378_v32  ;;  %5237 = vmatprep.mubr.f32.mxu0 %v6876_v29  ;;  %5271 = vmatprep.subr.mxu1 %v3302_v43 }
 0x117   : > { %5238 = vmatmul.mubr.f32.gmra.mxu0 %v6890_v59  ;;  %5272 = vmatpush3.msra.mxu1 %v3302_v43  ;;  %v7133_v9 = vpop.f32.mrf.mxu1 }
 0x118   : > { %5351 = vmatprep.subr.mxu0 %v3575_v52  ;;  %5160 = vmatprep.mubr.f32.mxu1 %v7127_v63 }
 0x119   : > { %5352 = vmatpush3.msra.mxu0 %v3575_v52  ;;  %5161 = vmatmul.mubr.f32.gmra.mxu1 %v7129_v48  ;;  %v7140_v25 = vpop.f32.mrf.mxu0  ;;  %v7142_v29 = vpop.f32.mrf.mxu1 }
 0x11a   : > { %5240 = vmatprep.mubr.f32.mxu0 %v1343_v17  ;;  %5273 = vmatprep.subr.mxu1 %v3301_v7 }
 0x11b   : > { %5241 = vmatmul.mubr.f32.gmra.mxu0 %v7908_v45  ;;  %5274 = vmatpush3.msra.mxu1 %v3301_v7  ;;  %v7148_v59 = vpop.f32.mrf.mxu0 }
 0x11c   : > { %5353 = vmatprep.subr.mxu0 %v3574_v61  ;;  %5275 = vmatprep.mubr.f32.mxu1 %v6668_v21 }
 0x11d   : > { %5354 = vmatpush3.msra.mxu0 %v3574_v61  ;;  %v4797_v16 = vpop.f32.mrf.mxu1  ;;  %5276 = vmatmul.mubr.f32.vlgmr.msra.gmra.mxu1 %v6672_v14 }
 0x11e   : > { %v1783_v32 = vadd.f32 %v4797_v16, %v6961_v27  ;;  %5355 = vmatprep.mubr.f32.mxu0 %v7878_v18  ;;  %5278 = vmatprep.mubr.f32.mxu1 %v6684_v6 }
 0x11f   : > { %v4877_v24 = vpop.f32.mrf.mxu0  ;;  %5356 = vmatmul.mubr.f32.vlgmr.msra.gmra.mxu0 %v7879_v34  ;;  %v1777_v45 = vpop.f32.mrf.mxu1 }
 0x120   : > { %v7156_v7 = vadd.f32 %v4877_v24, %v1783_v32  ;;  %v1778_v35 = vadd.f32 %v1777_v45, %v6970_v46  ;;  %5358 = vmatprep.mubr.f32.mxu0 %v7880_v11  ;;  %v5488_v45 = vld [vmem:[%s5636_s16 + $0x60] sm:$0xff] }
 0x121   : > { %v2018_v21 = vpop.f32.mrf.mxu0  ;;  %v4800_v43 = vpop.f32.mrf.mxu1  ;;  %5279 = vmatmul.mubr.f32.gmra.mxu1 %v6688_v42 }
 0x122   : > { %v7161_v14 = vadd.f32 %v2018_v21, %v1778_v35  ;;  %v1793_v18 = vadd.f32 %v4800_v43, %v6984_v10  ;;  %5281 = vmatprep.mubr.f32.mxu1 %v6700_v4 }
 0x123   : > { %v4880_v6 = vpop.f32.mrf.mxu0  ;;  %5359 = vmatmul.mubr.f32.gmra.mxu0 %v7881_v28  ;;  %v1787_v34 = vpop.f32.mrf.mxu1 }
 0x124   : > { %v7166_v27 = vadd.f32 %v4880_v6, %v1793_v18  ;;  %v1788_v46 = vadd.f32 %v1787_v34, %v6993_v15  ;;  %5361 = vmatprep.mubr.f32.mxu0 %v7882_v53  ;;  %v5489_v18 = vld [vmem:[%s5636_s16 + $0x68] sm:$0xff]  ;;  %v7913_v34 = vld [vmem:[#allocation25_spill] sm:$0xff] }
 0x125   : > { %v2028_v11 = vpop.f32.mrf.mxu0  ;;  %v4803_v22 = vpop.f32.mrf.mxu1  ;;  %5282 = vmatmul.mubr.f32.gmra.mxu1 %v6704_v23 }
 0x126   : > { %v7171_v42 = vadd.f32 %v2028_v11, %v1788_v46  ;;  %v1803_v10 = vadd.f32 %v4803_v22, %v7007_v8  ;;  %5284 = vmatprep.mubr.f32.mxu1 %v6716_v33  ;;  %v7911_v33 = vld [vmem:[#allocation23_spill] sm:$0xff] }
 0x127   : > { %v4883_v4 = vpop.f32.mrf.mxu0  ;;  %5362 = vmatmul.mubr.f32.gmra.mxu0 %v7883_v57  ;;  %v1797_v28 = vpop.f32.mrf.mxu1 }
 0x128   : > { %v7176_v52 = vadd.f32 %v4883_v4, %v1803_v10  ;;  %v1798_v15 = vadd.f32 %v1797_v28, %v7016_v54  ;;  %5364 = vmatprep.mubr.f32.mxu0 %v7884_v60  ;;  %v7914_v10 = vld [vmem:[#allocation26_spill] sm:$0xff]  ;;  %v7915_v28 = vld [vmem:[#allocation27_spill] sm:$0xff] }
 0x129   : > { %v2038_v53 = vpop.f32.mrf.mxu0  ;;  %v4806_v17 = vpop.f32.mrf.mxu1  ;;  %5285 = vmatmul.mubr.f32.gmra.mxu1 %v6720_v20  ;;  %v7912_v20 = vld [vmem:[#allocation24_spill] sm:$0xff] }
 0x12a   : > { %v7181_v23 = vadd.f32 %v2038_v53, %v1798_v15  ;;  %v1813_v8 = vadd.f32 %v4806_v17, %v7030_v40  ;;  %5287 = vmatprep.mubr.f32.mxu1 %v7911_v33 }
 0x12b   : > { %v4886_v61 = vpop.f32.mrf.mxu0  ;;  %5365 = vmatmul.mubr.f32.gmra.mxu0 %v7885_v3  ;;  %v1807_v57 = vpop.f32.mrf.mxu1 }
 0x12c   : > { %v7186_v16 = vadd.f32 %v4886_v61, %v1813_v8  ;;  %v1808_v54 = vadd.f32 %v1807_v57, %v7039_v0  ;;  %5367 = vmatprep.mubr.f32.mxu0 %v7886_v26  ;;  %v7916_v8 = vld [vmem:[#allocation28_spill] sm:$0xff]  ;;  %v7917_v61 = vld [vmem:[#allocation29_spill] sm:$0xff] }
 0x12d   : > { %v2048_v60 = vpop.f32.mrf.mxu0  ;;  %v4809_v32 = vpop.f32.mrf.mxu1  ;;  %5288 = vmatmul.mubr.f32.gmra.mxu1 %v7912_v20 }
 0x12e   : > { %v7191_v24 = vadd.f32 %v2048_v60, %v1808_v54  ;;  %v1823_v40 = vadd.f32 %v4809_v32, %v7053_v58  ;;  %5290 = vmatprep.mubr.f32.mxu1 %v5488_v45  ;;  %v7918_v32 = vld [vmem:[#allocation30_spill] sm:$0xff] }
 0x12f   : > { %v4889_v35 = vpop.f32.mrf.mxu0  ;;  %5368 = vmatmul.mubr.f32.gmra.mxu0 %v7888_v36  ;;  %v1817_v3 = vpop.f32.mrf.mxu1 }
 0x130   : > { %v7196_v21 = vadd.f32 %v4889_v35, %v1823_v40  ;;  %v1818_v0 = vadd.f32 %v1817_v3, %v7064_v30  ;;  %5370 = vmatprep.mubr.f32.mxu0 %v6216_v1  ;;  %v7919_v40 = vld [vmem:[#allocation31_spill] sm:$0xff]  ;;  %v7920_v3 = vld [vmem:[#allocation4_spill] sm:$0xff] }
 0x131   : > { %v2058_v26 = vpop.f32.mrf.mxu0  ;;  %v4812_v43 = vpop.f32.mrf.mxu1  ;;  %5291 = vmatmul.mubr.f32.gmra.mxu1 %v5489_v18 }
 0x132   : > { %v7201_v6 = vadd.f32 %v2058_v26, %v1818_v0  ;;  %v1833_v58 = vadd.f32 %v4812_v43, %v7078_v62  ;;  %5293 = vmatprep.mubr.f32.mxu1 %v7913_v34  ;;  %v7921_v0 = vld [vmem:[#allocation17_spill] sm:$0xff]  ;;  %v7922_v43 = vld [vmem:[#allocation32_spill] sm:$0xff] }
 0x133   : > { %v4892_v46 = vpop.f32.mrf.mxu0  ;;  %5371 = vmatmul.mubr.f32.gmra.mxu0 %v6262_v50  ;;  %v1827_v36 = vpop.f32.mrf.mxu1  ;;  %v7924_v34 = vld [vmem:[#allocation33_spill] sm:$0xff] }
 0x134   : > { %v7206_v11 = vadd.f32 %v4892_v46, %v1833_v58  ;;  %v1828_v30 = vadd.f32 %v1827_v36, %v7088_v5  ;;  %5373 = vmatprep.mubr.f32.mxu0 %v6315_v12  ;;  %v7923_v58 = vld [vmem:[#allocation5_spill] sm:$0xff]  ;;  %v7925_v36 = vld [vmem:[#allocation18_spill] sm:$0xff] }
 0x135   : > { %v2068_v1 = vpop.f32.mrf.mxu0  ;;  %v4815_v22 = vpop.f32.mrf.mxu1  ;;  %5294 = vmatmul.mubr.f32.gmra.mxu1 %v7914_v10 }
 0x136   : > { %v7211_v4 = vadd.f32 %v2068_v1, %v1828_v30  ;;  %v1843_v62 = vadd.f32 %v4815_v22, %v7106_v47  ;;  %5296 = vmatprep.mubr.f32.mxu1 %v7915_v28  ;;  %v7926_v1 = vld [vmem:[#allocation6_spill] sm:$0xff] }
 0x137   : > { %v4895_v15 = vpop.f32.mrf.mxu0  ;;  %5374 = vmatmul.mubr.f32.gmra.mxu0 %v6326_v37  ;;  %v1837_v50 = vpop.f32.mrf.mxu1  ;;  %v7927_v28 = vld [vmem:[#allocation34_spill] sm:$0xff] }
 0x138   : > { %v7216_v53 = vadd.f32 %v4895_v15, %v1843_v62  ;;  %v1838_v5 = vadd.f32 %v1837_v50, %v7121_v19  ;;  %5376 = vmatprep.mubr.f32.mxu0 %v7893_v31  ;;  %v7928_v50 = vld [vmem:[#allocation7_spill] sm:$0xff] }
 0x139   : > { %v2078_v12 = vpop.f32.mrf.mxu0  ;;  %v4818_v17 = vpop.f32.mrf.mxu1  ;;  %5297 = vmatmul.mubr.f32.gmra.mxu1 %v7916_v8  ;;  %v7930_v8 = vld [vmem:[#allocation20_spill] sm:$0xff] }
 0x13a   : > { %v7221_v33 = vadd.f32 %v2078_v12, %v1838_v5  ;;  %v1853_v47 = vadd.f32 %v4818_v17, %v7140_v25  ;;  %5299 = vmatprep.mubr.f32.mxu1 %v7917_v61  ;;  %v7929_v12 = vld [vmem:[#allocation35_spill] sm:$0xff] }
 0x13b   : > { %v4898_v57 = vpop.f32.mrf.mxu0  ;;  %5377 = vmatmul.mubr.f32.gmra.mxu0 %v7894_v2  ;;  %v1847_v37 = vpop.f32.mrf.mxu1 }
 0x13c   : > { %v7226_v54 = vadd.f32 %v4898_v57, %v1853_v47  ;;  %v1848_v19 = vadd.f32 %v1847_v37, %v7148_v59  ;;  %5379 = vmatprep.mubr.f32.mxu0 %v6389_v55  ;;  %v7931_v57 = vld [vmem:[#allocation8_spill] sm:$0xff] }
 0x13d   : > { %v2088_v31 = vpop.f32.mrf.mxu0  ;;  %v4821_v60 = vpop.f32.mrf.mxu1  ;;  %5300 = vmatmul.mubr.f32.gmra.mxu1 %v7918_v32 }
 0x13e   : > { %v7231_v20 = vadd.f32 %v2088_v31, %v1848_v19  ;;  %v1863_v25 = vadd.f32 %v4821_v60, %v6955_v39  ;;  %5302 = vmatprep.mubr.f32.mxu1 %v7919_v40  ;;  %v7932_v31 = vld [vmem:[#allocation36_spill] sm:$0xff]  ;;  %v587_v60 = vadd.s32 280, %v5750_v49 }
 0x13f   : > { %v4901_v45 = vpop.f32.mrf.mxu0  ;;  %5380 = vmatmul.mubr.f32.gmra.mxu0 %v7896_v44  ;;  %v1857_v2 = vpop.f32.mrf.mxu1 }
 0x140   : > { %v7236_v35 = vadd.f32 %v4901_v45, %v1863_v25  ;;  %v1858_v59 = vadd.f32 %v1857_v2, %v7920_v3  ;;  %5382 = vmatprep.mubr.f32.mxu0 %v7921_v0  ;;  %v7933_v25 = vld [vmem:[#allocation9_spill] sm:$0xff]  ;;  %v7934_v45 = vld [vmem:[#allocation38_spill] sm:$0xff]  ;;  %v837_v49 = vand.u32 15, %v587_v60 }
 0x141   : > { %v2098_v55 = vpop.f32.mrf.mxu0  ;;  %v4824_v26 = vpop.f32.mrf.mxu1  ;;  %5303 = vmatmul.mubr.f32.gmra.mxu1 %v7922_v43  ;;  %v7935_v0 = vld [vmem:[#allocation10_spill] sm:$0xff] }
 0x142   : > { %v7241_v18 = vadd.f32 %v2098_v55, %v1858_v59  ;;  %v1873_v39 = vadd.f32 %v4824_v26, %v7923_v58  ;;  %5305 = vmatprep.mubr.f32.mxu1 %v7924_v34  ;;  %v7936_v55 = vld [vmem:[#allocation21_spill] sm:$0xff]  ;;  %v7937_v58 = vld [vmem:[#allocation39_spill] sm:$0xff]  ;;  %vm1163_vm1 = vcmp.ne.s32.totalorder %v837_v49, 15 }
 0x143   : > { %v4904_v46 = vpop.f32.mrf.mxu0  ;;  %5383 = vmatmul.mubr.f32.gmra.mxu0 %v7925_v36  ;;  %v1867_v44 = vpop.f32.mrf.mxu1  ;;  %v7938_v34 = vld [vmem:[#allocation11_spill] sm:$0xff]  ;;  %v7939_v36 = vld [vmem:[#allocation40_spill] sm:$0xff] }
 0x144   : > { %v7246_v30 = vadd.f32 %v4904_v46, %v1873_v39  ;;  %v1868_v22 = vadd.f32 %v1867_v44, %v7926_v1  ;;  %5385 = vmatprep.mubr.f32.mxu0 %v7902_v13  ;;  %v7940_v44 = vld [vmem:[#allocation22_spill] sm:$0xff] }
 0x145   : > { %v2108_v10 = vpop.f32.mrf.mxu0  ;;  %v4827_v62 = vpop.f32.mrf.mxu1  ;;  %5306 = vmatmul.mubr.f32.gmra.mxu1 %v7927_v28 }
 0x146   : > { %v7251_v15 = vadd.f32 %v2108_v10, %v1868_v22  ;;  %v1883_v5 = vadd.f32 %v4827_v62, %v7928_v50  ;;  %5308 = vmatprep.mubr.f32.mxu1 %v7929_v12  ;;  %v7941_v10 = vld [vmem:[#allocation12_spill] sm:$0xff] }
 0x147   : > { %v4907_v17 = vpop.f32.mrf.mxu0  ;;  %5386 = vmatmul.mubr.f32.gmra.mxu0 %v7930_v8  ;;  %v1877_v47 = vpop.f32.mrf.mxu1 }
 0x148   : > { %v7256_v61 = vadd.f32 %v4907_v17, %v1883_v5  ;;  %v1878_v37 = vadd.f32 %v1877_v47, %v7931_v57  ;;  %5388 = vmatprep.mubr.f32.mxu0 %v6569_v51  ;;  %v7942_v5 = vld [vmem:[#allocation41_spill] sm:$0xff]  ;;  %v5490_v47 = vld [vmem:[%s5636_s16 + $0xf0] sm:$0xff] }
 0x149   : > { %v2118_v13 = vpop.f32.mrf.mxu0  ;;  %v4830_v19 = vpop.f32.mrf.mxu1  ;;  %5309 = vmatmul.mubr.f32.gmra.mxu1 %v7932_v31  ;;  %v7943_v17 = vld [vmem:[#allocation13_spill] sm:$0xff] }
 0x14a   : > { %v7262_v32 = vadd.f32 %v2118_v13, %v1878_v37  ;;  %v1893_v40 = vadd.f32 %v4830_v19, %v7933_v25  ;;  %5311 = vmatprep.mubr.f32.mxu1 %v7934_v45  ;;  %v7944_v19 = vld [vmem:[#allocation14_spill] sm:$0xff]  ;;  %v7946_v45 = vld [vmem:[#allocation37_spill] sm:$0xff] }
 0x14b   : > { %v4910_v2 = vpop.f32.mrf.mxu0  ;;  %5389 = vmatmul.mubr.f32.gmra.mxu0 %v6574_v38  ;;  %v1887_v3 = vpop.f32.mrf.mxu1 }
 0x14c   : > { %v7267_v59 = vadd.f32 %v4910_v2, %v1893_v40  ;;  %v1888_v51 = vadd.f32 %v1887_v3, %v7935_v0  ;;  %5391 = vmatprep.mubr.f32.mxu0 %v7936_v55  ;;  %v7947_v3 = vld [vmem:[#allocation15_spill] sm:$0xff]  ;;  %v7948_v55 = vld [vmem:[#allocation2_spill] sm:$0xff] }
 0x14d   : > { %v2128_v26 = vpop.f32.mrf.mxu0  ;;  %v4833_v43 = vpop.f32.mrf.mxu1  ;;  %5312 = vmatmul.mubr.f32.gmra.mxu1 %v7937_v58 }
 0x14e   : > { %v7272_v39 = vadd.f32 %v2128_v26, %v1888_v51  ;;  %v1903_v46 = vadd.f32 %v4833_v43, %v7938_v34  ;;  %5314 = vmatprep.mubr.f32.mxu1 %v7939_v36 }
 0x14f   : > { %v4913_v38 = vpop.f32.mrf.mxu0  ;;  %5392 = vmatmul.mubr.f32.gmra.mxu0 %v7940_v44  ;;  %v1897_v1 = vpop.f32.mrf.mxu1 }
 0x150   : > { %v7277_v22 = vadd.f32 %v4913_v38, %v1903_v46  ;;  %v1898_v62 = vadd.f32 %v1897_v1, %v7941_v10  ;;  %5394 = vmatprep.mubr.f32.mxu0 %v6635_v41  ;;  %v7945_v41 = vmov 0.0  }
 0x151   : > { %v2138_v28 = vpop.f32.mrf.mxu0  ;;  %v4836_v50 = vpop.f32.mrf.mxu1  ;;  %5315 = vmatmul.mubr.f32.gmra.mxu1 %v7942_v5  ;;  %v4243_v60 = vsel %vm1163_vm1, 1.0, %v7945_v41 }
 0x152   : > { %v7282_v12 = vadd.f32 %v2138_v28, %v1898_v62  ;;  %v1913_v8 = vadd.f32 %v4836_v50, %v7943_v17  ;;  %5317 = vmatprep.mubr.f32.mxu1 %v5490_v47  ;;  %v1453_v26 = vmul.f32 %v4243_v60, %v7948_v55 }
 0x153   : > { %v4916_v57 = vpop.f32.mrf.mxu0  ;;  %5395 = vmatmul.mubr.f32.gmra.mxu0 %v6640_v56  ;;  %v1907_v37 = vpop.f32.mrf.mxu1 }
 0x154   : > { %v7287_v13 = vadd.f32 %v4916_v57, %v1913_v8  ;;  %v1908_v31 = vadd.f32 %v1907_v37, %v7944_v19  ;;  %5397 = vmatprep.mubr.f32.mxu0 %v7127_v63  ;;  %v7949_v63 = vld [vmem:[#allocation16_spill] sm:$0xff] }
 0x155   : > { %v2148_v25 = vpop.f32.mrf.mxu0  ;;  %v4839_v40 = vpop.f32.mrf.mxu1  ;;  %5318 = vmatmul.mubr.f32.gmra.mxu1 %v7946_v45 }
 0x156   : > { %v7293_v2 = vadd.f32 %v2148_v25, %v1908_v31  ;;  %v1923_v0 = vadd.f32 %v4839_v40, %v7947_v3  ;;  %5320 = vmatprep.mubr.f32.mxu1 %v7945_v41 }
 0x157   : > { %v4919_v56 = vpop.f32.mrf.mxu0  ;;  %5398 = vmatmul.mubr.f32.gmra.mxu0 %v7129_v48  ;;  %v1917_v51 = vpop.f32.mrf.mxu1 }
 0x158   : > { %v7299_v43 = vadd.f32 %v4919_v56, %v1923_v0  ;;  %v1918_v58 = vadd.f32 %v1917_v51, %v7949_v63  ;;  %5400 = vmatprep.mubr.f32.mxu0 %v7948_v55 }
 0x159   : > { %v2158_v49 = vpop.f32.mrf.mxu0  ;;  %v4842_v34 = vpop.f32.mrf.mxu1  ;;  %5321 = vmatmul.mubr.f32.gmra.mxu1 %v7945_v41 }
 0x15a   : > { %v7304_v46 = vadd.f32 %v2158_v49, %v1918_v58  ;;  %v1933_v36 = vadd.f32 %v4842_v34, %v7133_v9 }
 0x15b   : > { %v4922_v38 = vpop.f32.mrf.mxu0  ;;  %5401 = vmatmul.mubr.f32.gmra.mxu0 %v1453_v26  ;;  %v1927_v48 = vpop.f32.mrf.mxu1 }
 0x15c   : > { %v7307_v44 = vadd.f32 %v4922_v38, %v1933_v36  ;;  %v1928_v1 = vadd.f32 %v1927_v48, %v7142_v29 }
 0x15d   : > { %v2168_v10 = vpop.f32.mrf.mxu0  ;;  %v4957_v62 = vpop.f32.mrf.mxu1 }
 0x15e   : > { %v7310_v28 = vadd.f32 %v2168_v10, %v1928_v1  ;;  %v2451_v50 = vadd.f32 %v4957_v62, %v7156_v7 }
 0x15f   : > { %v5037_v5 = vpop.f32.mrf.mxu0  ;;  %v2291_v17 = vpop.f32.mrf.mxu1 }
 0x160   : > { %v7313_v8 = vadd.f32 %v5037_v5, %v2451_v50  ;;  %v2450_v47 = vadd.f32 %v2291_v17, %v7161_v14 }
 0x161   : > { %v2564_v9 = vpop.f32.mrf.mxu0  ;;  %v4960_v57 = vpop.f32.mrf.mxu1 }
 0x162   : > { %v7316_v37 = vadd.f32 %v2564_v9, %v2450_v47  ;;  %v2453_v19 = vadd.f32 %v4960_v57, %v7166_v27 }
 0x163   : > { %v5040_v31 = vpop.f32.mrf.mxu0  ;;  %v2301_v29 = vpop.f32.mrf.mxu1 }
 0x164   : > { %v7319_v41 = vadd.f32 %v5040_v31, %v2453_v19  ;;  %v2452_v60 = vadd.f32 %v2301_v29, %v7171_v42 }
 0x165   : > { %v2574_v25 = vpop.f32.mrf.mxu0  ;;  %v4963_v7 = vpop.f32.mrf.mxu1 }
 0x166   : > { %v7322_v40 = vadd.f32 %v2574_v25, %v2452_v60  ;;  %v2455_v45 = vadd.f32 %v4963_v7, %v7176_v52 }
 0x167   : > { %v5043_v3 = vpop.f32.mrf.mxu0  ;;  %v2311_v14 = vpop.f32.mrf.mxu1 }
 0x168   : > { %v7325_v0 = vadd.f32 %v5043_v3, %v2455_v45  ;;  %v2454_v56 = vadd.f32 %v2311_v14, %v7181_v23 }
 0x169   : > { %v2584_v51 = vpop.f32.mrf.mxu0  ;;  %v4966_v27 = vpop.f32.mrf.mxu1 }
 0x16a   : > { %v7328_v55 = vadd.f32 %v2584_v51, %v2454_v56  ;;  %v2457_v26 = vadd.f32 %v4966_v27, %v7186_v16 }
 0x16b   : > { %v5046_v63 = vpop.f32.mrf.mxu0  ;;  %v2321_v42 = vpop.f32.mrf.mxu1 }
 0x16c   : > { %v7331_v58 = vadd.f32 %v5046_v63, %v2457_v26  ;;  %v2456_v49 = vadd.f32 %v2321_v42, %v7191_v24 }
 0x16d   : > { %v2594_v34 = vpop.f32.mrf.mxu0  ;;  %v4969_v52 = vpop.f32.mrf.mxu1 }
 0x16e   : > { %v7334_v36 = vadd.f32 %v2594_v34, %v2456_v49  ;;  %v2459_v38 = vadd.f32 %v4969_v52, %v7196_v21 }
 0x16f   : > { %v5049_v48 = vpop.f32.mrf.mxu0  ;;  %v2331_v23 = vpop.f32.mrf.mxu1 }
 0x170   : > { %v7337_v1 = vadd.f32 %v5049_v48, %v2459_v38  ;;  %v2458_v10 = vadd.f32 %v2331_v23, %v7201_v6 }
 0x171   : > { %v2604_v62 = vpop.f32.mrf.mxu0  ;;  %v4972_v16 = vpop.f32.mrf.mxu1 }
 0x172   : > { %v7340_v50 = vadd.f32 %v2604_v62, %v2458_v10  ;;  %v2461_v5 = vadd.f32 %v4972_v16, %v7206_v11 }
 0x173   : > { %v5052_v17 = vpop.f32.mrf.mxu0  ;;  %v2341_v24 = vpop.f32.mrf.mxu1 }
 0x174   : > { %v7343_v47 = vadd.f32 %v5052_v17, %v2461_v5  ;;  %v2460_v9 = vadd.f32 %v2341_v24, %v7211_v4 }
 0x175   : > { %v2614_v57 = vpop.f32.mrf.mxu0  ;;  %v4975_v21 = vpop.f32.mrf.mxu1 }
 0x176   : > { %v7346_v19 = vadd.f32 %v2614_v57, %v2460_v9  ;;  %v2463_v31 = vadd.f32 %v4975_v21, %v7216_v53 }
 0x177   : > { %v5055_v29 = vpop.f32.mrf.mxu0  ;;  %v2351_v6 = vpop.f32.mrf.mxu1 }
 0x178   : > { %v7349_v60 = vadd.f32 %v5055_v29, %v2463_v31  ;;  %v2462_v25 = vadd.f32 %v2351_v6, %v7221_v33 }
 0x179   : > { %v2624_v7 = vpop.f32.mrf.mxu0  ;;  %v4978_v11 = vpop.f32.mrf.mxu1 }
 0x17a   : > { %v7352_v45 = vadd.f32 %v2624_v7, %v2462_v25  ;;  %v2465_v3 = vadd.f32 %v4978_v11, %v7226_v54 }
 0x17b   : > { %v5058_v14 = vpop.f32.mrf.mxu0  ;;  %v2361_v4 = vpop.f32.mrf.mxu1 }
 0x17c   : > { %v7355_v56 = vadd.f32 %v5058_v14, %v2465_v3  ;;  %v2464_v51 = vadd.f32 %v2361_v4, %v7231_v20 }
 0x17d   : > { %v2634_v27 = vpop.f32.mrf.mxu0  ;;  %v4981_v53 = vpop.f32.mrf.mxu1 }
 0x17e   : > { %v7358_v26 = vadd.f32 %v2634_v27, %v2464_v51  ;;  %v2467_v63 = vadd.f32 %v4981_v53, %v7236_v35 }
 0x17f   : > { %v5061_v42 = vpop.f32.mrf.mxu0  ;;  %v2371_v33 = vpop.f32.mrf.mxu1 }
 0x180   : > { %v7361_v49 = vadd.f32 %v5061_v42, %v2467_v63  ;;  %v2466_v34 = vadd.f32 %v2371_v33, %v7241_v18 }
 0x181   : > { %v2644_v52 = vpop.f32.mrf.mxu0  ;;  %v4984_v54 = vpop.f32.mrf.mxu1 }
 0x182   : > { %v7364_v38 = vadd.f32 %v2644_v52, %v2466_v34  ;;  %v2469_v48 = vadd.f32 %v4984_v54, %v7246_v30 }
 0x183   : > { %v5064_v23 = vpop.f32.mrf.mxu0  ;;  %v2381_v20 = vpop.f32.mrf.mxu1 }
 0x184   : > { %v7367_v10 = vadd.f32 %v5064_v23, %v2469_v48  ;;  %v2468_v62 = vadd.f32 %v2381_v20, %v7251_v15 }
 0x185   : > { %v2654_v16 = vpop.f32.mrf.mxu0  ;;  %v4987_v35 = vpop.f32.mrf.mxu1 }
 0x186   : > { %7950 = vst [vmem:[#allocation19_spill] sm:$0xff] %v7367_v10  ;;  %v7370_v5 = vadd.f32 %v2654_v16, %v2468_v62  ;;  %v2471_v17 = vadd.f32 %v4987_v35, %v7256_v61 }
 0x187   : > { %v5067_v24 = vpop.f32.mrf.mxu0  ;;  %v2391_v18 = vpop.f32.mrf.mxu1 }
 0x188   : > { %7951 = vst [vmem:[#allocation3_spill] sm:$0xff] %v7370_v5  ;;  %v7373_v9 = vadd.f32 %v5067_v24, %v2471_v17  ;;  %v2470_v57 = vadd.f32 %v2391_v18, %v7262_v32 }
 0x189   : > { %v2664_v21 = vpop.f32.mrf.mxu0  ;;  %v4990_v30 = vpop.f32.mrf.mxu1 }
 0x18a   : > { %7952 = vst [vmem:[#allocation23_spill] sm:$0xff] %v7373_v9  ;;  %v7376_v31 = vadd.f32 %v2664_v21, %v2470_v57  ;;  %v2473_v29 = vadd.f32 %v4990_v30, %v7267_v59 }
 0x18b   : > { %v5070_v6 = vpop.f32.mrf.mxu0  ;;  %v2401_v15 = vpop.f32.mrf.mxu1 }
 0x18c   : > { %7953 = vst [vmem:[#allocation24_spill] sm:$0xff] %v7376_v31  ;;  %v7379_v25 = vadd.f32 %v5070_v6, %v2473_v29  ;;  %v2472_v7 = vadd.f32 %v2401_v15, %v7272_v39 }
 0x18d   : > { %v2674_v11 = vpop.f32.mrf.mxu0  ;;  %v4993_v61 = vpop.f32.mrf.mxu1 }
 0x18e   : > { %7954 = vst [vmem:[#allocation25_spill] sm:$0xff] %v7379_v25  ;;  %v7382_v3 = vadd.f32 %v2674_v11, %v2472_v7  ;;  %v2475_v14 = vadd.f32 %v4993_v61, %v7277_v22 }
 0x18f   : > { %v5073_v4 = vpop.f32.mrf.mxu0  ;;  %v2411_v32 = vpop.f32.mrf.mxu1 }
 0x190   : > { %7955 = vst [vmem:[#allocation26_spill] sm:$0xff] %v7382_v3  ;;  %v7385_v51 = vadd.f32 %v5073_v4, %v2475_v14  ;;  %v2474_v27 = vadd.f32 %v2411_v32, %v7282_v12 }
 0x191   : > { %v2684_v53 = vpop.f32.mrf.mxu0  ;;  %v4996_v59 = vpop.f32.mrf.mxu1 }
 0x192   : > { %7956 = vst [vmem:[#allocation27_spill] sm:$0xff] %v7385_v51  ;;  %v7388_v63 = vadd.f32 %v2684_v53, %v2474_v27  ;;  %v2477_v42 = vadd.f32 %v4996_v59, %v7287_v13 }
 0x193   : > { %v5076_v33 = vpop.f32.mrf.mxu0  ;;  %v2421_v39 = vpop.f32.mrf.mxu1 }
 0x194   : > { %7957 = vst [vmem:[#allocation28_spill] sm:$0xff] %v7388_v63  ;;  %v7391_v34 = vadd.f32 %v5076_v33, %v2477_v42  ;;  %v2476_v52 = vadd.f32 %v2421_v39, %v7293_v2 }
 0x195   : > { %v2694_v54 = vpop.f32.mrf.mxu0  ;;  %v4999_v22 = vpop.f32.mrf.mxu1 }
 0x196   : > { %7958 = vst [vmem:[#allocation29_spill] sm:$0xff] %v7391_v34  ;;  %v7394_v48 = vadd.f32 %v2694_v54, %v2476_v52  ;;  %v2479_v23 = vadd.f32 %v4999_v22, %v7299_v43 }
 0x197   : > { %v5079_v20 = vpop.f32.mrf.mxu0  ;;  %v2431_v12 = vpop.f32.mrf.mxu1 }
 0x198   : > { %7959 = vst [vmem:[#allocation30_spill] sm:$0xff] %v7394_v48  ;;  %v7397_v62 = vadd.f32 %v5079_v20, %v2479_v23  ;;  %v2478_v16 = vadd.f32 %v2431_v12, %v7304_v46 }
 0x199   : > { %v2704_v35 = vpop.f32.mrf.mxu0  ;;  %v5002_v13 = vpop.f32.mrf.mxu1 }
 0x19a   : > { %7960 = vst [vmem:[#allocation31_spill] sm:$0xff] %v7397_v62  ;;  %v7400_v17 = vadd.f32 %v2704_v35, %v2478_v16  ;;  %v2481_v24 = vadd.f32 %v5002_v13, %v7307_v44 }
 0x19b   : > { %v5082_v18 = vpop.f32.mrf.mxu0  ;;  %v2441_v2 = vpop.f32.mrf.mxu1 }
 0x19c   : > { %7961 = vst [vmem:[#allocation4_spill] sm:$0xff] %v7400_v17  ;;  %v7403_v57 = vadd.f32 %v5082_v18, %v2481_v24  ;;  %v2480_v21 = vadd.f32 %v2441_v2, %v7310_v28 }
 0x19d   : > { %v2714_v30 = vpop.f32.mrf.mxu0  ;;  %v5117_v43 = vpop.f32.mrf.mxu1 }
 0x19e   : > { %7962 = vst [vmem:[#allocation17_spill] sm:$0xff] %v7403_v57  ;;  %v7406_v29 = vadd.f32 %v2714_v30, %v2480_v21 }
 0x19f   : > { %v7408_v6 = vpop.f32.mrf.mxu0  ;;  %v2837_v15 = vpop.f32.mrf.mxu1 }
 0x1a0   : > { %7963 = vst [vmem:[#allocation32_spill] sm:$0xff] %v7406_v29 }
 0x1a1   : > { %v7410_v46 = vpop.f32.mrf.mxu0  ;;  %v5120_v7 = vpop.f32.mrf.mxu1 }
 0x1a3   : > { %v7412_v11 = vpop.f32.mrf.mxu0  ;;  %v7414_v61 = vpop.f32.mrf.mxu1 }
 0x1a5   : > { %v7416_v44 = vpop.f32.mrf.mxu0  ;;  %v7418_v14 = vpop.f32.mrf.mxu1 }
 0x1a7   : > { %v7420_v4 = vpop.f32.mrf.mxu0  ;;  %v7422_v28 = vpop.f32.mrf.mxu1 }
 0x1a9   : > { %v7424_v32 = vpop.f32.mrf.mxu0  ;;  %v7426_v27 = vpop.f32.mrf.mxu1 }
 0x1ab   : > { %v7428_v53 = vpop.f32.mrf.mxu0  ;;  %v7430_v59 = vpop.f32.mrf.mxu1 }
 0x1ad   : > { %v7432_v42 = vpop.f32.mrf.mxu0  ;;  %v7434_v33 = vpop.f32.mrf.mxu1 }
 0x1af   : > { %v7436_v39 = vpop.f32.mrf.mxu0  ;;  %v7438_v52 = vpop.f32.mrf.mxu1 }
 0x1b1   : > { %v7440_v54 = vpop.f32.mrf.mxu0  ;;  %v7442_v22 = vpop.f32.mrf.mxu1 }
 0x1b3   : > { %v7444_v23 = vpop.f32.mrf.mxu0  ;;  %v7446_v20 = vpop.f32.mrf.mxu1 }
 0x1b5   : > { %v7448_v12 = vpop.f32.mrf.mxu0  ;;  %v7450_v16 = vpop.f32.mrf.mxu1 }
 0x1b7   : > { %v7452_v35 = vpop.f32.mrf.mxu0  ;;  %v7454_v13 = vpop.f32.mrf.mxu1 }
 0x1b9   : > { %v7456_v24 = vpop.f32.mrf.mxu0  ;;  %v7458_v18 = vpop.f32.mrf.mxu1 }
 0x1bb   : > { %v7460_v2 = vpop.f32.mrf.mxu0  ;;  %v7462_v21 = vpop.f32.mrf.mxu1 }
 0x1bd   : > { %v7464_v30 = vpop.f32.mrf.mxu0  ;;  %v7466_v29 = vpop.f32.mrf.mxu1 }
 0x1bf   : > { %v7468_v57 = vpop.f32.mrf.mxu0  ;;  %v7470_v17 = vpop.f32.mrf.mxu1 }
 0x1c1   : > { %v7472_v62 = vpop.f32.mrf.mxu0  ;;  %v7474_v48 = vpop.f32.mrf.mxu1 }
 0x1c2   : > { %7964 = vst [vmem:[#allocation5_spill] sm:$0xff] %v7472_v62  ;;  %7965 = vst [vmem:[#allocation33_spill] sm:$0xff] %v7474_v48 }
 0x1c3   : > { %v7476_v34 = vpop.f32.mrf.mxu0  ;;  %v7478_v63 = vpop.f32.mrf.mxu1 }
 0x1c4   : > { %7966 = vst [vmem:[#allocation18_spill] sm:$0xff] %v7476_v34  ;;  %7967 = vst [vmem:[#allocation6_spill] sm:$0xff] %v7478_v63 }
 0x1c5   : > { %v7480_v51 = vpop.f32.mrf.mxu0  ;;  %v7482_v3 = vpop.f32.mrf.mxu1 }
 0x1c6   : > { %7968 = vst [vmem:[#allocation34_spill] sm:$0xff] %v7480_v51  ;;  %7969 = vst [vmem:[#allocation7_spill] sm:$0xff] %v7482_v3 }
 0x1c7   : > { %v7484_v25 = vpop.f32.mrf.mxu0  ;;  %v7486_v31 = vpop.f32.mrf.mxu1 }
 0x1c8   : > { %7970 = vst [vmem:[#allocation35_spill] sm:$0xff] %v7484_v25  ;;  %7971 = vst [vmem:[#allocation20_spill] sm:$0xff] %v7486_v31 }
 0x1c9   : > { %v7488_v9 = vpop.f32.mrf.mxu0  ;;  %v7490_v5 = vpop.f32.mrf.mxu1 }
 0x1ca   : > { %7972 = vst [vmem:[#allocation8_spill] sm:$0xff] %v7488_v9  ;;  %7973 = vst [vmem:[#allocation36_spill] sm:$0xff] %v7490_v5 }
 0x1cb   : > { %v7492_v10 = vpop.f32.mrf.mxu0  ;;  %v7494_v62 = vpop.f32.mrf.mxu1 }
 0x1cc   : > { %7974 = vst [vmem:[#allocation9_spill] sm:$0xff] %v7492_v10  ;;  %7975 = vst [vmem:[#allocation38_spill] sm:$0xff] %v7494_v62 }
 0x1cd   : > { %v7496_v48 = vpop.f32.mrf.mxu0  ;;  %v7498_v34 = vpop.f32.mrf.mxu1 }
 0x1ce   : > { %7976 = vst [vmem:[#allocation10_spill] sm:$0xff] %v7496_v48  ;;  %7977 = vst [vmem:[#allocation21_spill] sm:$0xff] %v7498_v34 }
 0x1cf   : > { %v7500_v63 = vpop.f32.mrf.mxu0  ;;  %v7502_v51 = vpop.f32.mrf.mxu1 }
 0x1d0   : > { %7978 = vst [vmem:[#allocation39_spill] sm:$0xff] %v7500_v63  ;;  %7979 = vst [vmem:[#allocation11_spill] sm:$0xff] %v7502_v51  ;;  %v2997_v63 = vadd.f32 %v5117_v43, %v7313_v8  ;;  %v2998_v8 = vadd.f32 %v7414_v61, %v7322_v40 }
 0x1d1   : > { %v7504_v3 = vpop.f32.mrf.mxu0  ;;  %v7506_v25 = vpop.f32.mrf.mxu1 }
 0x1d2   : > { %7980 = vst [vmem:[#allocation40_spill] sm:$0xff] %v7504_v3  ;;  %7981 = vst [vmem:[#allocation22_spill] sm:$0xff] %v7506_v25  ;;  %v2996_v25 = vadd.f32 %v2837_v15, %v7316_v37  ;;  %v3001_v37 = vadd.f32 %v7418_v14, %v7325_v0  ;;  %v3000_v0 = vadd.f32 %v7422_v28, %v7328_v55 }
 0x1d3   : > { %v7508_v31 = vpop.f32.mrf.mxu0  ;;  %v7510_v9 = vpop.f32.mrf.mxu1  ;;  %v3002_v55 = vadd.f32 %v7430_v59, %v7334_v36 }
 0x1d4   : > { %7982 = vst [vmem:[#allocation12_spill] sm:$0xff] %v7508_v31  ;;  %7983 = vst [vmem:[#allocation41_spill] sm:$0xff] %v7510_v9  ;;  %v3274_v61 = vadd.f32 %v7420_v4, %v3001_v37 }
 0x1d5   : > { %v7512_v5 = vpop.f32.mrf.mxu0  ;;  %v7514_v10 = vpop.f32.mrf.mxu1 }
 0x1d6   : > { %7984 = vst [vmem:[#allocation13_spill] sm:$0xff] %v7512_v5  ;;  %7985 = vst [vmem:[#allocation14_spill] sm:$0xff] %v7514_v10  ;;  %v3270_v5 = vadd.f32 %v7408_v6, %v2997_v63  ;;  %v2999_v10 = vadd.f32 %v5120_v7, %v7319_v41 }
 0x1d7   : > { %v7516_v62 = vpop.f32.mrf.mxu0  ;;  %v7518_v48 = vpop.f32.mrf.mxu1 }
 0x1d8   : > { %7986 = vst [vmem:[#allocation37_spill] sm:$0xff] %v7516_v62  ;;  %7987 = vst [vmem:[#allocation15_spill] sm:$0xff] %v7518_v48  ;;  %v3269_v48 = vadd.f32 %v7410_v46, %v2996_v25  ;;  %v3272_v6 = vadd.f32 %v7412_v11, %v2999_v10 }
 0x1d9   : > { %v7521_v51 = vpop.f32.mrf.mxu0  ;;  %v7523_v3 = vpop.f32.mrf.mxu1 }
 0x1db   : > { %v7526_v31 = vpop.f32.mrf.mxu0  ;;  %v7528_v9 = vpop.f32.mrf.mxu1 }
 0x1dc   : > { %7988 = vst [vmem:[#allocation2_spill] sm:$0xff] %v7526_v31 }
 0x1dd   : > { %v7532_v62 = vpop.f32.mrf.mxu0  ;;  %v5277_v34 = vpop.f32.mrf.mxu1 }
 0x1de   : > { %7989 = vst [vmem:[#allocation16_spill] sm:$0xff] %v7532_v62  ;;  %v3543_v43 = vadd.f32 %v5277_v34, %v3270_v5  ;;  %v3271_v5 = vadd.f32 %v7416_v44, %v2998_v8  ;;  %v3003_v44 = vadd.f32 %v7426_v27, %v7331_v58 }
 0x1df   : > { %v5357_v41 = vpop.f32.mrf.mxu0  ;;  %v3383_v63 = vpop.f32.mrf.mxu1 }
 0x1e0   : > { %v3816_v25 = vadd.f32 %v5357_v41, %v3543_v43  ;;  %v3542_v15 = vadd.f32 %v3383_v63, %v3269_v48  ;;  %v3273_v41 = vadd.f32 %v7424_v32, %v3000_v0  ;;  %v3276_v36 = vadd.f32 %v7428_v53, %v3003_v44 }
 0x1e1   : > { %v3656_v46 = vpop.f32.mrf.mxu0  ;;  %v5280_v40 = vpop.f32.mrf.mxu1  ;;  %v3275_v32 = vadd.f32 %v7432_v42, %v3002_v55 }
 0x1e2   : > { %3848 = vst [vmem:[%s7544_s15 + $0x8] sm:$0xff] %v3816_v25  ;;  %v3815_v34 = vadd.f32 %v3656_v46, %v3542_v15  ;;  %v3545_v7 = vadd.f32 %v5280_v40, %v3272_v6  ;;  %v3918_v14 = vmul.f32 %v3816_v25, %v3816_v25  ;;  %v3005_v6 = vadd.f32 %v7434_v33, %v7337_v1 }
 0x1e3   : > { %v5360_v62 = vpop.f32.mrf.mxu0  ;;  %v3393_v31 = vpop.f32.mrf.mxu1  ;;  %v3004_v33 = vadd.f32 %v7438_v52, %v7340_v50 }
 0x1e4   : > { %3847 = vst [vmem:[%s7544_s15] sm:$0xff] %v3815_v34  ;;  %v3879_v10 = vadd.f32 %v3816_v25, %v3815_v34  ;;  %v3917_v48 = vmul.f32 %v3815_v34, %v3815_v34  ;;  %v3818_v11 = vadd.f32 %v5360_v62, %v3545_v7  ;;  %v3544_v43 = vadd.f32 %v3393_v31, %v3271_v5 }
 0x1e5   : > { %v3666_v28 = vpop.f32.mrf.mxu0  ;;  %v5283_v8 = vpop.f32.mrf.mxu1  ;;  %v3278_v1 = vadd.f32 %v7436_v39, %v3005_v6  ;;  %v3007_v7 = vadd.f32 %v7442_v22, %v7343_v47 }
 0x1e6   : > { %v3949_v4 = vadd.f32 %v3918_v14, %v3917_v48  ;;  %3850 = vst [vmem:[%s7544_s15 + $0x18] sm:$0xff] %v3818_v11  ;;  %v3817_v37 = vadd.f32 %v3666_v28, %v3544_v43  ;;  %v3547_v63 = vadd.f32 %v5283_v8, %v3274_v61  ;;  %v3920_v40 = vmul.f32 %v3818_v11, %v3818_v11 }
 0x1e7   : > { %v5363_v62 = vpop.f32.mrf.mxu0  ;;  %v3403_v31 = vpop.f32.mrf.mxu1  ;;  %v3277_v8 = vadd.f32 %v7440_v54, %v3004_v33 }
 0x1e8   : > { %3849 = vst [vmem:[%s7544_s15 + $0x10] sm:$0xff] %v3817_v37  ;;  %v3880_v25 = vadd.f32 %v3879_v10, %v3817_v37  ;;  %v3919_v58 = vmul.f32 %v3817_v37, %v3817_v37  ;;  %v3820_v27 = vadd.f32 %v5363_v62, %v3547_v63  ;;  %v3546_v15 = vadd.f32 %v3403_v31, %v3273_v41 }
 0x1e9   : > { %v3676_v59 = vpop.f32.mrf.mxu0  ;;  %v5286_v46 = vpop.f32.mrf.mxu1  ;;  %v3280_v41 = vadd.f32 %v7444_v23, %v3007_v7 }
 0x1ea   : > { %v3950_v5 = vadd.f32 %v3949_v4, %v3919_v58  ;;  %3852 = vst [vmem:[%s7544_s15 + $0x28] sm:$0xff] %v3820_v27  ;;  %v3819_v0 = vadd.f32 %v3676_v59, %v3546_v15  ;;  %v3881_v34 = vadd.f32 %v3880_v25, %v3818_v11  ;;  %v3549_v61 = vadd.f32 %v5286_v46, %v3276_v36 }
 0x1eb   : > { %v5366_v14 = vpop.f32.mrf.mxu0  ;;  %v3413_v53 = vpop.f32.mrf.mxu1  ;;  %v3006_v11 = vadd.f32 %v7446_v20, %v7346_v19  ;;  %v3922_v39 = vmul.f32 %v3820_v27, %v3820_v27  ;;  %v3009_v4 = vadd.f32 %v7450_v16, %v7349_v60  ;;  %v3008_v25 = vadd.f32 %v7454_v13, %v7352_v45 }
 0x1ec   : > { %3851 = vst [vmem:[%s7544_s15 + $0x20] sm:$0xff] %v3819_v0  ;;  %v3882_v42 = vadd.f32 %v3881_v34, %v3819_v0  ;;  %v3921_v10 = vmul.f32 %v3819_v0, %v3819_v0  ;;  %v3951_v48 = vadd.f32 %v3950_v5, %v3920_v40  ;;  %v3548_v43 = vadd.f32 %v3413_v53, %v3275_v32 }
 0x1ed   : > { %v3822_v44 = vadd.f32 %v5366_v14, %v3549_v61  ;;  %v3686_v55 = vpop.f32.mrf.mxu0  ;;  %v5289_v50 = vpop.f32.mrf.mxu1  ;;  %v3279_v31 = vadd.f32 %v7448_v12, %v3006_v11  ;;  %v3282_v36 = vadd.f32 %v7452_v35, %v3009_v4  ;;  %v3011_v12 = vadd.f32 %v7458_v18, %v7355_v56  ;;  %v7991_v4 = vld [vmem:[#allocation33_spill] sm:$0xff] }
 0x1ee   : > { %v3952_v52 = vadd.f32 %v3951_v48, %v3921_v10  ;;  %v3821_v28 = vadd.f32 %v3686_v55, %v3548_v43  ;;  %v3883_v47 = vadd.f32 %v3882_v42, %v3820_v27  ;;  %v3551_v22 = vadd.f32 %v5289_v50, %v3278_v1 }
 0x1ef   : > { %3854 = vst [vmem:[%s7544_s15 + $0x38] sm:$0xff] %v3822_v44  ;;  %v5369_v37 = vpop.f32.mrf.mxu0  ;;  %v3423_v63 = vpop.f32.mrf.mxu1  ;;  %v3924_v27 = vmul.f32 %v3822_v44, %v3822_v44  ;;  %v3281_v33 = vadd.f32 %v7456_v24, %v3008_v25  ;;  %v3010_v35 = vadd.f32 %v7462_v21, %v7358_v26  ;;  %v3013_v56 = vadd.f32 %v7466_v29, %v7361_v49  ;;  %v7994_v25 = vld [vmem:[#allocation6_spill] sm:$0xff] }
 0x1f0   : > { %3853 = vst [vmem:[%s7544_s15 + $0x30] sm:$0xff] %v3821_v28  ;;  %v3884_v19 = vadd.f32 %v3883_v47, %v3821_v28  ;;  %v3923_v20 = vmul.f32 %v3821_v28, %v3821_v28  ;;  %v3953_v6 = vadd.f32 %v3952_v52, %v3922_v39  ;;  %v3824_v62 = vadd.f32 %v5369_v37, %v3551_v22 }
 0x1f1   : > { %v3550_v54 = vadd.f32 %v3423_v63, %v3277_v8  ;;  %v3696_v23 = vpop.f32.mrf.mxu0  ;;  %v5292_v58 = vpop.f32.mrf.mxu1  ;;  %v3284_v48 = vadd.f32 %v7460_v2, %v3011_v12  ;;  %v3283_v55 = vadd.f32 %v7464_v30, %v3010_v35  ;;  %v3012_v49 = vadd.f32 %v7470_v17, %v7364_v38  ;;  %v7997_v12 = vld [vmem:[#allocation18_spill] sm:$0xff] }
 0x1f2   : > { %v3954_v60 = vadd.f32 %v3953_v6, %v3923_v20  ;;  %3856 = vst [vmem:[%s7544_s15 + $0x48] sm:$0xff] %v3824_v62  ;;  %v3885_v16 = vadd.f32 %v3884_v19, %v3822_v44  ;;  %v3553_v15 = vadd.f32 %v5292_v58, %v3280_v41  ;;  %v3926_v18 = vmul.f32 %v3824_v62, %v3824_v62  ;;  %v7990_v41 = vld [vmem:[#allocation19_spill] sm:$0xff]  ;;  %v7998_v35 = vld [vmem:[#allocation34_spill] sm:$0xff] }
 0x1f3   : > { %v3823_v32 = vadd.f32 %v3696_v23, %v3550_v54  ;;  %v5372_v59 = vpop.f32.mrf.mxu0  ;;  %v3433_v46 = vpop.f32.mrf.mxu1  ;;  %v3286_v52 = vadd.f32 %v7468_v57, %v3013_v56  ;;  %v3015_v37 = vadd.f32 %v7991_v4, %v7990_v41  ;;  %v8000_v56 = vld [vmem:[#allocation20_spill] sm:$0xff]  ;;  %v8006_v41 = vld [vmem:[#allocation38_spill] sm:$0xff] }
 0x1f4   : > { %v3955_v40 = vadd.f32 %v3954_v60, %v3924_v27  ;;  %v3826_v45 = vadd.f32 %v5372_v59, %v3553_v15  ;;  %v3552_v13 = vadd.f32 %v3433_v46, %v3279_v31  ;;  %v7993_v31 = vld [vmem:[#allocation3_spill] sm:$0xff] }
 0x1f5   : > { %3855 = vst [vmem:[%s7544_s15 + $0x40] sm:$0xff] %v3823_v32  ;;  %v3886_v5 = vadd.f32 %v3885_v16, %v3823_v32  ;;  %v3925_v0 = vmul.f32 %v3823_v32, %v3823_v32  ;;  %v3706_v34 = vpop.f32.mrf.mxu0  ;;  %v5295_v1 = vpop.f32.mrf.mxu1  ;;  %v3014_v54 = vadd.f32 %v7994_v25, %v7993_v31  ;;  %v7995_v27 = vld [vmem:[#allocation23_spill] sm:$0xff]  ;;  %v8009_v31 = vld [vmem:[#allocation9_spill] sm:$0xff] }
 0x1f6   : > { %3858 = vst [vmem:[%s7544_s15 + $0x58] sm:$0xff] %v3826_v45  ;;  %v3825_v7 = vadd.f32 %v3706_v34, %v3552_v13  ;;  %v3555_v61 = vadd.f32 %v5295_v1, %v3282_v36  ;;  %v3928_v2 = vmul.f32 %v3826_v45, %v3826_v45  ;;  %v7996_v60 = vld [vmem:[#allocation7_spill] sm:$0xff] }
 0x1f7   : > { %v3956_v14 = vadd.f32 %v3955_v40, %v3925_v0  ;;  %v3887_v53 = vadd.f32 %v3886_v5, %v3824_v62  ;;  %v5375_v42 = vpop.f32.mrf.mxu0  ;;  %v3443_v10 = vpop.f32.mrf.mxu1  ;;  %v7992_v62 = vld [vmem:[#allocation5_spill] sm:$0xff]  ;;  %v3017_v16 = vadd.f32 %v7996_v60, %v7995_v27  ;;  %v3288_v40 = vadd.f32 %v7997_v12, %v3015_v37 }
 0x1f8   : > { %3857 = vst [vmem:[%s7544_s15 + $0x50] sm:$0xff] %v3825_v7  ;;  %v3927_v43 = vmul.f32 %v3825_v7, %v3825_v7  ;;  %v3828_v24 = vadd.f32 %v5375_v42, %v3555_v61  ;;  %v3554_v11 = vadd.f32 %v3443_v10, %v3281_v33  ;;  %v3285_v57 = vadd.f32 %v7992_v62, %v3012_v49  ;;  %v7999_v61 = vld [vmem:[#allocation24_spill] sm:$0xff]  ;;  %v8001_v42 = vld [vmem:[#allocation35_spill] sm:$0xff] }
 0x1f9   : > { %v3888_v39 = vadd.f32 %v3887_v53, %v3825_v7  ;;  %v3957_v26 = vadd.f32 %v3956_v14, %v3926_v18  ;;  %v3716_v21 = vpop.f32.mrf.mxu0  ;;  %v5298_v44 = vpop.f32.mrf.mxu1  ;;  %v3287_v7 = vadd.f32 %v7998_v35, %v3014_v54  ;;  %v3016_v18 = vadd.f32 %v8000_v56, %v7999_v61  ;;  %v8015_v61 = vld [vmem:[#allocation22_spill] sm:$0xff] }
 0x1fa   : > { %3860 = vst [vmem:[%s7544_s15 + $0x68] sm:$0xff] %v3828_v24  ;;  %v3827_v29 = vadd.f32 %v3716_v21, %v3554_v11  ;;  %v3557_v50 = vadd.f32 %v5298_v44, %v3284_v48  ;;  %v3930_v15 = vmul.f32 %v3828_v24, %v3828_v24  ;;  %v3290_v10 = vadd.f32 %v8001_v42, %v3017_v16  ;;  %v8003_v21 = vld [vmem:[#allocation36_spill] sm:$0xff] }
 0x1fb   : > { %v3958_v28 = vadd.f32 %v3957_v26, %v3927_v43  ;;  %v3889_v47 = vadd.f32 %v3888_v39, %v3826_v45  ;;  %v5378_v22 = vpop.f32.mrf.mxu0  ;;  %v3453_v8 = vpop.f32.mrf.mxu1  ;;  %v8002_v26 = vld [vmem:[#allocation25_spill] sm:$0xff] }
 0x1fc   : > { %3859 = vst [vmem:[%s7544_s15 + $0x60] sm:$0xff] %v3827_v29  ;;  %v3929_v63 = vmul.f32 %v3827_v29, %v3827_v29  ;;  %v3830_v30 = vadd.f32 %v5378_v22, %v3557_v50  ;;  %v3556_v19 = vadd.f32 %v3453_v8, %v3283_v55  ;;  %v3019_v44 = vadd.f32 %v8003_v21, %v8002_v26  ;;  %v8005_v8 = vld [vmem:[#allocation26_spill] sm:$0xff]  ;;  %v8018_v26 = vld [vmem:[#allocation41_spill] sm:$0xff] }
 0x1fd   : > { %v3890_v20 = vadd.f32 %v3889_v47, %v3827_v29  ;;  %v3959_v38 = vadd.f32 %v3958_v28, %v3928_v2  ;;  %v3726_v17 = vpop.f32.mrf.mxu0  ;;  %v5301_v6 = vpop.f32.mrf.mxu1  ;;  %v8004_v47 = vld [vmem:[#allocation8_spill] sm:$0xff]  ;;  %v3018_v4 = vadd.f32 %v8006_v41, %v8005_v8 }
 0x1fe   : > { %3862 = vst [vmem:[%s7544_s15 + $0x78] sm:$0xff] %v3830_v30  ;;  %v3829_v23 = vadd.f32 %v3726_v17, %v3556_v19  ;;  %v3559_v58 = vadd.f32 %v5301_v6, %v3286_v52  ;;  %v3932_v48 = vmul.f32 %v3830_v30, %v3830_v30  ;;  %v3289_v22 = vadd.f32 %v8004_v47, %v3016_v18  ;;  %v8008_v19 = vld [vmem:[#allocation21_spill] sm:$0xff]  ;;  %v8021_v8 = vld [vmem:[#allocation12_spill] sm:$0xff] }
 0x1ff   : > { %v3960_v36 = vadd.f32 %v3959_v38, %v3929_v63  ;;  %v3891_v32 = vadd.f32 %v3890_v20, %v3828_v24  ;;  %v5381_v59 = vpop.f32.mrf.mxu0  ;;  %v3463_v46 = vpop.f32.mrf.mxu1  ;;  %v3292_v25 = vadd.f32 %v8009_v31, %v3019_v44 }
 0x200   : > { %3861 = vst [vmem:[%s7544_s15 + $0x70] sm:$0xff] %v3829_v23  ;;  %v3931_v45 = vmul.f32 %v3829_v23, %v3829_v23  ;;  %v3832_v13 = vadd.f32 %v5381_v59, %v3559_v58  ;;  %v3558_v5 = vadd.f32 %v3463_v46, %v3285_v57  ;;  %v8011_v59 = vld [vmem:[#allocation28_spill] sm:$0xff]  ;;  %v8012_v46 = vld [vmem:[#allocation11_spill] sm:$0xff] }
 0x201   : > { %v3892_v0 = vadd.f32 %v3891_v32, %v3829_v23  ;;  %v3961_v34 = vadd.f32 %v3960_v36, %v3930_v15  ;;  %v3736_v1 = vpop.f32.mrf.mxu0  ;;  %v5304_v33 = vpop.f32.mrf.mxu1  ;;  %v8010_v36 = vld [vmem:[#allocation10_spill] sm:$0xff]  ;;  %v3020_v12 = vadd.f32 %v8012_v46, %v8011_v59 }
 0x202   : > { %3864 = vst [vmem:[%s7544_s15 + $0x88] sm:$0xff] %v3832_v13  ;;  %v3831_v14 = vadd.f32 %v3736_v1, %v3558_v5  ;;  %v3561_v53 = vadd.f32 %v5304_v33, %v3288_v40  ;;  %v3934_v38 = vmul.f32 %v3832_v13, %v3832_v13  ;;  %v3291_v32 = vadd.f32 %v8010_v36, %v3018_v4 }
 0x203   : > { %v3962_v43 = vadd.f32 %v3961_v34, %v3931_v45  ;;  %v3893_v24 = vadd.f32 %v3892_v0, %v3830_v30  ;;  %v5384_v11 = vpop.f32.mrf.mxu0  ;;  %v3473_v39 = vpop.f32.mrf.mxu1  ;;  %v8007_v30 = vld [vmem:[#allocation27_spill] sm:$0xff] }
 0x204   : > { %3863 = vst [vmem:[%s7544_s15 + $0x80] sm:$0xff] %v3831_v14  ;;  %v3933_v55 = vmul.f32 %v3831_v14, %v3831_v14  ;;  %v3834_v49 = vadd.f32 %v5384_v11, %v3561_v53  ;;  %v3560_v29 = vadd.f32 %v3473_v39, %v3287_v7  ;;  %v3021_v20 = vadd.f32 %v8008_v19, %v8007_v30  ;;  %v8014_v7 = vld [vmem:[#allocation29_spill] sm:$0xff]  ;;  %v8017_v39 = vld [vmem:[#allocation30_spill] sm:$0xff] }
 0x205   : > { %v3894_v50 = vadd.f32 %v3893_v24, %v3831_v14  ;;  %v3963_v52 = vadd.f32 %v3962_v43, %v3932_v48  ;;  %v3746_v2 = vpop.f32.mrf.mxu0  ;;  %v5307_v28 = vpop.f32.mrf.mxu1  ;;  %v3023_v56 = vadd.f32 %v8015_v61, %v8014_v7  ;;  %v8016_v24 = vld [vmem:[#allocation40_spill] sm:$0xff]  ;;  %v3022_v21 = vadd.f32 %v8018_v26, %v8017_v39 }
 0x206   : > { %3866 = vst [vmem:[%s7544_s15 + $0x98] sm:$0xff] %v3834_v49  ;;  %v3833_v37 = vadd.f32 %v3746_v2, %v3560_v29  ;;  %v3563_v63 = vadd.f32 %v5307_v28, %v3290_v10  ;;  %v3936_v0 = vmul.f32 %v3834_v49, %v3834_v49  ;;  %v3293_v11 = vadd.f32 %v8016_v24, %v3020_v12  ;;  %v8020_v29 = vld [vmem:[#allocation14_spill] sm:$0xff]  ;;  %v8029_v39 = vld [vmem:[#allocation16_spill] sm:$0xff] }
 0x207   : > { %v3964_v17 = vadd.f32 %v3963_v52, %v3933_v55  ;;  %v3895_v6 = vadd.f32 %v3894_v50, %v3832_v13  ;;  %v5387_v62 = vpop.f32.mrf.mxu0  ;;  %v3483_v57 = vpop.f32.mrf.mxu1  ;;  %v8013_v13 = vld [vmem:[#allocation39_spill] sm:$0xff]  ;;  %v3296_v41 = vadd.f32 %v8021_v8, %v3023_v56 }
 0x208   : > { %3865 = vst [vmem:[%s7544_s15 + $0x90] sm:$0xff] %v3833_v37  ;;  %v3935_v54 = vmul.f32 %v3833_v37, %v3833_v37  ;;  %v3836_v23 = vadd.f32 %v5387_v62, %v3563_v63  ;;  %v3562_v58 = vadd.f32 %v3483_v57, %v3289_v22  ;;  %v3294_v5 = vadd.f32 %v8013_v13, %v3021_v20  ;;  %v8023_v62 = vld [vmem:[#allocation4_spill] sm:$0xff]  ;;  %v8024_v57 = vld [vmem:[#allocation15_spill] sm:$0xff] }
 0x209   : > { %v3896_v27 = vadd.f32 %v3895_v6, %v3833_v37  ;;  %v3965_v60 = vadd.f32 %v3964_v17, %v3934_v38  ;;  %v3756_v16 = vpop.f32.mrf.mxu0  ;;  %v5310_v15 = vpop.f32.mrf.mxu1  ;;  %v8022_v17 = vld [vmem:[#allocation13_spill] sm:$0xff]  ;;  %v3024_v31 = vadd.f32 %v8024_v57, %v8023_v62 }
 0x20a   : > { %3868 = vst [vmem:[%s7544_s15 + $0xa8] sm:$0xff] %v3836_v23  ;;  %v3835_v40 = vadd.f32 %v3756_v16, %v3562_v58  ;;  %v3565_v45 = vadd.f32 %v5310_v15, %v3292_v25  ;;  %v3938_v52 = vmul.f32 %v3836_v23, %v3836_v23  ;;  %v3295_v6 = vadd.f32 %v8022_v17, %v3022_v21 }
 0x20b   : > { %v3966_v34 = vadd.f32 %v3965_v60, %v3935_v54  ;;  %v3897_v1 = vadd.f32 %v3896_v27, %v3834_v49  ;;  %v5390_v33 = vpop.f32.mrf.mxu0  ;;  %v3493_v35 = vpop.f32.mrf.mxu1  ;;  %v8019_v49 = vld [vmem:[#allocation31_spill] sm:$0xff] }
 0x20c   : > { %3867 = vst [vmem:[%s7544_s15 + $0xa0] sm:$0xff] %v3835_v40  ;;  %v3937_v18 = vmul.f32 %v3835_v40, %v3835_v40  ;;  %v3838_v14 = vadd.f32 %v5390_v33, %v3565_v45  ;;  %v3564_v53 = vadd.f32 %v3493_v35, %v3291_v32  ;;  %v3025_v50 = vadd.f32 %v8020_v29, %v8019_v49  ;;  %v8026_v32 = vld [vmem:[#allocation17_spill] sm:$0xff] }
 0x20d   : > { %v3898_v42 = vadd.f32 %v3897_v1, %v3835_v40  ;;  %v3967_v10 = vadd.f32 %v3966_v34, %v3936_v0  ;;  %v3766_v48 = vpop.f32.mrf.mxu0  ;;  %v5313_v43 = vpop.f32.mrf.mxu1  ;;  %v3027_v59 = vadd.f32 %v7523_v3, %v8026_v32  ;;  %v3297_v34 = vadd.f32 %v7521_v51, %v3024_v31  ;;  %v8027_v1 = vld [vmem:[#allocation32_spill] sm:$0xff] }
 0x20e   : > { %3870 = vst [vmem:[%s7544_s15 + $0xb8] sm:$0xff] %v3838_v14  ;;  %v3837_v44 = vadd.f32 %v3766_v48, %v3564_v53  ;;  %v3567_v55 = vadd.f32 %v5313_v43, %v3294_v5  ;;  %v3940_v27 = vmul.f32 %v3838_v14, %v3838_v14  ;;  %v3026_v33 = vadd.f32 %v7528_v9, %v8027_v1  ;;  %v8028_v53 = vld [vmem:[#allocation2_spill] sm:$0xff] }
 0x20f   : > { %v3968_v2 = vadd.f32 %v3967_v10, %v3937_v18  ;;  %v3899_v28 = vadd.f32 %v3898_v42, %v3836_v23  ;;  %v5393_v47 = vpop.f32.mrf.mxu0  ;;  %v3503_v22 = vpop.f32.mrf.mxu1  ;;  %v8025_v23 = vld [vmem:[#allocation37_spill] sm:$0xff]  ;;  %v3300_v42 = vadd.f32 %v8028_v53, %v3027_v59 }
 0x210   : > { %3869 = vst [vmem:[%s7544_s15 + $0xb0] sm:$0xff] %v3837_v44  ;;  %v3939_v4 = vmul.f32 %v3837_v44, %v3837_v44  ;;  %v3840_v37 = vadd.f32 %v5393_v47, %v3567_v55  ;;  %v3566_v63 = vadd.f32 %v3503_v22, %v3293_v11  ;;  %v3298_v58 = vadd.f32 %v8025_v23, %v3025_v50 }
 0x211   : > { %v3900_v30 = vadd.f32 %v3899_v28, %v3837_v44  ;;  %v3969_v19 = vadd.f32 %v3968_v2, %v3938_v52  ;;  %v3776_v20 = vpop.f32.mrf.mxu0  ;;  %v5316_v38 = vpop.f32.mrf.mxu1  ;;  %v3299_v26 = vadd.f32 %v8029_v39, %v3026_v33 }
 0x212   : > { %3872 = vst [vmem:[%s7544_s15 + $0xc8] sm:$0xff] %v3840_v37  ;;  %v3839_v25 = vadd.f32 %v3776_v20, %v3566_v63  ;;  %v3569_v54 = vadd.f32 %v5316_v38, %v3296_v41  ;;  %v3942_v61 = vmul.f32 %v3840_v37, %v3840_v37 }
 0x213   : > { %v3970_v60 = vadd.f32 %v3969_v19, %v3939_v4  ;;  %v3901_v16 = vadd.f32 %v3900_v30, %v3838_v14  ;;  %v5396_v15 = vpop.f32.mrf.mxu0  ;;  %v3513_v36 = vpop.f32.mrf.mxu1 }
 0x214   : > { %3871 = vst [vmem:[%s7544_s15 + $0xc0] sm:$0xff] %v3839_v25  ;;  %v3941_v46 = vmul.f32 %v3839_v25, %v3839_v25  ;;  %v3842_v12 = vadd.f32 %v5396_v15, %v3569_v54  ;;  %v3568_v40 = vadd.f32 %v3513_v36, %v3295_v6 }
 0x215   : > { %v3902_v45 = vadd.f32 %v3901_v16, %v3839_v25  ;;  %v3971_v13 = vadd.f32 %v3970_v60, %v3940_v27  ;;  %v3786_v5 = vpop.f32.mrf.mxu0  ;;  %v5319_v0 = vpop.f32.mrf.mxu1 }
 0x216   : > { %3874 = vst [vmem:[%s7544_s15 + $0xd8] sm:$0xff] %v3842_v12  ;;  %v3841_v35 = vadd.f32 %v3786_v5, %v3568_v40  ;;  %v3571_v7 = vadd.f32 %v5319_v0, %v3298_v58  ;;  %v3944_v55 = vmul.f32 %v3842_v12, %v3842_v12 }
 0x217   : > { %v3972_v3 = vadd.f32 %v3971_v13, %v3941_v46  ;;  %v3903_v56 = vadd.f32 %v3902_v45, %v3840_v37  ;;  %v5399_v18 = vpop.f32.mrf.mxu0  ;;  %v3523_v14 = vpop.f32.mrf.mxu1 }
 0x218   : > { %3873 = vst [vmem:[%s7544_s15 + $0xd0] sm:$0xff] %v3841_v35  ;;  %v3943_v10 = vmul.f32 %v3841_v35, %v3841_v35  ;;  %v3844_v48 = vadd.f32 %v5399_v18, %v3571_v7  ;;  %v3570_v43 = vadd.f32 %v3523_v14, %v3297_v34 }
 0x219   : > { %v3904_v51 = vadd.f32 %v3903_v56, %v3841_v35  ;;  %v3973_v24 = vadd.f32 %v3972_v3, %v3942_v61  ;;  %v3796_v11 = vpop.f32.mrf.mxu0  ;;  %v5322_v9 = vpop.f32.mrf.mxu1 }
 0x21a   : > { %3876 = vst [vmem:[%s7544_s15 + $0xe8] sm:$0xff] %v3844_v48  ;;  %v3843_v21 = vadd.f32 %v3796_v11, %v3570_v43  ;;  %v3573_v44 = vadd.f32 %v5322_v9, %v3300_v42  ;;  %v3946_v37 = vmul.f32 %v3844_v48, %v3844_v48 }
 0x21b   : > { %v3974_v49 = vadd.f32 %v3973_v24, %v3943_v10  ;;  %v3905_v29 = vadd.f32 %v3904_v51, %v3842_v12  ;;  %v5402_v50 = vpop.f32.mrf.mxu0  ;;  %v3533_v52 = vpop.f32.mrf.mxu1 }
 0x21c   : > { %3875 = vst [vmem:[%s7544_s15 + $0xe0] sm:$0xff] %v3843_v21  ;;  %v3945_v2 = vmul.f32 %v3843_v21, %v3843_v21  ;;  %v3846_v28 = vadd.f32 %v5402_v50, %v3573_v44  ;;  %v3572_v47 = vadd.f32 %v3533_v52, %v3299_v26 }
 0x21d   : > { %v3906_v22 = vadd.f32 %v3905_v29, %v3843_v21  ;;  %v3975_v8 = vadd.f32 %v3974_v49, %v3944_v55  ;;  %v3806_v41 = vpop.f32.mrf.mxu0 }
 0x21e   : > { %3878 = vst [vmem:[%s7544_s15 + $0xf8] sm:$0xff] %v3846_v28  ;;  %v3845_v4 = vadd.f32 %v3806_v41, %v3572_v47  ;;  %v3948_v17 = vmul.f32 %v3846_v28, %v3846_v28 }
 0x21f   : > { %v3976_v63 = vadd.f32 %v3975_v8, %v3945_v2  ;;  %v3907_v30 = vadd.f32 %v3906_v22, %v3844_v48 }
 0x220   : > { %3877 = vst [vmem:[%s7544_s15 + $0xf0] sm:$0xff] %v3845_v4  ;;  %v3947_v19 = vmul.f32 %v3845_v4, %v3845_v4 }
 0x221   : > { %v3908_v20 = vadd.f32 %v3907_v30, %v3845_v4  ;;  %v3977_v38 = vadd.f32 %v3976_v63, %v3946_v37 }
 0x223   : > { %v3909_v6 = vadd.f32 %v3908_v20, %v3846_v28  ;;  %v3978_v62 = vadd.f32 %v3977_v38, %v3947_v19 }
 0x225   : > { %v3910_v57 = vrot.slane %v3909_v6, 4  ;;  %v3979_v31 = vadd.f32 %v3978_v62, %v3948_v17 }
 0x227   : > { %v3911_v25 = vadd.f32 %v3910_v57, %v3909_v6  ;;  %v3980_v54 = vrot.slane %v3979_v31, 4 }
 0x229   : > { %v3912_v23 = vrot.slane %v3911_v25, 2  ;;  %v3981_v58 = vadd.f32 %v3980_v54, %v3979_v31 }
 0x22b   : > { %v3913_v27 = vadd.f32 %v3912_v23, %v3911_v25  ;;  %v3982_v60 = vrot.slane %v3981_v58, 2 }
 0x22d   : > { %v3914_v16 = vrot.slane %v3913_v27, 1  ;;  %v3983_v15 = vadd.f32 %v3982_v60, %v3981_v58 }
 0x22f   : > { %v3915_v36 = vadd.f32 %v3914_v16, %v3913_v27  ;;  %v3984_v32 = vrot.slane %v3983_v15, 1 }
 0x231   : > { %3916 = vst [vmem:[%s500_s18] sm:$0x1] %v3915_v36  ;;  %v3985_v59 = vadd.f32 %v3984_v32, %v3983_v15 }
 0x233   : > { %3986 = vst [vmem:[%s506_s21] sm:$0x1] %v3985_v59 }
 0x234 PF: > { %s19_s27 = sadd.s32 1, %s5513_s27   ;;  %s8030_s26 = smov %s5509_s2 }
 0x235   : > { %p16_p5 = scmp.ge.s32.totalorder %s19_s27, 4   ;;  %s8031_s2 = smov %s8033_s4 }
 0x237   :  { %18 = sbr.rel (!%p16_p5) target bundleno = 2 (0x2), region = 104 }

</bundles_post_ra>
